<compile_context>
chip_gen: v7x
topology: tpu7x:2x2x1
jax: 0.10.0
libtpu: 0.0.40
codegen_flags: <defaults>
</compile_context>

<pallas_src>
import jax
import jax.numpy as jnp
from jax import lax
from jax.experimental import pallas as pl
from jax.experimental.pallas import tpu as pltpu


def bilstm_fc_kernel(x_ref, wih_f_ref, whh_f_ref, b_f_ref,
                     wih_r_ref, b_r_ref,
                     wfc_ref, bfc_ref,
                     logits_ref, gx_ref):
    B_blk, T, D = x_ref.shape
    H = whh_f_ref.shape[0]
    G = 4 * H

    # Forward-direction input projection for all timesteps in one MXU call,
    # computed batch-major (no relayout of the D-wide input); the narrower
    # 4H-wide gate slab is transposed into time-major VMEM scratch so each
    # step's read is a contiguous leading-axis slice.
    x_bm = x_ref[...].reshape(B_blk * T, D)                       # bf16
    gx = jnp.dot(x_bm, wih_f_ref[...],
                 preferred_element_type=jnp.float32) + b_f_ref[...]
    gx_ref[...] = jnp.transpose(gx.reshape(B_blk, T, G), (1, 0, 2))

    whh_f = whh_f_ref[...]                                        # bf16

    def gates(g, c):
        i = jax.nn.sigmoid(g[:, 0:H])
        f = jax.nn.sigmoid(g[:, H:2 * H])
        gg = jnp.tanh(g[:, 2 * H:3 * H])
        o = jax.nn.sigmoid(g[:, 3 * H:4 * H])
        c_new = f * c + i * gg
        h_new = o * jnp.tanh(c_new)
        return h_new, c_new

    h0 = jnp.zeros((B_blk, H), jnp.float32)
    c0 = jnp.zeros((B_blk, H), jnp.float32)

    def fwd_body(t, carry):
        h, c = carry
        g = gx_ref[t] + jnp.dot(h.astype(whh_f.dtype), whh_f,
                                preferred_element_type=jnp.float32)
        return gates(g, c)

    # Short static trip count: full unroll gives the scheduler visibility to
    # overlap EUP sigmoid/tanh with the next step's recurrent MXU matmul.
    h_f, _ = lax.fori_loop(0, T, fwd_body, (h0, c0), unroll=True)

    # Reverse direction: out[:, -1, H:] is the reverse LSTM hidden state after
    # a single step on x[:, T-1, :] from zero state (recurrent term is zero,
    # so whh_r is never needed in the kernel).
    g_r = jnp.dot(x_ref[:, T - 1, :], wih_r_ref[...],
                  preferred_element_type=jnp.float32) + b_r_ref[...]
    h_r, _ = gates(g_r, c0)

    last = jnp.concatenate([h_f, h_r], axis=-1).astype(wfc_ref.dtype)
    logits_ref[...] = (jnp.dot(last, wfc_ref[...],
                               preferred_element_type=jnp.float32)
                       + bfc_ref[...])


def my_model_forward(bert_output, params, *, b_blk=None):
    """bert_output: (B, T, D) float32, batch-first like nn.LSTM(batch_first=True)."""
    B, T, D = bert_output.shape
    H = params["whh_f"].shape[0]
    C = params["w_fc"].shape[1]

    # Batch block: whole (padded) batch for B <= 128, else blocks of 128.
    if b_blk is None:
        b_blk = min(128, max(8, -(-B // 8) * 8))
    B_pad = -(-B // b_blk) * b_blk

    # bf16 MXU inputs; all accumulation / gate math stays f32 in the kernel.
    x = bert_output.astype(jnp.bfloat16)
    if B_pad != B:
        x = jnp.pad(x, ((0, B_pad - B), (0, 0), (0, 0)))

    # Pad class dim to a full 128-lane vector -> unmasked lane-dense stores.
    C_pad = max(128, -(-C // 128) * 128)
    w_fc, b_fc = params["w_fc"], params["b_fc"]
    if C_pad != C:
        w_fc = jnp.pad(w_fc, ((0, 0), (0, C_pad - C)))
        b_fc = jnp.pad(b_fc, ((0, 0), (0, C_pad - C)))

    wih_f = params["wih_f"].astype(jnp.bfloat16)
    whh_f = params["whh_f"].astype(jnp.bfloat16)
    wih_r = params["wih_r"].astype(jnp.bfloat16)
    w_fc = w_fc.astype(jnp.bfloat16)
    b_f, b_r = params["b_f"], params["b_r"]          # stay f32

    grid = (B_pad // b_blk,)
    n_blocks = grid[0]

    # Weight-DMA-bound kernel: only shard across v7x's two TensorCores when
    # there are enough batch blocks to amortize the duplicated weight fetch.
    dim_sem = ("parallel",) if n_blocks > 2 else ("arbitrary",)

    # VMEM footprint (weights double-buffer worst case + x/out blocks + scratch)
    # with headroom, capped well under v7x's 64 MiB physical VMEM.
    bf16, f32 = 2, 4
    weight_bytes = ((D * 4 * H) * 2 + H * 4 * H + 2 * H * C_pad) * bf16 \
                   + (2 * 4 * H + C_pad) * f32
    x_block_bytes = b_blk * T * D * bf16
    out_block_bytes = b_blk * C_pad * f32
    gx_bytes = T * b_blk * 4 * H * f32
    vmem_limit = int(min(2 * weight_bytes
                         + 2 * (x_block_bytes + out_block_bytes)
                         + gx_bytes + (8 << 20),
                         48 << 20))

    cost = pl.CostEstimate(
        flops=int(n_blocks * (2 * T * b_blk * D * 4 * H        # fwd input proj
                              + 2 * b_blk * D * 4 * H          # rev last-step proj
                              + 2 * T * b_blk * H * 4 * H      # recurrent
                              + 2 * b_blk * 2 * H * C_pad)),   # fc head
        transcendentals=int(n_blocks * (T + 1) * b_blk * 5 * H),
        bytes_accessed=int(B_pad * T * D * bf16 + weight_bytes
                           + B_pad * C_pad * f32),
    )

    def rep(shape, weight_mode):
        n = len(shape)
        idx = lambda b, _n=n: (0,) * _n
        if weight_mode is None:
            return pl.BlockSpec(shape, idx)
        return pl.BlockSpec(shape, idx, pipeline_mode=weight_mode)

    def run(weight_mode):
        in_specs = [
            pl.BlockSpec((b_blk, T, D), lambda b: (b, 0, 0)),
            rep((D, 4 * H), weight_mode), rep((H, 4 * H), weight_mode),
            rep((1, 4 * H), weight_mode),
            rep((D, 4 * H), weight_mode), rep((1, 4 * H), weight_mode),
            rep((2 * H, C_pad), weight_mode), rep((1, C_pad), weight_mode),
        ]
        out_spec = pl.BlockSpec((b_blk, C_pad), lambda b: (b, 0))
        return pl.pallas_call(
            bilstm_fc_kernel,
            out_shape=jax.ShapeDtypeStruct((B_pad, C_pad), jnp.float32),
            grid=grid,
            in_specs=in_specs,
            out_specs=out_spec,
            scratch_shapes=[pltpu.VMEM((T, b_blk, 4 * H), jnp.float32)],
            compiler_params=pltpu.CompilerParams(
                dimension_semantics=dim_sem,
                vmem_limit_bytes=vmem_limit),
            cost_estimate=cost,
        )(x, wih_f, whh_f, b_f, wih_r, b_r, w_fc, b_fc)

    try:
        # Replicated weights never change across grid steps -> single-buffer
        # them (halves resident weight VMEM; matters most on v7x's 64 MiB).
        out = run(pl.Buffered(1))
    except Exception:
        # Fall back to default buffering if Buffered(1) is unsupported here.
        out = run(None)

    return out[:B, :C]


def init_params(key, D, H, C):
    """Deterministic PyTorch-style init: U(-1/sqrt(H), 1/sqrt(H)) etc."""
    ks = jax.random.split(key, 10)
    k_lstm = 1.0 / float(H) ** 0.5
    k_fc = 1.0 / float(2 * H) ** 0.5

    def u(k, shape, bound):
        return jax.random.uniform(k, shape, jnp.float32, -bound, bound)

    wih_f = u(ks[0], (4 * H, D), k_lstm)
    whh_f = u(ks[1], (4 * H, H), k_lstm)
    bih_f = u(ks[2], (4 * H,), k_lstm)
    bhh_f = u(ks[3], (4 * H,), k_lstm)
    wih_r = u(ks[4], (4 * H, D), k_lstm)
    whh_r = u(ks[5], (4 * H, H), k_lstm)
    bih_r = u(ks[6], (4 * H,), k_lstm)
    bhh_r = u(ks[7], (4 * H,), k_lstm)
    w_fc = u(ks[8], (C, 2 * H), k_fc)
    b_fc = u(ks[9], (C,), k_fc)

    return {
        "wih_f": wih_f.T, "whh_f": whh_f.T, "b_f": (bih_f + bhh_f)[None, :],
        "wih_r": wih_r.T, "whh_r": whh_r.T, "b_r": (bih_r + bhh_r)[None, :],
        "w_fc": w_fc.T, "b_fc": b_fc[None, :],
    }


def ref_forward(bert_output, params):
    """Pure-JAX f32 reference (same math as nn.LSTM bidirectional + Linear)."""
    B, T, D = bert_output.shape
    H = params["whh_f"].shape[0]

    def cell(gx_t, h, c, whh):
        g = gx_t + h @ whh
        i = jax.nn.sigmoid(g[:, :H])
        f = jax.nn.sigmoid(g[:, H:2 * H])
        gg = jnp.tanh(g[:, 2 * H:3 * H])
        o = jax.nn.sigmoid(g[:, 3 * H:])
        c = f * c + i * gg
        h = o * jnp.tanh(c)
        return h, c

    def run(x_tbd, wih, whh, b, reverse):
        gx = jnp.einsum("tbd,dg->tbg", x_tbd, wih) + b
        if reverse:
            gx = gx[::-1]

        def scan_fn(carry, gx_t):
            h, c = cell(gx_t, carry[0], carry[1], whh)
            return (h, c), h

        h0 = jnp.zeros((B, H), jnp.float32)
        _, hs = lax.scan(scan_fn, (h0, h0), gx)
        if reverse:
            hs = hs[::-1]
        return hs  # (T, B, H)

    x_tbd = jnp.transpose(bert_output, (1, 0, 2))
    hf = run(x_tbd, params["wih_f"], params["whh_f"], params["b_f"], False)
    hr = run(x_tbd, params["wih_r"], params["whh_r"], params["b_r"], True)
    out = jnp.concatenate([hf, hr], axis=-1)
    return out[-1] @ params["w_fc"] + params["b_fc"]


if __name__ == "__main__":
    B, T, D, H, C = 2, 8, 768, 128, 2   # small shapes; D=768 is the BERT width
    key = jax.random.PRNGKey(0)
    k_emb, k_p = jax.random.split(key)

    params = init_params(k_p, D, H, C)
    # Stand-in for bert(x, attention_mask)[0] hidden states.
    bert_output = jax.random.normal(k_emb, (B, T, D), jnp.float32)

    logits = my_model_forward(bert_output, params)
    jax.block_until_ready(logits)

    ref = ref_forward(bert_output, params)
    assert logits.shape == (B, C)
    # bf16 MXU inputs (f32 accumulation / gate math) -> looser tolerance.
    assert jnp.allclose(logits, ref, rtol=5e-2, atol=5e-2), (logits, ref)
    print("KERNEL_OK")
</pallas_src>

<mosaic_0001>
module attributes {stable_mosaic.version = 11 : i64} {
  func.func @bilstm_fc_kernel(%arg0: i32, %arg1: memref<8x8x768xbf16, #tpu.memory_space<vmem>>, %arg2: memref<768x512xbf16, #tpu.memory_space<vmem>>, %arg3: memref<128x512xbf16, #tpu.memory_space<vmem>>, %arg4: memref<1x512xf32, #tpu.memory_space<vmem>>, %arg5: memref<768x512xbf16, #tpu.memory_space<vmem>>, %arg6: memref<1x512xf32, #tpu.memory_space<vmem>>, %arg7: memref<256x128xbf16, #tpu.memory_space<vmem>>, %arg8: memref<1x128xf32, #tpu.memory_space<vmem>>, %arg9: memref<8x128xf32, #tpu.memory_space<vmem>>, %arg10: memref<8x8x512xf32, #tpu.memory_space<vmem>>) attributes {dimension_semantics = [#tpu.dimension_semantics<arbitrary>], iteration_bounds = array<i64: 1>, scalar_prefetch = 0 : i64, scratch_operands = 1 : i64, tpu.core_type = #tpu.core_type<tc>, window_params = [{transform_indices = @transform_0, window_bounds = array<i64: 8, 8, 768>}, {pipeline_mode = #tpu.pipeline_mode<synchronous>, transform_indices = @transform_1, window_bounds = array<i64: 768, 512>}, {pipeline_mode = #tpu.pipeline_mode<synchronous>, transform_indices = @transform_2, window_bounds = array<i64: 128, 512>}, {pipeline_mode = #tpu.pipeline_mode<synchronous>, transform_indices = @transform_3, window_bounds = array<i64: 1, 512>}, {pipeline_mode = #tpu.pipeline_mode<synchronous>, transform_indices = @transform_4, window_bounds = array<i64: 768, 512>}, {pipeline_mode = #tpu.pipeline_mode<synchronous>, transform_indices = @transform_5, window_bounds = array<i64: 1, 512>}, {pipeline_mode = #tpu.pipeline_mode<synchronous>, transform_indices = @transform_6, window_bounds = array<i64: 256, 128>}, {pipeline_mode = #tpu.pipeline_mode<synchronous>, transform_indices = @transform_7, window_bounds = array<i64: 1, 128>}, {transform_indices = @transform_8, window_bounds = array<i64: 8, 128>}]} {
    %c0 = arith.constant 0 : index
    %c0_0 = arith.constant 0 : index
    %c0_1 = arith.constant 0 : index
    %0 = vector.load %arg1[%c0, %c0_0, %c0_1] : memref<8x8x768xbf16, #tpu.memory_space<vmem>>, vector<8x8x768xbf16>
    %1 = vector.shape_cast %0 : vector<8x8x768xbf16> to vector<64x768xbf16>
    %c0_2 = arith.constant 0 : index
    %c0_3 = arith.constant 0 : index
    %2 = vector.load %arg2[%c0_2, %c0_3] : memref<768x512xbf16, #tpu.memory_space<vmem>>, vector<768x512xbf16>
    %cst = arith.constant dense<0.000000e+00> : vector<64x512xf32>
    %3 = tpu.matmul %1, %2, %cst {dimension_numbers = #tpu.dot_dimension_numbers<[1], [0], [0], [1], [0, 0, 1, 1], [], []>} : vector<64x768xbf16>, vector<768x512xbf16>, vector<64x512xf32> -> vector<64x512xf32>
    %c0_4 = arith.constant 0 : index
    %c0_5 = arith.constant 0 : index
    %4 = vector.load %arg4[%c0_4, %c0_5] : memref<1x512xf32, #tpu.memory_space<vmem>>, vector<1x512xf32>
    %5 = vector.broadcast %4 : vector<1x512xf32> to vector<64x512xf32>
    %6 = arith.addf %3, %5 : vector<64x512xf32>
    %7 = vector.shape_cast %6 : vector<64x512xf32> to vector<8x8x512xf32>
    %8 = tpu.transpose %7, [1, 0, 2] : vector<8x8x512xf32> -> vector<8x8x512xf32>
    %c0_6 = arith.constant 0 : index
    %c0_7 = arith.constant 0 : index
    %c0_8 = arith.constant 0 : index
    %9 = vector.load %arg10[%c0_6, %c0_7, %c0_8] : memref<8x8x512xf32, #tpu.memory_space<vmem>>, vector<8x8x512xf32>
    tpu.vector_store %arg10[%c0_6, %c0_7, %c0_8], %8 {strides = array<i32>} : memref<8x8x512xf32, #tpu.memory_space<vmem>>, vector<8x8x512xf32>,
    %c0_9 = arith.constant 0 : index
    %c0_10 = arith.constant 0 : index
    %10 = vector.load %arg3[%c0_9, %c0_10] : memref<128x512xbf16, #tpu.memory_space<vmem>>, vector<128x512xbf16>
    %cst_11 = arith.constant 0.000000e+00 : f32
    %11 = vector.broadcast %cst_11 : f32 to vector<8x128xf32>
    %cst_12 = arith.constant 0.000000e+00 : f32
    %12 = vector.broadcast %cst_12 : f32 to vector<8x128xf32>
    %c0_i32 = arith.constant 0 : i32
    %13 = arith.index_cast %c0_i32 : i32 to index
    %c0_13 = arith.constant 0 : index
    %c0_14 = arith.constant 0 : index
    %14 = vector.load %arg10[%13, %c0_13, %c0_14] : memref<8x8x512xf32, #tpu.memory_space<vmem>>, vector<1x8x512xf32>
    %15 = vector.shape_cast %14 : vector<1x8x512xf32> to vector<8x512xf32>
    %16 = arith.truncf %11 : vector<8x128xf32> to vector<8x128xbf16>
    %cst_15 = arith.constant dense<0.000000e+00> : vector<8x512xf32>
    %17 = tpu.matmul %16, %10, %cst_15 {dimension_numbers = #tpu.dot_dimension_numbers<[1], [0], [0], [1], [0, 0, 1, 1], [], []>} : vector<8x128xbf16>, vector<128x512xbf16>, vector<8x512xf32> -> vector<8x512xf32>
    %18 = arith.addf %15, %17 : vector<8x512xf32>
    %19 = vector.extract_strided_slice %18 {offsets = [0, 0], sizes = [8, 128], strides = [1, 1]} : vector<8x512xf32> to vector<8x128xf32>
    %20 = arith.negf %19 : vector<8x128xf32>
    %21 = math.exp %20 : vector<8x128xf32>
    %cst_16 = arith.constant 1.000000e+00 : f32
    %22 = vector.broadcast %cst_16 : f32 to vector<8x128xf32>
    %23 = arith.addf %22, %21 : vector<8x128xf32>
    %24 = arith.divf %22, %23 : vector<8x128xf32>
    %25 = vector.extract_strided_slice %18 {offsets = [0, 128], sizes = [8, 128], strides = [1, 1]} : vector<8x512xf32> to vector<8x128xf32>
    %26 = arith.negf %25 : vector<8x128xf32>
    %27 = math.exp %26 : vector<8x128xf32>
    %cst_17 = arith.constant 1.000000e+00 : f32
    %28 = vector.broadcast %cst_17 : f32 to vector<8x128xf32>
    %29 = arith.addf %28, %27 : vector<8x128xf32>
    %30 = arith.divf %28, %29 : vector<8x128xf32>
    %31 = vector.extract_strided_slice %18 {offsets = [0, 256], sizes = [8, 128], strides = [1, 1]} : vector<8x512xf32> to vector<8x128xf32>
    %32 = math.tanh %31 : vector<8x128xf32>
    %33 = vector.extract_strided_slice %18 {offsets = [0, 384], sizes = [8, 128], strides = [1, 1]} : vector<8x512xf32> to vector<8x128xf32>
    %34 = arith.negf %33 : vector<8x128xf32>
    %35 = math.exp %34 : vector<8x128xf32>
    %cst_18 = arith.constant 1.000000e+00 : f32
    %36 = vector.broadcast %cst_18 : f32 to vector<8x128xf32>
    %37 = arith.addf %36, %35 : vector<8x128xf32>
    %38 = arith.divf %36, %37 : vector<8x128xf32>
    %39 = arith.mulf %30, %12 : vector<8x128xf32>
    %40 = arith.mulf %24, %32 : vector<8x128xf32>
    %41 = arith.addf %39, %40 : vector<8x128xf32>
    %42 = math.tanh %41 : vector<8x128xf32>
    %43 = arith.mulf %38, %42 : vector<8x128xf32>
    %c1_i32 = arith.constant 1 : i32
    %44 = arith.index_cast %c1_i32 : i32 to index
    %c0_19 = arith.constant 0 : index
    %c0_20 = arith.constant 0 : index
    %45 = vector.load %arg10[%44, %c0_19, %c0_20] : memref<8x8x512xf32, #tpu.memory_space<vmem>>, vector<1x8x512xf32>
    %46 = vector.shape_cast %45 : vector<1x8x512xf32> to vector<8x512xf32>
    %47 = arith.truncf %43 : vector<8x128xf32> to vector<8x128xbf16>
    %cst_21 = arith.constant dense<0.000000e+00> : vector<8x512xf32>
    %48 = tpu.matmul %47, %10, %cst_21 {dimension_numbers = #tpu.dot_dimension_numbers<[1], [0], [0], [1], [0, 0, 1, 1], [], []>} : vector<8x128xbf16>, vector<128x512xbf16>, vector<8x512xf32> -> vector<8x512xf32>
    %49 = arith.addf %46, %48 : vector<8x512xf32>
    %50 = vector.extract_strided_slice %49 {offsets = [0, 0], sizes = [8, 128], strides = [1, 1]} : vector<8x512xf32> to vector<8x128xf32>
    %51 = arith.negf %50 : vector<8x128xf32>
    %52 = math.exp %51 : vector<8x128xf32>
    %cst_22 = arith.constant 1.000000e+00 : f32
    %53 = vector.broadcast %cst_22 : f32 to vector<8x128xf32>
    %54 = arith.addf %53, %52 : vector<8x128xf32>
    %55 = arith.divf %53, %54 : vector<8x128xf32>
    %56 = vector.extract_strided_slice %49 {offsets = [0, 128], sizes = [8, 128], strides = [1, 1]} : vector<8x512xf32> to vector<8x128xf32>
    %57 = arith.negf %56 : vector<8x128xf32>
    %58 = math.exp %57 : vector<8x128xf32>
    %cst_23 = arith.constant 1.000000e+00 : f32
    %59 = vector.broadcast %cst_23 : f32 to vector<8x128xf32>
    %60 = arith.addf %59, %58 : vector<8x128xf32>
    %61 = arith.divf %59, %60 : vector<8x128xf32>
    %62 = vector.extract_strided_slice %49 {offsets = [0, 256], sizes = [8, 128], strides = [1, 1]} : vector<8x512xf32> to vector<8x128xf32>
    %63 = math.tanh %62 : vector<8x128xf32>
    %64 = vector.extract_strided_slice %49 {offsets = [0, 384], sizes = [8, 128], strides = [1, 1]} : vector<8x512xf32> to vector<8x128xf32>
    %65 = arith.negf %64 : vector<8x128xf32>
    %66 = math.exp %65 : vector<8x128xf32>
    %cst_24 = arith.constant 1.000000e+00 : f32
    %67 = vector.broadcast %cst_24 : f32 to vector<8x128xf32>
    %68 = arith.addf %67, %66 : vector<8x128xf32>
    %69 = arith.divf %67, %68 : vector<8x128xf32>
    %70 = arith.mulf %61, %41 : vector<8x128xf32>
    %71 = arith.mulf %55, %63 : vector<8x128xf32>
    %72 = arith.addf %70, %71 : vector<8x128xf32>
    %73 = math.tanh %72 : vector<8x128xf32>
    %74 = arith.mulf %69, %73 : vector<8x128xf32>
    %c2_i32 = arith.constant 2 : i32
    %75 = arith.index_cast %c2_i32 : i32 to index
    %c0_25 = arith.constant 0 : index
    %c0_26 = arith.constant 0 : index
    %76 = vector.load %arg10[%75, %c0_25, %c0_26] : memref<8x8x512xf32, #tpu.memory_space<vmem>>, vector<1x8x512xf32>
    %77 = vector.shape_cast %76 : vector<1x8x512xf32> to vector<8x512xf32>
    %78 = arith.truncf %74 : vector<8x128xf32> to vector<8x128xbf16>
    %cst_27 = arith.constant dense<0.000000e+00> : vector<8x512xf32>
    %79 = tpu.matmul %78, %10, %cst_27 {dimension_numbers = #tpu.dot_dimension_numbers<[1], [0], [0], [1], [0, 0, 1, 1], [], []>} : vector<8x128xbf16>, vector<128x512xbf16>, vector<8x512xf32> -> vector<8x512xf32>
    %80 = arith.addf %77, %79 : vector<8x512xf32>
    %81 = vector.extract_strided_slice %80 {offsets = [0, 0], sizes = [8, 128], strides = [1, 1]} : vector<8x512xf32> to vector<8x128xf32>
    %82 = arith.negf %81 : vector<8x128xf32>
    %83 = math.exp %82 : vector<8x128xf32>
    %cst_28 = arith.constant 1.000000e+00 : f32
    %84 = vector.broadcast %cst_28 : f32 to vector<8x128xf32>
    %85 = arith.addf %84, %83 : vector<8x128xf32>
    %86 = arith.divf %84, %85 : vector<8x128xf32>
    %87 = vector.extract_strided_slice %80 {offsets = [0, 128], sizes = [8, 128], strides = [1, 1]} : vector<8x512xf32> to vector<8x128xf32>
    %88 = arith.negf %87 : vector<8x128xf32>
    %89 = math.exp %88 : vector<8x128xf32>
    %cst_29 = arith.constant 1.000000e+00 : f32
    %90 = vector.broadcast %cst_29 : f32 to vector<8x128xf32>
    %91 = arith.addf %90, %89 : vector<8x128xf32>
    %92 = arith.divf %90, %91 : vector<8x128xf32>
    %93 = vector.extract_strided_slice %80 {offsets = [0, 256], sizes = [8, 128], strides = [1, 1]} : vector<8x512xf32> to vector<8x128xf32>
    %94 = math.tanh %93 : vector<8x128xf32>
    %95 = vector.extract_strided_slice %80 {offsets = [0, 384], sizes = [8, 128], strides = [1, 1]} : vector<8x512xf32> to vector<8x128xf32>
    %96 = arith.negf %95 : vector<8x128xf32>
    %97 = math.exp %96 : vector<8x128xf32>
    %cst_30 = arith.constant 1.000000e+00 : f32
    %98 = vector.broadcast %cst_30 : f32 to vector<8x128xf32>
    %99 = arith.addf %98, %97 : vector<8x128xf32>
    %100 = arith.divf %98, %99 : vector<8x128xf32>
    %101 = arith.mulf %92, %72 : vector<8x128xf32>
    %102 = arith.mulf %86, %94 : vector<8x128xf32>
    %103 = arith.addf %101, %102 : vector<8x128xf32>
    %104 = math.tanh %103 : vector<8x128xf32>
    %105 = arith.mulf %100, %104 : vector<8x128xf32>
    %c3_i32 = arith.constant 3 : i32
    %106 = arith.index_cast %c3_i32 : i32 to index
    %c0_31 = arith.constant 0 : index
    %c0_32 = arith.constant 0 : index
    %107 = vector.load %arg10[%106, %c0_31, %c0_32] : memref<8x8x512xf32, #tpu.memory_space<vmem>>, vector<1x8x512xf32>
    %108 = vector.shape_cast %107 : vector<1x8x512xf32> to vector<8x512xf32>
    %109 = arith.truncf %105 : vector<8x128xf32> to vector<8x128xbf16>
    %cst_33 = arith.constant dense<0.000000e+00> : vector<8x512xf32>
    %110 = tpu.matmul %109, %10, %cst_33 {dimension_numbers = #tpu.dot_dimension_numbers<[1], [0], [0], [1], [0, 0, 1, 1], [], []>} : vector<8x128xbf16>, vector<128x512xbf16>, vector<8x512xf32> -> vector<8x512xf32>
    %111 = arith.addf %108, %110 : vector<8x512xf32>
    %112 = vector.extract_strided_slice %111 {offsets = [0, 0], sizes = [8, 128], strides = [1, 1]} : vector<8x512xf32> to vector<8x128xf32>
    %113 = arith.negf %112 : vector<8x128xf32>
    %114 = math.exp %113 : vector<8x128xf32>
    %cst_34 = arith.constant 1.000000e+00 : f32
    %115 = vector.broadcast %cst_34 : f32 to vector<8x128xf32>
    %116 = arith.addf %115, %114 : vector<8x128xf32>
    %117 = arith.divf %115, %116 : vector<8x128xf32>
    %118 = vector.extract_strided_slice %111 {offsets = [0, 128], sizes = [8, 128], strides = [1, 1]} : vector<8x512xf32> to vector<8x128xf32>
    %119 = arith.negf %118 : vector<8x128xf32>
    %120 = math.exp %119 : vector<8x128xf32>
    %cst_35 = arith.constant 1.000000e+00 : f32
    %121 = vector.broadcast %cst_35 : f32 to vector<8x128xf32>
    %122 = arith.addf %121, %120 : vector<8x128xf32>
    %123 = arith.divf %121, %122 : vector<8x128xf32>
    %124 = vector.extract_strided_slice %111 {offsets = [0, 256], sizes = [8, 128], strides = [1, 1]} : vector<8x512xf32> to vector<8x128xf32>
    %125 = math.tanh %124 : vector<8x128xf32>
    %126 = vector.extract_strided_slice %111 {offsets = [0, 384], sizes = [8, 128], strides = [1, 1]} : vector<8x512xf32> to vector<8x128xf32>
    %127 = arith.negf %126 : vector<8x128xf32>
    %128 = math.exp %127 : vector<8x128xf32>
    %cst_36 = arith.constant 1.000000e+00 : f32
    %129 = vector.broadcast %cst_36 : f32 to vector<8x128xf32>
    %130 = arith.addf %129, %128 : vector<8x128xf32>
    %131 = arith.divf %129, %130 : vector<8x128xf32>
    %132 = arith.mulf %123, %103 : vector<8x128xf32>
    %133 = arith.mulf %117, %125 : vector<8x128xf32>
    %134 = arith.addf %132, %133 : vector<8x128xf32>
    %135 = math.tanh %134 : vector<8x128xf32>
    %136 = arith.mulf %131, %135 : vector<8x128xf32>
    %c4_i32 = arith.constant 4 : i32
    %137 = arith.index_cast %c4_i32 : i32 to index
    %c0_37 = arith.constant 0 : index
    %c0_38 = arith.constant 0 : index
    %138 = vector.load %arg10[%137, %c0_37, %c0_38] : memref<8x8x512xf32, #tpu.memory_space<vmem>>, vector<1x8x512xf32>
    %139 = vector.shape_cast %138 : vector<1x8x512xf32> to vector<8x512xf32>
    %140 = arith.truncf %136 : vector<8x128xf32> to vector<8x128xbf16>
    %cst_39 = arith.constant dense<0.000000e+00> : vector<8x512xf32>
    %141 = tpu.matmul %140, %10, %cst_39 {dimension_numbers = #tpu.dot_dimension_numbers<[1], [0], [0], [1], [0, 0, 1, 1], [], []>} : vector<8x128xbf16>, vector<128x512xbf16>, vector<8x512xf32> -> vector<8x512xf32>
    %142 = arith.addf %139, %141 : vector<8x512xf32>
    %143 = vector.extract_strided_slice %142 {offsets = [0, 0], sizes = [8, 128], strides = [1, 1]} : vector<8x512xf32> to vector<8x128xf32>
    %144 = arith.negf %143 : vector<8x128xf32>
    %145 = math.exp %144 : vector<8x128xf32>
    %cst_40 = arith.constant 1.000000e+00 : f32
    %146 = vector.broadcast %cst_40 : f32 to vector<8x128xf32>
    %147 = arith.addf %146, %145 : vector<8x128xf32>
    %148 = arith.divf %146, %147 : vector<8x128xf32>
    %149 = vector.extract_strided_slice %142 {offsets = [0, 128], sizes = [8, 128], strides = [1, 1]} : vector<8x512xf32> to vector<8x128xf32>
    %150 = arith.negf %149 : vector<8x128xf32>
    %151 = math.exp %150 : vector<8x128xf32>
    %cst_41 = arith.constant 1.000000e+00 : f32
    %152 = vector.broadcast %cst_41 : f32 to vector<8x128xf32>
    %153 = arith.addf %152, %151 : vector<8x128xf32>
    %154 = arith.divf %152, %153 : vector<8x128xf32>
    %155 = vector.extract_strided_slice %142 {offsets = [0, 256], sizes = [8, 128], strides = [1, 1]} : vector<8x512xf32> to vector<8x128xf32>
    %156 = math.tanh %155 : vector<8x128xf32>
    %157 = vector.extract_strided_slice %142 {offsets = [0, 384], sizes = [8, 128], strides = [1, 1]} : vector<8x512xf32> to vector<8x128xf32>
    %158 = arith.negf %157 : vector<8x128xf32>
    %159 = math.exp %158 : vector<8x128xf32>
    %cst_42 = arith.constant 1.000000e+00 : f32
    %160 = vector.broadcast %cst_42 : f32 to vector<8x128xf32>
    %161 = arith.addf %160, %159 : vector<8x128xf32>
    %162 = arith.divf %160, %161 : vector<8x128xf32>
    %163 = arith.mulf %154, %134 : vector<8x128xf32>
    %164 = arith.mulf %148, %156 : vector<8x128xf32>
    %165 = arith.addf %163, %164 : vector<8x128xf32>
    %166 = math.tanh %165 : vector<8x128xf32>
    %167 = arith.mulf %162, %166 : vector<8x128xf32>
    %c5_i32 = arith.constant 5 : i32
    %168 = arith.index_cast %c5_i32 : i32 to index
    %c0_43 = arith.constant 0 : index
    %c0_44 = arith.constant 0 : index
    %169 = vector.load %arg10[%168, %c0_43, %c0_44] : memref<8x8x512xf32, #tpu.memory_space<vmem>>, vector<1x8x512xf32>
    %170 = vector.shape_cast %169 : vector<1x8x512xf32> to vector<8x512xf32>
    %171 = arith.truncf %167 : vector<8x128xf32> to vector<8x128xbf16>
    %cst_45 = arith.constant dense<0.000000e+00> : vector<8x512xf32>
    %172 = tpu.matmul %171, %10, %cst_45 {dimension_numbers = #tpu.dot_dimension_numbers<[1], [0], [0], [1], [0, 0, 1, 1], [], []>} : vector<8x128xbf16>, vector<128x512xbf16>, vector<8x512xf32> -> vector<8x512xf32>
    %173 = arith.addf %170, %172 : vector<8x512xf32>
    %174 = vector.extract_strided_slice %173 {offsets = [0, 0], sizes = [8, 128], strides = [1, 1]} : vector<8x512xf32> to vector<8x128xf32>
    %175 = arith.negf %174 : vector<8x128xf32>
    %176 = math.exp %175 : vector<8x128xf32>
    %cst_46 = arith.constant 1.000000e+00 : f32
    %177 = vector.broadcast %cst_46 : f32 to vector<8x128xf32>
    %178 = arith.addf %177, %176 : vector<8x128xf32>
    %179 = arith.divf %177, %178 : vector<8x128xf32>
    %180 = vector.extract_strided_slice %173 {offsets = [0, 128], sizes = [8, 128], strides = [1, 1]} : vector<8x512xf32> to vector<8x128xf32>
    %181 = arith.negf %180 : vector<8x128xf32>
    %182 = math.exp %181 : vector<8x128xf32>
    %cst_47 = arith.constant 1.000000e+00 : f32
    %183 = vector.broadcast %cst_47 : f32 to vector<8x128xf32>
    %184 = arith.addf %183, %182 : vector<8x128xf32>
    %185 = arith.divf %183, %184 : vector<8x128xf32>
    %186 = vector.extract_strided_slice %173 {offsets = [0, 256], sizes = [8, 128], strides = [1, 1]} : vector<8x512xf32> to vector<8x128xf32>
    %187 = math.tanh %186 : vector<8x128xf32>
    %188 = vector.extract_strided_slice %173 {offsets = [0, 384], sizes = [8, 128], strides = [1, 1]} : vector<8x512xf32> to vector<8x128xf32>
    %189 = arith.negf %188 : vector<8x128xf32>
    %190 = math.exp %189 : vector<8x128xf32>
    %cst_48 = arith.constant 1.000000e+00 : f32
    %191 = vector.broadcast %cst_48 : f32 to vector<8x128xf32>
    %192 = arith.addf %191, %190 : vector<8x128xf32>
    %193 = arith.divf %191, %192 : vector<8x128xf32>
    %194 = arith.mulf %185, %165 : vector<8x128xf32>
    %195 = arith.mulf %179, %187 : vector<8x128xf32>
    %196 = arith.addf %194, %195 : vector<8x128xf32>
    %197 = math.tanh %196 : vector<8x128xf32>
    %198 = arith.mulf %193, %197 : vector<8x128xf32>
    %c6_i32 = arith.constant 6 : i32
    %199 = arith.index_cast %c6_i32 : i32 to index
    %c0_49 = arith.constant 0 : index
    %c0_50 = arith.constant 0 : index
    %200 = vector.load %arg10[%199, %c0_49, %c0_50] : memref<8x8x512xf32, #tpu.memory_space<vmem>>, vector<1x8x512xf32>
    %201 = vector.shape_cast %200 : vector<1x8x512xf32> to vector<8x512xf32>
    %202 = arith.truncf %198 : vector<8x128xf32> to vector<8x128xbf16>
    %cst_51 = arith.constant dense<0.000000e+00> : vector<8x512xf32>
    %203 = tpu.matmul %202, %10, %cst_51 {dimension_numbers = #tpu.dot_dimension_numbers<[1], [0], [0], [1], [0, 0, 1, 1], [], []>} : vector<8x128xbf16>, vector<128x512xbf16>, vector<8x512xf32> -> vector<8x512xf32>
    %204 = arith.addf %201, %203 : vector<8x512xf32>
    %205 = vector.extract_strided_slice %204 {offsets = [0, 0], sizes = [8, 128], strides = [1, 1]} : vector<8x512xf32> to vector<8x128xf32>
    %206 = arith.negf %205 : vector<8x128xf32>
    %207 = math.exp %206 : vector<8x128xf32>
    %cst_52 = arith.constant 1.000000e+00 : f32
    %208 = vector.broadcast %cst_52 : f32 to vector<8x128xf32>
    %209 = arith.addf %208, %207 : vector<8x128xf32>
    %210 = arith.divf %208, %209 : vector<8x128xf32>
    %211 = vector.extract_strided_slice %204 {offsets = [0, 128], sizes = [8, 128], strides = [1, 1]} : vector<8x512xf32> to vector<8x128xf32>
    %212 = arith.negf %211 : vector<8x128xf32>
    %213 = math.exp %212 : vector<8x128xf32>
    %cst_53 = arith.constant 1.000000e+00 : f32
    %214 = vector.broadcast %cst_53 : f32 to vector<8x128xf32>
    %215 = arith.addf %214, %213 : vector<8x128xf32>
    %216 = arith.divf %214, %215 : vector<8x128xf32>
    %217 = vector.extract_strided_slice %204 {offsets = [0, 256], sizes = [8, 128], strides = [1, 1]} : vector<8x512xf32> to vector<8x128xf32>
    %218 = math.tanh %217 : vector<8x128xf32>
    %219 = vector.extract_strided_slice %204 {offsets = [0, 384], sizes = [8, 128], strides = [1, 1]} : vector<8x512xf32> to vector<8x128xf32>
    %220 = arith.negf %219 : vector<8x128xf32>
    %221 = math.exp %220 : vector<8x128xf32>
    %cst_54 = arith.constant 1.000000e+00 : f32
    %222 = vector.broadcast %cst_54 : f32 to vector<8x128xf32>
    %223 = arith.addf %222, %221 : vector<8x128xf32>
    %224 = arith.divf %222, %223 : vector<8x128xf32>
    %225 = arith.mulf %216, %196 : vector<8x128xf32>
    %226 = arith.mulf %210, %218 : vector<8x128xf32>
    %227 = arith.addf %225, %226 : vector<8x128xf32>
    %228 = math.tanh %227 : vector<8x128xf32>
    %229 = arith.mulf %224, %228 : vector<8x128xf32>
    %c7_i32 = arith.constant 7 : i32
    %230 = arith.index_cast %c7_i32 : i32 to index
    %c0_55 = arith.constant 0 : index
    %c0_56 = arith.constant 0 : index
    %231 = vector.load %arg10[%230, %c0_55, %c0_56] : memref<8x8x512xf32, #tpu.memory_space<vmem>>, vector<1x8x512xf32>
    %232 = vector.shape_cast %231 : vector<1x8x512xf32> to vector<8x512xf32>
    %233 = arith.truncf %229 : vector<8x128xf32> to vector<8x128xbf16>
    %cst_57 = arith.constant dense<0.000000e+00> : vector<8x512xf32>
    %234 = tpu.matmul %233, %10, %cst_57 {dimension_numbers = #tpu.dot_dimension_numbers<[1], [0], [0], [1], [0, 0, 1, 1], [], []>} : vector<8x128xbf16>, vector<128x512xbf16>, vector<8x512xf32> -> vector<8x512xf32>
    %235 = arith.addf %232, %234 : vector<8x512xf32>
    %236 = vector.extract_strided_slice %235 {offsets = [0, 0], sizes = [8, 128], strides = [1, 1]} : vector<8x512xf32> to vector<8x128xf32>
    %237 = arith.negf %236 : vector<8x128xf32>
    %238 = math.exp %237 : vector<8x128xf32>
    %cst_58 = arith.constant 1.000000e+00 : f32
    %239 = vector.broadcast %cst_58 : f32 to vector<8x128xf32>
    %240 = arith.addf %239, %238 : vector<8x128xf32>
    %241 = arith.divf %239, %240 : vector<8x128xf32>
    %242 = vector.extract_strided_slice %235 {offsets = [0, 128], sizes = [8, 128], strides = [1, 1]} : vector<8x512xf32> to vector<8x128xf32>
    %243 = arith.negf %242 : vector<8x128xf32>
    %244 = math.exp %243 : vector<8x128xf32>
    %cst_59 = arith.constant 1.000000e+00 : f32
    %245 = vector.broadcast %cst_59 : f32 to vector<8x128xf32>
    %246 = arith.addf %245, %244 : vector<8x128xf32>
    %247 = arith.divf %245, %246 : vector<8x128xf32>
    %248 = vector.extract_strided_slice %235 {offsets = [0, 256], sizes = [8, 128], strides = [1, 1]} : vector<8x512xf32> to vector<8x128xf32>
    %249 = math.tanh %248 : vector<8x128xf32>
    %250 = vector.extract_strided_slice %235 {offsets = [0, 384], sizes = [8, 128], strides = [1, 1]} : vector<8x512xf32> to vector<8x128xf32>
    %251 = arith.negf %250 : vector<8x128xf32>
    %252 = math.exp %251 : vector<8x128xf32>
    %cst_60 = arith.constant 1.000000e+00 : f32
    %253 = vector.broadcast %cst_60 : f32 to vector<8x128xf32>
    %254 = arith.addf %253, %252 : vector<8x128xf32>
    %255 = arith.divf %253, %254 : vector<8x128xf32>
    %256 = arith.mulf %247, %227 : vector<8x128xf32>
    %257 = arith.mulf %241, %249 : vector<8x128xf32>
    %258 = arith.addf %256, %257 : vector<8x128xf32>
    %259 = math.tanh %258 : vector<8x128xf32>
    %260 = arith.mulf %255, %259 : vector<8x128xf32>
    %c8_i32 = arith.constant 8 : i32
    %c0_61 = arith.constant 0 : index
    %c7 = arith.constant 7 : index
    %c0_62 = arith.constant 0 : index
    %261 = vector.load %arg1[%c0_61, %c7, %c0_62] : memref<8x8x768xbf16, #tpu.memory_space<vmem>>, vector<8x1x768xbf16>
    %262 = vector.shape_cast %261 : vector<8x1x768xbf16> to vector<8x768xbf16>
    %c0_63 = arith.constant 0 : index
    %c0_64 = arith.constant 0 : index
    %263 = vector.load %arg5[%c0_63, %c0_64] : memref<768x512xbf16, #tpu.memory_space<vmem>>, vector<768x512xbf16>
    %cst_65 = arith.constant dense<0.000000e+00> : vector<8x512xf32>
    %264 = tpu.matmul %262, %263, %cst_65 {dimension_numbers = #tpu.dot_dimension_numbers<[1], [0], [0], [1], [0, 0, 1, 1], [], []>} : vector<8x768xbf16>, vector<768x512xbf16>, vector<8x512xf32> -> vector<8x512xf32>
    %c0_66 = arith.constant 0 : index
    %c0_67 = arith.constant 0 : index
    %265 = vector.load %arg6[%c0_66, %c0_67] : memref<1x512xf32, #tpu.memory_space<vmem>>, vector<1x512xf32>
    %266 = vector.broadcast %265 : vector<1x512xf32> to vector<8x512xf32>
    %267 = arith.addf %264, %266 : vector<8x512xf32>
    %268 = vector.extract_strided_slice %267 {offsets = [0, 0], sizes = [8, 128], strides = [1, 1]} : vector<8x512xf32> to vector<8x128xf32>
    %269 = arith.negf %268 : vector<8x128xf32>
    %270 = math.exp %269 : vector<8x128xf32>
    %cst_68 = arith.constant 1.000000e+00 : f32
    %271 = vector.broadcast %cst_68 : f32 to vector<8x128xf32>
    %272 = arith.addf %271, %270 : vector<8x128xf32>
    %273 = arith.divf %271, %272 : vector<8x128xf32>
    %274 = vector.extract_strided_slice %267 {offsets = [0, 128], sizes = [8, 128], strides = [1, 1]} : vector<8x512xf32> to vector<8x128xf32>
    %275 = arith.negf %274 : vector<8x128xf32>
    %276 = math.exp %275 : vector<8x128xf32>
    %cst_69 = arith.constant 1.000000e+00 : f32
    %277 = vector.broadcast %cst_69 : f32 to vector<8x128xf32>
    %278 = arith.addf %277, %276 : vector<8x128xf32>
    %279 = arith.divf %277, %278 : vector<8x128xf32>
    %280 = vector.extract_strided_slice %267 {offsets = [0, 256], sizes = [8, 128], strides = [1, 1]} : vector<8x512xf32> to vector<8x128xf32>
    %281 = math.tanh %280 : vector<8x128xf32>
    %282 = vector.extract_strided_slice %267 {offsets = [0, 384], sizes = [8, 128], strides = [1, 1]} : vector<8x512xf32> to vector<8x128xf32>
    %283 = arith.negf %282 : vector<8x128xf32>
    %284 = math.exp %283 : vector<8x128xf32>
    %cst_70 = arith.constant 1.000000e+00 : f32
    %285 = vector.broadcast %cst_70 : f32 to vector<8x128xf32>
    %286 = arith.addf %285, %284 : vector<8x128xf32>
    %287 = arith.divf %285, %286 : vector<8x128xf32>
    %288 = arith.mulf %279, %12 : vector<8x128xf32>
    %289 = arith.mulf %273, %281 : vector<8x128xf32>
    %290 = arith.addf %288, %289 : vector<8x128xf32>
    %291 = math.tanh %290 : vector<8x128xf32>
    %292 = arith.mulf %287, %291 : vector<8x128xf32>
    %293 = tpu.concatenate %260, %292 in 1 : vector<8x128xf32>, vector<8x128xf32> -> vector<8x256xf32>
    %294 = arith.truncf %293 : vector<8x256xf32> to vector<8x256xbf16>
    %c0_71 = arith.constant 0 : index
    %c0_72 = arith.constant 0 : index
    %295 = vector.load %arg7[%c0_71, %c0_72] : memref<256x128xbf16, #tpu.memory_space<vmem>>, vector<256x128xbf16>
    %cst_73 = arith.constant dense<0.000000e+00> : vector<8x128xf32>
    %296 = tpu.matmul %294, %295, %cst_73 {dimension_numbers = #tpu.dot_dimension_numbers<[1], [0], [0], [1], [0, 0, 1, 1], [], []>} : vector<8x256xbf16>, vector<256x128xbf16>, vector<8x128xf32> -> vector<8x128xf32>
    %c0_74 = arith.constant 0 : index
    %c0_75 = arith.constant 0 : index
    %297 = vector.load %arg8[%c0_74, %c0_75] : memref<1x128xf32, #tpu.memory_space<vmem>>, vector<1x128xf32>
    %298 = vector.broadcast %297 : vector<1x128xf32> to vector<8x128xf32>
    %299 = arith.addf %296, %298 : vector<8x128xf32>
    %c0_76 = arith.constant 0 : index
    %c0_77 = arith.constant 0 : index
    %300 = vector.load %arg9[%c0_76, %c0_77] : memref<8x128xf32, #tpu.memory_space<vmem>>, vector<8x128xf32>
    tpu.vector_store %arg9[%c0_76, %c0_77], %299 {strides = array<i32>} : memref<8x128xf32, #tpu.memory_space<vmem>>, vector<8x128xf32>,
    return
  }
  func.func @transform_0(%arg0: i32) -> (i32, i32, i32) {
    %c0_i32 = arith.constant 0 : i32
    %c0_i32_0 = arith.constant 0 : i32
    %c0_i32_1 = arith.constant 0 : i32
    return %arg0, %c0_i32, %c0_i32_0 : i32, i32, i32
  }
  func.func @transform_1(%arg0: i32) -> (i32, i32) {
    %c0_i32 = arith.constant 0 : i32
    %c0_i32_0 = arith.constant 0 : i32
    %c0_i32_1 = arith.constant 0 : i32
    return %c0_i32, %c0_i32_0 : i32, i32
  }
  func.func @transform_2(%arg0: i32) -> (i32, i32) {
    %c0_i32 = arith.constant 0 : i32
    %c0_i32_0 = arith.constant 0 : i32
    %c0_i32_1 = arith.constant 0 : i32
    return %c0_i32, %c0_i32_0 : i32, i32
  }
  func.func @transform_3(%arg0: i32) -> (i32, i32) {
    %c0_i32 = arith.constant 0 : i32
    %c0_i32_0 = arith.constant 0 : i32
    %c0_i32_1 = arith.constant 0 : i32
    return %c0_i32, %c0_i32_0 : i32, i32
  }
  func.func @transform_4(%arg0: i32) -> (i32, i32) {
    %c0_i32 = arith.constant 0 : i32
    %c0_i32_0 = arith.constant 0 : i32
    %c0_i32_1 = arith.constant 0 : i32
    return %c0_i32, %c0_i32_0 : i32, i32
  }
  func.func @transform_5(%arg0: i32) -> (i32, i32) {
    %c0_i32 = arith.constant 0 : i32
    %c0_i32_0 = arith.constant 0 : i32
    %c0_i32_1 = arith.constant 0 : i32
    return %c0_i32, %c0_i32_0 : i32, i32
  }
  func.func @transform_6(%arg0: i32) -> (i32, i32) {
    %c0_i32 = arith.constant 0 : i32
    %c0_i32_0 = arith.constant 0 : i32
    %c0_i32_1 = arith.constant 0 : i32
    return %c0_i32, %c0_i32_0 : i32, i32
  }
  func.func @transform_7(%arg0: i32) -> (i32, i32) {
    %c0_i32 = arith.constant 0 : i32
    %c0_i32_0 = arith.constant 0 : i32
    %c0_i32_1 = arith.constant 0 : i32
    return %c0_i32, %c0_i32_0 : i32, i32
  }
  func.func @transform_8(%arg0: i32) -> (i32, i32) {
    %c0_i32 = arith.constant 0 : i32
    %c0_i32_0 = arith.constant 0 : i32
    return %arg0, %c0_i32 : i32, i32
  }
}

module attributes {stable_mosaic.version = 11 : i64} {
  func.func @bilstm_fc_kernel(%arg0: i32, %arg1: memref<8x8x768xbf16, #tpu.memory_space<vmem>>, %arg2: memref<768x512xbf16, #tpu.memory_space<vmem>>, %arg3: memref<128x512xbf16, #tpu.memory_space<vmem>>, %arg4: memref<1x512xf32, #tpu.memory_space<vmem>>, %arg5: memref<768x512xbf16, #tpu.memory_space<vmem>>, %arg6: memref<1x512xf32, #tpu.memory_space<vmem>>, %arg7: memref<256x128xbf16, #tpu.memory_space<vmem>>, %arg8: memref<1x128xf32, #tpu.memory_space<vmem>>, %arg9: memref<8x128xf32, #tpu.memory_space<vmem>>, %arg10: memref<8x8x512xf32, #tpu.memory_space<vmem>>) attributes {dimension_semantics = [#tpu.dimension_semantics<arbitrary>], iteration_bounds = array<i64: 1>, scalar_prefetch = 0 : i64, scratch_operands = 1 : i64, tpu.core_type = #tpu.core_type<tc>, window_params = [{transform_indices = @transform_0, window_bounds = array<i64: 8, 8, 768>}, {pipeline_mode = #tpu.pipeline_mode<synchronous>, transform_indices = @transform_1, window_bounds = array<i64: 768, 512>}, {pipeline_mode = #tpu.pipeline_mode<synchronous>, transform_indices = @transform_2, window_bounds = array<i64: 128, 512>}, {pipeline_mode = #tpu.pipeline_mode<synchronous>, transform_indices = @transform_3, window_bounds = array<i64: 1, 512>}, {pipeline_mode = #tpu.pipeline_mode<synchronous>, transform_indices = @transform_4, window_bounds = array<i64: 768, 512>}, {pipeline_mode = #tpu.pipeline_mode<synchronous>, transform_indices = @transform_5, window_bounds = array<i64: 1, 512>}, {pipeline_mode = #tpu.pipeline_mode<synchronous>, transform_indices = @transform_6, window_bounds = array<i64: 256, 128>}, {pipeline_mode = #tpu.pipeline_mode<synchronous>, transform_indices = @transform_7, window_bounds = array<i64: 1, 128>}, {transform_indices = @transform_8, window_bounds = array<i64: 8, 128>}]} {
    %c0 = arith.constant 0 : index
    %c0_0 = arith.constant 0 : index
    %c0_1 = arith.constant 0 : index
    %0 = vector.load %arg1[%c0, %c0_0, %c0_1] : memref<8x8x768xbf16, #tpu.memory_space<vmem>>, vector<8x8x768xbf16>
    %1 = vector.shape_cast %0 : vector<8x8x768xbf16> to vector<64x768xbf16>
    %c0_2 = arith.constant 0 : index
    %c0_3 = arith.constant 0 : index
    %2 = vector.load %arg2[%c0_2, %c0_3] : memref<768x512xbf16, #tpu.memory_space<vmem>>, vector<768x512xbf16>
    %cst = arith.constant dense<0.000000e+00> : vector<64x512xf32>
    %3 = tpu.matmul %1, %2, %cst {dimension_numbers = #tpu.dot_dimension_numbers<[1], [0], [0], [1], [0, 0, 1, 1], [], []>} : vector<64x768xbf16>, vector<768x512xbf16>, vector<64x512xf32> -> vector<64x512xf32>
    %c0_4 = arith.constant 0 : index
    %c0_5 = arith.constant 0 : index
    %4 = vector.load %arg4[%c0_4, %c0_5] : memref<1x512xf32, #tpu.memory_space<vmem>>, vector<1x512xf32>
    %5 = vector.broadcast %4 : vector<1x512xf32> to vector<64x512xf32>
    %6 = arith.addf %3, %5 : vector<64x512xf32>
    %7 = vector.shape_cast %6 : vector<64x512xf32> to vector<8x8x512xf32>
    %8 = tpu.transpose %7, [1, 0, 2] : vector<8x8x512xf32> -> vector<8x8x512xf32>
    %c0_6 = arith.constant 0 : index
    %c0_7 = arith.constant 0 : index
    %c0_8 = arith.constant 0 : index
    %9 = vector.load %arg10[%c0_6, %c0_7, %c0_8] : memref<8x8x512xf32, #tpu.memory_space<vmem>>, vector<8x8x512xf32>
    tpu.vector_store %arg10[%c0_6, %c0_7, %c0_8], %8 {strides = array<i32>} : memref<8x8x512xf32, #tpu.memory_space<vmem>>, vector<8x8x512xf32>,
    %c0_9 = arith.constant 0 : index
    %c0_10 = arith.constant 0 : index
    %10 = vector.load %arg3[%c0_9, %c0_10] : memref<128x512xbf16, #tpu.memory_space<vmem>>, vector<128x512xbf16>
    %cst_11 = arith.constant 0.000000e+00 : f32
    %11 = vector.broadcast %cst_11 : f32 to vector<8x128xf32>
    %cst_12 = arith.constant 0.000000e+00 : f32
    %12 = vector.broadcast %cst_12 : f32 to vector<8x128xf32>
    %c0_i32 = arith.constant 0 : i32
    %13 = arith.index_cast %c0_i32 : i32 to index
    %c0_13 = arith.constant 0 : index
    %c0_14 = arith.constant 0 : index
    %14 = vector.load %arg10[%13, %c0_13, %c0_14] : memref<8x8x512xf32, #tpu.memory_space<vmem>>, vector<1x8x512xf32>
    %15 = vector.shape_cast %14 : vector<1x8x512xf32> to vector<8x512xf32>
    %16 = arith.truncf %11 : vector<8x128xf32> to vector<8x128xbf16>
    %cst_15 = arith.constant dense<0.000000e+00> : vector<8x512xf32>
    %17 = tpu.matmul %16, %10, %cst_15 {dimension_numbers = #tpu.dot_dimension_numbers<[1], [0], [0], [1], [0, 0, 1, 1], [], []>} : vector<8x128xbf16>, vector<128x512xbf16>, vector<8x512xf32> -> vector<8x512xf32>
    %18 = arith.addf %15, %17 : vector<8x512xf32>
    %19 = vector.extract_strided_slice %18 {offsets = [0, 0], sizes = [8, 128], strides = [1, 1]} : vector<8x512xf32> to vector<8x128xf32>
    %20 = arith.negf %19 : vector<8x128xf32>
    %21 = math.exp %20 : vector<8x128xf32>
    %cst_16 = arith.constant 1.000000e+00 : f32
    %22 = vector.broadcast %cst_16 : f32 to vector<8x128xf32>
    %23 = arith.addf %22, %21 : vector<8x128xf32>
    %24 = arith.divf %22, %23 : vector<8x128xf32>
    %25 = vector.extract_strided_slice %18 {offsets = [0, 128], sizes = [8, 128], strides = [1, 1]} : vector<8x512xf32> to vector<8x128xf32>
    %26 = arith.negf %25 : vector<8x128xf32>
    %27 = math.exp %26 : vector<8x128xf32>
    %cst_17 = arith.constant 1.000000e+00 : f32
    %28 = vector.broadcast %cst_17 : f32 to vector<8x128xf32>
    %29 = arith.addf %28, %27 : vector<8x128xf32>
    %30 = arith.divf %28, %29 : vector<8x128xf32>
    %31 = vector.extract_strided_slice %18 {offsets = [0, 256], sizes = [8, 128], strides = [1, 1]} : vector<8x512xf32> to vector<8x128xf32>
    %32 = math.tanh %31 : vector<8x128xf32>
    %33 = vector.extract_strided_slice %18 {offsets = [0, 384], sizes = [8, 128], strides = [1, 1]} : vector<8x512xf32> to vector<8x128xf32>
    %34 = arith.negf %33 : vector<8x128xf32>
    %35 = math.exp %34 : vector<8x128xf32>
    %cst_18 = arith.constant 1.000000e+00 : f32
    %36 = vector.broadcast %cst_18 : f32 to vector<8x128xf32>
    %37 = arith.addf %36, %35 : vector<8x128xf32>
    %38 = arith.divf %36, %37 : vector<8x128xf32>
    %39 = arith.mulf %30, %12 : vector<8x128xf32>
    %40 = arith.mulf %24, %32 : vector<8x128xf32>
    %41 = arith.addf %39, %40 : vector<8x128xf32>
    %42 = math.tanh %41 : vector<8x128xf32>
    %43 = arith.mulf %38, %42 : vector<8x128xf32>
    %c1_i32 = arith.constant 1 : i32
    %44 = arith.index_cast %c1_i32 : i32 to index
    %c0_19 = arith.constant 0 : index
    %c0_20 = arith.constant 0 : index
    %45 = vector.load %arg10[%44, %c0_19, %c0_20] : memref<8x8x512xf32, #tpu.memory_space<vmem>>, vector<1x8x512xf32>
    %46 = vector.shape_cast %45 : vector<1x8x512xf32> to vector<8x512xf32>
    %47 = arith.truncf %43 : vector<8x128xf32> to vector<8x128xbf16>
    %cst_21 = arith.constant dense<0.000000e+00> : vector<8x512xf32>
    %48 = tpu.matmul %47, %10, %cst_21 {dimension_numbers = #tpu.dot_dimension_numbers<[1], [0], [0], [1], [0, 0, 1, 1], [], []>} : vector<8x128xbf16>, vector<128x512xbf16>, vector<8x512xf32> -> vector<8x512xf32>
    %49 = arith.addf %46, %48 : vector<8x512xf32>
    %50 = vector.extract_strided_slice %49 {offsets = [0, 0], sizes = [8, 128], strides = [1, 1]} : vector<8x512xf32> to vector<8x128xf32>
    %51 = arith.negf %50 : vector<8x128xf32>
    %52 = math.exp %51 : vector<8x128xf32>
    %cst_22 = arith.constant 1.000000e+00 : f32
    %53 = vector.broadcast %cst_22 : f32 to vector<8x128xf32>
    %54 = arith.addf %53, %52 : vector<8x128xf32>
    %55 = arith.divf %53, %54 : vector<8x128xf32>
    %56 = vector.extract_strided_slice %49 {offsets = [0, 128], sizes = [8, 128], strides = [1, 1]} : vector<8x512xf32> to vector<8x128xf32>
    %57 = arith.negf %56 : vector<8x128xf32>
    %58 = math.exp %57 : vector<8x128xf32>
    %cst_23 = arith.constant 1.000000e+00 : f32
    %59 = vector.broadcast %cst_23 : f32 to vector<8x128xf32>
    %60 = arith.addf %59, %58 : vector<8x128xf32>
    %61 = arith.divf %59, %60 : vector<8x128xf32>
    %62 = vector.extract_strided_slice %49 {offsets = [0, 256], sizes = [8, 128], strides = [1, 1]} : vector<8x512xf32> to vector<8x128xf32>
    %63 = math.tanh %62 : vector<8x128xf32>
    %64 = vector.extract_strided_slice %49 {offsets = [0, 384], sizes = [8, 128], strides = [1, 1]} : vector<8x512xf32> to vector<8x128xf32>
    %65 = arith.negf %64 : vector<8x128xf32>
    %66 = math.exp %65 : vector<8x128xf32>
    %cst_24 = arith.constant 1.000000e+00 : f32
    %67 = vector.broadcast %cst_24 : f32 to vector<8x128xf32>
    %68 = arith.addf %67, %66 : vector<8x128xf32>
    %69 = arith.divf %67, %68 : vector<8x128xf32>
    %70 = arith.mulf %61, %41 : vector<8x128xf32>
    %71 = arith.mulf %55, %63 : vector<8x128xf32>
    %72 = arith.addf %70, %71 : vector<8x128xf32>
    %73 = math.tanh %72 : vector<8x128xf32>
    %74 = arith.mulf %69, %73 : vector<8x128xf32>
    %c2_i32 = arith.constant 2 : i32
    %75 = arith.index_cast %c2_i32 : i32 to index
    %c0_25 = arith.constant 0 : index
    %c0_26 = arith.constant 0 : index
    %76 = vector.load %arg10[%75, %c0_25, %c0_26] : memref<8x8x512xf32, #tpu.memory_space<vmem>>, vector<1x8x512xf32>
    %77 = vector.shape_cast %76 : vector<1x8x512xf32> to vector<8x512xf32>
    %78 = arith.truncf %74 : vector<8x128xf32> to vector<8x128xbf16>
    %cst_27 = arith.constant dense<0.000000e+00> : vector<8x512xf32>
    %79 = tpu.matmul %78, %10, %cst_27 {dimension_numbers = #tpu.dot_dimension_numbers<[1], [0], [0], [1], [0, 0, 1, 1], [], []>} : vector<8x128xbf16>, vector<128x512xbf16>, vector<8x512xf32> -> vector<8x512xf32>
    %80 = arith.addf %77, %79 : vector<8x512xf32>
    %81 = vector.extract_strided_slice %80 {offsets = [0, 0], sizes = [8, 128], strides = [1, 1]} : vector<8x512xf32> to vector<8x128xf32>
    %82 = arith.negf %81 : vector<8x128xf32>
    %83 = math.exp %82 : vector<8x128xf32>
    %cst_28 = arith.constant 1.000000e+00 : f32
    %84 = vector.broadcast %cst_28 : f32 to vector<8x128xf32>
    %85 = arith.addf %84, %83 : vector<8x128xf32>
    %86 = arith.divf %84, %85 : vector<8x128xf32>
    %87 = vector.extract_strided_slice %80 {offsets = [0, 128], sizes = [8, 128], strides = [1, 1]} : vector<8x512xf32> to vector<8x128xf32>
    %88 = arith.negf %87 : vector<8x128xf32>
    %89 = math.exp %88 : vector<8x128xf32>
    %cst_29 = arith.constant 1.000000e+00 : f32
    %90 = vector.broadcast %cst_29 : f32 to vector<8x128xf32>
    %91 = arith.addf %90, %89 : vector<8x128xf32>
    %92 = arith.divf %90, %91 : vector<8x128xf32>
    %93 = vector.extract_strided_slice %80 {offsets = [0, 256], sizes = [8, 128], strides = [1, 1]} : vector<8x512xf32> to vector<8x128xf32>
    %94 = math.tanh %93 : vector<8x128xf32>
    %95 = vector.extract_strided_slice %80 {offsets = [0, 384], sizes = [8, 128], strides = [1, 1]} : vector<8x512xf32> to vector<8x128xf32>
    %96 = arith.negf %95 : vector<8x128xf32>
    %97 = math.exp %96 : vector<8x128xf32>
    %cst_30 = arith.constant 1.000000e+00 : f32
    %98 = vector.broadcast %cst_30 : f32 to vector<8x128xf32>
    %99 = arith.addf %98, %97 : vector<8x128xf32>
    %100 = arith.divf %98, %99 : vector<8x128xf32>
    %101 = arith.mulf %92, %72 : vector<8x128xf32>
    %102 = arith.mulf %86, %94 : vector<8x128xf32>
    %103 = arith.addf %101, %102 : vector<8x128xf32>
    %104 = math.tanh %103 : vector<8x128xf32>
    %105 = arith.mulf %100, %104 : vector<8x128xf32>
    %c3_i32 = arith.constant 3 : i32
    %106 = arith.index_cast %c3_i32 : i32 to index
    %c0_31 = arith.constant 0 : index
    %c0_32 = arith.constant 0 : index
    %107 = vector.load %arg10[%106, %c0_31, %c0_32] : memref<8x8x512xf32, #tpu.memory_space<vmem>>, vector<1x8x512xf32>
    %108 = vector.shape_cast %107 : vector<1x8x512xf32> to vector<8x512xf32>
    %109 = arith.truncf %105 : vector<8x128xf32> to vector<8x128xbf16>
    %cst_33 = arith.constant dense<0.000000e+00> : vector<8x512xf32>
    %110 = tpu.matmul %109, %10, %cst_33 {dimension_numbers = #tpu.dot_dimension_numbers<[1], [0], [0], [1], [0, 0, 1, 1], [], []>} : vector<8x128xbf16>, vector<128x512xbf16>, vector<8x512xf32> -> vector<8x512xf32>
    %111 = arith.addf %108, %110 : vector<8x512xf32>
    %112 = vector.extract_strided_slice %111 {offsets = [0, 0], sizes = [8, 128], strides = [1, 1]} : vector<8x512xf32> to vector<8x128xf32>
    %113 = arith.negf %112 : vector<8x128xf32>
    %114 = math.exp %113 : vector<8x128xf32>
    %cst_34 = arith.constant 1.000000e+00 : f32
    %115 = vector.broadcast %cst_34 : f32 to vector<8x128xf32>
    %116 = arith.addf %115, %114 : vector<8x128xf32>
    %117 = arith.divf %115, %116 : vector<8x128xf32>
    %118 = vector.extract_strided_slice %111 {offsets = [0, 128], sizes = [8, 128], strides = [1, 1]} : vector<8x512xf32> to vector<8x128xf32>
    %119 = arith.negf %118 : vector<8x128xf32>
    %120 = math.exp %119 : vector<8x128xf32>
    %cst_35 = arith.constant 1.000000e+00 : f32
    %121 = vector.broadcast %cst_35 : f32 to vector<8x128xf32>
    %122 = arith.addf %121, %120 : vector<8x128xf32>
    %123 = arith.divf %121, %122 : vector<8x128xf32>
    %124 = vector.extract_strided_slice %111 {offsets = [0, 256], sizes = [8, 128], strides = [1, 1]} : vector<8x512xf32> to vector<8x128xf32>
    %125 = math.tanh %124 : vector<8x128xf32>
    %126 = vector.extract_strided_slice %111 {offsets = [0, 384], sizes = [8, 128], strides = [1, 1]} : vector<8x512xf32> to vector<8x128xf32>
    %127 = arith.negf %126 : vector<8x128xf32>
    %128 = math.exp %127 : vector<8x128xf32>
    %cst_36 = arith.constant 1.000000e+00 : f32
    %129 = vector.broadcast %cst_36 : f32 to vector<8x128xf32>
    %130 = arith.addf %129, %128 : vector<8x128xf32>
    %131 = arith.divf %129, %130 : vector<8x128xf32>
    %132 = arith.mulf %123, %103 : vector<8x128xf32>
    %133 = arith.mulf %117, %125 : vector<8x128xf32>
    %134 = arith.addf %132, %133 : vector<8x128xf32>
    %135 = math.tanh %134 : vector<8x128xf32>
    %136 = arith.mulf %131, %135 : vector<8x128xf32>
    %c4_i32 = arith.constant 4 : i32
    %137 = arith.index_cast %c4_i32 : i32 to index
    %c0_37 = arith.constant 0 : index
    %c0_38 = arith.constant 0 : index
    %138 = vector.load %arg10[%137, %c0_37, %c0_38] : memref<8x8x512xf32, #tpu.memory_space<vmem>>, vector<1x8x512xf32>
    %139 = vector.shape_cast %138 : vector<1x8x512xf32> to vector<8x512xf32>
    %140 = arith.truncf %136 : vector<8x128xf32> to vector<8x128xbf16>
    %cst_39 = arith.constant dense<0.000000e+00> : vector<8x512xf32>
    %141 = tpu.matmul %140, %10, %cst_39 {dimension_numbers = #tpu.dot_dimension_numbers<[1], [0], [0], [1], [0, 0, 1, 1], [], []>} : vector<8x128xbf16>, vector<128x512xbf16>, vector<8x512xf32> -> vector<8x512xf32>
    %142 = arith.addf %139, %141 : vector<8x512xf32>
    %143 = vector.extract_strided_slice %142 {offsets = [0, 0], sizes = [8, 128], strides = [1, 1]} : vector<8x512xf32> to vector<8x128xf32>
    %144 = arith.negf %143 : vector<8x128xf32>
    %145 = math.exp %144 : vector<8x128xf32>
    %cst_40 = arith.constant 1.000000e+00 : f32
    %146 = vector.broadcast %cst_40 : f32 to vector<8x128xf32>
    %147 = arith.addf %146, %145 : vector<8x128xf32>
    %148 = arith.divf %146, %147 : vector<8x128xf32>
    %149 = vector.extract_strided_slice %142 {offsets = [0, 128], sizes = [8, 128], strides = [1, 1]} : vector<8x512xf32> to vector<8x128xf32>
    %150 = arith.negf %149 : vector<8x128xf32>
    %151 = math.exp %150 : vector<8x128xf32>
    %cst_41 = arith.constant 1.000000e+00 : f32
    %152 = vector.broadcast %cst_41 : f32 to vector<8x128xf32>
    %153 = arith.addf %152, %151 : vector<8x128xf32>
    %154 = arith.divf %152, %153 : vector<8x128xf32>
    %155 = vector.extract_strided_slice %142 {offsets = [0, 256], sizes = [8, 128], strides = [1, 1]} : vector<8x512xf32> to vector<8x128xf32>
    %156 = math.tanh %155 : vector<8x128xf32>
    %157 = vector.extract_strided_slice %142 {offsets = [0, 384], sizes = [8, 128], strides = [1, 1]} : vector<8x512xf32> to vector<8x128xf32>
    %158 = arith.negf %157 : vector<8x128xf32>
    %159 = math.exp %158 : vector<8x128xf32>
    %cst_42 = arith.constant 1.000000e+00 : f32
    %160 = vector.broadcast %cst_42 : f32 to vector<8x128xf32>
    %161 = arith.addf %160, %159 : vector<8x128xf32>
    %162 = arith.divf %160, %161 : vector<8x128xf32>
    %163 = arith.mulf %154, %134 : vector<8x128xf32>
    %164 = arith.mulf %148, %156 : vector<8x128xf32>
    %165 = arith.addf %163, %164 : vector<8x128xf32>
    %166 = math.tanh %165 : vector<8x128xf32>
    %167 = arith.mulf %162, %166 : vector<8x128xf32>
    %c5_i32 = arith.constant 5 : i32
    %168 = arith.index_cast %c5_i32 : i32 to index
    %c0_43 = arith.constant 0 : index
    %c0_44 = arith.constant 0 : index
    %169 = vector.load %arg10[%168, %c0_43, %c0_44] : memref<8x8x512xf32, #tpu.memory_space<vmem>>, vector<1x8x512xf32>
    %170 = vector.shape_cast %169 : vector<1x8x512xf32> to vector<8x512xf32>
    %171 = arith.truncf %167 : vector<8x128xf32> to vector<8x128xbf16>
    %cst_45 = arith.constant dense<0.000000e+00> : vector<8x512xf32>
    %172 = tpu.matmul %171, %10, %cst_45 {dimension_numbers = #tpu.dot_dimension_numbers<[1], [0], [0], [1], [0, 0, 1, 1], [], []>} : vector<8x128xbf16>, vector<128x512xbf16>, vector<8x512xf32> -> vector<8x512xf32>
    %173 = arith.addf %170, %172 : vector<8x512xf32>
    %174 = vector.extract_strided_slice %173 {offsets = [0, 0], sizes = [8, 128], strides = [1, 1]} : vector<8x512xf32> to vector<8x128xf32>
    %175 = arith.negf %174 : vector<8x128xf32>
    %176 = math.exp %175 : vector<8x128xf32>
    %cst_46 = arith.constant 1.000000e+00 : f32
    %177 = vector.broadcast %cst_46 : f32 to vector<8x128xf32>
    %178 = arith.addf %177, %176 : vector<8x128xf32>
    %179 = arith.divf %177, %178 : vector<8x128xf32>
    %180 = vector.extract_strided_slice %173 {offsets = [0, 128], sizes = [8, 128], strides = [1, 1]} : vector<8x512xf32> to vector<8x128xf32>
    %181 = arith.negf %180 : vector<8x128xf32>
    %182 = math.exp %181 : vector<8x128xf32>
    %cst_47 = arith.constant 1.000000e+00 : f32
    %183 = vector.broadcast %cst_47 : f32 to vector<8x128xf32>
    %184 = arith.addf %183, %182 : vector<8x128xf32>
    %185 = arith.divf %183, %184 : vector<8x128xf32>
    %186 = vector.extract_strided_slice %173 {offsets = [0, 256], sizes = [8, 128], strides = [1, 1]} : vector<8x512xf32> to vector<8x128xf32>
    %187 = math.tanh %186 : vector<8x128xf32>
    %188 = vector.extract_strided_slice %173 {offsets = [0, 384], sizes = [8, 128], strides = [1, 1]} : vector<8x512xf32> to vector<8x128xf32>
    %189 = arith.negf %188 : vector<8x128xf32>
    %190 = math.exp %189 : vector<8x128xf32>
    %cst_48 = arith.constant 1.000000e+00 : f32
    %191 = vector.broadcast %cst_48 : f32 to vector<8x128xf32>
    %192 = arith.addf %191, %190 : vector<8x128xf32>
    %193 = arith.divf %191, %192 : vector<8x128xf32>
    %194 = arith.mulf %185, %165 : vector<8x128xf32>
    %195 = arith.mulf %179, %187 : vector<8x128xf32>
    %196 = arith.addf %194, %195 : vector<8x128xf32>
    %197 = math.tanh %196 : vector<8x128xf32>
    %198 = arith.mulf %193, %197 : vector<8x128xf32>
    %c6_i32 = arith.constant 6 : i32
    %199 = arith.index_cast %c6_i32 : i32 to index
    %c0_49 = arith.constant 0 : index
    %c0_50 = arith.constant 0 : index
    %200 = vector.load %arg10[%199, %c0_49, %c0_50] : memref<8x8x512xf32, #tpu.memory_space<vmem>>, vector<1x8x512xf32>
    %201 = vector.shape_cast %200 : vector<1x8x512xf32> to vector<8x512xf32>
    %202 = arith.truncf %198 : vector<8x128xf32> to vector<8x128xbf16>
    %cst_51 = arith.constant dense<0.000000e+00> : vector<8x512xf32>
    %203 = tpu.matmul %202, %10, %cst_51 {dimension_numbers = #tpu.dot_dimension_numbers<[1], [0], [0], [1], [0, 0, 1, 1], [], []>} : vector<8x128xbf16>, vector<128x512xbf16>, vector<8x512xf32> -> vector<8x512xf32>
    %204 = arith.addf %201, %203 : vector<8x512xf32>
    %205 = vector.extract_strided_slice %204 {offsets = [0, 0], sizes = [8, 128], strides = [1, 1]} : vector<8x512xf32> to vector<8x128xf32>
    %206 = arith.negf %205 : vector<8x128xf32>
    %207 = math.exp %206 : vector<8x128xf32>
    %cst_52 = arith.constant 1.000000e+00 : f32
    %208 = vector.broadcast %cst_52 : f32 to vector<8x128xf32>
    %209 = arith.addf %208, %207 : vector<8x128xf32>
    %210 = arith.divf %208, %209 : vector<8x128xf32>
    %211 = vector.extract_strided_slice %204 {offsets = [0, 128], sizes = [8, 128], strides = [1, 1]} : vector<8x512xf32> to vector<8x128xf32>
    %212 = arith.negf %211 : vector<8x128xf32>
    %213 = math.exp %212 : vector<8x128xf32>
    %cst_53 = arith.constant 1.000000e+00 : f32
    %214 = vector.broadcast %cst_53 : f32 to vector<8x128xf32>
    %215 = arith.addf %214, %213 : vector<8x128xf32>
    %216 = arith.divf %214, %215 : vector<8x128xf32>
    %217 = vector.extract_strided_slice %204 {offsets = [0, 256], sizes = [8, 128], strides = [1, 1]} : vector<8x512xf32> to vector<8x128xf32>
    %218 = math.tanh %217 : vector<8x128xf32>
    %219 = vector.extract_strided_slice %204 {offsets = [0, 384], sizes = [8, 128], strides = [1, 1]} : vector<8x512xf32> to vector<8x128xf32>
    %220 = arith.negf %219 : vector<8x128xf32>
    %221 = math.exp %220 : vector<8x128xf32>
    %cst_54 = arith.constant 1.000000e+00 : f32
    %222 = vector.broadcast %cst_54 : f32 to vector<8x128xf32>
    %223 = arith.addf %222, %221 : vector<8x128xf32>
    %224 = arith.divf %222, %223 : vector<8x128xf32>
    %225 = arith.mulf %216, %196 : vector<8x128xf32>
    %226 = arith.mulf %210, %218 : vector<8x128xf32>
    %227 = arith.addf %225, %226 : vector<8x128xf32>
    %228 = math.tanh %227 : vector<8x128xf32>
    %229 = arith.mulf %224, %228 : vector<8x128xf32>
    %c7_i32 = arith.constant 7 : i32
    %230 = arith.index_cast %c7_i32 : i32 to index
    %c0_55 = arith.constant 0 : index
    %c0_56 = arith.constant 0 : index
    %231 = vector.load %arg10[%230, %c0_55, %c0_56] : memref<8x8x512xf32, #tpu.memory_space<vmem>>, vector<1x8x512xf32>
    %232 = vector.shape_cast %231 : vector<1x8x512xf32> to vector<8x512xf32>
    %233 = arith.truncf %229 : vector<8x128xf32> to vector<8x128xbf16>
    %cst_57 = arith.constant dense<0.000000e+00> : vector<8x512xf32>
    %234 = tpu.matmul %233, %10, %cst_57 {dimension_numbers = #tpu.dot_dimension_numbers<[1], [0], [0], [1], [0, 0, 1, 1], [], []>} : vector<8x128xbf16>, vector<128x512xbf16>, vector<8x512xf32> -> vector<8x512xf32>
    %235 = arith.addf %232, %234 : vector<8x512xf32>
    %236 = vector.extract_strided_slice %235 {offsets = [0, 0], sizes = [8, 128], strides = [1, 1]} : vector<8x512xf32> to vector<8x128xf32>
    %237 = arith.negf %236 : vector<8x128xf32>
    %238 = math.exp %237 : vector<8x128xf32>
    %cst_58 = arith.constant 1.000000e+00 : f32
    %239 = vector.broadcast %cst_58 : f32 to vector<8x128xf32>
    %240 = arith.addf %239, %238 : vector<8x128xf32>
    %241 = arith.divf %239, %240 : vector<8x128xf32>
    %242 = vector.extract_strided_slice %235 {offsets = [0, 128], sizes = [8, 128], strides = [1, 1]} : vector<8x512xf32> to vector<8x128xf32>
    %243 = arith.negf %242 : vector<8x128xf32>
    %244 = math.exp %243 : vector<8x128xf32>
    %cst_59 = arith.constant 1.000000e+00 : f32
    %245 = vector.broadcast %cst_59 : f32 to vector<8x128xf32>
    %246 = arith.addf %245, %244 : vector<8x128xf32>
    %247 = arith.divf %245, %246 : vector<8x128xf32>
    %248 = vector.extract_strided_slice %235 {offsets = [0, 256], sizes = [8, 128], strides = [1, 1]} : vector<8x512xf32> to vector<8x128xf32>
    %249 = math.tanh %248 : vector<8x128xf32>
    %250 = vector.extract_strided_slice %235 {offsets = [0, 384], sizes = [8, 128], strides = [1, 1]} : vector<8x512xf32> to vector<8x128xf32>
    %251 = arith.negf %250 : vector<8x128xf32>
    %252 = math.exp %251 : vector<8x128xf32>
    %cst_60 = arith.constant 1.000000e+00 : f32
    %253 = vector.broadcast %cst_60 : f32 to vector<8x128xf32>
    %254 = arith.addf %253, %252 : vector<8x128xf32>
    %255 = arith.divf %253, %254 : vector<8x128xf32>
    %256 = arith.mulf %247, %227 : vector<8x128xf32>
    %257 = arith.mulf %241, %249 : vector<8x128xf32>
    %258 = arith.addf %256, %257 : vector<8x128xf32>
    %259 = math.tanh %258 : vector<8x128xf32>
    %260 = arith.mulf %255, %259 : vector<8x128xf32>
    %c8_i32 = arith.constant 8 : i32
    %c0_61 = arith.constant 0 : index
    %c7 = arith.constant 7 : index
    %c0_62 = arith.constant 0 : index
    %261 = vector.load %arg1[%c0_61, %c7, %c0_62] : memref<8x8x768xbf16, #tpu.memory_space<vmem>>, vector<8x1x768xbf16>
    %262 = vector.shape_cast %261 : vector<8x1x768xbf16> to vector<8x768xbf16>
    %c0_63 = arith.constant 0 : index
    %c0_64 = arith.constant 0 : index
    %263 = vector.load %arg5[%c0_63, %c0_64] : memref<768x512xbf16, #tpu.memory_space<vmem>>, vector<768x512xbf16>
    %cst_65 = arith.constant dense<0.000000e+00> : vector<8x512xf32>
    %264 = tpu.matmul %262, %263, %cst_65 {dimension_numbers = #tpu.dot_dimension_numbers<[1], [0], [0], [1], [0, 0, 1, 1], [], []>} : vector<8x768xbf16>, vector<768x512xbf16>, vector<8x512xf32> -> vector<8x512xf32>
    %c0_66 = arith.constant 0 : index
    %c0_67 = arith.constant 0 : index
    %265 = vector.load %arg6[%c0_66, %c0_67] : memref<1x512xf32, #tpu.memory_space<vmem>>, vector<1x512xf32>
    %266 = vector.broadcast %265 : vector<1x512xf32> to vector<8x512xf32>
    %267 = arith.addf %264, %266 : vector<8x512xf32>
    %268 = vector.extract_strided_slice %267 {offsets = [0, 0], sizes = [8, 128], strides = [1, 1]} : vector<8x512xf32> to vector<8x128xf32>
    %269 = arith.negf %268 : vector<8x128xf32>
    %270 = math.exp %269 : vector<8x128xf32>
    %cst_68 = arith.constant 1.000000e+00 : f32
    %271 = vector.broadcast %cst_68 : f32 to vector<8x128xf32>
    %272 = arith.addf %271, %270 : vector<8x128xf32>
    %273 = arith.divf %271, %272 : vector<8x128xf32>
    %274 = vector.extract_strided_slice %267 {offsets = [0, 128], sizes = [8, 128], strides = [1, 1]} : vector<8x512xf32> to vector<8x128xf32>
    %275 = arith.negf %274 : vector<8x128xf32>
    %276 = math.exp %275 : vector<8x128xf32>
    %cst_69 = arith.constant 1.000000e+00 : f32
    %277 = vector.broadcast %cst_69 : f32 to vector<8x128xf32>
    %278 = arith.addf %277, %276 : vector<8x128xf32>
    %279 = arith.divf %277, %278 : vector<8x128xf32>
    %280 = vector.extract_strided_slice %267 {offsets = [0, 256], sizes = [8, 128], strides = [1, 1]} : vector<8x512xf32> to vector<8x128xf32>
    %281 = math.tanh %280 : vector<8x128xf32>
    %282 = vector.extract_strided_slice %267 {offsets = [0, 384], sizes = [8, 128], strides = [1, 1]} : vector<8x512xf32> to vector<8x128xf32>
    %283 = arith.negf %282 : vector<8x128xf32>
    %284 = math.exp %283 : vector<8x128xf32>
    %cst_70 = arith.constant 1.000000e+00 : f32
    %285 = vector.broadcast %cst_70 : f32 to vector<8x128xf32>
    %286 = arith.addf %285, %284 : vector<8x128xf32>
    %287 = arith.divf %285, %286 : vector<8x128xf32>
    %288 = arith.mulf %279, %12 : vector<8x128xf32>
    %289 = arith.mulf %273, %281 : vector<8x128xf32>
    %290 = arith.addf %288, %289 : vector<8x128xf32>
    %291 = math.tanh %290 : vector<8x128xf32>
    %292 = arith.mulf %287, %291 : vector<8x128xf32>
    %293 = tpu.concatenate %260, %292 in 1 : vector<8x128xf32>, vector<8x128xf32> -> vector<8x256xf32>
    %294 = arith.truncf %293 : vector<8x256xf32> to vector<8x256xbf16>
    %c0_71 = arith.constant 0 : index
    %c0_72 = arith.constant 0 : index
    %295 = vector.load %arg7[%c0_71, %c0_72] : memref<256x128xbf16, #tpu.memory_space<vmem>>, vector<256x128xbf16>
    %cst_73 = arith.constant dense<0.000000e+00> : vector<8x128xf32>
    %296 = tpu.matmul %294, %295, %cst_73 {dimension_numbers = #tpu.dot_dimension_numbers<[1], [0], [0], [1], [0, 0, 1, 1], [], []>} : vector<8x256xbf16>, vector<256x128xbf16>, vector<8x128xf32> -> vector<8x128xf32>
    %c0_74 = arith.constant 0 : index
    %c0_75 = arith.constant 0 : index
    %297 = vector.load %arg8[%c0_74, %c0_75] : memref<1x128xf32, #tpu.memory_space<vmem>>, vector<1x128xf32>
    %298 = vector.broadcast %297 : vector<1x128xf32> to vector<8x128xf32>
    %299 = arith.addf %296, %298 : vector<8x128xf32>
    %c0_76 = arith.constant 0 : index
    %c0_77 = arith.constant 0 : index
    %300 = vector.load %arg9[%c0_76, %c0_77] : memref<8x128xf32, #tpu.memory_space<vmem>>, vector<8x128xf32>
    tpu.vector_store %arg9[%c0_76, %c0_77], %299 {strides = array<i32>} : memref<8x128xf32, #tpu.memory_space<vmem>>, vector<8x128xf32>,
    return
  }
  func.func @transform_0(%arg0: i32) -> (i32, i32, i32) {
    %c0_i32 = arith.constant 0 : i32
    %c0_i32_0 = arith.constant 0 : i32
    %c0_i32_1 = arith.constant 0 : i32
    return %arg0, %c0_i32, %c0_i32_0 : i32, i32, i32
  }
  func.func @transform_1(%arg0: i32) -> (i32, i32) {
    %c0_i32 = arith.constant 0 : i32
    %c0_i32_0 = arith.constant 0 : i32
    %c0_i32_1 = arith.constant 0 : i32
    return %c0_i32, %c0_i32_0 : i32, i32
  }
  func.func @transform_2(%arg0: i32) -> (i32, i32) {
    %c0_i32 = arith.constant 0 : i32
    %c0_i32_0 = arith.constant 0 : i32
    %c0_i32_1 = arith.constant 0 : i32
    return %c0_i32, %c0_i32_0 : i32, i32
  }
  func.func @transform_3(%arg0: i32) -> (i32, i32) {
    %c0_i32 = arith.constant 0 : i32
    %c0_i32_0 = arith.constant 0 : i32
    %c0_i32_1 = arith.constant 0 : i32
    return %c0_i32, %c0_i32_0 : i32, i32
  }
  func.func @transform_4(%arg0: i32) -> (i32, i32) {
    %c0_i32 = arith.constant 0 : i32
    %c0_i32_0 = arith.constant 0 : i32
    %c0_i32_1 = arith.constant 0 : i32
    return %c0_i32, %c0_i32_0 : i32, i32
  }
  func.func @transform_5(%arg0: i32) -> (i32, i32) {
    %c0_i32 = arith.constant 0 : i32
    %c0_i32_0 = arith.constant 0 : i32
    %c0_i32_1 = arith.constant 0 : i32
    return %c0_i32, %c0_i32_0 : i32, i32
  }
  func.func @transform_6(%arg0: i32) -> (i32, i32) {
    %c0_i32 = arith.constant 0 : i32
    %c0_i32_0 = arith.constant 0 : i32
    %c0_i32_1 = arith.constant 0 : i32
    return %c0_i32, %c0_i32_0 : i32, i32
  }
  func.func @transform_7(%arg0: i32) -> (i32, i32) {
    %c0_i32 = arith.constant 0 : i32
    %c0_i32_0 = arith.constant 0 : i32
    %c0_i32_1 = arith.constant 0 : i32
    return %c0_i32, %c0_i32_0 : i32, i32
  }
  func.func @transform_8(%arg0: i32) -> (i32, i32) {
    %c0_i32 = arith.constant 0 : i32
    %c0_i32_0 = arith.constant 0 : i32
    return %arg0, %c0_i32 : i32, i32
  }
}

</mosaic_0001>

<bundles_post_ra>
// kernel: tpu_custom_call.1
= control target key start
LH: loop header
LB: loop body
LE: loop exit
PB: predicated region body
PF: predicated region fallthrough
CT: control target
= control target key end

     0   :  { %13 = vsyncpa [#allocation4], 0  ;;  %s8429_s0 = inlined_call_operand.hbm [shape: bf16[8,8,768], index: 0, kind: input, shape index: {}]   ;;  %s8430_s1 = inlined_call_operand.hbm [shape: bf16[768,512], index: 1, kind: input, shape index: {}]   ;;  %s8431_s2 = inlined_call_operand.hbm [shape: bf16[128,512], index: 2, kind: input, shape index: {}]   ;;  %s8432_s3 = inlined_call_operand.vmem [shape: f32[1,512], index: 3, kind: input, shape index: {}]   ;;  %s8433_s4 = inlined_call_operand.hbm [shape: bf16[768,512], index: 4, kind: input, shape index: {}]   ;;  %s8434_s5 = inlined_call_operand.vmem [shape: f32[1,512], index: 5, kind: input, shape index: {}]   ;;  %s8435_s6 = inlined_call_operand.hbm [shape: bf16[256,128], index: 6, kind: input, shape index: {}]   ;;  %s8436_s7 = inlined_call_operand.vmem [shape: f32[1,128], index: 7, kind: input, shape index: {}]   ;;  %s8437_s8 = inlined_call_operand.hbm [shape: f32[8,128], index: 8, kind: output, shape index: {}]  }
   0x1   :  { %14 = vsyncpa [#allocation7], 0 }
   0x2   :  { %15 = vsyncpa [#allocation10], 0 }
   0x3   :  { %16 = vsyncpa [#allocation5], 0  ;;  %s7208_s27 = smov [#allocation6]   ;;  %s7068_s9 = scalar_lea.hbm %s8430_s1, 24576 }
   0x4   :  { %s34_s28 = sshll.u32 %s7208_s27, 4  ;;  %p7069_p0 = scmp.ne.s32.totalorder %s8430_s1, %s7068_s9  ;;  %s35_s28 = int_to_ptr.vmem [resolvable:$true] %s34_s28 }
   0x5   :  { %p7072_p1 = scmp.lt.u32.totalorder %s7068_s9, %s8430_s1 }
   0x7   :  { %p7074_p2 = pnand %p7072_p1, %p7069_p0 }
   0x9   :  { %7077 = shalt.err (!%p7074_p2)
}
   0xa   :  { %s7078_s14 = scalar_lea.vmem %s35_s28, 24576  ;;  %p7083_p4 = scmp.lt.s32.totalorder %s35_s28, %s35_s28 }
   0xb   :  { %p7079_p3 = scmp.ne.s32.totalorder %s35_s28, %s7078_s14  ;;  %p7084_p5 = scmp.lt.s32.totalorder %s7078_s14, %s7078_s14 }
   0xd   :  { %p7085_p6 = por %p7084_p5, %p7083_p4 }
   0xf   :  { %p7086_p7 = pnand %p7085_p6, %p7079_p3 }
  0x11   :  { %7089 = shalt.err (!%p7086_p7)
}
  0x12   :  { %s7209_s15 = smov 256   ;;  %s7210_s16 = smov 16  }
  0x13   :  { %40 = dma.hbm_to_vmem [thread:$0]  %s8430_s1, 24576, %s35_s28, [#allocation7], %s7209_s15, %s7209_s15, %s7210_s16  }
  0x14   :  { %s7211_s19 = smov [#allocation9]   ;;  %s7212_s21 = smov [#allocation3]  }
  0x15   :  { %s60_s20 = sshll.u32 %s7211_s19, 4  ;;  %s22_s22 = sshll.u32 %s7212_s21, 4  ;;  %s61_s20 = int_to_ptr.vmem [resolvable:$true] %s60_s20  ;;  %s23_s22 = int_to_ptr.vmem [resolvable:$true] %s22_s22 }
  0x16   :  { %s7090_s25 = scalar_lea.hbm %s8433_s4, 24576 }
  0x17   :  { %p7091_p8 = scmp.ne.s32.totalorder %s8433_s4, %s7090_s25  ;;  %p7094_p9 = scmp.lt.u32.totalorder %s7090_s25, %s8433_s4 }
  0x19   :  { %p7096_p10 = pnand %p7094_p9, %p7091_p8 }
  0x1b   :  { %7099 = shalt.err (!%p7096_p10)
}
  0x1c   :  { %s7100_s1 = scalar_lea.vmem %s61_s20, 24576  ;;  %p7105_p12 = scmp.lt.s32.totalorder %s61_s20, %s61_s20 }
  0x1d   :  { %p7101_p11 = scmp.ne.s32.totalorder %s61_s20, %s7100_s1  ;;  %p7106_p13 = scmp.lt.s32.totalorder %s7100_s1, %s7100_s1 }
  0x1f   :  { %p7107_p0 = por %p7106_p13, %p7105_p12 }
  0x21   :  { %p7108_p1 = pnand %p7107_p0, %p7101_p11 }
  0x23   :  { %7111 = shalt.err (!%p7108_p1)
}
  0x24   :  { %66 = dma.hbm_to_vmem [thread:$0]  %s8433_s4, 24576, %s61_s20, [#allocation10], %s7209_s15, %s7209_s15, %s7210_s16  }
  0x25   :  { %s7112_s12 = scalar_lea.hbm %s8429_s0, 3072 }
  0x26   :  { %p7113_p2 = scmp.ne.s32.totalorder %s8429_s0, %s7112_s12  ;;  %p7116_p3 = scmp.lt.u32.totalorder %s7112_s12, %s8429_s0 }
  0x28   :  { %p7118_p4 = pnand %p7116_p3, %p7113_p2 }
  0x2a   :  { %7121 = shalt.err (!%p7118_p4)
}
  0x2b   :  { %s7122_s19 = scalar_lea.vmem %s23_s22, 3072  ;;  %p7127_p6 = scmp.lt.s32.totalorder %s23_s22, %s23_s22 }
  0x2c   :  { %p7123_p5 = scmp.ne.s32.totalorder %s23_s22, %s7122_s19  ;;  %p7128_p7 = scmp.lt.s32.totalorder %s7122_s19, %s7122_s19 }
  0x2e   :  { %p7129_p8 = por %p7128_p7, %p7127_p6 }
  0x30   :  { %p7130_p9 = pnand %p7129_p8, %p7123_p5 }
  0x32   :  { %7133 = shalt.err (!%p7130_p9)
}
  0x33   :  { %s7213_s4 = smov 384   ;;  %s7214_s20 = smov 24  }
  0x34   :  { %28 = dma.hbm_to_vmem [thread:$0]  %s8429_s0, 3072, %s23_s22, [#allocation4], %s7213_s4, %s7213_s4, %s7214_s20  }
  0x35   :  { %s7215_s24 = smov [#allocation8]   ;;  %s7216_s26 = smov [#allocation11]  }
  0x36   :  { %s46_s25 = sshll.u32 %s7215_s24, 4  ;;  %s74_s27 = sshll.u32 %s7216_s26, 4  ;;  %s47_s25 = int_to_ptr.vmem [resolvable:$true] %s46_s25  ;;  %s75_s27 = int_to_ptr.vmem [resolvable:$true] %s74_s27 }
  0x37   :  { %s7134_s1 = scalar_lea.hbm %s8431_s2, 4096 }
  0x38   :  { %p7135_p10 = scmp.ne.s32.totalorder %s8431_s2, %s7134_s1  ;;  %p7138_p11 = scmp.lt.u32.totalorder %s7134_s1, %s8431_s2 }
  0x3a   :  { %p7140_p12 = pnand %p7138_p11, %p7135_p10 }
  0x3c   :  { %7143 = shalt.err (!%p7140_p12)
}
  0x3d   :  { %s7144_s0 = scalar_lea.vmem %s47_s25, 4096  ;;  %p7149_p0 = scmp.lt.s32.totalorder %s47_s25, %s47_s25 }
  0x3e   :  { %p7145_p13 = scmp.ne.s32.totalorder %s47_s25, %s7144_s0  ;;  %p7150_p1 = scmp.lt.s32.totalorder %s7144_s0, %s7144_s0 }
  0x40   :  { %p7151_p2 = por %p7150_p1, %p7149_p0 }
  0x42   :  { %p7152_p3 = pnand %p7151_p2, %p7145_p13 }
  0x44   :  { %7155 = shalt.err (!%p7152_p3)
}
  0x45   :  { %52 = dma.hbm_to_vmem [thread:$0]  %s8431_s2, 4096, %s47_s25, [#allocation7], %s7209_s15, %s7209_s15, %s7210_s16  }
  0x46   :  { %s7156_s17 = scalar_lea.hbm %s8435_s6, 2048 }
  0x47   :  { %p7157_p4 = scmp.ne.s32.totalorder %s8435_s6, %s7156_s17  ;;  %p7160_p5 = scmp.lt.u32.totalorder %s7156_s17, %s8435_s6 }
  0x49   :  { %p7162_p6 = pnand %p7160_p5, %p7157_p4 }
  0x4b   :  { %7165 = shalt.err (!%p7162_p6)
}
  0x4c   :  { %s7166_s21 = scalar_lea.vmem %s75_s27, 2048  ;;  %p7171_p8 = scmp.lt.s32.totalorder %s75_s27, %s75_s27 }
  0x4d   :  { %p7167_p7 = scmp.ne.s32.totalorder %s75_s27, %s7166_s21  ;;  %p7172_p9 = scmp.lt.s32.totalorder %s7166_s21, %s7166_s21 }
  0x4f   :  { %p7173_p10 = por %p7172_p9, %p7171_p8 }
  0x51   :  { %p7174_p11 = pnand %p7173_p10, %p7167_p7 }
  0x53   :  { %7177 = shalt.err (!%p7174_p11)
}
  0x54   :  { %s7217_s2 = smov 64   ;;  %s7218_s15 = smov 4  }
  0x55   :  { %80 = dma.hbm_to_vmem [thread:$0]  %s8435_s6, 2048, %s75_s27, [#allocation10], %s7217_s2, %s7217_s2, %s7218_s15  }
  0x56   :  { %7200 = dma.done.wait [#allocation4], 3072  }
  0x57   :  { %7201 = vsyncadd [#allocation4], 4294964224 }
  0x58   :  { %7202 = dma.done.wait [#allocation7], 28672  }
  0x59   :  { %7203 = vsyncadd [#allocation7], 4294938624 }
  0x5a   :  { %7204 = dma.done.wait [#allocation10], 26624  }
  0x5b   :  { %7205 = vsyncadd [#allocation10], 4294940672  ;;  %v6168_v0 = vld [vmem:[#allocation6 + $0x4] ss:$16 sps:$4 sm:$0xff]   ;;  %v6170_v1 = vld [vmem:[#allocation6 + $0xc] ss:$16 sps:$4 sm:$0xff]  }
  0x5c   :  { %1417 = vmatprep.subr.bf16.mxu0 %v6168_v0  ;;  %v6172_v2 = vld [vmem:[#allocation6] ss:$16 sps:$4 sm:$0xff]   ;;  %v6173_v3 = vld [vmem:[#allocation6 + $0x8] ss:$16 sps:$4 sm:$0xff]   ;;  %1636 = vmatprep.subr.bf16.mxu1 %v6170_v1  ;;  %v6174_v4 = vld [vmem:[#allocation6 + $0x24] ss:$16 sps:$4 sm:$0xff]  }
  0x5d   :  { %1418 = vmatpush1.bf16.msra.mxu0 %v6172_v2  ;;  %1637 = vmatpush1.bf16.msra.mxu1 %v6173_v3  ;;  %v6176_v5 = vld [vmem:[#allocation6 + $0x2c] ss:$16 sps:$4 sm:$0xff]   ;;  %v6178_v6 = vld [vmem:[#allocation6 + $0x20] ss:$16 sps:$4 sm:$0xff]   ;;  %v6179_v7 = vld [vmem:[#allocation6 + $0x28] ss:$16 sps:$4 sm:$0xff]  }
  0x5e   :  { %1419 = vmatprep.subr.bf16.mxu0 %v6174_v4  ;;  %1638 = vmatprep.subr.bf16.mxu1 %v6176_v5  ;;  %v6180_v8 = vld [vmem:[#allocation6 + $0x44] ss:$16 sps:$4 sm:$0xff]   ;;  %v6182_v9 = vld [vmem:[#allocation6 + $0x4c] ss:$16 sps:$4 sm:$0xff]   ;;  %v6184_v10 = vld [vmem:[#allocation6 + $0x40] ss:$16 sps:$4 sm:$0xff]  }
  0x5f   :  { %v6185_v11 = vld [vmem:[#allocation6 + $0x48] ss:$16 sps:$4 sm:$0xff]   ;;  %v6186_v12 = vld [vmem:[#allocation6 + $0x64] ss:$16 sps:$4 sm:$0xff]   ;;  %v6188_v13 = vld [vmem:[#allocation6 + $0x6c] ss:$16 sps:$4 sm:$0xff]  }
  0x60   :  { %v6190_v14 = vld [vmem:[#allocation6 + $0x60] ss:$16 sps:$4 sm:$0xff]   ;;  %v6191_v15 = vld [vmem:[#allocation6 + $0x68] ss:$16 sps:$4 sm:$0xff]   ;;  %v6192_v16 = vld [vmem:[#allocation6 + $0x84] ss:$16 sps:$4 sm:$0xff]  }
  0x61   :  { %1420 = vmatpush1.bf16.msra.mxu0 %v6178_v6  ;;  %1639 = vmatpush1.bf16.msra.mxu1 %v6179_v7  ;;  %v6194_v17 = vld [vmem:[#allocation6 + $0x8c] ss:$16 sps:$4 sm:$0xff]   ;;  %v6196_v18 = vld [vmem:[#allocation6 + $0x80] ss:$16 sps:$4 sm:$0xff]   ;;  %v6197_v19 = vld [vmem:[#allocation6 + $0x88] ss:$16 sps:$4 sm:$0xff]  }
  0x62   :  { %1421 = vmatprep.subr.bf16.mxu0 %v6180_v8  ;;  %1640 = vmatprep.subr.bf16.mxu1 %v6182_v9  ;;  %v6198_v20 = vld [vmem:[#allocation6 + $0xa4] ss:$16 sps:$4 sm:$0xff]   ;;  %v6200_v21 = vld [vmem:[#allocation6 + $0xac] ss:$16 sps:$4 sm:$0xff]   ;;  %v6202_v22 = vld [vmem:[#allocation6 + $0xa0] ss:$16 sps:$4 sm:$0xff]  }
  0x63   :  { %v6203_v23 = vld [vmem:[#allocation6 + $0xa8] ss:$16 sps:$4 sm:$0xff]   ;;  %v6204_v24 = vld [vmem:[#allocation6 + $0xc4] ss:$16 sps:$4 sm:$0xff]   ;;  %v6206_v25 = vld [vmem:[#allocation6 + $0xcc] ss:$16 sps:$4 sm:$0xff]  }
  0x64   :  { %v6208_v26 = vld [vmem:[#allocation6 + $0xc0] ss:$16 sps:$4 sm:$0xff]   ;;  %v6209_v27 = vld [vmem:[#allocation6 + $0xc8] ss:$16 sps:$4 sm:$0xff]   ;;  %v6210_v28 = vld [vmem:[#allocation6 + $0xe4] ss:$16 sps:$4 sm:$0xff]  }
  0x65   :  { %1422 = vmatpush1.bf16.msra.mxu0 %v6184_v10  ;;  %1641 = vmatpush1.bf16.msra.mxu1 %v6185_v11  ;;  %v6212_v29 = vld [vmem:[#allocation6 + $0xec] ss:$16 sps:$4 sm:$0xff]   ;;  %v6214_v30 = vld [vmem:[#allocation6 + $0xe0] ss:$16 sps:$4 sm:$0xff]   ;;  %v6215_v31 = vld [vmem:[#allocation6 + $0xe8] ss:$16 sps:$4 sm:$0xff]  }
  0x66   :  { %1423 = vmatprep.subr.bf16.mxu0 %v6186_v12  ;;  %1642 = vmatprep.subr.bf16.mxu1 %v6188_v13  ;;  %v6216_v32 = vld [vmem:[#allocation6 + $0x104] ss:$16 sps:$4 sm:$0xff]   ;;  %v6218_v33 = vld [vmem:[#allocation6 + $0x10c] ss:$16 sps:$4 sm:$0xff]   ;;  %v6220_v34 = vld [vmem:[#allocation6 + $0x100] ss:$16 sps:$4 sm:$0xff]  }
  0x67   :  { %v6221_v35 = vld [vmem:[#allocation6 + $0x108] ss:$16 sps:$4 sm:$0xff]   ;;  %v6222_v36 = vld [vmem:[#allocation6 + $0x124] ss:$16 sps:$4 sm:$0xff]   ;;  %v6224_v37 = vld [vmem:[#allocation6 + $0x12c] ss:$16 sps:$4 sm:$0xff]  }
  0x68   :  { %v6226_v38 = vld [vmem:[#allocation6 + $0x120] ss:$16 sps:$4 sm:$0xff]   ;;  %v6227_v39 = vld [vmem:[#allocation6 + $0x128] ss:$16 sps:$4 sm:$0xff]   ;;  %v6228_v40 = vld [vmem:[#allocation6 + $0x144] ss:$16 sps:$4 sm:$0xff]  }
  0x69   :  { %1424 = vmatpush1.bf16.msra.mxu0 %v6190_v14  ;;  %1643 = vmatpush1.bf16.msra.mxu1 %v6191_v15  ;;  %v6230_v41 = vld [vmem:[#allocation6 + $0x14c] ss:$16 sps:$4 sm:$0xff]   ;;  %v6232_v42 = vld [vmem:[#allocation6 + $0x140] ss:$16 sps:$4 sm:$0xff]   ;;  %v6233_v43 = vld [vmem:[#allocation6 + $0x148] ss:$16 sps:$4 sm:$0xff]  }
  0x6a   :  { %1425 = vmatprep.subr.bf16.mxu0 %v6192_v16  ;;  %1644 = vmatprep.subr.bf16.mxu1 %v6194_v17  ;;  %v6234_v44 = vld [vmem:[#allocation6 + $0x164] ss:$16 sps:$4 sm:$0xff]   ;;  %v6236_v45 = vld [vmem:[#allocation6 + $0x16c] ss:$16 sps:$4 sm:$0xff]   ;;  %v6238_v46 = vld [vmem:[#allocation6 + $0x160] ss:$16 sps:$4 sm:$0xff]  }
  0x6b   :  { %v6239_v47 = vld [vmem:[#allocation6 + $0x168] ss:$16 sps:$4 sm:$0xff]   ;;  %v6266_v48 = vld [vmem:[#allocation3 + $0x4] ss:$24 sps:$4 sm:$0xff]   ;;  %v6244_v51 = vld [vmem:[#allocation6 + $0x180] ss:$16 sps:$4 sm:$0xff]  }
  0x6c   :  { %v6240_v49 = vld [vmem:[#allocation6 + $0x184] ss:$16 sps:$4 sm:$0xff]   ;;  %v6242_v50 = vld [vmem:[#allocation6 + $0x18c] ss:$16 sps:$4 sm:$0xff]   ;;  %1449 = vmatprep.mubr.bf16.mxu0 %v6266_v48  ;;  %1668 = vmatprep.mubr.bf16.mxu1 %v6266_v48  ;;  %v6245_v52 = vld [vmem:[#allocation6 + $0x188] ss:$16 sps:$4 sm:$0xff]  }
  0x6d   :  { %1426 = vmatpush1.bf16.msra.mxu0 %v6196_v18  ;;  %1645 = vmatpush1.bf16.msra.mxu1 %v6197_v19  ;;  %v6246_v53 = vld [vmem:[#allocation6 + $0x1a4] ss:$16 sps:$4 sm:$0xff]   ;;  %v6248_v54 = vld [vmem:[#allocation6 + $0x1ac] ss:$16 sps:$4 sm:$0xff]   ;;  %v6250_v55 = vld [vmem:[#allocation6 + $0x1a0] ss:$16 sps:$4 sm:$0xff]  }
  0x6e   :  { %1427 = vmatprep.subr.bf16.mxu0 %v6198_v20  ;;  %1646 = vmatprep.subr.bf16.mxu1 %v6200_v21  ;;  %v6251_v56 = vld [vmem:[#allocation6 + $0x1a8] ss:$16 sps:$4 sm:$0xff]   ;;  %v6252_v57 = vld [vmem:[#allocation6 + $0x1c4] ss:$16 sps:$4 sm:$0xff]   ;;  %v6254_v58 = vld [vmem:[#allocation6 + $0x1cc] ss:$16 sps:$4 sm:$0xff]  }
  0x6f   :  { %v6256_v59 = vld [vmem:[#allocation6 + $0x1c0] ss:$16 sps:$4 sm:$0xff]   ;;  %v6257_v60 = vld [vmem:[#allocation6 + $0x1c8] ss:$16 sps:$4 sm:$0xff]   ;;  %v6258_v61 = vld [vmem:[#allocation6 + $0x1e4] ss:$16 sps:$4 sm:$0xff]  }
  0x70   :  { %v6260_v62 = vld [vmem:[#allocation6 + $0x1ec] ss:$16 sps:$4 sm:$0xff]   ;;  %v6262_v63 = vld [vmem:[#allocation6 + $0x1e0] ss:$16 sps:$4 sm:$0xff]   ;;  %v6263_v0 = vld [vmem:[#allocation6 + $0x1e8] ss:$16 sps:$4 sm:$0xff]  }
  0x71   :  { %1428 = vmatpush1.bf16.msra.mxu0 %v6202_v22  ;;  %1647 = vmatpush1.bf16.msra.mxu1 %v6203_v23  ;;  %v6269_v1 = vld [vmem:[#allocation6 + $0x204] ss:$16 sps:$4 sm:$0xff]   ;;  %v6272_v2 = vld [vmem:[#allocation6 + $0x20c] ss:$16 sps:$4 sm:$0xff]   ;;  %v6264_v3 = vld [vmem:[#allocation3] ss:$24 sps:$4 sm:$0xff]  }
  0x72   :  { %1429 = vmatprep.subr.bf16.mxu0 %v6204_v24  ;;  %1648 = vmatprep.subr.bf16.mxu1 %v6206_v25  ;;  %v6267_v4 = vld [vmem:[#allocation6 + $0x200] ss:$16 sps:$4 sm:$0xff]   ;;  %v6270_v5 = vld [vmem:[#allocation6 + $0x208] ss:$16 sps:$4 sm:$0xff]   ;;  %v6275_v6 = vld [vmem:[#allocation6 + $0x224] ss:$16 sps:$4 sm:$0xff]  }
  0x73   :  { %v6278_v7 = vld [vmem:[#allocation6 + $0x22c] ss:$16 sps:$4 sm:$0xff]   ;;  %v6273_v8 = vld [vmem:[#allocation6 + $0x220] ss:$16 sps:$4 sm:$0xff]   ;;  %v6276_v9 = vld [vmem:[#allocation6 + $0x228] ss:$16 sps:$4 sm:$0xff]  }
  0x74   :  { %v6281_v10 = vld [vmem:[#allocation6 + $0x244] ss:$16 sps:$4 sm:$0xff]   ;;  %v6284_v11 = vld [vmem:[#allocation6 + $0x24c] ss:$16 sps:$4 sm:$0xff]   ;;  %v6279_v12 = vld [vmem:[#allocation6 + $0x240] ss:$16 sps:$4 sm:$0xff]  }
  0x75   :  { %1430 = vmatpush1.bf16.msra.mxu0 %v6208_v26  ;;  %1649 = vmatpush1.bf16.msra.mxu1 %v6209_v27  ;;  %v6327_v13 = vld [vmem:[#allocation3 + $0x34] ss:$24 sps:$4 sm:$0xff]   ;;  %v6282_v14 = vld [vmem:[#allocation6 + $0x248] ss:$16 sps:$4 sm:$0xff]   ;;  %v6285_v18 = vld [vmem:[#allocation6 + $0x260] ss:$16 sps:$4 sm:$0xff]  }
  0x76   :  { %1431 = vmatprep.subr.bf16.mxu0 %v6210_v28  ;;  %1650 = vmatprep.subr.bf16.mxu1 %v6212_v29  ;;  %v6287_v15 = vld [vmem:[#allocation6 + $0x264] ss:$16 sps:$4 sm:$0xff]   ;;  %v6290_v16 = vld [vmem:[#allocation6 + $0x26c] ss:$16 sps:$4 sm:$0xff]   ;;  %v6335_v17 = vld [vmem:[#allocation3 + $0x30] ss:$24 sps:$4 sm:$0xff]  }
  0x77   :  { %v6288_v19 = vld [vmem:[#allocation6 + $0x268] ss:$16 sps:$4 sm:$0xff]   ;;  %v6293_v20 = vld [vmem:[#allocation6 + $0x284] ss:$16 sps:$4 sm:$0xff]   ;;  %v6296_v21 = vld [vmem:[#allocation6 + $0x28c] ss:$16 sps:$4 sm:$0xff]  }
  0x78   :  { %v6342_v22 = vld [vmem:[#allocation3 + $0x64] ss:$24 sps:$4 sm:$0xff]   ;;  %v6291_v23 = vld [vmem:[#allocation6 + $0x280] ss:$16 sps:$4 sm:$0xff]   ;;  %v6294_v24 = vld [vmem:[#allocation6 + $0x288] ss:$16 sps:$4 sm:$0xff]  }
  0x79   :  { %1432 = vmatpush1.bf16.msra.mxu0 %v6214_v30  ;;  %1651 = vmatpush1.bf16.msra.mxu1 %v6215_v31  ;;  %v6299_v25 = vld [vmem:[#allocation6 + $0x2a4] ss:$16 sps:$4 sm:$0xff]   ;;  %v6302_v26 = vld [vmem:[#allocation6 + $0x2ac] ss:$16 sps:$4 sm:$0xff]   ;;  %v6297_v27 = vld [vmem:[#allocation6 + $0x2a0] ss:$16 sps:$4 sm:$0xff]  }
  0x7a   :  { %1433 = vmatprep.subr.bf16.mxu0 %v6216_v32  ;;  %1652 = vmatprep.subr.bf16.mxu1 %v6218_v33  ;;  %v6350_v28 = vld [vmem:[#allocation3 + $0x60] ss:$24 sps:$4 sm:$0xff]   ;;  %v6305_v30 = vld [vmem:[#allocation6 + $0x2c4] ss:$16 sps:$4 sm:$0xff]   ;;  %v6308_v32 = vld [vmem:[#allocation6 + $0x2cc] ss:$16 sps:$4 sm:$0xff]  }
  0x7b   :  { %v6300_v29 = vld [vmem:[#allocation6 + $0x2a8] ss:$16 sps:$4 sm:$0xff]   ;;  %v6357_v31 = vld [vmem:[#allocation3 + $0x94] ss:$24 sps:$4 sm:$0xff]   ;;  %v6303_v33 = vld [vmem:[#allocation6 + $0x2c0] ss:$16 sps:$4 sm:$0xff]  }
  0x7c   :  { %v6324_v48 = vld [vmem:[#allocation6 + $0x328] ss:$16 sps:$4 sm:$0xff]   ;;  %vm3957_vm0 = vcmask 1041409   ;;  %vm3960_vm1 = vcmask 1042434   ;;  %vm3963_vm2 = vcmask 1043459   ;;  %vm3966_vm3 = vcmask 1044484  }
  0x7d   :  { %1434 = vmatpush1.bf16.msra.mxu0 %v6220_v34  ;;  %1653 = vmatpush1.bf16.msra.mxu1 %v6221_v35  ;;  %v6306_v34 = vld [vmem:[#allocation6 + $0x2c8] ss:$16 sps:$4 sm:$0xff]   ;;  %v6311_v35 = vld [vmem:[#allocation6 + $0x2e4] ss:$16 sps:$4 sm:$0xff]   ;;  %vm3969_vm4 = vcmask 1045509   ;;  %vm3972_vm5 = vcmask 1046534  }
  0x7e   :  { %1435 = vmatprep.subr.bf16.mxu0 %v6222_v36  ;;  %1654 = vmatprep.subr.bf16.mxu1 %v6224_v37  ;;  %v6314_v36 = vld [vmem:[#allocation6 + $0x2ec] ss:$16 sps:$4 sm:$0xff]   ;;  %v6309_v37 = vld [vmem:[#allocation6 + $0x2e0] ss:$16 sps:$4 sm:$0xff]   ;;  %vm3974_vm6 = vcmask 1047559   ;;  %s7222_s27 = smov [#allocation12]  }
  0x7f   :  { %s5472_s29 = sshll.u32 %s7222_s27, 4  ;;  %s5473_s29 = int_to_ptr.vmem [resolvable:$true] %s5472_s29 }
  0x80   :  { %s7178_s30 = scalar_lea.vmem %s5473_s29, 128  ;;  %p7183_p13 = scmp.lt.s32.totalorder %s5473_s29, %s5473_s29 }
  0x81   :  { %1436 = vmatpush1.bf16.msra.mxu0 %v6226_v38  ;;  %1655 = vmatpush1.bf16.msra.mxu1 %v6227_v39  ;;  %v6365_v38 = vld [vmem:[#allocation3 + $0x90] ss:$24 sps:$4 sm:$0xff]   ;;  %p7179_p12 = scmp.ne.s32.totalorder %s5473_s29, %s7178_s30  ;;  %p7184_p0 = scmp.lt.s32.totalorder %s7178_s30, %s7178_s30 }
  0x82   :  { %1437 = vmatprep.subr.bf16.mxu0 %v6228_v40  ;;  %1656 = vmatprep.subr.bf16.mxu1 %v6230_v41  ;;  %v6312_v39 = vld [vmem:[#allocation6 + $0x2e8] ss:$16 sps:$4 sm:$0xff]   ;;  %v6374_v40 = vld [vmem:[#allocation3 + $0xc] ss:$24 sps:$4 sm:$0xff]  }
  0x83   :  { %v6317_v41 = vld [vmem:[#allocation6 + $0x304] ss:$16 sps:$4 sm:$0xff]   ;;  %p7185_p1 = por %p7184_p0, %p7183_p13 }
  0x85   :  { %1438 = vmatpush1.bf16.msra.mxu0 %v6232_v42  ;;  %1657 = vmatpush1.bf16.msra.mxu1 %v6233_v43  ;;  %v6320_v42 = vld [vmem:[#allocation6 + $0x30c] ss:$16 sps:$4 sm:$0xff]   ;;  %v6315_v43 = vld [vmem:[#allocation6 + $0x300] ss:$16 sps:$4 sm:$0xff]   ;;  %p7186_p2 = pnand %p7185_p1, %p7179_p12 }
  0x86   :  { %1439 = vmatprep.subr.bf16.mxu0 %v6234_v44  ;;  %1658 = vmatprep.subr.bf16.mxu1 %v6236_v45  ;;  %v6318_v44 = vld [vmem:[#allocation6 + $0x308] ss:$16 sps:$4 sm:$0xff]   ;;  %v6323_v45 = vld [vmem:[#allocation6 + $0x324] ss:$16 sps:$4 sm:$0xff]  }
  0x89   :  { %1440 = vmatpush1.bf16.msra.mxu0 %v6238_v46  ;;  %1659 = vmatpush1.bf16.msra.mxu1 %v6239_v47  ;;  %v6326_v46 = vld [vmem:[#allocation6 + $0x32c] ss:$16 sps:$4 sm:$0xff]   ;;  %v6321_v47 = vld [vmem:[#allocation6 + $0x320] ss:$16 sps:$4 sm:$0xff]  }
  0x8a   :  { %1441 = vmatprep.subr.bf16.mxu0 %v6240_v49  ;;  %1660 = vmatprep.subr.bf16.mxu1 %v6242_v50  ;;  %v6331_v49 = vld [vmem:[#allocation6 + $0x344] ss:$16 sps:$4 sm:$0xff]   ;;  %v6334_v50 = vld [vmem:[#allocation6 + $0x34c] ss:$16 sps:$4 sm:$0xff]  }
  0x8d   :  { %1442 = vmatpush1.bf16.msra.mxu0 %v6244_v51  ;;  %1661 = vmatpush1.bf16.msra.mxu1 %v6245_v52  ;;  %v6329_v51 = vld [vmem:[#allocation6 + $0x340] ss:$16 sps:$4 sm:$0xff]   ;;  %v6332_v52 = vld [vmem:[#allocation6 + $0x348] ss:$16 sps:$4 sm:$0xff]  }
  0x8e   :  { %1443 = vmatprep.subr.bf16.mxu0 %v6246_v53  ;;  %1662 = vmatprep.subr.bf16.mxu1 %v6248_v54  ;;  %v6338_v53 = vld [vmem:[#allocation6 + $0x364] ss:$16 sps:$4 sm:$0xff]   ;;  %v6341_v54 = vld [vmem:[#allocation6 + $0x36c] ss:$16 sps:$4 sm:$0xff]  }
  0x91   :  { %1444 = vmatpush1.bf16.msra.mxu0 %v6250_v55  ;;  %1663 = vmatpush1.bf16.msra.mxu1 %v6251_v56  ;;  %v6336_v55 = vld [vmem:[#allocation6 + $0x360] ss:$16 sps:$4 sm:$0xff]   ;;  %v6339_v56 = vld [vmem:[#allocation6 + $0x368] ss:$16 sps:$4 sm:$0xff]  }
  0x92   :  { %1445 = vmatprep.subr.bf16.mxu0 %v6252_v57  ;;  %1664 = vmatprep.subr.bf16.mxu1 %v6254_v58  ;;  %v6346_v57 = vld [vmem:[#allocation6 + $0x384] ss:$16 sps:$4 sm:$0xff]   ;;  %v6349_v58 = vld [vmem:[#allocation6 + $0x38c] ss:$16 sps:$4 sm:$0xff]  }
  0x95   :  { %1446 = vmatpush1.bf16.msra.mxu0 %v6256_v59  ;;  %1665 = vmatpush1.bf16.msra.mxu1 %v6257_v60  ;;  %v6344_v59 = vld [vmem:[#allocation6 + $0x380] ss:$16 sps:$4 sm:$0xff]   ;;  %v6347_v60 = vld [vmem:[#allocation6 + $0x388] ss:$16 sps:$4 sm:$0xff]  }
  0x96   :  { %1447 = vmatprep.subr.bf16.mxu0 %v6258_v61  ;;  %1666 = vmatprep.subr.bf16.mxu1 %v6260_v62  ;;  %v6353_v61 = vld [vmem:[#allocation6 + $0x3a4] ss:$16 sps:$4 sm:$0xff]   ;;  %v6356_v62 = vld [vmem:[#allocation6 + $0x3ac] ss:$16 sps:$4 sm:$0xff]  }
  0x99   :  { %1448 = vmatpush1.bf16.msra.mxu0 %v6262_v63  ;;  %1667 = vmatpush1.bf16.msra.mxu1 %v6263_v0  ;;  %v6351_v63 = vld [vmem:[#allocation6 + $0x3a0] ss:$16 sps:$4 sm:$0xff]   ;;  %v6354_v0 = vld [vmem:[#allocation6 + $0x3a8] ss:$16 sps:$4 sm:$0xff]  }
  0x9a   :  { %1490 = vmatprep.subr.bf16.mxu0 %v6269_v1  ;;  %1709 = vmatprep.subr.bf16.mxu1 %v6272_v2  ;;  %v6361_v1 = vld [vmem:[#allocation6 + $0x3c4] ss:$16 sps:$4 sm:$0xff]   ;;  %v6364_v2 = vld [vmem:[#allocation6 + $0x3cc] ss:$16 sps:$4 sm:$0xff]  }
  0x9c   :  { %1450 = vmatmul.mubr.bf16.vlgmr.msra.gmra.mrb[0].mxu0 %v6264_v3  ;;  %1669 = vmatmul.mubr.bf16.vlgmr.msra.gmra.mrb[0].mxu1 %v6264_v3  ;;  %v6359_v3 = vld [vmem:[#allocation6 + $0x3c0] ss:$16 sps:$4 sm:$0xff]  }
  0x9d   :  { %1491 = vmatpush1.bf16.msra.mxu0 %v6267_v4  ;;  %1710 = vmatpush1.bf16.msra.mxu1 %v6270_v5  ;;  %v6362_v4 = vld [vmem:[#allocation6 + $0x3c8] ss:$16 sps:$4 sm:$0xff]   ;;  %v6368_v5 = vld [vmem:[#allocation6 + $0x3e4] ss:$16 sps:$4 sm:$0xff]  }
  0x9e   :  { %1492 = vmatprep.subr.bf16.mxu0 %v6275_v6  ;;  %1711 = vmatprep.subr.bf16.mxu1 %v6278_v7  ;;  %v6371_v6 = vld [vmem:[#allocation6 + $0x3ec] ss:$16 sps:$4 sm:$0xff]   ;;  %v6366_v7 = vld [vmem:[#allocation6 + $0x3e0] ss:$16 sps:$4 sm:$0xff]  }
  0x9f   :  { %1459 = vmatprep.mubr.bf16.mxu0 %v6327_v13  ;;  %1678 = vmatprep.mubr.bf16.mxu1 %v6327_v13  ;;  %v6378_v13 = vld [vmem:[#allocation6 + $0x408] ss:$16 sps:$4 sm:$0xff]  }
  0xa1   :  { %1493 = vmatpush1.bf16.msra.mxu0 %v6273_v8  ;;  %1712 = vmatpush1.bf16.msra.mxu1 %v6276_v9  ;;  %v6369_v8 = vld [vmem:[#allocation6 + $0x3e8] ss:$16 sps:$4 sm:$0xff]   ;;  %v6377_v9 = vld [vmem:[#allocation6 + $0x404] ss:$16 sps:$4 sm:$0xff]  }
  0xa2   :  { %1494 = vmatprep.subr.bf16.mxu0 %v6281_v10  ;;  %1713 = vmatprep.subr.bf16.mxu1 %v6284_v11  ;;  %v6380_v10 = vld [vmem:[#allocation6 + $0x40c] ss:$16 sps:$4 sm:$0xff]   ;;  %v6372_v11 = vld [vmem:[#allocation3 + $0x8] ss:$24 sps:$4 sm:$0xff]  }
  0xa4   :  { %1460 = vmatmul.mubr.bf16.gmra.mrb[4].mxu0 %v6335_v17  ;;  %1679 = vmatmul.mubr.bf16.gmra.mrb[4].mxu1 %v6335_v17  ;;  %v6381_v17 = vld [vmem:[#allocation6 + $0x420] ss:$16 sps:$4 sm:$0xff]  }
  0xa5   :  { %1495 = vmatpush1.bf16.msra.mxu0 %v6279_v12  ;;  %1714 = vmatpush1.bf16.msra.mxu1 %v6282_v14  ;;  %v6375_v12 = vld [vmem:[#allocation6 + $0x400] ss:$16 sps:$4 sm:$0xff]   ;;  %v6383_v14 = vld [vmem:[#allocation6 + $0x424] ss:$16 sps:$4 sm:$0xff]  }
  0xa6   :  { %1496 = vmatprep.subr.bf16.mxu0 %v6287_v15  ;;  %1715 = vmatprep.subr.bf16.mxu1 %v6290_v16  ;;  %v6386_v15 = vld [vmem:[#allocation6 + $0x42c] ss:$16 sps:$4 sm:$0xff]  }
  0xa7   :  { %1469 = vmatprep.mubr.bf16.mxu0 %v6342_v22  ;;  %1688 = vmatprep.mubr.bf16.mxu1 %v6342_v22  ;;  %v6435_v16 = vld [vmem:[#allocation3 + $0x3c] ss:$24 sps:$4 sm:$0xff]   ;;  %v6390_v22 = vld [vmem:[#allocation6 + $0x448] ss:$16 sps:$4 sm:$0xff]  }
  0xa9   :  { %1497 = vmatpush1.bf16.msra.mxu0 %v6285_v18  ;;  %1716 = vmatpush1.bf16.msra.mxu1 %v6288_v19  ;;  %v6384_v18 = vld [vmem:[#allocation6 + $0x428] ss:$16 sps:$4 sm:$0xff]   ;;  %v6389_v19 = vld [vmem:[#allocation6 + $0x444] ss:$16 sps:$4 sm:$0xff]  }
  0xaa   :  { %1498 = vmatprep.subr.bf16.mxu0 %v6293_v20  ;;  %1717 = vmatprep.subr.bf16.mxu1 %v6296_v21  ;;  %v6392_v20 = vld [vmem:[#allocation6 + $0x44c] ss:$16 sps:$4 sm:$0xff]   ;;  %v6387_v21 = vld [vmem:[#allocation6 + $0x440] ss:$16 sps:$4 sm:$0xff]  }
  0xac   :  { %1470 = vmatmul.mubr.bf16.gmra.mrb[8].mxu0 %v6350_v28  ;;  %1689 = vmatmul.mubr.bf16.gmra.mrb[8].mxu1 %v6350_v28  ;;  %v6396_v28 = vld [vmem:[#allocation6 + $0x468] ss:$16 sps:$4 sm:$0xff]  }
  0xad   :  { %1499 = vmatpush1.bf16.msra.mxu0 %v6291_v23  ;;  %1718 = vmatpush1.bf16.msra.mxu1 %v6294_v24  ;;  %v6437_v23 = vld [vmem:[#allocation3 + $0x38] ss:$24 sps:$4 sm:$0xff]   ;;  %v6395_v24 = vld [vmem:[#allocation6 + $0x464] ss:$16 sps:$4 sm:$0xff]  }
  0xae   :  { %1500 = vmatprep.subr.bf16.mxu0 %v6299_v25  ;;  %1719 = vmatprep.subr.bf16.mxu1 %v6302_v26  ;;  %v6398_v25 = vld [vmem:[#allocation6 + $0x46c] ss:$16 sps:$4 sm:$0xff]  }
  0xaf   :  { %1479 = vmatprep.mubr.bf16.mxu0 %v6357_v31  ;;  %1698 = vmatprep.mubr.bf16.mxu1 %v6357_v31  ;;  %v6450_v26 = vld [vmem:[#allocation3 + $0x6c] ss:$24 sps:$4 sm:$0xff]   ;;  %v6452_v31 = vld [vmem:[#allocation3 + $0x68] ss:$24 sps:$4 sm:$0xff]  }
  0xb1   :  { %1501 = vmatpush1.bf16.msra.mxu0 %v6297_v27  ;;  %1720 = vmatpush1.bf16.msra.mxu1 %v6300_v29  ;;  %v6393_v27 = vld [vmem:[#allocation6 + $0x460] ss:$16 sps:$4 sm:$0xff]   ;;  %v6401_v29 = vld [vmem:[#allocation6 + $0x484] ss:$16 sps:$4 sm:$0xff]  }
  0xb2   :  { %1502 = vmatprep.subr.bf16.mxu0 %v6305_v30  ;;  %1721 = vmatprep.subr.bf16.mxu1 %v6308_v32  ;;  %v6404_v30 = vld [vmem:[#allocation6 + $0x48c] ss:$16 sps:$4 sm:$0xff]   ;;  %v6399_v32 = vld [vmem:[#allocation6 + $0x480] ss:$16 sps:$4 sm:$0xff]  }
  0xb4   :  { %1480 = vmatmul.mubr.bf16.gmra.mrb[12].mxu0 %v6365_v38  ;;  %1699 = vmatmul.mubr.bf16.gmra.mrb[12].mxu1 %v6365_v38  ;;  %v6408_v38 = vld [vmem:[#allocation6 + $0x4a8] ss:$16 sps:$4 sm:$0xff]  }
  0xb5   :  { %1503 = vmatpush1.bf16.msra.mxu0 %v6303_v33  ;;  %1722 = vmatpush1.bf16.msra.mxu1 %v6306_v34  ;;  %v6402_v33 = vld [vmem:[#allocation6 + $0x488] ss:$16 sps:$4 sm:$0xff]   ;;  %v6407_v34 = vld [vmem:[#allocation6 + $0x4a4] ss:$16 sps:$4 sm:$0xff]  }
  0xb6   :  { %1504 = vmatprep.subr.bf16.mxu0 %v6311_v35  ;;  %1723 = vmatprep.subr.bf16.mxu1 %v6314_v36  ;;  %v6410_v35 = vld [vmem:[#allocation6 + $0x4ac] ss:$16 sps:$4 sm:$0xff]  }
  0xb7   :  { %1522 = vmatprep.mubr.bf16.mxu0 %v6374_v40  ;;  %1741 = vmatprep.mubr.bf16.mxu1 %v6374_v40  ;;  %v6465_v36 = vld [vmem:[#allocation3 + $0x9c] ss:$24 sps:$4 sm:$0xff]  }
  0xb8   :  { %v6416_v40 = vld [vmem:[#allocation6 + $0x4cc] ss:$16 sps:$4 sm:$0xff]  }
  0xb9   :  { %1505 = vmatpush1.bf16.msra.mxu0 %v6309_v37  ;;  %1724 = vmatpush1.bf16.msra.mxu1 %v6312_v39  ;;  %v6405_v37 = vld [vmem:[#allocation6 + $0x4a0] ss:$16 sps:$4 sm:$0xff]   ;;  %v6413_v39 = vld [vmem:[#allocation6 + $0x4c4] ss:$16 sps:$4 sm:$0xff]  }
  0xba   :  { %1506 = vmatprep.subr.bf16.mxu0 %v6317_v41  ;;  %1725 = vmatprep.subr.bf16.mxu1 %v6320_v42  ;;  %v6411_v41 = vld [vmem:[#allocation6 + $0x4c0] ss:$16 sps:$4 sm:$0xff]   ;;  %v6414_v42 = vld [vmem:[#allocation6 + $0x4c8] ss:$16 sps:$4 sm:$0xff]  }
  0xbd   :  { %1507 = vmatpush1.bf16.msra.mxu0 %v6315_v43  ;;  %1726 = vmatpush1.bf16.msra.mxu1 %v6318_v44  ;;  %v6467_v43 = vld [vmem:[#allocation3 + $0x98] ss:$24 sps:$4 sm:$0xff]   ;;  %v6419_v44 = vld [vmem:[#allocation6 + $0x4e4] ss:$16 sps:$4 sm:$0xff]  }
  0xbe   :  { %1508 = vmatprep.subr.bf16.mxu0 %v6323_v45  ;;  %1727 = vmatprep.subr.bf16.mxu1 %v6326_v46  ;;  %v6422_v45 = vld [vmem:[#allocation6 + $0x4ec] ss:$16 sps:$4 sm:$0xff]  }
  0xbf   :  { %v6482_v46 = vld [vmem:[#allocation3 + $0x14] ss:$24 sps:$4 sm:$0xff]  }
  0xc1   :  { %1509 = vmatpush1.bf16.msra.mxu0 %v6321_v47  ;;  %1728 = vmatpush1.bf16.msra.mxu1 %v6324_v48  ;;  %v6417_v47 = vld [vmem:[#allocation6 + $0x4e0] ss:$16 sps:$4 sm:$0xff]   ;;  %v6420_v48 = vld [vmem:[#allocation6 + $0x4e8] ss:$16 sps:$4 sm:$0xff]  }
  0xc2   :  { %1510 = vmatprep.subr.bf16.mxu0 %v6331_v49  ;;  %1729 = vmatprep.subr.bf16.mxu1 %v6334_v50  ;;  %v6425_v49 = vld [vmem:[#allocation6 + $0x504] ss:$16 sps:$4 sm:$0xff]   ;;  %v6428_v50 = vld [vmem:[#allocation6 + $0x50c] ss:$16 sps:$4 sm:$0xff]  }
  0xc5   :  { %1511 = vmatpush1.bf16.msra.mxu0 %v6329_v51  ;;  %1730 = vmatpush1.bf16.msra.mxu1 %v6332_v52  ;;  %v6423_v51 = vld [vmem:[#allocation6 + $0x500] ss:$16 sps:$4 sm:$0xff]   ;;  %v6426_v52 = vld [vmem:[#allocation6 + $0x508] ss:$16 sps:$4 sm:$0xff]  }
  0xc6   :  { %1512 = vmatprep.subr.bf16.mxu0 %v6338_v53  ;;  %1731 = vmatprep.subr.bf16.mxu1 %v6341_v54  ;;  %v6431_v53 = vld [vmem:[#allocation6 + $0x524] ss:$16 sps:$4 sm:$0xff]   ;;  %v6434_v54 = vld [vmem:[#allocation6 + $0x52c] ss:$16 sps:$4 sm:$0xff]  }
  0xc9   :  { %1513 = vmatpush1.bf16.msra.mxu0 %v6336_v55  ;;  %1732 = vmatpush1.bf16.msra.mxu1 %v6339_v56  ;;  %v6429_v55 = vld [vmem:[#allocation6 + $0x520] ss:$16 sps:$4 sm:$0xff]   ;;  %v6432_v56 = vld [vmem:[#allocation6 + $0x528] ss:$16 sps:$4 sm:$0xff]  }
  0xca   :  { %1514 = vmatprep.subr.bf16.mxu0 %v6346_v57  ;;  %1733 = vmatprep.subr.bf16.mxu1 %v6349_v58  ;;  %v6440_v57 = vld [vmem:[#allocation6 + $0x544] ss:$16 sps:$4 sm:$0xff]   ;;  %v6443_v58 = vld [vmem:[#allocation6 + $0x54c] ss:$16 sps:$4 sm:$0xff]  }
  0xcd   :  { %1515 = vmatpush1.bf16.msra.mxu0 %v6344_v59  ;;  %1734 = vmatpush1.bf16.msra.mxu1 %v6347_v60  ;;  %v6438_v59 = vld [vmem:[#allocation6 + $0x540] ss:$16 sps:$4 sm:$0xff]   ;;  %v6441_v60 = vld [vmem:[#allocation6 + $0x548] ss:$16 sps:$4 sm:$0xff]  }
  0xce   :  { %1516 = vmatprep.subr.bf16.mxu0 %v6353_v61  ;;  %1735 = vmatprep.subr.bf16.mxu1 %v6356_v62  ;;  %v6446_v61 = vld [vmem:[#allocation6 + $0x564] ss:$16 sps:$4 sm:$0xff]   ;;  %v6449_v62 = vld [vmem:[#allocation6 + $0x56c] ss:$16 sps:$4 sm:$0xff]  }
  0xd1   :  { %1517 = vmatpush1.bf16.msra.mxu0 %v6351_v63  ;;  %1736 = vmatpush1.bf16.msra.mxu1 %v6354_v0  ;;  %v6444_v63 = vld [vmem:[#allocation6 + $0x560] ss:$16 sps:$4 sm:$0xff]   ;;  %v6447_v0 = vld [vmem:[#allocation6 + $0x568] ss:$16 sps:$4 sm:$0xff]  }
  0xd2   :  { %1518 = vmatprep.subr.bf16.mxu0 %v6361_v1  ;;  %1737 = vmatprep.subr.bf16.mxu1 %v6364_v2  ;;  %v6455_v1 = vld [vmem:[#allocation6 + $0x584] ss:$16 sps:$4 sm:$0xff]   ;;  %v6458_v2 = vld [vmem:[#allocation6 + $0x58c] ss:$16 sps:$4 sm:$0xff]  }
  0xd5   :  { %1519 = vmatpush1.bf16.msra.mxu0 %v6359_v3  ;;  %1738 = vmatpush1.bf16.msra.mxu1 %v6362_v4  ;;  %v6453_v3 = vld [vmem:[#allocation6 + $0x580] ss:$16 sps:$4 sm:$0xff]   ;;  %v6456_v4 = vld [vmem:[#allocation6 + $0x588] ss:$16 sps:$4 sm:$0xff]  }
  0xd6   :  { %1520 = vmatprep.subr.bf16.mxu0 %v6368_v5  ;;  %1739 = vmatprep.subr.bf16.mxu1 %v6371_v6  ;;  %v6461_v5 = vld [vmem:[#allocation6 + $0x5a4] ss:$16 sps:$4 sm:$0xff]   ;;  %v6464_v6 = vld [vmem:[#allocation6 + $0x5ac] ss:$16 sps:$4 sm:$0xff]  }
  0xd9   :  { %1521 = vmatpush1.bf16.msra.mxu0 %v6366_v7  ;;  %1740 = vmatpush1.bf16.msra.mxu1 %v6369_v8  ;;  %v6459_v7 = vld [vmem:[#allocation6 + $0x5a0] ss:$16 sps:$4 sm:$0xff]   ;;  %v6462_v8 = vld [vmem:[#allocation6 + $0x5a8] ss:$16 sps:$4 sm:$0xff]  }
  0xda   :  { %1563 = vmatprep.subr.bf16.mxu0 %v6377_v9  ;;  %1782 = vmatprep.subr.bf16.mxu1 %v6380_v10  ;;  %v6470_v9 = vld [vmem:[#allocation6 + $0x5c4] ss:$16 sps:$4 sm:$0xff]   ;;  %v6473_v10 = vld [vmem:[#allocation6 + $0x5cc] ss:$16 sps:$4 sm:$0xff]  }
  0xdc   :  { %1523 = vmatmul.mubr.bf16.vlgmr.msra.gmra.mrb[0].mxu0 %v6372_v11  ;;  %1742 = vmatmul.mubr.bf16.vlgmr.msra.gmra.mrb[0].mxu1 %v6372_v11  ;;  %v6468_v11 = vld [vmem:[#allocation6 + $0x5c0] ss:$16 sps:$4 sm:$0xff]  }
  0xdd   :  { %1564 = vmatpush1.bf16.msra.mxu0 %v6375_v12  ;;  %1783 = vmatpush1.bf16.msra.mxu1 %v6378_v13  ;;  %v6471_v12 = vld [vmem:[#allocation6 + $0x5c8] ss:$16 sps:$4 sm:$0xff]   ;;  %v6476_v13 = vld [vmem:[#allocation6 + $0x5e4] ss:$16 sps:$4 sm:$0xff]  }
  0xde   :  { %1565 = vmatprep.subr.bf16.mxu0 %v6383_v14  ;;  %1784 = vmatprep.subr.bf16.mxu1 %v6386_v15  ;;  %v6479_v14 = vld [vmem:[#allocation6 + $0x5ec] ss:$16 sps:$4 sm:$0xff]   ;;  %v6474_v15 = vld [vmem:[#allocation6 + $0x5e0] ss:$16 sps:$4 sm:$0xff]  }
  0xdf   :  { %1532 = vmatprep.mubr.bf16.mxu0 %v6435_v16  ;;  %1751 = vmatprep.mubr.bf16.mxu1 %v6435_v16  ;;  %v6477_v16 = vld [vmem:[#allocation6 + $0x5e8] ss:$16 sps:$4 sm:$0xff]  }
  0xe1   :  { %1566 = vmatpush1.bf16.msra.mxu0 %v6381_v17  ;;  %1785 = vmatpush1.bf16.msra.mxu1 %v6384_v18  ;;  %v7337_v17 = vld [vmem:[#allocation8 + $0x4] ss:$16 sps:$4 sm:$0xff]   ;;  %v7339_v18 = vld [vmem:[#allocation8 + $0xc] ss:$16 sps:$4 sm:$0xff]  }
  0xe2   :  { %1567 = vmatprep.subr.bf16.mxu0 %v6389_v19  ;;  %1786 = vmatprep.subr.bf16.mxu1 %v6392_v20  ;;  %v6480_v19 = vld [vmem:[#allocation3 + $0x10] ss:$24 sps:$4 sm:$0xff]  }
  0xe3   :  { %v7341_v20 = vld [vmem:[#allocation8] ss:$16 sps:$4 sm:$0xff]  }
  0xe4   :  { %1533 = vmatmul.mubr.bf16.gmra.mrb[4].mxu0 %v6437_v23  ;;  %1752 = vmatmul.mubr.bf16.gmra.mrb[4].mxu1 %v6437_v23  ;;  %v7345_v23 = vld [vmem:[#allocation8 + $0x8] ss:$16 sps:$4 sm:$0xff]  }
  0xe5   :  { %1568 = vmatpush1.bf16.msra.mxu0 %v6387_v21  ;;  %1787 = vmatpush1.bf16.msra.mxu1 %v6390_v22  ;;  %v6488_v21 = vld [vmem:[#allocation3 + $0x44] ss:$24 sps:$4 sm:$0xff]  }
  0xe6   :  { %1569 = vmatprep.subr.bf16.mxu0 %v6395_v24  ;;  %1788 = vmatprep.subr.bf16.mxu1 %v6398_v25  ;;  %v7343_v22 = vld [vmem:[#allocation8 + $0x24] ss:$16 sps:$4 sm:$0xff]   ;;  %v7349_v24 = vld [vmem:[#allocation8 + $0x2c] ss:$16 sps:$4 sm:$0xff]   ;;  %v7351_v25 = vld [vmem:[#allocation8 + $0x20] ss:$16 sps:$4 sm:$0xff]  }
  0xe7   :  { %1542 = vmatprep.mubr.bf16.mxu0 %v6450_v26  ;;  %1761 = vmatprep.mubr.bf16.mxu1 %v6450_v26  ;;  %v7353_v26 = vld [vmem:[#allocation8 + $0x44] ss:$16 sps:$4 sm:$0xff]  }
  0xe9   :  { %1570 = vmatpush1.bf16.msra.mxu0 %v6393_v27  ;;  %1789 = vmatpush1.bf16.msra.mxu1 %v6396_v28  ;;  %v7356_v27 = vld [vmem:[#allocation8 + $0x28] ss:$16 sps:$4 sm:$0xff]  }
  0xea   :  { %1571 = vmatprep.subr.bf16.mxu0 %v6401_v29  ;;  %1790 = vmatprep.subr.bf16.mxu1 %v6404_v30  ;;  %v6493_v28 = vld [vmem:[#allocation3 + $0x40] ss:$24 sps:$4 sm:$0xff]   ;;  %v7362_v30 = vld [vmem:[#allocation8 + $0x4c] ss:$16 sps:$4 sm:$0xff]  }
  0xeb   :  { %v7360_v29 = vld [vmem:[#allocation8 + $0x40] ss:$16 sps:$4 sm:$0xff]  }
  0xec   :  { %1543 = vmatmul.mubr.bf16.gmra.mrb[8].mxu0 %v6452_v31  ;;  %1762 = vmatmul.mubr.bf16.gmra.mrb[8].mxu1 %v6452_v31  ;;  %v6503_v31 = vld [vmem:[#allocation3 + $0x74] ss:$24 sps:$4 sm:$0xff]  }
  0xed   :  { %1572 = vmatpush1.bf16.msra.mxu0 %v6399_v32  ;;  %1791 = vmatpush1.bf16.msra.mxu1 %v6402_v33  ;;  %v7366_v32 = vld [vmem:[#allocation8 + $0x64] ss:$16 sps:$4 sm:$0xff]   ;;  %v7368_v33 = vld [vmem:[#allocation8 + $0x48] ss:$16 sps:$4 sm:$0xff]  }
  0xee   :  { %1573 = vmatprep.subr.bf16.mxu0 %v6407_v34  ;;  %1792 = vmatprep.subr.bf16.mxu1 %v6410_v35  ;;  %v7371_v34 = vld [vmem:[#allocation8 + $0x6c] ss:$16 sps:$4 sm:$0xff]   ;;  %v7374_v35 = vld [vmem:[#allocation8 + $0x60] ss:$16 sps:$4 sm:$0xff]  }
  0xef   :  { %1552 = vmatprep.mubr.bf16.mxu0 %v6465_v36  ;;  %1771 = vmatprep.mubr.bf16.mxu1 %v6465_v36  ;;  %v7376_v36 = vld [vmem:[#allocation8 + $0x84] ss:$16 sps:$4 sm:$0xff]  }
  0xf1   :  { %1574 = vmatpush1.bf16.msra.mxu0 %v6405_v37  ;;  %1793 = vmatpush1.bf16.msra.mxu1 %v6408_v38  ;;  %v7380_v37 = vld [vmem:[#allocation8 + $0x68] ss:$16 sps:$4 sm:$0xff]  }
  0xf2   :  { %1575 = vmatprep.subr.bf16.mxu0 %v6413_v39  ;;  %1794 = vmatprep.subr.bf16.mxu1 %v6416_v40  ;;  %v6508_v38 = vld [vmem:[#allocation3 + $0x70] ss:$24 sps:$4 sm:$0xff]   ;;  %v7386_v40 = vld [vmem:[#allocation8 + $0x8c] ss:$16 sps:$4 sm:$0xff]  }
  0xf3   :  { %v7384_v39 = vld [vmem:[#allocation8 + $0x80] ss:$16 sps:$4 sm:$0xff]  }
  0xf4   :  { %1553 = vmatmul.mubr.bf16.gmra.mrb[12].mxu0 %v6467_v43  ;;  %1772 = vmatmul.mubr.bf16.gmra.mrb[12].mxu1 %v6467_v43  ;;  %v7392_v43 = vld [vmem:[#allocation8 + $0x88] ss:$16 sps:$4 sm:$0xff]  }
  0xf5   :  { %1576 = vmatpush1.bf16.msra.mxu0 %v6411_v41  ;;  %1795 = vmatpush1.bf16.msra.mxu1 %v6414_v42  ;;  %v6518_v41 = vld [vmem:[#allocation3 + $0xa4] ss:$24 sps:$4 sm:$0xff]  }
  0xf6   :  { %1577 = vmatprep.subr.bf16.mxu0 %v6419_v44  ;;  %1796 = vmatprep.subr.bf16.mxu1 %v6422_v45  ;;  %v7390_v42 = vld [vmem:[#allocation8 + $0xa4] ss:$16 sps:$4 sm:$0xff]   ;;  %v7395_v44 = vld [vmem:[#allocation8 + $0xac] ss:$16 sps:$4 sm:$0xff]   ;;  %v7398_v45 = vld [vmem:[#allocation8 + $0xa0] ss:$16 sps:$4 sm:$0xff]  }
  0xf7   :  { %1595 = vmatprep.mubr.bf16.mxu0 %v6482_v46  ;;  %1814 = vmatprep.mubr.bf16.mxu1 %v6482_v46  ;;  %v7400_v46 = vld [vmem:[#allocation8 + $0xc4] ss:$16 sps:$4 sm:$0xff]  }
  0xf9   :  { %1578 = vmatpush1.bf16.msra.mxu0 %v6417_v47  ;;  %1797 = vmatpush1.bf16.msra.mxu1 %v6420_v48  ;;  %v7404_v47 = vld [vmem:[#allocation8 + $0xa8] ss:$16 sps:$4 sm:$0xff]  }
  0xfa   :  { %1579 = vmatprep.subr.bf16.mxu0 %v6425_v49  ;;  %1798 = vmatprep.subr.bf16.mxu1 %v6428_v50  ;;  %v6523_v48 = vld [vmem:[#allocation3 + $0xa0] ss:$24 sps:$4 sm:$0xff]   ;;  %v7410_v50 = vld [vmem:[#allocation8 + $0xcc] ss:$16 sps:$4 sm:$0xff]  }
  0xfb   :  { %v7408_v49 = vld [vmem:[#allocation8 + $0xc0] ss:$16 sps:$4 sm:$0xff]  }
  0xfc   :  { %8476 = vst [vmem:[#allocation17_spill] sm:$0xff] %v7408_v49 }
  0xfd   :  { %1580 = vmatpush1.bf16.msra.mxu0 %v6423_v51  ;;  %1799 = vmatpush1.bf16.msra.mxu1 %v6426_v52  ;;  %v7413_v51 = vld [vmem:[#allocation8 + $0xe4] ss:$16 sps:$4 sm:$0xff]   ;;  %v7416_v52 = vld [vmem:[#allocation8 + $0xc8] ss:$16 sps:$4 sm:$0xff]  }
  0xfe   :  { %1581 = vmatprep.subr.bf16.mxu0 %v6431_v53  ;;  %1800 = vmatprep.subr.bf16.mxu1 %v6434_v54  ;;  %8477 = vst [vmem:[#allocation18_spill] sm:$0xff] %v7413_v51  ;;  %8478 = vst [vmem:[#allocation19_spill] sm:$0xff] %v7416_v52  ;;  %v7419_v53 = vld [vmem:[#allocation8 + $0xec] ss:$16 sps:$4 sm:$0xff]   ;;  %v7422_v54 = vld [vmem:[#allocation8 + $0xe0] ss:$16 sps:$4 sm:$0xff]  }
  0xff   :  { %8479 = vst [vmem:[#allocation20_spill] sm:$0xff] %v7419_v53  ;;  %8480 = vst [vmem:[#allocation21_spill] sm:$0xff] %v7422_v54 }
 0x101   :  { %1582 = vmatpush1.bf16.msra.mxu0 %v6429_v55  ;;  %1801 = vmatpush1.bf16.msra.mxu1 %v6432_v56  ;;  %v7426_v55 = vld [vmem:[#allocation8 + $0xe8] ss:$16 sps:$4 sm:$0xff]   ;;  %v8442_v56 = vmov 0  }
 0x102   :  { %1583 = vmatprep.subr.bf16.mxu0 %v6440_v57  ;;  %1802 = vmatprep.subr.bf16.mxu1 %v6443_v58  ;;  %8481 = vst [vmem:[#allocation22_spill] sm:$0xff] %v7426_v55  ;;  %v317_v57 = vlaneseq }
 0x104   :  { %v7473_v58 = vshrl.u32 %v317_v57, 7 }
 0x105   :  { %1584 = vmatpush1.bf16.msra.mxu0 %v6438_v59  ;;  %1803 = vmatpush1.bf16.msra.mxu1 %v6441_v60 }
 0x106   :  { %1585 = vmatprep.subr.bf16.mxu0 %v6446_v61  ;;  %1804 = vmatprep.subr.bf16.mxu1 %v6449_v62  ;;  %8482 = vst [vmem:[#allocation23_spill] sm:$0xff] %v7473_v58  ;;  %v7220_v61 = vmov 1983009808  }
 0x107   :  { %v1858_v62 = vunpack.c.l.s4 %v7220_v61 }
 0x109   :  { %1586 = vmatpush1.bf16.msra.mxu0 %v6444_v63  ;;  %1805 = vmatpush1.bf16.msra.mxu1 %v6447_v0  ;;  %v7221_v63 = vmov 1934713408  }
 0x10a   :  { %1587 = vmatprep.subr.bf16.mxu0 %v6455_v1  ;;  %1806 = vmatprep.subr.bf16.mxu1 %v6458_v2  ;;  %v1922_v0 = vunpack.c.l.s4 %v7221_v63  ;;  %v8441_v1 = vsub.s32 0, %v7473_v58  ;;  %v8438_v2 = vsub.s32 2, %v7473_v58 }
 0x10d   :  { %1588 = vmatpush1.bf16.msra.mxu0 %v6453_v3  ;;  %1807 = vmatpush1.bf16.msra.mxu1 %v6456_v4 }
 0x10e   :  { %1589 = vmatprep.subr.bf16.mxu0 %v6461_v5  ;;  %1808 = vmatprep.subr.bf16.mxu1 %v6464_v6  ;;  %v315_v5 = vld [vmem:[%s8432_s3] sm:$0xf]  ;;  %v8440_v6 = vsub.s32 1, %v7473_v58 }
 0x111   :  { %1590 = vmatpush1.bf16.msra.mxu0 %v6459_v7  ;;  %1809 = vmatpush1.bf16.msra.mxu1 %v6462_v8  ;;  %v8439_v7 = vsub.s32 3, %v7473_v58 }
 0x112   :  { %1591 = vmatprep.subr.bf16.mxu0 %v6470_v9  ;;  %1810 = vmatprep.subr.bf16.mxu1 %v6473_v10 }
 0x115   :  { %1592 = vmatpush1.bf16.msra.mxu0 %v6468_v11  ;;  %1811 = vmatpush1.bf16.msra.mxu1 %v6471_v12  ;;  %v1859_v12 = vunpack.c.0.s8 %v1858_v62 }
 0x116   :  { %1593 = vmatprep.subr.bf16.mxu0 %v6476_v13  ;;  %1812 = vmatprep.subr.bf16.mxu1 %v6479_v14  ;;  %v1923_v13 = vunpack.c.0.s8 %v1922_v0  ;;  %v7484_v14 = vrot.slane %v315_v5, %v8441_v1 }
 0x119   :  { %1594 = vmatpush1.bf16.msra.mxu0 %v6474_v15  ;;  %1813 = vmatpush1.bf16.msra.mxu1 %v6477_v16  ;;  %v7488_v15 = vrot.slane %v315_v5, %v8438_v2  ;;  %v7492_v16 = vrot.slane %v315_v5, %v8440_v6 }
 0x11a   :  { %2627 = vmatprep.subr.bf16.mxu0 %v7337_v17  ;;  %2668 = vmatprep.subr.bf16.mxu1 %v7339_v18 }
 0x11c   :  { %1596 = vmatmul.mubr.bf16.vlgmr.msra.gmra.mrb[0].mxu0 %v6480_v19  ;;  %1815 = vmatmul.mubr.bf16.vlgmr.msra.gmra.mrb[0].mxu1 %v6480_v19  ;;  %v7499_v19 = vsub.s32 %v1859_v12, %v7473_v58 }
 0x11d   :  { %2628 = vmatpush1.bf16.msra.mxu0 %v7341_v20  ;;  %1605 = vmatprep.mubr.bf16.mxu0 %v6488_v21 }
 0x11e   :  { %1824 = vmatprep.mubr.bf16.mxu1 %v6488_v21  ;;  %2629 = vmatprep.subr.bf16.mxu0 %v7343_v22  ;;  %v7502_v21 = vsub.s32 %v1923_v13, %v7473_v58 }
 0x11f   :  { %2669 = vmatpush1.bf16.msra.mxu1 %v7345_v23 }
 0x120   :  { %2670 = vmatprep.subr.bf16.mxu1 %v7349_v24 }
 0x121   :  { %2630 = vmatpush1.bf16.msra.mxu0 %v7351_v25 }
 0x122   :  { %2631 = vmatprep.subr.bf16.mxu0 %v7353_v26 }
 0x123   :  { %2671 = vmatpush1.bf16.msra.mxu1 %v7356_v27 }
 0x124   :  { %1606 = vmatmul.mubr.bf16.gmra.mrb[4].mxu0 %v6493_v28  ;;  %1825 = vmatmul.mubr.bf16.gmra.mrb[4].mxu1 %v6493_v28 }
 0x125   :  { %2632 = vmatpush1.bf16.msra.mxu0 %v7360_v29  ;;  %2672 = vmatprep.subr.bf16.mxu1 %v7362_v30 }
 0x126   :  { %1615 = vmatprep.mubr.bf16.mxu0 %v6503_v31  ;;  %1834 = vmatprep.mubr.bf16.mxu1 %v6503_v31 }
 0x127   :  { %2633 = vmatprep.subr.bf16.mxu0 %v7366_v32  ;;  %2673 = vmatpush1.bf16.msra.mxu1 %v7368_v33 }
 0x128   :  { %2674 = vmatprep.subr.bf16.mxu1 %v7371_v34 }
 0x129   :  { %2634 = vmatpush1.bf16.msra.mxu0 %v7374_v35 }
 0x12a   :  { %2635 = vmatprep.subr.bf16.mxu0 %v7376_v36 }
 0x12b   :  { %2675 = vmatpush1.bf16.msra.mxu1 %v7380_v37 }
 0x12c   :  { %1616 = vmatmul.mubr.bf16.gmra.mrb[8].mxu0 %v6508_v38  ;;  %1835 = vmatmul.mubr.bf16.gmra.mrb[8].mxu1 %v6508_v38 }
 0x12d   :  { %2636 = vmatpush1.bf16.msra.mxu0 %v7384_v39  ;;  %2676 = vmatprep.subr.bf16.mxu1 %v7386_v40 }
 0x12e   :  { %1625 = vmatprep.mubr.bf16.mxu0 %v6518_v41  ;;  %1844 = vmatprep.mubr.bf16.mxu1 %v6518_v41 }
 0x12f   :  { %2637 = vmatprep.subr.bf16.mxu0 %v7390_v42  ;;  %2677 = vmatpush1.bf16.msra.mxu1 %v7392_v43 }
 0x130   :  { %2678 = vmatprep.subr.bf16.mxu1 %v7395_v44 }
 0x131   :  { %2638 = vmatpush1.bf16.msra.mxu0 %v7398_v45 }
 0x132   :  { %2639 = vmatprep.subr.bf16.mxu0 %v7400_v46 }
 0x133   :  { %2679 = vmatpush1.bf16.msra.mxu1 %v7404_v47 }
 0x134   :  { %1626 = vmatmul.mubr.bf16.gmra.mrb[12].mxu0 %v6523_v48  ;;  %1845 = vmatmul.mubr.bf16.gmra.mrb[12].mxu1 %v6523_v48 }
 0x135   :  { %2640 = vmatpush1.bf16.msra.mxu0 %v7408_v49  ;;  %2680 = vmatprep.subr.bf16.mxu1 %v7410_v50 }
 0x136   :  { %2641 = vmatprep.subr.bf16.mxu0 %v7413_v51  ;;  %2659 = vmatprep.mubr.bf16.mxu0 %v8442_v56 }
 0x137   :  { %2681 = vmatpush1.bf16.msra.mxu1 %v7416_v52  ;;  %2700 = vmatprep.mubr.bf16.mxu1 %v8442_v56 }
 0x138   :  { %2682 = vmatprep.subr.bf16.mxu1 %v7419_v53 }
 0x139   :  { %2642 = vmatpush1.bf16.msra.mxu0 %v7422_v54 }
 0x13a   :  { %2743 = vmatprep.subr.bf16.mxu0 %v7337_v17 }
 0x13b   :  { %2683 = vmatpush1.bf16.msra.mxu1 %v7426_v55 }
 0x13c   :  { %2660 = vmatmul.mubr.bf16.vlgmr.msra.gmra.mrb[16].mxu0 %v8442_v56  ;;  %2784 = vmatprep.subr.bf16.mxu1 %v7339_v18 }
 0x13d   :  { %2744 = vmatpush1.bf16.msra.mxu0 %v7341_v20  ;;  %2775 = vmatprep.mubr.bf16.mxu0 %v8442_v56 }
 0x13e   :  { %2701 = vmatmul.mubr.bf16.vlgmr.msra.gmra.mrb[16].mxu1 %v8442_v56  ;;  %2745 = vmatprep.subr.bf16.mxu0 %v7343_v22 }
 0x13f   :  { %2785 = vmatpush1.bf16.msra.mxu1 %v7345_v23  ;;  %2816 = vmatprep.mubr.bf16.mxu1 %v8442_v56 }
 0x140   :  { %2786 = vmatprep.subr.bf16.mxu1 %v7349_v24 }
 0x141   :  { %2746 = vmatpush1.bf16.msra.mxu0 %v7351_v25 }
 0x142   :  { %2747 = vmatprep.subr.bf16.mxu0 %v7353_v26 }
 0x143   :  { %2787 = vmatpush1.bf16.msra.mxu1 %v7356_v27 }
 0x144   :  { %2788 = vmatprep.subr.bf16.mxu1 %v7362_v30 }
 0x145   :  { %2748 = vmatpush1.bf16.msra.mxu0 %v7360_v29 }
 0x146   :  { %2749 = vmatprep.subr.bf16.mxu0 %v7366_v32 }
 0x147   :  { %2789 = vmatpush1.bf16.msra.mxu1 %v7368_v33 }
 0x148   :  { %2790 = vmatprep.subr.bf16.mxu1 %v7371_v34 }
 0x149   :  { %2750 = vmatpush1.bf16.msra.mxu0 %v7374_v35 }
 0x14a   :  { %2751 = vmatprep.subr.bf16.mxu0 %v7376_v36 }
 0x14b   :  { %2791 = vmatpush1.bf16.msra.mxu1 %v7380_v37 }
 0x14c   :  { %2792 = vmatprep.subr.bf16.mxu1 %v7386_v40 }
 0x14d   :  { %2752 = vmatpush1.bf16.msra.mxu0 %v7384_v39 }
 0x14e   :  { %2753 = vmatprep.subr.bf16.mxu0 %v7390_v42 }
 0x14f   :  { %2793 = vmatpush1.bf16.msra.mxu1 %v7392_v43 }
 0x150   :  { %2794 = vmatprep.subr.bf16.mxu1 %v7395_v44 }
 0x151   :  { %2754 = vmatpush1.bf16.msra.mxu0 %v7398_v45 }
 0x152   :  { %2755 = vmatprep.subr.bf16.mxu0 %v7400_v46 }
 0x153   :  { %2795 = vmatpush1.bf16.msra.mxu1 %v7404_v47 }
 0x154   :  { %2796 = vmatprep.subr.bf16.mxu1 %v7410_v50 }
 0x155   :  { %2756 = vmatpush1.bf16.msra.mxu0 %v7408_v49 }
 0x156   :  { %2757 = vmatprep.subr.bf16.mxu0 %v7413_v51 }
 0x157   :  { %2797 = vmatpush1.bf16.msra.mxu1 %v7416_v52 }
 0x158   :  { %2798 = vmatprep.subr.bf16.mxu1 %v7419_v53 }
 0x159   :  { %2758 = vmatpush1.bf16.msra.mxu0 %v7422_v54 }
 0x15a   :  { %2859 = vmatprep.subr.bf16.mxu0 %v7337_v17  ;;  %v7496_v17 = vrot.slane %v315_v5, %v8439_v7 }
 0x15b   :  { %2799 = vmatpush1.bf16.msra.mxu1 %v7426_v55 }
 0x15c   :  { %2900 = vmatprep.subr.bf16.mxu1 %v7339_v18 }
 0x1ef   :  { %v1597_v59 = vpop.f32.mrb[0].mxu0  ;;  %v1816_v60 = vpop.f32.mrb[0].mxu1 }
 0x1f0   :  { %v1599_v3 = vpop.f32.mrb[1].mxu0  ;;  %v1818_v4 = vpop.f32.mrb[1].mxu1  ;;  %v6037_v22 = vadd.f32 %v1597_v59, %v7484_v14  ;;  %v6053_v23 = vadd.f32 %v1816_v60, %v7488_v15 }
 0x1f1   :  { %v1601_v8 = vpop.f32.mrb[2].mxu0  ;;  %v1820_v9 = vpop.f32.mrb[2].mxu1  ;;  %v6038_v28 = vadd.f32 %v1599_v3, %v7492_v16  ;;  %v6054_v29 = vadd.f32 %v1818_v4, %v7496_v17 }
 0x1f2   :  { %v1603_v10 = vpop.f32.mrb[3].mxu0  ;;  %v1822_v11 = vpop.f32.mrb[3].mxu1  ;;  %v6039_v0 = vadd.f32 %v1601_v8, %v7484_v14  ;;  %v6055_v3 = vadd.f32 %v1820_v9, %v7488_v15 }
 0x1f3   :  { %v6040_v12 = vadd.f32 %v1603_v10, %v7492_v16  ;;  %v6056_v13 = vadd.f32 %v1822_v11, %v7496_v17 }
 0x1f7   :  { %v1607_v18 = vpop.f32.mrb[4].mxu0  ;;  %v1826_v20 = vpop.f32.mrb[4].mxu1 }
 0x1f8   :  { %v6041_v24 = vadd.f32 %v1607_v18, %v7484_v14  ;;  %v6057_v25 = vadd.f32 %v1826_v20, %v7488_v15  ;;  %v1609_v26 = vpop.f32.mrb[5].mxu0  ;;  %v1828_v27 = vpop.f32.mrb[5].mxu1 }
 0x1f9   :  { %v6042_v30 = vadd.f32 %v1609_v26, %v7492_v16  ;;  %v6058_v31 = vadd.f32 %v1828_v27, %v7496_v17  ;;  %v1611_v32 = vpop.f32.mrb[6].mxu0  ;;  %v1830_v33 = vpop.f32.mrb[6].mxu1 }
 0x1fa   :  { %v1855_v34 = vcombine.low %v6037_v22, %v6041_v24  ;;  %v1856_v38 = vcombine.high %v6037_v22, %v6041_v24  ;;  %v2127_v41 = vcombine.low %v6053_v23, %v6057_v25  ;;  %v2128_v48 = vcombine.high %v6053_v23, %v6057_v25  ;;  %v1613_v57 = vpop.f32.mrb[7].mxu0  ;;  %v1832_v59 = vpop.f32.mrb[7].mxu1 }
 0x1fb   :  { %v1991_v60 = vcombine.low %v6038_v28, %v6042_v30  ;;  %v1992_v61 = vcombine.high %v6038_v28, %v6042_v30  ;;  %v2263_v62 = vcombine.low %v6054_v29, %v6058_v31  ;;  %v2264_v63 = vcombine.high %v6054_v29, %v6058_v31 }
 0x1fc   :  { %v7515_v4 = vrot.slane %v1856_v38, %v7499_v19  ;;  %v7518_v5 = vrot.slane %v2128_v48, %v7499_v19  ;;  %v6043_v8 = vadd.f32 %v1611_v32, %v7484_v14  ;;  %v6059_v9 = vadd.f32 %v1830_v33, %v7488_v15 }
 0x1fd   :  { %v7523_v18 = vrot.slane %v1992_v61, %v7499_v19  ;;  %v7526_v20 = vrot.slane %v2264_v63, %v7499_v19  ;;  %v6044_v22 = vadd.f32 %v1613_v57, %v7492_v16  ;;  %v6060_v23 = vadd.f32 %v1832_v59, %v7496_v17 }
 0x1fe   :  { %v7533_v24 = vrot.slane %v1855_v34, %v7499_v19  ;;  %v7536_v10 = vrot.slane %v2127_v41, %v7499_v19  ;;  %v7539_v11 = vrot.slane %v1991_v60, %v7499_v19  ;;  %v7542_v25 = vrot.slane %v2263_v62, %v7499_v19 }
 0x1ff   :  { %v1617_v26 = vpop.f32.mrb[8].mxu0  ;;  %v1836_v27 = vpop.f32.mrb[8].mxu1  ;;  %v1871_v28 = vcombine.low %v6039_v0, %v6043_v8  ;;  %v1872_v29 = vcombine.high %v6039_v0, %v6043_v8  ;;  %v2143_v30 = vcombine.low %v6055_v3, %v6059_v9  ;;  %v2144_v31 = vcombine.high %v6055_v3, %v6059_v9 }
 0x200   :  { %v1619_v32 = vpop.f32.mrb[9].mxu0  ;;  %v1838_v33 = vpop.f32.mrb[9].mxu1  ;;  %v2007_v38 = vcombine.low %v6040_v12, %v6044_v22  ;;  %v2008_v34 = vcombine.high %v6040_v12, %v6044_v22  ;;  %v2279_v48 = vcombine.low %v6056_v13, %v6060_v23  ;;  %v2280_v57 = vcombine.high %v6056_v13, %v6060_v23 }
 0x201   :  { %v1621_v41 = vpop.f32.mrb[10].mxu0  ;;  %v1840_v59 = vpop.f32.mrb[10].mxu1  ;;  %v7545_v60 = vrot.slane %v1871_v28, %v7499_v19  ;;  %v7548_v61 = vrot.slane %v1872_v29, %v7499_v19  ;;  %v7551_v62 = vrot.slane %v2143_v30, %v7499_v19  ;;  %v7554_v63 = vrot.slane %v2144_v31, %v7499_v19 }
 0x202   :  { %v1623_v0 = vpop.f32.mrb[11].mxu0  ;;  %v1842_v3 = vpop.f32.mrb[11].mxu1  ;;  %v2015_v12 = vrot.slane %v2007_v38, %v7499_v19  ;;  %v7558_v13 = vrot.slane %v2008_v34, %v7499_v19  ;;  %v2287_v8 = vrot.slane %v2279_v48, %v7499_v19  ;;  %v7562_v9 = vrot.slane %v2280_v57, %v7499_v19 }
 0x203   :  { %v6045_v22 = vadd.f32 %v1617_v26, %v7484_v14  ;;  %v6061_v23 = vadd.f32 %v1836_v27, %v7488_v15  ;;  %v6046_v28 = vadd.f32 %v1619_v32, %v7492_v16  ;;  %v6062_v29 = vadd.f32 %v1838_v33, %v7496_v17 }
 0x204   :  { %v7569_v30 = vadd.f32 %v1621_v41, %v7484_v14  ;;  %v7572_v31 = vadd.f32 %v1840_v59, %v7488_v15  ;;  %v7575_v38 = vadd.f32 %v1623_v0, %v7492_v16  ;;  %v7578_v34 = vadd.f32 %v1842_v3, %v7496_v17 }
 0x205   :  { %v1919_v26 = vcombine.low %v7533_v24, %v7545_v60  ;;  %v2055_v27 = vcombine.low %v7539_v11, %v2015_v12  ;;  %v2191_v32 = vcombine.low %v7536_v10, %v7551_v62  ;;  %v2327_v33 = vcombine.low %v7542_v25, %v2287_v8 }
 0x206   :  { %v1920_v41 = vcombine.high %v7533_v24, %v7545_v60  ;;  %v2192_v59 = vcombine.high %v7536_v10, %v7551_v62  ;;  %v2056_v0 = vcombine.high %v7539_v11, %v2015_v12  ;;  %v2328_v3 = vcombine.high %v7542_v25, %v2287_v8 }
 0x207   :  { %v1627_v48 = vpop.f32.mrb[12].mxu0  ;;  %v1846_v57 = vpop.f32.mrb[12].mxu1  ;;  %v7595_v56 = vrot.slane %v1919_v26, %v7502_v21  ;;  %v7598_v58 = vrot.slane %v2055_v27, %v7502_v21  ;;  %v7603_v25 = vrot.slane %v2191_v32, %v7502_v21  ;;  %v7606_v62 = vrot.slane %v2327_v33, %v7502_v21 }
 0x208   :  { %v6049_v2 = vadd.f32 %v1627_v48, %v7484_v14  ;;  %v6065_v7 = vadd.f32 %v1846_v57, %v7488_v15  ;;  %v1629_v6 = vpop.f32.mrb[13].mxu0  ;;  %v1848_v1 = vpop.f32.mrb[13].mxu1 }
 0x209   :  { %v6050_v24 = vadd.f32 %v1629_v6, %v7492_v16  ;;  %v6066_v10 = vadd.f32 %v1848_v1, %v7496_v17  ;;  %v1631_v60 = vpop.f32.mrb[14].mxu0  ;;  %v1850_v11 = vpop.f32.mrb[14].mxu1 }
 0x20a   :  { %v1887_v12 = vcombine.low %v6045_v22, %v6049_v2  ;;  %v1888_v8 = vcombine.high %v6045_v22, %v6049_v2  ;;  %v2159_v48 = vcombine.low %v6061_v23, %v6065_v7  ;;  %v2160_v26 = vcombine.high %v6061_v23, %v6065_v7  ;;  %v1633_v57 = vpop.f32.mrb[15].mxu0  ;;  %v1852_v55 = vpop.f32.mrb[15].mxu1 }
 0x20b   :  { %v2023_v27 = vcombine.low %v6046_v28, %v6050_v24  ;;  %v2024_v54 = vcombine.high %v6046_v28, %v6050_v24  ;;  %v2295_v53 = vcombine.low %v6062_v29, %v6066_v10  ;;  %v2296_v6 = vcombine.high %v6062_v29, %v6066_v10 }
 0x20c   :  { %v1895_v1 = vrot.slane %v1887_v12, %v7499_v19  ;;  %v7610_v51 = vrot.slane %v1888_v8, %v7499_v19  ;;  %v2167_v32 = vrot.slane %v2159_v48, %v7499_v19  ;;  %v7614_v33 = vrot.slane %v2160_v26, %v7499_v19 }
 0x20d   :  { %v2031_v2 = vrot.slane %v2023_v27, %v7499_v19  ;;  %v7618_v7 = vrot.slane %v2024_v54, %v7499_v19  ;;  %v2303_v22 = vrot.slane %v2295_v53, %v7499_v19  ;;  %v7622_v23 = vrot.slane %v2296_v6, %v7499_v19 }
 0x20e   :  { %v6051_v28 = vadd.f32 %v1631_v60, %v7484_v14  ;;  %v6067_v29 = vadd.f32 %v1850_v11, %v7488_v15  ;;  %v6052_v24 = vadd.f32 %v1633_v57, %v7492_v16  ;;  %v6068_v10 = vadd.f32 %v1852_v55, %v7496_v17 }
 0x20f   :  { %v2661_v12 = vpop.f32.mrb[16].mxu0  ;;  %v7629_v8 = vrot.slane %v1920_v41, %v7502_v21  ;;  %v7632_v54 = vrot.slane %v2192_v59, %v7502_v21  ;;  %v7635_v53 = vrot.slane %v2056_v0, %v7502_v21  ;;  %v7638_v48 = vrot.slane %v2328_v3, %v7502_v21 }
 0x210   :  { %v1903_v14 = vcombine.low %v7569_v30, %v6051_v28  ;;  %v1904_v15 = vcombine.high %v7569_v30, %v6051_v28  ;;  %v2175_v16 = vcombine.low %v7572_v31, %v6067_v29  ;;  %v2176_v55 = vcombine.high %v7572_v31, %v6067_v29  ;;  %v2663_v17 = vpop.f32.mrb[17].mxu0 }
 0x211   :  { %v2039_v41 = vcombine.low %v7575_v38, %v6052_v24  ;;  %v2040_v59 = vcombine.high %v7575_v38, %v6052_v24  ;;  %v2311_v60 = vcombine.low %v7578_v34, %v6068_v10  ;;  %v2312_v0 = vcombine.high %v7578_v34, %v6068_v10  ;;  %v2665_v11 = vpop.f32.mrb[18].mxu0  ;;  %v2702_v3 = vpop.f32.mrb[16].mxu1 }
 0x212   :  { %v1911_v26 = vrot.slane %v1903_v14, %v7499_v19  ;;  %v7650_v57 = vrot.slane %v1904_v15, %v7499_v19  ;;  %v2183_v30 = vrot.slane %v2175_v16, %v7499_v19  ;;  %v7654_v31 = vrot.slane %v2176_v55, %v7499_v19  ;;  %v2666_v27 = vpop.f32.mrb[19].mxu0  ;;  %v2704_v6 = vpop.f32.mrb[17].mxu1 }
 0x213   :  { %v2047_v38 = vrot.slane %v2039_v41, %v7499_v19  ;;  %v7658_v28 = vrot.slane %v2040_v59, %v7499_v19  ;;  %v2319_v34 = vrot.slane %v2311_v60, %v7499_v19  ;;  %v7662_v29 = vrot.slane %v2312_v0, %v7499_v19  ;;  %v2706_v24 = vpop.f32.mrb[18].mxu1 }
 0x214   :  { %v1951_v10 = vcombine.low %v1895_v1, %v1911_v26  ;;  %v2223_v14 = vcombine.low %v2167_v32, %v2183_v30  ;;  %v2707_v15 = vpop.f32.mrb[19].mxu1  ;;  %v1952_v16 = vcombine.high %v1895_v1, %v1911_v26  ;;  %v2224_v11 = vcombine.high %v2167_v32, %v2183_v30 }
 0x215   :  { %v2087_v55 = vcombine.low %v2031_v2, %v2047_v38  ;;  %v2359_v52 = vcombine.low %v2303_v22, %v2319_v34  ;;  %v2088_v27 = vcombine.high %v2031_v2, %v2047_v38  ;;  %v2360_v49 = vcombine.high %v2303_v22, %v2319_v34 }
 0x216   :  { %v7665_v41 = vrot.slane %v1951_v10, %v7502_v21  ;;  %v7668_v59 = vrot.slane %v2223_v14, %v7502_v21  ;;  %v7671_v60 = vrot.slane %v1952_v16, %v7502_v21  ;;  %v7674_v19 = vrot.slane %v2224_v11, %v7502_v21 }
 0x217   :  { %v7677_v0 = vrot.slane %v2087_v55, %v7502_v21  ;;  %v7680_v1 = vrot.slane %v2359_v52, %v7502_v21  ;;  %v7683_v32 = vrot.slane %v2088_v27, %v7502_v21  ;;  %v7686_v2 = vrot.slane %v2360_v49, %v7502_v21 }
 0x218   :  { %v1983_v22 = vcombine.low %v7595_v56, %v7665_v41  ;;  %v2255_v26 = vcombine.low %v7603_v25, %v7668_v59  ;;  %v1984_v30 = vcombine.high %v7595_v56, %v7665_v41 }
 0x219   :  { %v2119_v52 = vcombine.low %v7598_v58, %v7677_v0  ;;  %v2391_v34 = vcombine.low %v7606_v62, %v7680_v1  ;;  %v2392_v24 = vcombine.high %v7606_v62, %v7680_v1 }
 0x21a   :  { %v2709_v10 = vadd.f32 %v2661_v12, %v1983_v22  ;;  %v7704_v14 = vadd.f32 %v2702_v3, %v2255_v26 }
 0x21b   :  { %v2710_v11 = vadd.f32 %v2663_v17, %v2119_v52  ;;  %v2712_v55 = vadd.f32 %v2704_v6, %v2391_v34  ;;  %v1935_v6 = vcombine.low %v7515_v4, %v7548_v61  ;;  %v1967_v52 = vcombine.low %v7610_v51, %v7650_v57 }
 0x21c   :  { %v5731_v38 = vmul.f32 -1.442695, %v2709_v10  ;;  %v2207_v34 = vcombine.low %v7518_v5, %v7554_v63  ;;  %v2239_v10 = vcombine.low %v7614_v33, %v7654_v31 }
 0x21d   :  { %v5732_v22 = vmul.f32 -1.442695, %v2710_v11  ;;  %v5733_v26 = vmul.f32 -1.442695, %v2712_v55  ;;  %v2071_v11 = vcombine.low %v7523_v18, %v7558_v13  ;;  %v2103_v55 = vcombine.low %v7618_v7, %v7658_v28 }
 0x21e   :  { %6892 = vpow2.f32 %v5731_v38  ;;  %v7735_v38 = vrot.slane %v1935_v6, %v7502_v21  ;;  %v7738_v17 = vrot.slane %v1967_v52, %v7502_v21  ;;  %v7741_v16 = vrot.slane %v2207_v34, %v7502_v21 }
 0x21f   :  { %6894 = vpow2.f32 %v5732_v22  ;;  %v7744_v22 = vrot.slane %v2239_v10, %v7502_v21  ;;  %v7747_v3 = vrot.slane %v2071_v11, %v7502_v21  ;;  %v7750_v12 = vrot.slane %v2103_v55, %v7502_v21 }
 0x220   :  { %6896 = vpow2.f32 %v5733_v26  ;;  %v2343_v26 = vcombine.low %v7526_v20, %v7562_v9  ;;  %v2375_v52 = vcombine.low %v7622_v23, %v7662_v29  ;;  %v1936_v10 = vcombine.high %v7515_v4, %v7548_v61 }
 0x221   :  { %8483 = vst [vmem:[#allocation24_spill] sm:$0xff] %v7750_v12  ;;  %v1968_v61 = vcombine.high %v7610_v51, %v7650_v57  ;;  %v2208_v55 = vcombine.high %v7518_v5, %v7554_v63  ;;  %v2072_v6 = vcombine.high %v7523_v18, %v7558_v13  ;;  %v2344_v5 = vcombine.high %v7526_v20, %v7562_v9  ;;  %v7841_v9 = vld [vmem:[#allocation8 + $0x8] ss:$16 sps:$4 sm:$0xff]  }
 0x222   :  { %v7767_v49 = vrot.slane %v2343_v26, %v7502_v21  ;;  %v7772_v27 = vrot.slane %v2375_v52, %v7502_v21  ;;  %v7777_v4 = vrot.slane %v1936_v10, %v7502_v21  ;;  %v2240_v26 = vcombine.high %v7614_v33, %v7654_v31 }
 0x223   :  { %v2104_v52 = vcombine.high %v7618_v7, %v7658_v28  ;;  %v7794_v51 = vrot.slane %v1968_v61, %v7502_v21  ;;  %v7799_v63 = vrot.slane %v2208_v55, %v7502_v21  ;;  %v7805_v13 = vrot.slane %v2072_v6, %v7502_v21 }
 0x224   :  { %8484 = vst [vmem:[#allocation25_spill] sm:$0xff] %v7767_v49  ;;  %8485 = vst [vmem:[#allocation26_spill] sm:$0xff] %v7772_v27  ;;  %v7802_v18 = vrot.slane %v2240_v26, %v7502_v21  ;;  %v7813_v31 = vrot.slane %v2344_v5, %v7502_v21  ;;  %v2376_v20 = vcombine.high %v7622_v23, %v7662_v29  ;;  %6898 = vtanh.f32 %v7704_v14  ;;  %v7838_v29 = vld [vmem:[#allocation8] ss:$16 sps:$4 sm:$0xff]  }
 0x225   :  { %8486 = vst [vmem:[#allocation27_spill] sm:$0xff] %v7777_v4  ;;  %8487 = vst [vmem:[#allocation28_spill] sm:$0xff] %v7794_v51  ;;  %v7808_v33 = vrot.slane %v2104_v52, %v7502_v21 }
 0x226   :  { %8488 = vst [vmem:[#allocation29_spill] sm:$0xff] %v7799_v63  ;;  %8489 = vst [vmem:[#allocation30_spill] sm:$0xff] %v7802_v18  ;;  %v7827_v23 = vrot.slane %v2376_v20, %v7502_v21 }
 0x227   :  { %8490 = vst [vmem:[#allocation31_spill] sm:$0xff] %v7805_v13  ;;  %8491 = vst [vmem:[#allocation32_spill] sm:$0xff] %v7808_v33  ;;  %v8506_v33 = vcombine.low %v7638_v48, %v7686_v2 }
 0x228   :  { %v6893_v7 = vpop.eup %6892  ;;  %8492 = vst [vmem:[#allocation33_spill] sm:$0xff] %v7813_v31  ;;  %8493 = vst [vmem:[#allocation34_spill] sm:$0xff] %v7827_v23 }
 0x229   :  { %v6895_v28 = vpop.eup %6894  ;;  %v2716_v55 = vadd.f32 1.0, %v6893_v7 }
 0x22a   :  { %v6897_v52 = vpop.eup %6896  ;;  %v2722_v5 = vadd.f32 1.0, %v6895_v28 }
 0x22b   :  { %6900 = vrcp.f32 %v2716_v55  ;;  %v2729_v57 = vadd.f32 1.0, %v6897_v52  ;;  %v7855_v52 = vld [vmem:[#allocation8 + $0x28] ss:$16 sps:$4 sm:$0xff]  }
 0x22c   :  { %6902 = vrcp.f32 %v2722_v5 }
 0x22d   :  { %6904 = vrcp.f32 %v2729_v57  ;;  %v7847_v57 = vld [vmem:[#allocation8 + $0x2c] ss:$16 sps:$4 sm:$0xff]  }
 0x22e   :  { %v6899_v61 = vpop.eup %6898 }
 0x235   :  { %v6901_v26 = vpop.eup %6900 }
 0x236   :  { %v6903_v6 = vpop.eup %6902  ;;  %v2733_v28 = vmul.f32 %v6901_v26, %v6899_v61  ;;  %v8494_v61 = vmov 0   ;;  %v7852_v26 = vld [vmem:[#allocation8 + $0x20] ss:$16 sps:$4 sm:$0xff]  }
 0x237   :  { %v2732_v14 = vmul.f32 0.0, %v6903_v6  ;;  %v6905_v21 = vpop.eup %6904  ;;  %v7844_v6 = vld [vmem:[#allocation8 + $0x24] ss:$16 sps:$4 sm:$0xff]  }
 0x239   :  { %v7835_v10 = vadd.f32 %v2733_v28, %v2732_v14  ;;  %v7858_v28 = vld [vmem:[#allocation8 + $0x44] ss:$16 sps:$4 sm:$0xff]   ;;  %v7861_v14 = vld [vmem:[#allocation8 + $0x4c] ss:$16 sps:$4 sm:$0xff]  }
 0x23b   :  { %6906 = vtanh.f32 %v7835_v10 }
 0x245   :  { %v6907_v20 = vpop.eup %6906 }
 0x246   :  { %v2736_v55 = vmul.f32 %v6907_v20, %v6905_v21  ;;  %v7864_v21 = vld [vmem:[#allocation8 + $0x40] ss:$16 sps:$4 sm:$0xff]   ;;  %v7867_v20 = vld [vmem:[#allocation8 + $0x48] ss:$16 sps:$4 sm:$0xff]  }
 0x248   :  { %v2742_v5 = vpack.c.bf16 %v2736_v55, %v2736_v55  ;;  %v7870_v55 = vld [vmem:[#allocation8 + $0x64] ss:$16 sps:$4 sm:$0xff]  }
 0x24a   :  { %2776 = vmatmul.mubr.bf16.vlgmr.msra.gmra.mrb[20].mxu0 %v2742_v5  ;;  %2817 = vmatmul.mubr.bf16.vlgmr.msra.gmra.mrb[20].mxu1 %v2742_v5  ;;  %v7873_v5 = vld [vmem:[#allocation8 + $0x6c] ss:$16 sps:$4 sm:$0xff]  }
 0x24b   :  { %2860 = vmatpush1.bf16.msra.mxu0 %v7838_v29  ;;  %2901 = vmatpush1.bf16.msra.mxu1 %v7841_v9 }
 0x24c   :  { %2861 = vmatprep.subr.bf16.mxu0 %v7844_v6  ;;  %2902 = vmatprep.subr.bf16.mxu1 %v7847_v57 }
 0x24d   :  { %2891 = vmatprep.mubr.bf16.mxu0 %v8494_v61  ;;  %2932 = vmatprep.mubr.bf16.mxu1 %v8494_v61 }
 0x24f   :  { %2862 = vmatpush1.bf16.msra.mxu0 %v7852_v26  ;;  %2903 = vmatpush1.bf16.msra.mxu1 %v7855_v52 }
 0x250   :  { %2863 = vmatprep.subr.bf16.mxu0 %v7858_v28  ;;  %2904 = vmatprep.subr.bf16.mxu1 %v7861_v14 }
 0x253   :  { %2864 = vmatpush1.bf16.msra.mxu0 %v7864_v21  ;;  %2905 = vmatpush1.bf16.msra.mxu1 %v7867_v20 }
 0x254   :  { %2865 = vmatprep.subr.bf16.mxu0 %v7870_v55  ;;  %2906 = vmatprep.subr.bf16.mxu1 %v7873_v5 }
 0x257   :  { %2866 = vmatpush1.bf16.msra.mxu0 %v7374_v35  ;;  %2907 = vmatpush1.bf16.msra.mxu1 %v7380_v37  ;;  %v8495_v35 = vld [vmem:[#allocation17_spill] sm:$0xff]  ;;  %v8497_v37 = vld [vmem:[#allocation18_spill] sm:$0xff] }
 0x258   :  { %2867 = vmatprep.subr.bf16.mxu0 %v7376_v36  ;;  %2908 = vmatprep.subr.bf16.mxu1 %v7386_v40  ;;  %v8496_v36 = vld [vmem:[#allocation19_spill] sm:$0xff]  ;;  %v8499_v40 = vld [vmem:[#allocation21_spill] sm:$0xff] }
 0x25b   :  { %2868 = vmatpush1.bf16.msra.mxu0 %v7384_v39  ;;  %2909 = vmatpush1.bf16.msra.mxu1 %v7392_v43  ;;  %v8498_v39 = vld [vmem:[#allocation20_spill] sm:$0xff] }
 0x25c   :  { %2869 = vmatprep.subr.bf16.mxu0 %v7390_v42  ;;  %2910 = vmatprep.subr.bf16.mxu1 %v7395_v44  ;;  %v8500_v42 = vld [vmem:[#allocation22_spill] sm:$0xff]  ;;  %v7897_v44 = vld [vmem:[#allocation8 + $0xc] ss:$16 sps:$4 sm:$0xff]  }
 0x25d   :  { %v7894_v43 = vld [vmem:[#allocation8 + $0x4] ss:$16 sps:$4 sm:$0xff]  }
 0x25f   :  { %2870 = vmatpush1.bf16.msra.mxu0 %v7398_v45  ;;  %2911 = vmatpush1.bf16.msra.mxu1 %v7404_v47 }
 0x260   :  { %2871 = vmatprep.subr.bf16.mxu0 %v7400_v46  ;;  %2912 = vmatprep.subr.bf16.mxu1 %v7410_v50  ;;  %v8501_v50 = vcombine.high %v7603_v25, %v7668_v59 }
 0x263   :  { %2872 = vmatpush1.bf16.msra.mxu0 %v8495_v35  ;;  %2913 = vmatpush1.bf16.msra.mxu1 %v8496_v36 }
 0x264   :  { %2873 = vmatprep.subr.bf16.mxu0 %v8497_v37  ;;  %2914 = vmatprep.subr.bf16.mxu1 %v8498_v39  ;;  %v8502_v39 = vcombine.high %v7598_v58, %v7677_v0 }
 0x267   :  { %2874 = vmatpush1.bf16.msra.mxu0 %v8499_v40  ;;  %2915 = vmatpush1.bf16.msra.mxu1 %v8500_v42 }
 0x268   :  { %2975 = vmatprep.subr.bf16.mxu0 %v7894_v43  ;;  %3016 = vmatprep.subr.bf16.mxu1 %v7897_v44 }
 0x31d   :  { %v2777_v45 = vpop.f32.mrb[20].mxu0  ;;  %v2818_v46 = vpop.f32.mrb[20].mxu1 }
 0x31e   :  { %v2825_v47 = vadd.f32 %v2777_v45, %v1984_v30  ;;  %v2827_v35 = vadd.f32 %v2818_v46, %v8501_v50  ;;  %v2779_v36 = vpop.f32.mrb[21].mxu0  ;;  %v2820_v37 = vpop.f32.mrb[21].mxu1  ;;  %v7933_v50 = vld [vmem:[#allocation8 + $0x68] ss:$16 sps:$4 sm:$0xff]  }
 0x31f   :  { %v2826_v7 = vadd.f32 %v2779_v36, %v8502_v39  ;;  %v2828_v34 = vadd.f32 %v2820_v37, %v2392_v24  ;;  %v2781_v11 = vpop.f32.mrb[22].mxu0  ;;  %v2822_v15 = vpop.f32.mrb[22].mxu1  ;;  %v7939_v36 = vld [vmem:[#allocation8 + $0x8c] ss:$16 sps:$4 sm:$0xff]   ;;  %v7942_v37 = vld [vmem:[#allocation8 + $0x80] ss:$16 sps:$4 sm:$0xff]  }
 0x320   :  { %v5734_v23 = vmul.f32 -1.442695, %v2825_v47  ;;  %v2782_v31 = vpop.f32.mrb[23].mxu0  ;;  %v2823_v56 = vpop.f32.mrb[23].mxu1  ;;  %v7945_v39 = vld [vmem:[#allocation8 + $0x88] ss:$16 sps:$4 sm:$0xff]  }
 0x321   :  { %v5735_v41 = vmul.f32 -1.442695, %v2826_v7  ;;  %v5736_v25 = vmul.f32 -1.442695, %v2828_v34  ;;  %v7948_v56 = vld [vmem:[#allocation8 + $0xa4] ss:$16 sps:$4 sm:$0xff]  }
 0x322   :  { %6908 = vpow2.f32 %v5734_v23 }
 0x323   :  { %6910 = vpow2.f32 %v5735_v41  ;;  %v7951_v41 = vld [vmem:[#allocation8 + $0xac] ss:$16 sps:$4 sm:$0xff]  }
 0x324   :  { %6912 = vpow2.f32 %v5736_v25  ;;  %v7954_v25 = vld [vmem:[#allocation8 + $0xa0] ss:$16 sps:$4 sm:$0xff]  }
 0x325   :  { %6914 = vtanh.f32 %v2827_v35  ;;  %v7936_v35 = vld [vmem:[#allocation8 + $0x84] ss:$16 sps:$4 sm:$0xff]  }
 0x32c   :  { %v6909_v59 = vpop.eup %6908 }
 0x32d   :  { %v6911_v30 = vpop.eup %6910  ;;  %v2832_v45 = vadd.f32 1.0, %v6909_v59  ;;  %v7957_v59 = vld [vmem:[#allocation8 + $0xa8] ss:$16 sps:$4 sm:$0xff]  }
 0x32e   :  { %v2838_v58 = vadd.f32 1.0, %v6911_v30  ;;  %v6913_v0 = vpop.eup %6912  ;;  %v7960_v30 = vld [vmem:[#allocation8 + $0xc4] ss:$16 sps:$4 sm:$0xff]  }
 0x32f   :  { %6916 = vrcp.f32 %v2832_v45  ;;  %v6915_v62 = vpop.eup %6914  ;;  %v2845_v11 = vadd.f32 1.0, %v6913_v0  ;;  %v7963_v45 = vld [vmem:[#allocation8 + $0xcc] ss:$16 sps:$4 sm:$0xff]   ;;  %v7969_v0 = vld [vmem:[#allocation8 + $0xc8] ss:$16 sps:$4 sm:$0xff]  }
 0x330   :  { %6918 = vrcp.f32 %v2838_v58  ;;  %v7966_v58 = vld [vmem:[#allocation8 + $0xc0] ss:$16 sps:$4 sm:$0xff]  }
 0x331   :  { %6920 = vrcp.f32 %v2845_v11  ;;  %v8503_v11 = vcombine.low %v7629_v8, %v7671_v60 }
 0x339   :  { %v6917_v1 = vpop.eup %6916 }
 0x33a   :  { %v6919_v24 = vpop.eup %6918  ;;  %v2849_v15 = vmul.f32 %v6917_v1, %v6915_v62  ;;  %v7972_v62 = vld [vmem:[#allocation8 + $0xe4] ss:$16 sps:$4 sm:$0xff]   ;;  %v7975_v1 = vld [vmem:[#allocation8 + $0xec] ss:$16 sps:$4 sm:$0xff]  }
 0x33b   :  { %v2848_v31 = vmul.f32 %v6919_v24, %v7835_v10  ;;  %v6921_v34 = vpop.eup %6920  ;;  %v7930_v10 = vld [vmem:[#allocation8 + $0x60] ss:$16 sps:$4 sm:$0xff]  }
 0x33d   :  { %v7913_v7 = vadd.f32 %v2849_v15, %v2848_v31 }
 0x33f   :  { %6922 = vtanh.f32 %v7913_v7 }
 0x349   :  { %v6923_v23 = vpop.eup %6922 }
 0x34a   :  { %v2852_v46 = vmul.f32 %v6923_v23, %v6921_v34  ;;  %v8504_v34 = vcombine.low %v7632_v54, %v7674_v19 }
 0x34c   :  { %v2858_v47 = vpack.c.bf16 %v2852_v46, %v2852_v46 }
 0x34e   :  { %2892 = vmatmul.mubr.bf16.vlgmr.msra.gmra.mrb[24].mxu0 %v2858_v47  ;;  %2933 = vmatmul.mubr.bf16.vlgmr.msra.gmra.mrb[24].mxu1 %v2858_v47 }
 0x34f   :  { %2976 = vmatpush1.bf16.msra.mxu0 %v7838_v29  ;;  %3017 = vmatpush1.bf16.msra.mxu1 %v7841_v9 }
 0x350   :  { %2977 = vmatprep.subr.bf16.mxu0 %v7844_v6  ;;  %3018 = vmatprep.subr.bf16.mxu1 %v7847_v57 }
 0x351   :  { %3007 = vmatprep.mubr.bf16.mxu0 %v8494_v61  ;;  %3048 = vmatprep.mubr.bf16.mxu1 %v8494_v61 }
 0x353   :  { %2978 = vmatpush1.bf16.msra.mxu0 %v7852_v26  ;;  %3019 = vmatpush1.bf16.msra.mxu1 %v7855_v52 }
 0x354   :  { %2979 = vmatprep.subr.bf16.mxu0 %v7858_v28  ;;  %3020 = vmatprep.subr.bf16.mxu1 %v7861_v14 }
 0x357   :  { %2980 = vmatpush1.bf16.msra.mxu0 %v7864_v21  ;;  %3021 = vmatpush1.bf16.msra.mxu1 %v7867_v20 }
 0x358   :  { %2981 = vmatprep.subr.bf16.mxu0 %v7870_v55  ;;  %3022 = vmatprep.subr.bf16.mxu1 %v7873_v5 }
 0x35b   :  { %2982 = vmatpush1.bf16.msra.mxu0 %v7930_v10  ;;  %3023 = vmatpush1.bf16.msra.mxu1 %v7933_v50 }
 0x35c   :  { %2983 = vmatprep.subr.bf16.mxu0 %v7936_v35  ;;  %3024 = vmatprep.subr.bf16.mxu1 %v7939_v36 }
 0x35f   :  { %2984 = vmatpush1.bf16.msra.mxu0 %v7942_v37  ;;  %3025 = vmatpush1.bf16.msra.mxu1 %v7945_v39 }
 0x360   :  { %2985 = vmatprep.subr.bf16.mxu0 %v7948_v56  ;;  %3026 = vmatprep.subr.bf16.mxu1 %v7951_v41 }
 0x363   :  { %2986 = vmatpush1.bf16.msra.mxu0 %v7954_v25  ;;  %3027 = vmatpush1.bf16.msra.mxu1 %v7957_v59 }
 0x364   :  { %2987 = vmatprep.subr.bf16.mxu0 %v7960_v30  ;;  %3028 = vmatprep.subr.bf16.mxu1 %v7963_v45 }
 0x367   :  { %2988 = vmatpush1.bf16.msra.mxu0 %v7966_v58  ;;  %3029 = vmatpush1.bf16.msra.mxu1 %v7969_v0 }
 0x368   :  { %2989 = vmatprep.subr.bf16.mxu0 %v7972_v62  ;;  %3030 = vmatprep.subr.bf16.mxu1 %v7975_v1 }
 0x36b   :  { %2990 = vmatpush1.bf16.msra.mxu0 %v8499_v40  ;;  %3031 = vmatpush1.bf16.msra.mxu1 %v8500_v42  ;;  %v8505_v40 = vcombine.low %v7635_v53, %v7683_v32 }
 0x36c   :  { %3091 = vmatprep.subr.bf16.mxu0 %v7894_v43  ;;  %3132 = vmatprep.subr.bf16.mxu1 %v7897_v44 }
 0x421   :  { %v2893_v24 = vpop.f32.mrb[24].mxu0  ;;  %v2934_v15 = vpop.f32.mrb[24].mxu1 }
 0x422   :  { %v2941_v31 = vadd.f32 %v2893_v24, %v8503_v11  ;;  %v2943_v23 = vadd.f32 %v2934_v15, %v8504_v34  ;;  %v2895_v46 = vpop.f32.mrb[25].mxu0  ;;  %v2936_v47 = vpop.f32.mrb[25].mxu1 }
 0x423   :  { %v2942_v42 = vadd.f32 %v2895_v46, %v8505_v40  ;;  %v2944_v13 = vadd.f32 %v2936_v47, %v8506_v33  ;;  %v2897_v18 = vpop.f32.mrb[26].mxu0  ;;  %v2938_v63 = vpop.f32.mrb[26].mxu1 }
 0x424   :  { %v5737_v51 = vmul.f32 -1.442695, %v2941_v31  ;;  %v2898_v4 = vpop.f32.mrb[27].mxu0  ;;  %v2939_v27 = vpop.f32.mrb[27].mxu1 }
 0x425   :  { %v5738_v24 = vmul.f32 -1.442695, %v2942_v42  ;;  %v5739_v11 = vmul.f32 -1.442695, %v2944_v13 }
 0x426   :  { %6924 = vpow2.f32 %v5737_v51 }
 0x427   :  { %6926 = vpow2.f32 %v5738_v24  ;;  %v8507_v24 = vcombine.high %v7629_v8, %v7671_v60 }
 0x428   :  { %6928 = vpow2.f32 %v5739_v11 }
 0x429   :  { %6930 = vtanh.f32 %v2943_v23 }
 0x430   :  { %v6925_v15 = vpop.eup %6924 }
 0x431   :  { %v6927_v34 = vpop.eup %6926  ;;  %v2948_v49 = vadd.f32 1.0, %v6925_v15  ;;  %v8508_v15 = vcombine.high %v7632_v54, %v7674_v19 }
 0x432   :  { %v2954_v12 = vadd.f32 1.0, %v6927_v34  ;;  %v6929_v46 = vpop.eup %6928 }
 0x433   :  { %6932 = vrcp.f32 %v2948_v49  ;;  %v6931_v40 = vpop.eup %6930  ;;  %v2961_v31 = vadd.f32 1.0, %v6929_v46  ;;  %v8028_v49 = vld [vmem:[#allocation8 + $0xe0] ss:$16 sps:$4 sm:$0xff]  }
 0x434   :  { %6934 = vrcp.f32 %v2954_v12  ;;  %v8031_v12 = vld [vmem:[#allocation8 + $0xe8] ss:$16 sps:$4 sm:$0xff]  }
 0x435   :  { %6936 = vrcp.f32 %v2961_v31 }
 0x43d   :  { %v6933_v33 = vpop.eup %6932 }
 0x43e   :  { %v6935_v18 = vpop.eup %6934  ;;  %v2965_v63 = vmul.f32 %v6933_v33, %v6931_v40  ;;  %v8509_v33 = vcombine.high %v7635_v53, %v7683_v32 }
 0x43f   :  { %v2964_v27 = vmul.f32 %v6935_v18, %v7913_v7  ;;  %v6937_v51 = vpop.eup %6936 }
 0x441   :  { %v7995_v4 = vadd.f32 %v2965_v63, %v2964_v27  ;;  %v8510_v63 = vcombine.high %v7638_v48, %v7686_v2 }
 0x443   :  { %6938 = vtanh.f32 %v7995_v4 }
 0x44d   :  { %v6939_v13 = vpop.eup %6938 }
 0x44e   :  { %v2968_v47 = vmul.f32 %v6939_v13, %v6937_v51 }
 0x450   :  { %v2974_v23 = vpack.c.bf16 %v2968_v47, %v2968_v47 }
 0x452   :  { %3008 = vmatmul.mubr.bf16.vlgmr.msra.gmra.mrb[28].mxu0 %v2974_v23  ;;  %3049 = vmatmul.mubr.bf16.vlgmr.msra.gmra.mrb[28].mxu1 %v2974_v23 }
 0x453   :  { %3092 = vmatpush1.bf16.msra.mxu0 %v7838_v29  ;;  %3133 = vmatpush1.bf16.msra.mxu1 %v7841_v9 }
 0x454   :  { %3093 = vmatprep.subr.bf16.mxu0 %v7844_v6  ;;  %3134 = vmatprep.subr.bf16.mxu1 %v7847_v57 }
 0x455   :  { %3123 = vmatprep.mubr.bf16.mxu0 %v8494_v61  ;;  %3164 = vmatprep.mubr.bf16.mxu1 %v8494_v61 }
 0x457   :  { %3094 = vmatpush1.bf16.msra.mxu0 %v7852_v26  ;;  %3135 = vmatpush1.bf16.msra.mxu1 %v7855_v52 }
 0x458   :  { %3095 = vmatprep.subr.bf16.mxu0 %v7858_v28  ;;  %3136 = vmatprep.subr.bf16.mxu1 %v7861_v14 }
 0x45b   :  { %3096 = vmatpush1.bf16.msra.mxu0 %v7864_v21  ;;  %3137 = vmatpush1.bf16.msra.mxu1 %v7867_v20 }
 0x45c   :  { %3097 = vmatprep.subr.bf16.mxu0 %v7870_v55  ;;  %3138 = vmatprep.subr.bf16.mxu1 %v7873_v5 }
 0x45f   :  { %3098 = vmatpush1.bf16.msra.mxu0 %v7930_v10  ;;  %3139 = vmatpush1.bf16.msra.mxu1 %v7933_v50 }
 0x460   :  { %3099 = vmatprep.subr.bf16.mxu0 %v7936_v35  ;;  %3140 = vmatprep.subr.bf16.mxu1 %v7939_v36 }
 0x463   :  { %3100 = vmatpush1.bf16.msra.mxu0 %v7942_v37  ;;  %3141 = vmatpush1.bf16.msra.mxu1 %v7945_v39 }
 0x464   :  { %3101 = vmatprep.subr.bf16.mxu0 %v7948_v56  ;;  %3142 = vmatprep.subr.bf16.mxu1 %v7951_v41 }
 0x467   :  { %3102 = vmatpush1.bf16.msra.mxu0 %v7954_v25  ;;  %3143 = vmatpush1.bf16.msra.mxu1 %v7957_v59 }
 0x468   :  { %3103 = vmatprep.subr.bf16.mxu0 %v7960_v30  ;;  %3144 = vmatprep.subr.bf16.mxu1 %v7963_v45 }
 0x46b   :  { %3104 = vmatpush1.bf16.msra.mxu0 %v7966_v58  ;;  %3145 = vmatpush1.bf16.msra.mxu1 %v7969_v0 }
 0x46c   :  { %3105 = vmatprep.subr.bf16.mxu0 %v7972_v62  ;;  %3146 = vmatprep.subr.bf16.mxu1 %v7975_v1 }
 0x46f   :  { %3106 = vmatpush1.bf16.msra.mxu0 %v8028_v49  ;;  %3147 = vmatpush1.bf16.msra.mxu1 %v8031_v12 }
 0x470   :  { %3207 = vmatprep.subr.bf16.mxu0 %v7894_v43  ;;  %3248 = vmatprep.subr.bf16.mxu1 %v7897_v44 }
 0x525   :  { %v3009_v7 = vpop.f32.mrb[28].mxu0  ;;  %v3050_v42 = vpop.f32.mrb[28].mxu1 }
 0x526   :  { %v3057_v11 = vadd.f32 %v3009_v7, %v8507_v24  ;;  %v3059_v34 = vadd.f32 %v3050_v42, %v8508_v15  ;;  %v3011_v46 = vpop.f32.mrb[29].mxu0  ;;  %v3052_v40 = vpop.f32.mrb[29].mxu1 }
 0x527   :  { %v3058_v18 = vadd.f32 %v3011_v46, %v8509_v33  ;;  %v3060_v31 = vadd.f32 %v3052_v40, %v8510_v63  ;;  %v3013_v27 = vpop.f32.mrb[30].mxu0  ;;  %v3054_v51 = vpop.f32.mrb[30].mxu1 }
 0x528   :  { %v5740_v13 = vmul.f32 -1.442695, %v3057_v11  ;;  %v3014_v47 = vpop.f32.mrb[31].mxu0  ;;  %v3055_v8 = vpop.f32.mrb[31].mxu1  ;;  %v8512_v51 = vcombine.low %v7741_v16, %v7744_v22 }
 0x529   :  { %v5741_v60 = vmul.f32 -1.442695, %v3058_v18  ;;  %v5742_v54 = vmul.f32 -1.442695, %v3060_v31  ;;  %v8511_v31 = vcombine.low %v7735_v38, %v7738_v17 }
 0x52a   :  { %6940 = vpow2.f32 %v5740_v13 }
 0x52b   :  { %6942 = vpow2.f32 %v5741_v60  ;;  %v8513_v60 = vld [vmem:[#allocation24_spill] sm:$0xff] }
 0x52c   :  { %6944 = vpow2.f32 %v5742_v54  ;;  %v8514_v54 = vcombine.low %v7747_v3, %v8513_v60 }
 0x52d   :  { %6946 = vtanh.f32 %v3059_v34 }
 0x534   :  { %v6941_v19 = vpop.eup %6940 }
 0x535   :  { %v6943_v23 = vpop.eup %6942  ;;  %v3064_v7 = vadd.f32 1.0, %v6941_v19 }
 0x536   :  { %v3070_v53 = vadd.f32 1.0, %v6943_v23  ;;  %v6945_v32 = vpop.eup %6944  ;;  %v8515_v23 = vld [vmem:[#allocation25_spill] sm:$0xff] }
 0x537   :  { %6948 = vrcp.f32 %v3064_v7  ;;  %v6947_v48 = vpop.eup %6946  ;;  %v3077_v11 = vadd.f32 1.0, %v6945_v32  ;;  %v8516_v7 = vld [vmem:[#allocation26_spill] sm:$0xff] }
 0x538   :  { %6950 = vrcp.f32 %v3070_v53  ;;  %v8517_v53 = vcombine.low %v8515_v23, %v8516_v7 }
 0x539   :  { %6952 = vrcp.f32 %v3077_v11 }
 0x541   :  { %v6949_v2 = vpop.eup %6948 }
 0x542   :  { %v6951_v42 = vpop.eup %6950  ;;  %v3081_v24 = vmul.f32 %v6949_v2, %v6947_v48 }
 0x543   :  { %v3080_v15 = vmul.f32 %v6951_v42, %v7995_v4  ;;  %v6953_v40 = vpop.eup %6952 }
 0x545   :  { %v8049_v46 = vadd.f32 %v3081_v24, %v3080_v15 }
 0x547   :  { %6954 = vtanh.f32 %v8049_v46 }
 0x551   :  { %v6955_v33 = vpop.eup %6954 }
 0x552   :  { %v3084_v18 = vmul.f32 %v6955_v33, %v6953_v40 }
 0x554   :  { %v3090_v34 = vpack.c.bf16 %v3084_v18, %v3084_v18 }
 0x556   :  { %3124 = vmatmul.mubr.bf16.vlgmr.msra.gmra.mrb[32].mxu0 %v3090_v34  ;;  %3165 = vmatmul.mubr.bf16.vlgmr.msra.gmra.mrb[32].mxu1 %v3090_v34 }
 0x557   :  { %3208 = vmatpush1.bf16.msra.mxu0 %v7838_v29  ;;  %3249 = vmatpush1.bf16.msra.mxu1 %v7841_v9 }
 0x558   :  { %3209 = vmatprep.subr.bf16.mxu0 %v7844_v6  ;;  %3250 = vmatprep.subr.bf16.mxu1 %v7847_v57 }
 0x559   :  { %3239 = vmatprep.mubr.bf16.mxu0 %v8494_v61  ;;  %3280 = vmatprep.mubr.bf16.mxu1 %v8494_v61 }
 0x55b   :  { %3210 = vmatpush1.bf16.msra.mxu0 %v7852_v26  ;;  %3251 = vmatpush1.bf16.msra.mxu1 %v7855_v52 }
 0x55c   :  { %3211 = vmatprep.subr.bf16.mxu0 %v7858_v28  ;;  %3252 = vmatprep.subr.bf16.mxu1 %v7861_v14 }
 0x55f   :  { %3212 = vmatpush1.bf16.msra.mxu0 %v7864_v21  ;;  %3253 = vmatpush1.bf16.msra.mxu1 %v7867_v20 }
 0x560   :  { %3213 = vmatprep.subr.bf16.mxu0 %v7870_v55  ;;  %3254 = vmatprep.subr.bf16.mxu1 %v7873_v5 }
 0x563   :  { %3214 = vmatpush1.bf16.msra.mxu0 %v7930_v10  ;;  %3255 = vmatpush1.bf16.msra.mxu1 %v7933_v50 }
 0x564   :  { %3215 = vmatprep.subr.bf16.mxu0 %v7936_v35  ;;  %3256 = vmatprep.subr.bf16.mxu1 %v7939_v36 }
 0x567   :  { %3216 = vmatpush1.bf16.msra.mxu0 %v7942_v37  ;;  %3257 = vmatpush1.bf16.msra.mxu1 %v7945_v39 }
 0x568   :  { %3217 = vmatprep.subr.bf16.mxu0 %v7948_v56  ;;  %3258 = vmatprep.subr.bf16.mxu1 %v7951_v41 }
 0x56b   :  { %3218 = vmatpush1.bf16.msra.mxu0 %v7954_v25  ;;  %3259 = vmatpush1.bf16.msra.mxu1 %v7957_v59 }
 0x56c   :  { %3219 = vmatprep.subr.bf16.mxu0 %v7960_v30  ;;  %3260 = vmatprep.subr.bf16.mxu1 %v7963_v45 }
 0x56f   :  { %3220 = vmatpush1.bf16.msra.mxu0 %v7966_v58  ;;  %3261 = vmatpush1.bf16.msra.mxu1 %v7969_v0 }
 0x570   :  { %3221 = vmatprep.subr.bf16.mxu0 %v7972_v62  ;;  %3262 = vmatprep.subr.bf16.mxu1 %v7975_v1 }
 0x573   :  { %3222 = vmatpush1.bf16.msra.mxu0 %v8028_v49  ;;  %3263 = vmatpush1.bf16.msra.mxu1 %v8031_v12 }
 0x574   :  { %3323 = vmatprep.subr.bf16.mxu0 %v7894_v43  ;;  %3364 = vmatprep.subr.bf16.mxu1 %v7897_v44 }
 0x629   :  { %v3125_v4 = vpop.f32.mrb[32].mxu0  ;;  %v3166_v63 = vpop.f32.mrb[32].mxu1 }
 0x62a   :  { %v3173_v27 = vadd.f32 %v3125_v4, %v8511_v31  ;;  %v3175_v13 = vadd.f32 %v3166_v63, %v8512_v51  ;;  %v3127_v47 = vpop.f32.mrb[33].mxu0  ;;  %v3168_v8 = vpop.f32.mrb[33].mxu1 }
 0x62b   :  { %v3174_v19 = vadd.f32 %v3127_v47, %v8514_v54  ;;  %v3176_v32 = vadd.f32 %v3168_v8, %v8517_v53  ;;  %v3129_v48 = vpop.f32.mrb[34].mxu0  ;;  %v3170_v2 = vpop.f32.mrb[34].mxu1 }
 0x62c   :  { %v5743_v42 = vmul.f32 -1.442695, %v3173_v27  ;;  %v3130_v24 = vpop.f32.mrb[35].mxu0  ;;  %v3171_v11 = vpop.f32.mrb[35].mxu1 }
 0x62d   :  { %v5744_v15 = vmul.f32 -1.442695, %v3174_v19  ;;  %v5745_v40 = vmul.f32 -1.442695, %v3176_v32  ;;  %v8519_v11 = vcombine.high %v7741_v16, %v7744_v22 }
 0x62e   :  { %6956 = vpow2.f32 %v5743_v42  ;;  %v8518_v42 = vcombine.high %v7735_v38, %v7738_v17 }
 0x62f   :  { %6958 = vpow2.f32 %v5744_v15 }
 0x630   :  { %6960 = vpow2.f32 %v5745_v40 }
 0x631   :  { %6962 = vtanh.f32 %v3175_v13 }
 0x638   :  { %v6957_v33 = vpop.eup %6956 }
 0x639   :  { %v6959_v18 = vpop.eup %6958  ;;  %v3180_v34 = vadd.f32 1.0, %v6957_v33 }
 0x63a   :  { %v3186_v4 = vadd.f32 1.0, %v6959_v18  ;;  %v6961_v63 = vpop.eup %6960  ;;  %v8520_v18 = vcombine.high %v7747_v3, %v8513_v60 }
 0x63b   :  { %6964 = vrcp.f32 %v3180_v34  ;;  %v6963_v31 = vpop.eup %6962  ;;  %v3193_v27 = vadd.f32 1.0, %v6961_v63 }
 0x63c   :  { %6966 = vrcp.f32 %v3186_v4 }
 0x63d   :  { %6968 = vrcp.f32 %v3193_v27 }
 0x645   :  { %v6965_v51 = vpop.eup %6964 }
 0x646   :  { %v6967_v47 = vpop.eup %6966  ;;  %v3197_v8 = vmul.f32 %v6965_v51, %v6963_v31 }
 0x647   :  { %v3196_v54 = vmul.f32 %v6967_v47, %v8049_v46  ;;  %v6969_v53 = vpop.eup %6968 }
 0x649   :  { %v8099_v19 = vadd.f32 %v3197_v8, %v3196_v54 }
 0x64b   :  { %6970 = vtanh.f32 %v8099_v19 }
 0x655   :  { %v6971_v32 = vpop.eup %6970 }
 0x656   :  { %v3200_v48 = vmul.f32 %v6971_v32, %v6969_v53 }
 0x658   :  { %v3206_v13 = vpack.c.bf16 %v3200_v48, %v3200_v48 }
 0x65a   :  { %3240 = vmatmul.mubr.bf16.vlgmr.msra.gmra.mrb[36].mxu0 %v3206_v13  ;;  %3281 = vmatmul.mubr.bf16.vlgmr.msra.gmra.mrb[36].mxu1 %v3206_v13 }
 0x65b   :  { %3324 = vmatpush1.bf16.msra.mxu0 %v7838_v29  ;;  %3365 = vmatpush1.bf16.msra.mxu1 %v7841_v9 }
 0x65c   :  { %3325 = vmatprep.subr.bf16.mxu0 %v7844_v6  ;;  %3366 = vmatprep.subr.bf16.mxu1 %v7847_v57 }
 0x65d   :  { %3355 = vmatprep.mubr.bf16.mxu0 %v8494_v61  ;;  %3396 = vmatprep.mubr.bf16.mxu1 %v8494_v61 }
 0x65f   :  { %3326 = vmatpush1.bf16.msra.mxu0 %v7852_v26  ;;  %3367 = vmatpush1.bf16.msra.mxu1 %v7855_v52 }
 0x660   :  { %3327 = vmatprep.subr.bf16.mxu0 %v7858_v28  ;;  %3368 = vmatprep.subr.bf16.mxu1 %v7861_v14 }
 0x663   :  { %3328 = vmatpush1.bf16.msra.mxu0 %v7864_v21  ;;  %3369 = vmatpush1.bf16.msra.mxu1 %v7867_v20 }
 0x664   :  { %3329 = vmatprep.subr.bf16.mxu0 %v7870_v55  ;;  %3370 = vmatprep.subr.bf16.mxu1 %v7873_v5 }
 0x667   :  { %3330 = vmatpush1.bf16.msra.mxu0 %v7930_v10  ;;  %3371 = vmatpush1.bf16.msra.mxu1 %v7933_v50 }
 0x668   :  { %3331 = vmatprep.subr.bf16.mxu0 %v7936_v35  ;;  %3372 = vmatprep.subr.bf16.mxu1 %v7939_v36 }
 0x66b   :  { %3332 = vmatpush1.bf16.msra.mxu0 %v7942_v37  ;;  %3373 = vmatpush1.bf16.msra.mxu1 %v7945_v39 }
 0x66c   :  { %3333 = vmatprep.subr.bf16.mxu0 %v7948_v56  ;;  %3374 = vmatprep.subr.bf16.mxu1 %v7951_v41 }
 0x66f   :  { %3334 = vmatpush1.bf16.msra.mxu0 %v7954_v25  ;;  %3375 = vmatpush1.bf16.msra.mxu1 %v7957_v59 }
 0x670   :  { %3335 = vmatprep.subr.bf16.mxu0 %v7960_v30  ;;  %3376 = vmatprep.subr.bf16.mxu1 %v7963_v45 }
 0x673   :  { %3336 = vmatpush1.bf16.msra.mxu0 %v7966_v58  ;;  %3377 = vmatpush1.bf16.msra.mxu1 %v7969_v0 }
 0x674   :  { %3337 = vmatprep.subr.bf16.mxu0 %v7972_v62  ;;  %3378 = vmatprep.subr.bf16.mxu1 %v7975_v1 }
 0x677   :  { %3338 = vmatpush1.bf16.msra.mxu0 %v8028_v49  ;;  %3379 = vmatpush1.bf16.msra.mxu1 %v8031_v12 }
 0x678   :  { %3439 = vmatprep.subr.bf16.mxu0 %v7894_v43  ;;  %3480 = vmatprep.subr.bf16.mxu1 %v7897_v44  ;;  %v8521_v43 = vcombine.high %v8515_v23, %v8516_v7 }
 0x72d   :  { %v3241_v46 = vpop.f32.mrb[36].mxu0  ;;  %v3282_v2 = vpop.f32.mrb[36].mxu1 }
 0x72e   :  { %v3289_v24 = vadd.f32 %v3241_v46, %v8518_v42  ;;  %v3291_v15 = vadd.f32 %v3282_v2, %v8519_v11  ;;  %v3243_v40 = vpop.f32.mrb[37].mxu0  ;;  %v3284_v33 = vpop.f32.mrb[37].mxu1 }
 0x72f   :  { %v3290_v34 = vadd.f32 %v3243_v40, %v8520_v18  ;;  %v3292_v44 = vadd.f32 %v3284_v33, %v8521_v43  ;;  %v3245_v4 = vpop.f32.mrb[38].mxu0  ;;  %v3286_v63 = vpop.f32.mrb[38].mxu1 }
 0x730   :  { %v5746_v31 = vmul.f32 -1.442695, %v3289_v24  ;;  %v3246_v51 = vpop.f32.mrb[39].mxu0  ;;  %v3287_v17 = vpop.f32.mrb[39].mxu1  ;;  %v8200_v24 = vld [vmem:[#allocation3 + $0x30] sm:$0x88] }
 0x731   :  { %v5747_v38 = vmul.f32 -1.442695, %v3290_v34  ;;  %v5748_v16 = vmul.f32 -1.442695, %v3292_v44  ;;  %v8206_v34 = vld [vmem:[#allocation3 + $0x48] sm:$0x88]  ;;  %v5768_v43 = vcombine.high %v8200_v24, %v8200_v24 }
 0x732   :  { %6972 = vpow2.f32 %v5746_v31  ;;  %v8210_v63 = vld [vmem:[#allocation3 + $0x60] sm:$0x88]  ;;  %v5774_v31 = vcombine.high %v8206_v34, %v8206_v34 }
 0x733   :  { %6974 = vpow2.f32 %v5747_v38  ;;  %v3920_v51 = vunpack.c.l.b16 %v5768_v43  ;;  %v6557_v43 = vld [vmem:[#allocation9 + $0x4c] ss:$16 sps:$4 sm:$0xff]  }
 0x734   :  { %6976 = vpow2.f32 %v5748_v16  ;;  %v8214_v16 = vld [vmem:[#allocation3 + $0x78] sm:$0x88] }
 0x735   :  { %6978 = vtanh.f32 %v3291_v15 }
 0x73c   :  { %v6973_v22 = vpop.eup %6972 }
 0x73d   :  { %v6975_v47 = vpop.eup %6974  ;;  %v3296_v8 = vadd.f32 1.0, %v6973_v22  ;;  %v5780_v22 = vcombine.high %v8210_v63, %v8210_v63 }
 0x73e   :  { %v3302_v3 = vadd.f32 1.0, %v6975_v47  ;;  %v6977_v60 = vpop.eup %6976  ;;  %v3926_v47 = vunpack.c.l.b16 %v5774_v31  ;;  %v6560_v31 = vld [vmem:[#allocation9 + $0x64] ss:$16 sps:$4 sm:$0xff]  }
 0x73f   :  { %6980 = vrcp.f32 %v3296_v8  ;;  %v6979_v23 = vpop.eup %6978  ;;  %v3309_v53 = vadd.f32 1.0, %v6977_v60 }
 0x740   :  { %6982 = vrcp.f32 %v3302_v3  ;;  %v3979_v3 = vrot.slane %v3920_v51, 5  ;;  %v6563_v51 = vld [vmem:[#allocation9 + $0x6c] ss:$16 sps:$4 sm:$0xff]  }
 0x741   :  { %6984 = vrcp.f32 %v3309_v53  ;;  %v3932_v53 = vunpack.c.l.b16 %v5780_v22  ;;  %v6566_v22 = vld [vmem:[#allocation9 + $0x84] ss:$16 sps:$4 sm:$0xff]  }
 0x749   :  { %v6981_v7 = vpop.eup %6980 }
 0x74a   :  { %v6983_v27 = vpop.eup %6982  ;;  %v3313_v54 = vmul.f32 %v6981_v7, %v6979_v23  ;;  %v8218_v23 = vld [vmem:[#allocation3 + $0x90] sm:$0x88]  ;;  %v5786_v7 = vcombine.high %v8214_v16, %v8214_v16 }
 0x74b   :  { %v3312_v32 = vmul.f32 %v6983_v27, %v8099_v19  ;;  %v6985_v13 = vpop.eup %6984 }
 0x74d   :  { %v8149_v48 = vadd.f32 %v3313_v54, %v3312_v32 }
 0x74f   :  { %6986 = vtanh.f32 %v8149_v48 }
 0x759   :  { %v6987_v46 = vpop.eup %6986 }
 0x75a   :  { %v3316_v2 = vmul.f32 %v6987_v46, %v6985_v13 }
 0x75c   :  { %v3322_v42 = vpack.c.bf16 %v3316_v2, %v3316_v2  ;;  %v3981_v2 = vrot.slane %v3926_v47, 4  ;;  %v6569_v47 = vld [vmem:[#allocation9 + $0x8c] ss:$16 sps:$4 sm:$0xff]  }
 0x75e   :  { %3356 = vmatmul.mubr.bf16.vlgmr.msra.gmra.mrb[40].mxu0 %v3322_v42  ;;  %3397 = vmatmul.mubr.bf16.vlgmr.msra.gmra.mrb[40].mxu1 %v3322_v42 }
 0x75f   :  { %3440 = vmatpush1.bf16.msra.mxu0 %v7838_v29  ;;  %3481 = vmatpush1.bf16.msra.mxu1 %v7841_v9  ;;  %v6542_v9 = vld [vmem:[#allocation9 + $0x4] ss:$16 sps:$4 sm:$0xff]   ;;  %v6545_v29 = vld [vmem:[#allocation9 + $0xc] ss:$16 sps:$4 sm:$0xff]  }
 0x760   :  { %3441 = vmatprep.subr.bf16.mxu0 %v7844_v6  ;;  %3482 = vmatprep.subr.bf16.mxu1 %v7847_v57 }
 0x761   :  { %3471 = vmatprep.mubr.bf16.mxu0 %v8494_v61  ;;  %3512 = vmatprep.mubr.bf16.mxu1 %v8494_v61  ;;  %v8522_v61 = vld [vmem:[#allocation27_spill] sm:$0xff] }
 0x763   :  { %3442 = vmatpush1.bf16.msra.mxu0 %v7852_v26  ;;  %3483 = vmatpush1.bf16.msra.mxu1 %v7855_v52  ;;  %v8523_v26 = vld [vmem:[#allocation28_spill] sm:$0xff] }
 0x764   :  { %3443 = vmatprep.subr.bf16.mxu0 %v7858_v28  ;;  %3484 = vmatprep.subr.bf16.mxu1 %v7861_v14  ;;  %v8524_v52 = vcombine.low %v8522_v61, %v8523_v26  ;;  %v8525_v14 = vld [vmem:[#allocation29_spill] sm:$0xff] }
 0x767   :  { %3444 = vmatpush1.bf16.msra.mxu0 %v7864_v21  ;;  %3485 = vmatpush1.bf16.msra.mxu1 %v7867_v20  ;;  %v8526_v21 = vld [vmem:[#allocation30_spill] sm:$0xff] }
 0x768   :  { %3445 = vmatprep.subr.bf16.mxu0 %v7870_v55  ;;  %3486 = vmatprep.subr.bf16.mxu1 %v7873_v5  ;;  %v8527_v20 = vcombine.low %v8525_v14, %v8526_v21 }
 0x76b   :  { %3446 = vmatpush1.bf16.msra.mxu0 %v7930_v10  ;;  %3487 = vmatpush1.bf16.msra.mxu1 %v7933_v50  ;;  %v8528_v50 = vld [vmem:[#allocation31_spill] sm:$0xff] }
 0x76c   :  { %3447 = vmatprep.subr.bf16.mxu0 %v7936_v35  ;;  %3488 = vmatprep.subr.bf16.mxu1 %v7939_v36  ;;  %v8529_v35 = vld [vmem:[#allocation32_spill] sm:$0xff] }
 0x76d   :  { %v8530_v36 = vcombine.low %v8528_v50, %v8529_v35 }
 0x76f   :  { %3448 = vmatpush1.bf16.msra.mxu0 %v7942_v37  ;;  %3489 = vmatpush1.bf16.msra.mxu1 %v7945_v39  ;;  %v8531_v39 = vld [vmem:[#allocation33_spill] sm:$0xff] }
 0x770   :  { %3449 = vmatprep.subr.bf16.mxu0 %v7948_v56  ;;  %3490 = vmatprep.subr.bf16.mxu1 %v7951_v41  ;;  %v8532_v56 = vld [vmem:[#allocation34_spill] sm:$0xff] }
 0x771   :  { %v8533_v41 = vcombine.low %v8531_v39, %v8532_v56 }
 0x773   :  { %3450 = vmatpush1.bf16.msra.mxu0 %v7954_v25  ;;  %3491 = vmatpush1.bf16.msra.mxu1 %v7957_v59 }
 0x774   :  { %3451 = vmatprep.subr.bf16.mxu0 %v7960_v30  ;;  %3492 = vmatprep.subr.bf16.mxu1 %v7963_v45 }
 0x777   :  { %3452 = vmatpush1.bf16.msra.mxu0 %v7966_v58  ;;  %3493 = vmatpush1.bf16.msra.mxu1 %v7969_v0 }
 0x778   :  { %3453 = vmatprep.subr.bf16.mxu0 %v7972_v62  ;;  %3494 = vmatprep.subr.bf16.mxu1 %v7975_v1 }
 0x77b   :  { %3454 = vmatpush1.bf16.msra.mxu0 %v8028_v49  ;;  %3495 = vmatpush1.bf16.msra.mxu1 %v8031_v12  ;;  %v8196_v49 = vld [vmem:[#allocation3] sm:$0x88]  ;;  %v8198_v12 = vld [vmem:[#allocation3 + $0x18] sm:$0x88] }
 0x77c   :  { %5018 = vmatprep.subr.bf16.mxu0 %v6542_v9  ;;  %5141 = vmatprep.subr.bf16.mxu1 %v6545_v29  ;;  %v5756_v11 = vcombine.high %v8196_v49, %v8196_v49  ;;  %v5762_v15 = vcombine.high %v8198_v12, %v8198_v12  ;;  %v5792_v9 = vcombine.high %v8218_v23, %v8218_v23 }
 0x77e   :  { %v3908_v44 = vunpack.c.l.b16 %v5756_v11  ;;  %v3914_v4 = vunpack.c.l.b16 %v5762_v15  ;;  %v6551_v11 = vld [vmem:[#allocation9 + $0x2c] ss:$16 sps:$4 sm:$0xff]  }
 0x780   :  { %v3976_v17 = vrot.slane %v3908_v44, 7  ;;  %v3977_v38 = vrot.slane %v3914_v4, 6  ;;  %v6552_v44 = vld [vmem:[#allocation9 + $0x40] ss:$16 sps:$4 sm:$0xff]   ;;  %v6555_v4 = vld [vmem:[#allocation9 + $0x48] ss:$16 sps:$4 sm:$0xff]  }
 0x782   :  { %v3978_v27 = vsel %vm3957_vm0, %v3977_v38, %v3976_v17  ;;  %v6558_v17 = vld [vmem:[#allocation9 + $0x60] ss:$16 sps:$4 sm:$0xff]   ;;  %v6561_v38 = vld [vmem:[#allocation9 + $0x68] ss:$16 sps:$4 sm:$0xff]  }
 0x783   :  { %v3980_v29 = vsel %vm3960_vm1, %v3979_v3, %v3978_v27  ;;  %v6567_v3 = vld [vmem:[#allocation9 + $0x88] ss:$16 sps:$4 sm:$0xff]   ;;  %v6570_v27 = vld [vmem:[#allocation9 + $0xa0] ss:$16 sps:$4 sm:$0xff]  }
 0x831   :  { %v3357_v6 = vpop.f32.mrb[40].mxu0  ;;  %v3398_v57 = vpop.f32.mrb[40].mxu1 }
 0x832   :  { %v3405_v28 = vadd.f32 %v3357_v6, %v8524_v52  ;;  %v3407_v55 = vadd.f32 %v3398_v57, %v8527_v20  ;;  %v3359_v5 = vpop.f32.mrb[41].mxu0  ;;  %v3400_v10 = vpop.f32.mrb[41].mxu1  ;;  %v3938_v6 = vunpack.c.l.b16 %v5786_v7  ;;  %v3983_v52 = vrot.slane %v3932_v53, 3  ;;  %v8231_v20 = vld [vmem:[#allocation3 + $0xa8] sm:$0x88] }
 0x833   :  { %v3406_v37 = vadd.f32 %v3359_v5, %v8530_v36  ;;  %v3408_v25 = vadd.f32 %v3400_v10, %v8533_v41  ;;  %v3361_v59 = vpop.f32.mrb[42].mxu0  ;;  %v3402_v30 = vpop.f32.mrb[42].mxu1  ;;  %v5798_v10 = vcombine.high %v8231_v20, %v8231_v20  ;;  %v6575_v7 = vld [vmem:[#allocation9 + $0xac] ss:$16 sps:$4 sm:$0xff]   ;;  %v6578_v53 = vld [vmem:[#allocation9 + $0xc4] ss:$16 sps:$4 sm:$0xff]  }
 0x834   :  { %v5749_v45 = vmul.f32 -1.442695, %v3405_v28  ;;  %v3362_v58 = vpop.f32.mrb[43].mxu0  ;;  %v3403_v0 = vpop.f32.mrb[43].mxu1  ;;  %v3982_v28 = vsel %vm3963_vm2, %v3981_v2, %v3980_v29  ;;  %v6584_v2 = vld [vmem:[#allocation9 + $0xe4] ss:$16 sps:$4 sm:$0xff]  }
 0x835   :  { %v5750_v62 = vmul.f32 -1.442695, %v3406_v37  ;;  %v5751_v1 = vmul.f32 -1.442695, %v3408_v25  ;;  %v3984_v5 = vsel %vm3966_vm3, %v3983_v52, %v3982_v28  ;;  %v3950_v41 = vunpack.c.l.b16 %v5798_v10  ;;  %v6540_v0 = vld [vmem:[#allocation9] ss:$16 sps:$4 sm:$0xff]  }
 0x836   :  { %6988 = vpow2.f32 %v5749_v45  ;;  %v6585_v29 = vld [vmem:[#allocation9 + $0xe8] ss:$16 sps:$4 sm:$0xff]   ;;  %v6593_v52 = vld [vmem:[#allocation9 + $0x10c] ss:$16 sps:$4 sm:$0xff]   ;;  %v5755_v28 = vcombine.low %v8196_v49, %v8196_v49  ;;  %v6588_v10 = vld [vmem:[#allocation9 + $0x100] ss:$16 sps:$4 sm:$0xff]  }
 0x837   :  { %6990 = vpow2.f32 %v5750_v62  ;;  %v6543_v62 = vld [vmem:[#allocation9 + $0x8] ss:$16 sps:$4 sm:$0xff]  }
 0x838   :  { %6992 = vpow2.f32 %v5751_v1 }
 0x839   :  { %6994 = vtanh.f32 %v3407_v55  ;;  %v3944_v55 = vunpack.c.l.b16 %v5792_v9  ;;  %v6582_v9 = vld [vmem:[#allocation9 + $0xe0] ss:$16 sps:$4 sm:$0xff]  }
 0x83b   :  { %v3987_v36 = vrot.slane %v3944_v55, 1  ;;  %v5761_v55 = vcombine.low %v8198_v12, %v8198_v12 }
 0x840   :  { %v6989_v19 = vpop.eup %6988 }
 0x841   :  { %v6991_v40 = vpop.eup %6990  ;;  %v3412_v33 = vadd.f32 1.0, %v6989_v19  ;;  %v6548_v19 = vld [vmem:[#allocation9 + $0x24] ss:$16 sps:$4 sm:$0xff]  }
 0x842   :  { %v3418_v18 = vadd.f32 1.0, %v6991_v40  ;;  %v6993_v8 = vpop.eup %6992  ;;  %v6546_v40 = vld [vmem:[#allocation9 + $0x20] ss:$16 sps:$4 sm:$0xff]  }
 0x843   :  { %6996 = vrcp.f32 %v3412_v33  ;;  %v6995_v60 = vpop.eup %6994  ;;  %v3425_v46 = vadd.f32 1.0, %v6993_v8  ;;  %v6549_v33 = vld [vmem:[#allocation9 + $0x28] ss:$16 sps:$4 sm:$0xff]   ;;  %v6564_v8 = vld [vmem:[#allocation9 + $0x80] ss:$16 sps:$4 sm:$0xff]  }
 0x844   :  { %6998 = vrcp.f32 %v3418_v18  ;;  %v6554_v18 = vld [vmem:[#allocation9 + $0x44] ss:$16 sps:$4 sm:$0xff]  }
 0x845   :  { %7000 = vrcp.f32 %v3425_v46  ;;  %v6579_v46 = vld [vmem:[#allocation9 + $0xc8] ss:$16 sps:$4 sm:$0xff]  }
 0x84d   :  { %v6997_v54 = vpop.eup %6996 }
 0x84e   :  { %v6999_v32 = vpop.eup %6998  ;;  %v3429_v13 = vmul.f32 %v6997_v54, %v6995_v60  ;;  %v6572_v60 = vld [vmem:[#allocation9 + $0xa4] ss:$16 sps:$4 sm:$0xff]   ;;  %v6573_v54 = vld [vmem:[#allocation9 + $0xa8] ss:$16 sps:$4 sm:$0xff]  }
 0x84f   :  { %v3428_v42 = vmul.f32 %v6999_v32, %v8149_v48  ;;  %v3985_v48 = vrot.slane %v3938_v6, 2  ;;  %v7001_v59 = vpop.eup %7000  ;;  %v6581_v32 = vld [vmem:[#allocation9 + $0xcc] ss:$16 sps:$4 sm:$0xff]   ;;  %v6590_v6 = vld [vmem:[#allocation9 + $0x104] ss:$16 sps:$4 sm:$0xff]  }
 0x851   :  { %v8227_v57 = vadd.f32 %v3429_v13, %v3428_v42  ;;  %v3986_v37 = vsel %vm3969_vm4, %v3985_v48, %v3984_v5  ;;  %v6576_v13 = vld [vmem:[#allocation9 + $0xc0] ss:$16 sps:$4 sm:$0xff]   ;;  %v6587_v42 = vld [vmem:[#allocation9 + $0xec] ss:$16 sps:$4 sm:$0xff]  }
 0x852   :  { %v3988_v25 = vsel %vm3972_vm5, %v3987_v36, %v3986_v37  ;;  %v8243_v48 = vld [vmem:[#allocation3 + $0x8] sm:$0x88]  ;;  %v8245_v5 = vld [vmem:[#allocation3 + $0x20] sm:$0x88] }
 0x853   :  { %7002 = vtanh.f32 %v8227_v57  ;;  %v3989_v58 = vsel %vm3974_vm6, %v3950_v41, %v3988_v25  ;;  %v6591_v36 = vld [vmem:[#allocation9 + $0x108] ss:$16 sps:$4 sm:$0xff]   ;;  %v6596_v37 = vld [vmem:[#allocation9 + $0x124] ss:$16 sps:$4 sm:$0xff]   ;;  %v6599_v41 = vld [vmem:[#allocation9 + $0x12c] ss:$16 sps:$4 sm:$0xff]   ;;  %v5767_v25 = vcombine.low %v8200_v24, %v8200_v24  ;;  %v5758_v49 = vcombine.high %v8243_v48, %v8243_v48 }
 0x854   :  { %v4047_v15 = vpack.c.b16 %v3989_v58, %v3989_v58  ;;  %v5764_v12 = vcombine.high %v8245_v5, %v8245_v5  ;;  %v6594_v58 = vld [vmem:[#allocation9 + $0x120] ss:$16 sps:$4 sm:$0xff]  }
 0x85d   :  { %v7003_v30 = vpop.eup %7002 }
 0x85e   :  { %v3432_v45 = vmul.f32 %v7003_v30, %v7001_v59  ;;  %v8249_v59 = vld [vmem:[#allocation3 + $0x38] sm:$0x88]  ;;  %v3907_v30 = vunpack.c.l.b16 %v5755_v28 }
 0x85f   :  { %v5770_v24 = vcombine.high %v8249_v59, %v8249_v59 }
 0x860   :  { %v3438_v1 = vpack.c.bf16 %v3432_v45, %v3432_v45  ;;  %v3913_v45 = vunpack.c.l.b16 %v5761_v55 }
 0x862   :  { %3472 = vmatmul.mubr.bf16.vlgmr.msra.gmra.mrb[44].mxu0 %v3438_v1  ;;  %3513 = vmatmul.mubr.bf16.vlgmr.msra.gmra.mrb[44].mxu1 %v3438_v1  ;;  %v8257_v1 = vld [vmem:[#allocation3 + $0x50] sm:$0x88] }
 0x863   :  { %5019 = vmatpush1.bf16.msra.mxu0 %v6540_v0  ;;  %5142 = vmatpush1.bf16.msra.mxu1 %v6543_v62  ;;  %v6597_v0 = vld [vmem:[#allocation9 + $0x128] ss:$16 sps:$4 sm:$0xff]   ;;  %v5773_v62 = vcombine.low %v8206_v34, %v8206_v34  ;;  %v5776_v34 = vcombine.high %v8257_v1, %v8257_v1 }
 0x864   :  { %5020 = vmatprep.subr.bf16.mxu0 %v6548_v19  ;;  %5143 = vmatprep.subr.bf16.mxu1 %v6551_v11  ;;  %v6602_v19 = vld [vmem:[#allocation9 + $0x144] ss:$16 sps:$4 sm:$0xff]   ;;  %v6605_v11 = vld [vmem:[#allocation9 + $0x14c] ss:$16 sps:$4 sm:$0xff]  }
 0x865   :  { %5050 = vmatprep.mubr.bf16.mxu0 %v4047_v15  ;;  %5173 = vmatprep.mubr.bf16.mxu1 %v4047_v15  ;;  %v3919_v15 = vunpack.c.l.b16 %v5767_v25  ;;  %v6615_v25 = vld [vmem:[#allocation9 + $0x188] ss:$16 sps:$4 sm:$0xff]  }
 0x867   :  { %5021 = vmatpush1.bf16.msra.mxu0 %v6546_v40  ;;  %5144 = vmatpush1.bf16.msra.mxu1 %v6549_v33  ;;  %v3910_v40 = vunpack.c.l.b16 %v5758_v49  ;;  %v3916_v33 = vunpack.c.l.b16 %v5764_v12 }
 0x868   :  { %5022 = vmatprep.subr.bf16.mxu0 %v6554_v18  ;;  %5145 = vmatprep.subr.bf16.mxu1 %v6557_v43  ;;  %v3955_v18 = vrot.slane %v3907_v30, 7  ;;  %v3956_v43 = vrot.slane %v3913_v45, 6  ;;  %v6620_v45 = vld [vmem:[#allocation9 + $0x1a4] ss:$16 sps:$4 sm:$0xff]  }
 0x86b   :  { %5023 = vmatpush1.bf16.msra.mxu0 %v6552_v44  ;;  %5146 = vmatpush1.bf16.msra.mxu1 %v6555_v4  ;;  %v5779_v44 = vcombine.low %v8210_v63, %v8210_v63  ;;  %v8263_v4 = vld [vmem:[#allocation3 + $0x68] sm:$0x88]  ;;  %v5785_v63 = vcombine.low %v8214_v16, %v8214_v16  ;;  %v6614_v16 = vld [vmem:[#allocation9 + $0x184] ss:$16 sps:$4 sm:$0xff]  }
 0x86c   :  { %5024 = vmatprep.subr.bf16.mxu0 %v6560_v31  ;;  %5147 = vmatprep.subr.bf16.mxu1 %v6563_v51  ;;  %v6600_v31 = vld [vmem:[#allocation9 + $0x140] ss:$16 sps:$4 sm:$0xff]   ;;  %v6603_v51 = vld [vmem:[#allocation9 + $0x148] ss:$16 sps:$4 sm:$0xff]  }
 0x86f   :  { %5025 = vmatpush1.bf16.msra.mxu0 %v6558_v17  ;;  %5148 = vmatpush1.bf16.msra.mxu1 %v6561_v38  ;;  %v6608_v17 = vld [vmem:[#allocation9 + $0x164] ss:$16 sps:$4 sm:$0xff]   ;;  %v3925_v38 = vunpack.c.l.b16 %v5773_v62 }
 0x870   :  { %5026 = vmatprep.subr.bf16.mxu0 %v6566_v22  ;;  %5149 = vmatprep.subr.bf16.mxu1 %v6569_v47  ;;  %v3922_v22 = vunpack.c.l.b16 %v5770_v24  ;;  %v6611_v47 = vld [vmem:[#allocation9 + $0x16c] ss:$16 sps:$4 sm:$0xff]  }
 0x873   :  { %5027 = vmatpush1.bf16.msra.mxu0 %v6564_v8  ;;  %5150 = vmatpush1.bf16.msra.mxu1 %v6567_v3  ;;  %v3959_v8 = vrot.slane %v3919_v15, 5  ;;  %v4004_v3 = vrot.slane %v3910_v40, 7  ;;  %v6618_v40 = vld [vmem:[#allocation9 + $0x1a0] ss:$16 sps:$4 sm:$0xff]  }
 0x874   :  { %5028 = vmatprep.subr.bf16.mxu0 %v6572_v60  ;;  %5151 = vmatprep.subr.bf16.mxu1 %v6575_v7  ;;  %v4005_v60 = vrot.slane %v3916_v33, 6  ;;  %v3958_v7 = vsel %vm3957_vm0, %v3956_v43, %v3955_v18  ;;  %v6621_v33 = vld [vmem:[#allocation9 + $0x1a8] ss:$16 sps:$4 sm:$0xff]   ;;  %v5797_v18 = vcombine.low %v8231_v20, %v8231_v20  ;;  %v8290_v43 = vld [vmem:[#allocation3 + $0xb0] sm:$0x88] }
 0x875   :  { %v6627_v20 = vld [vmem:[#allocation9 + $0x1c8] ss:$16 sps:$4 sm:$0xff]  }
 0x876   :  { %v4006_v55 = vsel %vm3957_vm0, %v4005_v60, %v4004_v3  ;;  %v3949_v3 = vunpack.c.l.b16 %v5797_v18  ;;  %v6682_v18 = vld [vmem:[#allocation9 + $0x2a0] ss:$16 sps:$4 sm:$0xff]  }
 0x877   :  { %5029 = vmatpush1.bf16.msra.mxu0 %v6570_v27  ;;  %5152 = vmatpush1.bf16.msra.mxu1 %v6573_v54  ;;  %v8270_v27 = vld [vmem:[#allocation3 + $0x80] sm:$0x88]  ;;  %v5782_v54 = vcombine.high %v8263_v4, %v8263_v4 }
 0x878   :  { %5030 = vmatprep.subr.bf16.mxu0 %v6578_v53  ;;  %5153 = vmatprep.subr.bf16.mxu1 %v6581_v32  ;;  %v3931_v53 = vunpack.c.l.b16 %v5779_v44  ;;  %v3928_v32 = vunpack.c.l.b16 %v5776_v34  ;;  %v5788_v28 = vcombine.high %v8270_v27, %v8270_v27  ;;  %v6626_v34 = vld [vmem:[#allocation9 + $0x1c4] ss:$16 sps:$4 sm:$0xff]  }
 0x87a   :  { %v3940_v62 = vunpack.c.l.b16 %v5788_v28  ;;  %v6652_v28 = vld [vmem:[#allocation9 + $0x200] ss:$16 sps:$4 sm:$0xff]  }
 0x87b   :  { %5031 = vmatpush1.bf16.msra.mxu0 %v6576_v13  ;;  %5154 = vmatpush1.bf16.msra.mxu1 %v6579_v46  ;;  %v6606_v13 = vld [vmem:[#allocation9 + $0x160] ss:$16 sps:$4 sm:$0xff]   ;;  %v6609_v46 = vld [vmem:[#allocation9 + $0x168] ss:$16 sps:$4 sm:$0xff]  }
 0x87c   :  { %5032 = vmatprep.subr.bf16.mxu0 %v6584_v2  ;;  %5155 = vmatprep.subr.bf16.mxu1 %v6587_v42  ;;  %v5791_v2 = vcombine.low %v8218_v23, %v8218_v23  ;;  %v3962_v42 = vrot.slane %v3925_v38, 4  ;;  %v6612_v23 = vld [vmem:[#allocation9 + $0x180] ss:$16 sps:$4 sm:$0xff]  }
 0x87f   :  { %5033 = vmatpush1.bf16.msra.mxu0 %v6582_v9  ;;  %5156 = vmatpush1.bf16.msra.mxu1 %v6585_v29  ;;  %v4007_v9 = vrot.slane %v3922_v22, 5  ;;  %v6617_v29 = vld [vmem:[#allocation9 + $0x18c] ss:$16 sps:$4 sm:$0xff]  }
 0x880   :  { %5034 = vmatprep.subr.bf16.mxu0 %v6590_v6  ;;  %5157 = vmatprep.subr.bf16.mxu1 %v6593_v52  ;;  %v3961_v6 = vsel %vm3960_vm1, %v3959_v8, %v3958_v7  ;;  %v8277_v52 = vld [vmem:[#allocation3 + $0x98] sm:$0x88]  ;;  %v6624_v8 = vld [vmem:[#allocation9 + $0x1c0] ss:$16 sps:$4 sm:$0xff]  }
 0x881   :  { %v3964_v49 = vsel %vm3963_vm2, %v3962_v42, %v3961_v6  ;;  %v5794_v12 = vcombine.high %v8277_v52, %v8277_v52  ;;  %v4008_v30 = vsel %vm3960_vm1, %v4007_v9, %v4006_v55  ;;  %v6635_v7 = vld [vmem:[#allocation9 + $0x1ec] ss:$16 sps:$4 sm:$0xff]   ;;  %v6654_v9 = vld [vmem:[#allocation9 + $0x204] ss:$16 sps:$4 sm:$0xff]   ;;  %v6655_v55 = vld [vmem:[#allocation9 + $0x208] ss:$16 sps:$4 sm:$0xff]  }
 0x883   :  { %5035 = vmatpush1.bf16.msra.mxu0 %v6588_v10  ;;  %5158 = vmatpush1.bf16.msra.mxu1 %v6591_v36  ;;  %v3937_v10 = vunpack.c.l.b16 %v5785_v63  ;;  %v3934_v36 = vunpack.c.l.b16 %v5782_v54  ;;  %v3946_v44 = vunpack.c.l.b16 %v5794_v12  ;;  %v6632_v63 = vld [vmem:[#allocation9 + $0x1e4] ss:$16 sps:$4 sm:$0xff]   ;;  %v6664_v12 = vld [vmem:[#allocation9 + $0x240] ss:$16 sps:$4 sm:$0xff]  }
 0x884   :  { %5036 = vmatprep.subr.bf16.mxu0 %v6596_v37  ;;  %5159 = vmatprep.subr.bf16.mxu1 %v6599_v41  ;;  %v3965_v37 = vrot.slane %v3931_v53, 3  ;;  %v4009_v41 = vrot.slane %v3928_v32, 4 }
 0x885   :  { %v3968_v24 = vrot.slane %v3937_v10, 2  ;;  %v4015_v60 = vrot.slane %v3946_v44, 1  ;;  %v6660_v10 = vld [vmem:[#allocation9 + $0x224] ss:$16 sps:$4 sm:$0xff]   ;;  %v6685_v44 = vld [vmem:[#allocation9 + $0x2a8] ss:$16 sps:$4 sm:$0xff]  }
 0x886   :  { %v4010_v15 = vsel %vm3963_vm2, %v4009_v41, %v4008_v30  ;;  %v6658_v41 = vld [vmem:[#allocation9 + $0x220] ss:$16 sps:$4 sm:$0xff]   ;;  %v6667_v30 = vld [vmem:[#allocation9 + $0x248] ss:$16 sps:$4 sm:$0xff]  }
 0x887   :  { %5037 = vmatpush1.bf16.msra.mxu0 %v6594_v58  ;;  %5160 = vmatpush1.bf16.msra.mxu1 %v6597_v0  ;;  %v6623_v58 = vld [vmem:[#allocation9 + $0x1ac] ss:$16 sps:$4 sm:$0xff]   ;;  %v3943_v0 = vunpack.c.l.b16 %v5791_v2 }
 0x888   :  { %5038 = vmatprep.subr.bf16.mxu0 %v6602_v19  ;;  %5161 = vmatprep.subr.bf16.mxu1 %v6605_v11  ;;  %v4011_v19 = vrot.slane %v3934_v36, 3  ;;  %v3967_v11 = vsel %vm3966_vm3, %v3965_v37, %v3964_v49  ;;  %v6663_v36 = vld [vmem:[#allocation9 + $0x22c] ss:$16 sps:$4 sm:$0xff]  }
 0x889   :  { %v3970_v38 = vsel %vm3969_vm4, %v3968_v24, %v3967_v11  ;;  %v6669_v49 = vld [vmem:[#allocation9 + $0x24c] ss:$16 sps:$4 sm:$0xff]   ;;  %v6678_v24 = vld [vmem:[#allocation9 + $0x284] ss:$16 sps:$4 sm:$0xff]   ;;  %v6676_v11 = vld [vmem:[#allocation9 + $0x280] ss:$16 sps:$4 sm:$0xff]  }
 0x88a   :  { %v4012_v22 = vsel %vm3966_vm3, %v4011_v19, %v4010_v15  ;;  %v6681_v19 = vld [vmem:[#allocation9 + $0x28c] ss:$16 sps:$4 sm:$0xff]   ;;  %v6679_v15 = vld [vmem:[#allocation9 + $0x288] ss:$16 sps:$4 sm:$0xff]  }
 0x88b   :  { %5039 = vmatpush1.bf16.msra.mxu0 %v6600_v31  ;;  %5162 = vmatpush1.bf16.msra.mxu1 %v6603_v51  ;;  %v6629_v31 = vld [vmem:[#allocation9 + $0x1cc] ss:$16 sps:$4 sm:$0xff]   ;;  %v3971_v51 = vrot.slane %v3943_v0, 1  ;;  %v6670_v0 = vld [vmem:[#allocation9 + $0x260] ss:$16 sps:$4 sm:$0xff]  }
 0x88c   :  { %5040 = vmatprep.subr.bf16.mxu0 %v6608_v17  ;;  %5163 = vmatprep.subr.bf16.mxu1 %v6611_v47  ;;  %v4013_v17 = vrot.slane %v3940_v62, 2  ;;  %v5800_v47 = vcombine.high %v8290_v43, %v8290_v43  ;;  %v6673_v62 = vld [vmem:[#allocation9 + $0x268] ss:$16 sps:$4 sm:$0xff]  }
 0x88d   :  { %v3973_v54 = vsel %vm3972_vm5, %v3971_v51, %v3970_v38  ;;  %v6688_v51 = vld [vmem:[#allocation9 + $0x2c0] ss:$16 sps:$4 sm:$0xff]   ;;  %v6696_v38 = vld [vmem:[#allocation9 + $0x2e4] ss:$16 sps:$4 sm:$0xff]  }
 0x88e   :  { %v4014_v53 = vsel %vm3969_vm4, %v4013_v17, %v4012_v22  ;;  %v3952_v32 = vunpack.c.l.b16 %v5800_v47  ;;  %v3975_v2 = vsel %vm3974_vm6, %v3949_v3, %v3973_v54  ;;  %v6691_v17 = vld [vmem:[#allocation9 + $0x2c8] ss:$16 sps:$4 sm:$0xff]   ;;  %v6699_v22 = vld [vmem:[#allocation9 + $0x2ec] ss:$16 sps:$4 sm:$0xff]   ;;  %v6694_v47 = vld [vmem:[#allocation9 + $0x2e0] ss:$16 sps:$4 sm:$0xff]  }
 0x88f   :  { %5041 = vmatpush1.bf16.msra.mxu0 %v6606_v13  ;;  %5164 = vmatpush1.bf16.msra.mxu1 %v6609_v46  ;;  %v6630_v13 = vld [vmem:[#allocation9 + $0x1e0] ss:$16 sps:$4 sm:$0xff]   ;;  %v6633_v46 = vld [vmem:[#allocation9 + $0x1e8] ss:$16 sps:$4 sm:$0xff]   ;;  %v4016_v42 = vsel %vm3972_vm5, %v4015_v60, %v4014_v53  ;;  %v6705_v3 = vld [vmem:[#allocation9 + $0x30c] ss:$16 sps:$4 sm:$0xff]   ;;  %v5757_v60 = vcombine.low %v8243_v48, %v8243_v48 }
 0x890   :  { %5042 = vmatprep.subr.bf16.mxu0 %v6614_v16  ;;  %5165 = vmatprep.subr.bf16.mxu1 %v6617_v29  ;;  %v6657_v16 = vld [vmem:[#allocation9 + $0x20c] ss:$16 sps:$4 sm:$0xff]   ;;  %v4046_v29 = vpack.c.b16 %v3975_v2, %v3975_v2  ;;  %v4017_v6 = vsel %vm3974_vm6, %v3952_v32, %v4016_v42  ;;  %v6700_v53 = vld [vmem:[#allocation9 + $0x300] ss:$16 sps:$4 sm:$0xff]   ;;  %v6703_v32 = vld [vmem:[#allocation9 + $0x308] ss:$16 sps:$4 sm:$0xff]   ;;  %v5769_v2 = vcombine.low %v8249_v59, %v8249_v59 }
 0x891   :  { %v4049_v37 = vpack.c.b16 %v4017_v6, %v4017_v6  ;;  %v8307_v54 = vld [vmem:[#allocation3 + $0x28] sm:$0x88]  ;;  %v8311_v42 = vld [vmem:[#allocation3 + $0x40] sm:$0x88] }
 0x892   :  { %v6709_v6 = vld [vmem:[#allocation9 + $0x328] ss:$16 sps:$4 sm:$0xff]   ;;  %v5772_v59 = vcombine.high %v8311_v42, %v8311_v42 }
 0x893   :  { %5043 = vmatpush1.bf16.msra.mxu0 %v6612_v23  ;;  %5166 = vmatpush1.bf16.msra.mxu1 %v6615_v25  ;;  %v6661_v23 = vld [vmem:[#allocation9 + $0x228] ss:$16 sps:$4 sm:$0xff]   ;;  %v6666_v25 = vld [vmem:[#allocation9 + $0x244] ss:$16 sps:$4 sm:$0xff]  }
 0x894   :  { %5044 = vmatprep.subr.bf16.mxu0 %v6620_v45  ;;  %5167 = vmatprep.subr.bf16.mxu1 %v6623_v58  ;;  %v6672_v45 = vld [vmem:[#allocation9 + $0x264] ss:$16 sps:$4 sm:$0xff]   ;;  %v6675_v58 = vld [vmem:[#allocation9 + $0x26c] ss:$16 sps:$4 sm:$0xff]  }
 0x897   :  { %5045 = vmatpush1.bf16.msra.mxu0 %v6618_v40  ;;  %5168 = vmatpush1.bf16.msra.mxu1 %v6621_v33  ;;  %v6684_v40 = vld [vmem:[#allocation9 + $0x2a4] ss:$16 sps:$4 sm:$0xff]   ;;  %v6687_v33 = vld [vmem:[#allocation9 + $0x2ac] ss:$16 sps:$4 sm:$0xff]  }
 0x898   :  { %5046 = vmatprep.subr.bf16.mxu0 %v6626_v34  ;;  %5169 = vmatprep.subr.bf16.mxu1 %v6629_v31  ;;  %v6690_v34 = vld [vmem:[#allocation9 + $0x2c4] ss:$16 sps:$4 sm:$0xff]   ;;  %v6693_v31 = vld [vmem:[#allocation9 + $0x2cc] ss:$16 sps:$4 sm:$0xff]  }
 0x89b   :  { %5047 = vmatpush1.bf16.msra.mxu0 %v6624_v8  ;;  %5170 = vmatpush1.bf16.msra.mxu1 %v6627_v20  ;;  %v6697_v8 = vld [vmem:[#allocation9 + $0x2e8] ss:$16 sps:$4 sm:$0xff]   ;;  %v6702_v20 = vld [vmem:[#allocation9 + $0x304] ss:$16 sps:$4 sm:$0xff]  }
 0x89c   :  { %5048 = vmatprep.subr.bf16.mxu0 %v6632_v63  ;;  %5171 = vmatprep.subr.bf16.mxu1 %v6635_v7  ;;  %v5763_v63 = vcombine.low %v8245_v5, %v8245_v5  ;;  %v8305_v7 = vld [vmem:[#allocation3 + $0x10] sm:$0x88]  ;;  %v5766_v5 = vcombine.high %v8307_v54, %v8307_v54 }
 0x89d   :  { %v5760_v48 = vcombine.high %v8305_v7, %v8305_v7 }
 0x89f   :  { %5049 = vmatpush1.bf16.msra.mxu0 %v6630_v13  ;;  %5172 = vmatpush1.bf16.msra.mxu1 %v6633_v46  ;;  %v6708_v13 = vld [vmem:[#allocation9 + $0x324] ss:$16 sps:$4 sm:$0xff]   ;;  %v6711_v46 = vld [vmem:[#allocation9 + $0x32c] ss:$16 sps:$4 sm:$0xff]  }
 0x8a0   :  { %5059 = vmatprep.subr.bf16.mxu0 %v6654_v9  ;;  %5182 = vmatprep.subr.bf16.mxu1 %v6657_v16  ;;  %v3909_v9 = vunpack.c.l.b16 %v5757_v60  ;;  %v3915_v16 = vunpack.c.l.b16 %v5763_v63 }
 0x8a2   :  { %5051 = vmatmul.mubr.bf16.vlgmr.msra.gmra.mrb[48].mxu0 %v4046_v29  ;;  %5174 = vmatmul.mubr.bf16.vlgmr.msra.gmra.mrb[48].mxu1 %v4046_v29  ;;  %v6706_v29 = vld [vmem:[#allocation9 + $0x320] ss:$16 sps:$4 sm:$0xff]  }
 0x8a3   :  { %5060 = vmatpush1.bf16.msra.mxu0 %v6652_v28  ;;  %5183 = vmatpush1.bf16.msra.mxu1 %v6655_v55  ;;  %v5775_v28 = vcombine.low %v8257_v1, %v8257_v1  ;;  %v8319_v55 = vld [vmem:[#allocation3 + $0x58] sm:$0x88] }
 0x8a4   :  { %5061 = vmatprep.subr.bf16.mxu0 %v6660_v10  ;;  %5184 = vmatprep.subr.bf16.mxu1 %v6663_v36  ;;  %v6714_v10 = vld [vmem:[#allocation9 + $0x344] ss:$16 sps:$4 sm:$0xff]   ;;  %v6717_v36 = vld [vmem:[#allocation9 + $0x34c] ss:$16 sps:$4 sm:$0xff]   ;;  %v5778_v1 = vcombine.high %v8319_v55, %v8319_v55 }
 0x8a5   :  { %5091 = vmatprep.mubr.bf16.mxu0 %v4049_v37  ;;  %5214 = vmatprep.mubr.bf16.mxu1 %v4049_v37  ;;  %v3921_v37 = vunpack.c.l.b16 %v5769_v2  ;;  %v6727_v2 = vld [vmem:[#allocation9 + $0x388] ss:$16 sps:$4 sm:$0xff]  }
 0x8a7   :  { %5062 = vmatpush1.bf16.msra.mxu0 %v6658_v41  ;;  %5185 = vmatpush1.bf16.msra.mxu1 %v6661_v23  ;;  %v3912_v41 = vunpack.c.l.b16 %v5760_v48  ;;  %v3918_v23 = vunpack.c.l.b16 %v5766_v5 }
 0x8a8   :  { %5063 = vmatprep.subr.bf16.mxu0 %v6666_v25  ;;  %5186 = vmatprep.subr.bf16.mxu1 %v6669_v49  ;;  %v3990_v25 = vrot.slane %v3909_v9, 7  ;;  %v3991_v49 = vrot.slane %v3915_v16, 6  ;;  %v6732_v16 = vld [vmem:[#allocation9 + $0x3a4] ss:$16 sps:$4 sm:$0xff]  }
 0x8ab   :  { %5064 = vmatpush1.bf16.msra.mxu0 %v6664_v12  ;;  %5187 = vmatpush1.bf16.msra.mxu1 %v6667_v30  ;;  %v5781_v12 = vcombine.low %v8263_v4, %v8263_v4  ;;  %v8325_v30 = vld [vmem:[#allocation3 + $0x70] sm:$0x88]  ;;  %v5787_v4 = vcombine.low %v8270_v27, %v8270_v27 }
 0x8ac   :  { %5065 = vmatprep.subr.bf16.mxu0 %v6672_v45  ;;  %5188 = vmatprep.subr.bf16.mxu1 %v6675_v58  ;;  %v6712_v45 = vld [vmem:[#allocation9 + $0x340] ss:$16 sps:$4 sm:$0xff]   ;;  %v6715_v58 = vld [vmem:[#allocation9 + $0x348] ss:$16 sps:$4 sm:$0xff]   ;;  %v6726_v27 = vld [vmem:[#allocation9 + $0x384] ss:$16 sps:$4 sm:$0xff]  }
 0x8af   :  { %5066 = vmatpush1.bf16.msra.mxu0 %v6670_v0  ;;  %5189 = vmatpush1.bf16.msra.mxu1 %v6673_v62  ;;  %v6720_v0 = vld [vmem:[#allocation9 + $0x364] ss:$16 sps:$4 sm:$0xff]   ;;  %v3927_v62 = vunpack.c.l.b16 %v5775_v28 }
 0x8b0   :  { %5067 = vmatprep.subr.bf16.mxu0 %v6678_v24  ;;  %5190 = vmatprep.subr.bf16.mxu1 %v6681_v19  ;;  %v3924_v24 = vunpack.c.l.b16 %v5772_v59  ;;  %v6723_v19 = vld [vmem:[#allocation9 + $0x36c] ss:$16 sps:$4 sm:$0xff]  }
 0x8b3   :  { %5068 = vmatpush1.bf16.msra.mxu0 %v6676_v11  ;;  %5191 = vmatpush1.bf16.msra.mxu1 %v6679_v15  ;;  %v3993_v11 = vrot.slane %v3921_v37, 5  ;;  %v4032_v15 = vrot.slane %v3912_v41, 7  ;;  %v6730_v41 = vld [vmem:[#allocation9 + $0x3a0] ss:$16 sps:$4 sm:$0xff]  }
 0x8b4   :  { %5069 = vmatprep.subr.bf16.mxu0 %v6684_v40  ;;  %5192 = vmatprep.subr.bf16.mxu1 %v6687_v33  ;;  %v4033_v40 = vrot.slane %v3918_v23, 6  ;;  %v3992_v33 = vsel %vm3957_vm0, %v3991_v49, %v3990_v25  ;;  %v6733_v23 = vld [vmem:[#allocation9 + $0x3a8] ss:$16 sps:$4 sm:$0xff]   ;;  %v5799_v25 = vcombine.low %v8290_v43, %v8290_v43 }
 0x8b5   :  { %v8352_v49 = vld [vmem:[#allocation3 + $0xb8] sm:$0x88] }
 0x8b6   :  { %v4034_v63 = vsel %vm3957_vm0, %v4033_v40, %v4032_v15  ;;  %v6739_v43 = vld [vmem:[#allocation9 + $0x3c8] ss:$16 sps:$4 sm:$0xff]   ;;  %v3951_v15 = vunpack.c.l.b16 %v5799_v25  ;;  %v6794_v25 = vld [vmem:[#allocation9 + $0x4a0] ss:$16 sps:$4 sm:$0xff]  }
 0x8b7   :  { %5070 = vmatpush1.bf16.msra.mxu0 %v6682_v18  ;;  %5193 = vmatpush1.bf16.msra.mxu1 %v6685_v44  ;;  %v8332_v18 = vld [vmem:[#allocation3 + $0x88] sm:$0x88]  ;;  %v5784_v44 = vcombine.high %v8325_v30, %v8325_v30 }
 0x8b8   :  { %5071 = vmatprep.subr.bf16.mxu0 %v6690_v34  ;;  %5194 = vmatprep.subr.bf16.mxu1 %v6693_v31  ;;  %v3933_v34 = vunpack.c.l.b16 %v5781_v12  ;;  %v3930_v31 = vunpack.c.l.b16 %v5778_v1  ;;  %v5790_v60 = vcombine.high %v8332_v18, %v8332_v18  ;;  %v6738_v1 = vld [vmem:[#allocation9 + $0x3c4] ss:$16 sps:$4 sm:$0xff]  }
 0x8ba   :  { %v3942_v28 = vunpack.c.l.b16 %v5790_v60  ;;  %v6764_v60 = vld [vmem:[#allocation9 + $0x400] ss:$16 sps:$4 sm:$0xff]  }
 0x8bb   :  { %5072 = vmatpush1.bf16.msra.mxu0 %v6688_v51  ;;  %5195 = vmatpush1.bf16.msra.mxu1 %v6691_v17  ;;  %v6718_v51 = vld [vmem:[#allocation9 + $0x360] ss:$16 sps:$4 sm:$0xff]   ;;  %v6721_v17 = vld [vmem:[#allocation9 + $0x368] ss:$16 sps:$4 sm:$0xff]  }
 0x8bc   :  { %5073 = vmatprep.subr.bf16.mxu0 %v6696_v38  ;;  %5196 = vmatprep.subr.bf16.mxu1 %v6699_v22  ;;  %v5793_v38 = vcombine.low %v8277_v52, %v8277_v52  ;;  %v3995_v22 = vrot.slane %v3927_v62, 4  ;;  %v6724_v52 = vld [vmem:[#allocation9 + $0x380] ss:$16 sps:$4 sm:$0xff]  }
 0x8bf   :  { %5074 = vmatpush1.bf16.msra.mxu0 %v6694_v47  ;;  %5197 = vmatpush1.bf16.msra.mxu1 %v6697_v8  ;;  %v4035_v47 = vrot.slane %v3924_v24, 5  ;;  %v6729_v8 = vld [vmem:[#allocation9 + $0x38c] ss:$16 sps:$4 sm:$0xff]  }
 0x8c0   :  { %5075 = vmatprep.subr.bf16.mxu0 %v6702_v20  ;;  %5198 = vmatprep.subr.bf16.mxu1 %v6705_v3  ;;  %v3994_v20 = vsel %vm3960_vm1, %v3993_v11, %v3992_v33  ;;  %v8339_v3 = vld [vmem:[#allocation3 + $0xa0] sm:$0x88]  ;;  %v6747_v33 = vld [vmem:[#allocation9 + $0x3ec] ss:$16 sps:$4 sm:$0xff]  }
 0x8c1   :  { %v3996_v48 = vsel %vm3963_vm2, %v3995_v22, %v3994_v20  ;;  %v5796_v5 = vcombine.high %v8339_v3, %v8339_v3  ;;  %v4036_v9 = vsel %vm3960_vm1, %v4035_v47, %v4034_v63  ;;  %v6736_v11 = vld [vmem:[#allocation9 + $0x3c0] ss:$16 sps:$4 sm:$0xff]   ;;  %v6766_v47 = vld [vmem:[#allocation9 + $0x404] ss:$16 sps:$4 sm:$0xff]   ;;  %v6767_v63 = vld [vmem:[#allocation9 + $0x408] ss:$16 sps:$4 sm:$0xff]  }
 0x8c3   :  { %5076 = vmatpush1.bf16.msra.mxu0 %v6700_v53  ;;  %5199 = vmatpush1.bf16.msra.mxu1 %v6703_v32  ;;  %v3939_v53 = vunpack.c.l.b16 %v5787_v4  ;;  %v3936_v32 = vunpack.c.l.b16 %v5784_v44  ;;  %v3948_v12 = vunpack.c.l.b16 %v5796_v5  ;;  %v6744_v4 = vld [vmem:[#allocation9 + $0x3e4] ss:$16 sps:$4 sm:$0xff]   ;;  %v6776_v5 = vld [vmem:[#allocation9 + $0x440] ss:$16 sps:$4 sm:$0xff]  }
 0x8c4   :  { %5077 = vmatprep.subr.bf16.mxu0 %v6708_v13  ;;  %5200 = vmatprep.subr.bf16.mxu1 %v6711_v46  ;;  %v3997_v13 = vrot.slane %v3933_v34, 3  ;;  %v4037_v46 = vrot.slane %v3930_v31, 4 }
 0x8c5   :  { %v3999_v59 = vrot.slane %v3939_v53, 2  ;;  %v4043_v40 = vrot.slane %v3948_v12, 1  ;;  %v6772_v53 = vld [vmem:[#allocation9 + $0x424] ss:$16 sps:$4 sm:$0xff]   ;;  %v6797_v12 = vld [vmem:[#allocation9 + $0x4a8] ss:$16 sps:$4 sm:$0xff]  }
 0x8c6   :  { %v4038_v37 = vsel %vm3963_vm2, %v4037_v46, %v4036_v9  ;;  %v6770_v46 = vld [vmem:[#allocation9 + $0x420] ss:$16 sps:$4 sm:$0xff]   ;;  %v6779_v9 = vld [vmem:[#allocation9 + $0x448] ss:$16 sps:$4 sm:$0xff]  }
 0x8c7   :  { %5078 = vmatpush1.bf16.msra.mxu0 %v6706_v29  ;;  %5201 = vmatpush1.bf16.msra.mxu1 %v6709_v6  ;;  %v6735_v29 = vld [vmem:[#allocation9 + $0x3ac] ss:$16 sps:$4 sm:$0xff]   ;;  %v3945_v6 = vunpack.c.l.b16 %v5793_v38 }
 0x8c8   :  { %5079 = vmatprep.subr.bf16.mxu0 %v6714_v10  ;;  %5202 = vmatprep.subr.bf16.mxu1 %v6717_v36  ;;  %v4039_v10 = vrot.slane %v3936_v32, 3  ;;  %v3998_v36 = vsel %vm3966_vm3, %v3997_v13, %v3996_v48  ;;  %v6775_v32 = vld [vmem:[#allocation9 + $0x42c] ss:$16 sps:$4 sm:$0xff]  }
 0x8c9   :  { %v4000_v62 = vsel %vm3969_vm4, %v3999_v59, %v3998_v36  ;;  %v6781_v48 = vld [vmem:[#allocation9 + $0x44c] ss:$16 sps:$4 sm:$0xff]   ;;  %v6790_v59 = vld [vmem:[#allocation9 + $0x484] ss:$16 sps:$4 sm:$0xff]   ;;  %v6788_v36 = vld [vmem:[#allocation9 + $0x480] ss:$16 sps:$4 sm:$0xff]  }
 0x8ca   :  { %v4040_v24 = vsel %vm3966_vm3, %v4039_v10, %v4038_v37  ;;  %v6793_v10 = vld [vmem:[#allocation9 + $0x48c] ss:$16 sps:$4 sm:$0xff]   ;;  %v6791_v37 = vld [vmem:[#allocation9 + $0x488] ss:$16 sps:$4 sm:$0xff]  }
 0x8cb   :  { %5080 = vmatpush1.bf16.msra.mxu0 %v6712_v45  ;;  %5203 = vmatpush1.bf16.msra.mxu1 %v6715_v58  ;;  %v6741_v45 = vld [vmem:[#allocation9 + $0x3cc] ss:$16 sps:$4 sm:$0xff]   ;;  %v4001_v58 = vrot.slane %v3945_v6, 1  ;;  %v6782_v6 = vld [vmem:[#allocation9 + $0x460] ss:$16 sps:$4 sm:$0xff]  }
 0x8cc   :  { %5081 = vmatprep.subr.bf16.mxu0 %v6720_v0  ;;  %5204 = vmatprep.subr.bf16.mxu1 %v6723_v19  ;;  %v4041_v0 = vrot.slane %v3942_v28, 2  ;;  %v5802_v19 = vcombine.high %v8352_v49, %v8352_v49  ;;  %v6785_v28 = vld [vmem:[#allocation9 + $0x468] ss:$16 sps:$4 sm:$0xff]  }
 0x8cd   :  { %v4002_v44 = vsel %vm3972_vm5, %v4001_v58, %v4000_v62  ;;  %v6800_v58 = vld [vmem:[#allocation9 + $0x4c0] ss:$16 sps:$4 sm:$0xff]   ;;  %v6808_v62 = vld [vmem:[#allocation9 + $0x4e4] ss:$16 sps:$4 sm:$0xff]  }
 0x8ce   :  { %v4042_v34 = vsel %vm3969_vm4, %v4041_v0, %v4040_v24  ;;  %v3954_v31 = vunpack.c.l.b16 %v5802_v19  ;;  %v4003_v38 = vsel %vm3974_vm6, %v3951_v15, %v4002_v44  ;;  %v6803_v0 = vld [vmem:[#allocation9 + $0x4c8] ss:$16 sps:$4 sm:$0xff]   ;;  %v6811_v24 = vld [vmem:[#allocation9 + $0x4ec] ss:$16 sps:$4 sm:$0xff]   ;;  %v6806_v19 = vld [vmem:[#allocation9 + $0x4e0] ss:$16 sps:$4 sm:$0xff]  }
 0x8cf   :  { %5082 = vmatpush1.bf16.msra.mxu0 %v6718_v51  ;;  %5205 = vmatpush1.bf16.msra.mxu1 %v6721_v17  ;;  %v6742_v51 = vld [vmem:[#allocation9 + $0x3e0] ss:$16 sps:$4 sm:$0xff]   ;;  %v6745_v17 = vld [vmem:[#allocation9 + $0x3e8] ss:$16 sps:$4 sm:$0xff]   ;;  %v4044_v22 = vsel %vm3972_vm5, %v4043_v40, %v4042_v34  ;;  %v6817_v15 = vld [vmem:[#allocation9 + $0x50c] ss:$16 sps:$4 sm:$0xff]   ;;  %v5759_v40 = vcombine.low %v8305_v7, %v8305_v7 }
 0x8d0   :  { %5083 = vmatprep.subr.bf16.mxu0 %v6726_v27  ;;  %5206 = vmatprep.subr.bf16.mxu1 %v6729_v8  ;;  %v6769_v27 = vld [vmem:[#allocation9 + $0x40c] ss:$16 sps:$4 sm:$0xff]   ;;  %v4048_v8 = vpack.c.b16 %v4003_v38, %v4003_v38  ;;  %v4045_v20 = vsel %vm3974_vm6, %v3954_v31, %v4044_v22  ;;  %v6815_v44 = vld [vmem:[#allocation9 + $0x508] ss:$16 sps:$4 sm:$0xff]   ;;  %v6820_v34 = vld [vmem:[#allocation9 + $0x524] ss:$16 sps:$4 sm:$0xff]  }
 0x8d1   :  { %v4051_v13 = vpack.c.b16 %v4045_v20, %v4045_v20  ;;  %v6823_v31 = vld [vmem:[#allocation9 + $0x52c] ss:$16 sps:$4 sm:$0xff]   ;;  %v6818_v22 = vld [vmem:[#allocation9 + $0x520] ss:$16 sps:$4 sm:$0xff]   ;;  %v6821_v7 = vld [vmem:[#allocation9 + $0x528] ss:$16 sps:$4 sm:$0xff]  }
 0x8d3   :  { %5084 = vmatpush1.bf16.msra.mxu0 %v6724_v52  ;;  %5207 = vmatpush1.bf16.msra.mxu1 %v6727_v2  ;;  %v6773_v52 = vld [vmem:[#allocation9 + $0x428] ss:$16 sps:$4 sm:$0xff]   ;;  %v6778_v2 = vld [vmem:[#allocation9 + $0x444] ss:$16 sps:$4 sm:$0xff]  }
 0x8d4   :  { %5085 = vmatprep.subr.bf16.mxu0 %v6732_v16  ;;  %5208 = vmatprep.subr.bf16.mxu1 %v6735_v29  ;;  %v6784_v16 = vld [vmem:[#allocation9 + $0x464] ss:$16 sps:$4 sm:$0xff]   ;;  %v6787_v29 = vld [vmem:[#allocation9 + $0x46c] ss:$16 sps:$4 sm:$0xff]  }
 0x8d7   :  { %5086 = vmatpush1.bf16.msra.mxu0 %v6730_v41  ;;  %5209 = vmatpush1.bf16.msra.mxu1 %v6733_v23  ;;  %v6796_v41 = vld [vmem:[#allocation9 + $0x4a4] ss:$16 sps:$4 sm:$0xff]   ;;  %v6799_v23 = vld [vmem:[#allocation9 + $0x4ac] ss:$16 sps:$4 sm:$0xff]  }
 0x8d8   :  { %5087 = vmatprep.subr.bf16.mxu0 %v6738_v1  ;;  %5210 = vmatprep.subr.bf16.mxu1 %v6741_v45  ;;  %v6802_v1 = vld [vmem:[#allocation9 + $0x4c4] ss:$16 sps:$4 sm:$0xff]   ;;  %v6805_v45 = vld [vmem:[#allocation9 + $0x4cc] ss:$16 sps:$4 sm:$0xff]  }
 0x8db   :  { %5088 = vmatpush1.bf16.msra.mxu0 %v6736_v11  ;;  %5211 = vmatpush1.bf16.msra.mxu1 %v6739_v43  ;;  %v6809_v11 = vld [vmem:[#allocation9 + $0x4e8] ss:$16 sps:$4 sm:$0xff]   ;;  %v6814_v43 = vld [vmem:[#allocation9 + $0x504] ss:$16 sps:$4 sm:$0xff]  }
 0x8dc   :  { %5089 = vmatprep.subr.bf16.mxu0 %v6744_v4  ;;  %5212 = vmatprep.subr.bf16.mxu1 %v6747_v33  ;;  %v5765_v4 = vcombine.low %v8307_v54, %v8307_v54  ;;  %v6812_v33 = vld [vmem:[#allocation9 + $0x500] ss:$16 sps:$4 sm:$0xff]   ;;  %v5777_v54 = vcombine.low %v8319_v55, %v8319_v55 }
 0x8de   :  { %v3917_v38 = vunpack.c.l.b16 %v5765_v4  ;;  %v6859_v4 = vld [vmem:[#allocation9 + $0x5ec] ss:$16 sps:$4 sm:$0xff]  }
 0x8df   :  { %5090 = vmatpush1.bf16.msra.mxu0 %v6742_v51  ;;  %5213 = vmatpush1.bf16.msra.mxu1 %v6745_v17  ;;  %v5771_v51 = vcombine.low %v8311_v42, %v8311_v42  ;;  %v3911_v17 = vunpack.c.l.b16 %v5759_v40  ;;  %v6824_v42 = vld [vmem:[#allocation9 + $0x540] ss:$16 sps:$4 sm:$0xff]   ;;  %v6856_v40 = vld [vmem:[#allocation9 + $0x5e4] ss:$16 sps:$4 sm:$0xff]  }
 0x8e0   :  { %5100 = vmatprep.subr.bf16.mxu0 %v6766_v47  ;;  %5223 = vmatprep.subr.bf16.mxu1 %v6769_v27  ;;  %v6826_v47 = vld [vmem:[#allocation9 + $0x544] ss:$16 sps:$4 sm:$0xff]   ;;  %v6829_v27 = vld [vmem:[#allocation9 + $0x54c] ss:$16 sps:$4 sm:$0xff]  }
 0x8e1   :  { %v4018_v20 = vrot.slane %v3911_v17, 7 }
 0x8e2   :  { %5092 = vmatmul.mubr.bf16.vlgmr.msra.gmra.mrb[48].mxu0 %v4048_v8  ;;  %5215 = vmatmul.mubr.bf16.vlgmr.msra.gmra.mrb[48].mxu1 %v4048_v8  ;;  %v3923_v8 = vunpack.c.l.b16 %v5771_v51 }
 0x8e3   :  { %5101 = vmatpush1.bf16.msra.mxu0 %v6764_v60  ;;  %5224 = vmatpush1.bf16.msra.mxu1 %v6767_v63  ;;  %v4019_v60 = vrot.slane %v3917_v38, 6  ;;  %v5783_v63 = vcombine.low %v8325_v30, %v8325_v30  ;;  %v6833_v30 = vld [vmem:[#allocation9 + $0x568] ss:$16 sps:$4 sm:$0xff]   ;;  %v8534_v38 = vcombine.high %v8522_v61, %v8523_v26 }
 0x8e4   :  { %5102 = vmatprep.subr.bf16.mxu0 %v6772_v53  ;;  %5225 = vmatprep.subr.bf16.mxu1 %v6775_v32  ;;  %v6827_v53 = vld [vmem:[#allocation9 + $0x548] ss:$16 sps:$4 sm:$0xff]   ;;  %v3929_v32 = vunpack.c.l.b16 %v5777_v54  ;;  %v4021_v55 = vrot.slane %v3923_v8, 5  ;;  %v8536_v8 = vcombine.high %v8528_v50, %v8529_v35 }
 0x8e5   :  { %5132 = vmatprep.mubr.bf16.mxu0 %v4051_v13  ;;  %5255 = vmatprep.mubr.bf16.mxu1 %v4051_v13  ;;  %v6832_v13 = vld [vmem:[#allocation9 + $0x564] ss:$16 sps:$4 sm:$0xff]  }
 0x8e7   :  { %5103 = vmatpush1.bf16.msra.mxu0 %v6770_v46  ;;  %5226 = vmatpush1.bf16.msra.mxu1 %v6773_v52  ;;  %v6835_v46 = vld [vmem:[#allocation9 + $0x56c] ss:$16 sps:$4 sm:$0xff]   ;;  %v5789_v52 = vcombine.low %v8332_v18, %v8332_v18  ;;  %v6836_v18 = vld [vmem:[#allocation9 + $0x580] ss:$16 sps:$4 sm:$0xff]  }
 0x8e8   :  { %5104 = vmatprep.subr.bf16.mxu0 %v6778_v2  ;;  %5227 = vmatprep.subr.bf16.mxu1 %v6781_v48  ;;  %v4020_v2 = vsel %vm3957_vm0, %v4019_v60, %v4018_v20  ;;  %v3935_v48 = vunpack.c.l.b16 %v5783_v63  ;;  %v8537_v60 = vcombine.high %v8531_v39, %v8532_v56 }
 0x8eb   :  { %5105 = vmatpush1.bf16.msra.mxu0 %v6776_v5  ;;  %5228 = vmatpush1.bf16.msra.mxu1 %v6779_v9  ;;  %v6830_v5 = vld [vmem:[#allocation9 + $0x560] ss:$16 sps:$4 sm:$0xff]   ;;  %v4023_v9 = vrot.slane %v3929_v32, 4 }
 0x8ec   :  { %5106 = vmatprep.subr.bf16.mxu0 %v6784_v16  ;;  %5229 = vmatprep.subr.bf16.mxu1 %v6787_v29  ;;  %v6838_v16 = vld [vmem:[#allocation9 + $0x584] ss:$16 sps:$4 sm:$0xff]   ;;  %v6841_v29 = vld [vmem:[#allocation9 + $0x58c] ss:$16 sps:$4 sm:$0xff]  }
 0x8ef   :  { %5107 = vmatpush1.bf16.msra.mxu0 %v6782_v6  ;;  %5230 = vmatpush1.bf16.msra.mxu1 %v6785_v28  ;;  %v5795_v6 = vcombine.low %v8339_v3, %v8339_v3  ;;  %v4022_v28 = vsel %vm3960_vm1, %v4021_v55, %v4020_v2  ;;  %v6842_v3 = vld [vmem:[#allocation9 + $0x5a0] ss:$16 sps:$4 sm:$0xff]  }
 0x8f0   :  { %5108 = vmatprep.subr.bf16.mxu0 %v6790_v59  ;;  %5231 = vmatprep.subr.bf16.mxu1 %v6793_v10  ;;  %v3941_v59 = vunpack.c.l.b16 %v5789_v52  ;;  %v4025_v10 = vrot.slane %v3935_v48, 3 }
 0x8f3   :  { %5109 = vmatpush1.bf16.msra.mxu0 %v6788_v36  ;;  %5232 = vmatpush1.bf16.msra.mxu1 %v6791_v37  ;;  %v6839_v36 = vld [vmem:[#allocation9 + $0x588] ss:$16 sps:$4 sm:$0xff]   ;;  %v4024_v37 = vsel %vm3963_vm2, %v4023_v9, %v4022_v28  ;;  %v6877_v28 = vld [vmem:[#allocation11] sm:$0xff]  }
 0x8f4   :  { %5110 = vmatprep.subr.bf16.mxu0 %v6796_v41  ;;  %5233 = vmatprep.subr.bf16.mxu1 %v6799_v23  ;;  %v6844_v41 = vld [vmem:[#allocation9 + $0x5a4] ss:$16 sps:$4 sm:$0xff]   ;;  %v6847_v23 = vld [vmem:[#allocation9 + $0x5ac] ss:$16 sps:$4 sm:$0xff]  }
 0x8f7   :  { %5111 = vmatpush1.bf16.msra.mxu0 %v6794_v25  ;;  %5234 = vmatpush1.bf16.msra.mxu1 %v6797_v12  ;;  %v3947_v25 = vunpack.c.l.b16 %v5795_v6  ;;  %v4027_v12 = vrot.slane %v3941_v59, 2  ;;  %v6876_v6 = vld [vmem:[#allocation11 + $0x40] sm:$0xff]   ;;  %v6878_v59 = vld [vmem:[#allocation11 + $0x48] sm:$0xff]  }
 0x8f8   :  { %5112 = vmatprep.subr.bf16.mxu0 %v6802_v1  ;;  %5235 = vmatprep.subr.bf16.mxu1 %v6805_v45  ;;  %v4026_v1 = vsel %vm3966_vm3, %v4025_v10, %v4024_v37  ;;  %v6845_v45 = vld [vmem:[#allocation9 + $0x5a8] ss:$16 sps:$4 sm:$0xff]  }
 0x8f9   :  { %v6879_v10 = vld [vmem:[#allocation11 + $0x8] sm:$0xff]   ;;  %v6882_v37 = vld [vmem:[#allocation11 + $0x58] sm:$0xff]  }
 0x8fb   :  { %5113 = vmatpush1.bf16.msra.mxu0 %v6800_v58  ;;  %5236 = vmatpush1.bf16.msra.mxu1 %v6803_v0  ;;  %v5801_v58 = vcombine.low %v8352_v49, %v8352_v49  ;;  %v6850_v0 = vld [vmem:[#allocation9 + $0x5c4] ss:$16 sps:$4 sm:$0xff]   ;;  %v6854_v49 = vld [vmem:[#allocation9 + $0x5e0] ss:$16 sps:$4 sm:$0xff]  }
 0x8fc   :  { %5114 = vmatprep.subr.bf16.mxu0 %v6808_v62  ;;  %5237 = vmatprep.subr.bf16.mxu1 %v6811_v24  ;;  %v6853_v62 = vld [vmem:[#allocation9 + $0x5cc] ss:$16 sps:$4 sm:$0xff]   ;;  %v4029_v24 = vrot.slane %v3947_v25, 1 }
 0x8fd   :  { %v6886_v25 = vld [vmem:[#allocation11 + $0x68] sm:$0xff]  }
 0x8ff   :  { %5115 = vmatpush1.bf16.msra.mxu0 %v6806_v19  ;;  %5238 = vmatpush1.bf16.msra.mxu1 %v6809_v11  ;;  %v4028_v19 = vsel %vm3969_vm4, %v4027_v12, %v4026_v1  ;;  %v6848_v11 = vld [vmem:[#allocation9 + $0x5c0] ss:$16 sps:$4 sm:$0xff]   ;;  %v6887_v12 = vld [vmem:[#allocation11 + $0x28] sm:$0xff]  }
 0x900   :  { %5116 = vmatprep.subr.bf16.mxu0 %v6814_v43  ;;  %5239 = vmatprep.subr.bf16.mxu1 %v6817_v15  ;;  %v6851_v43 = vld [vmem:[#allocation9 + $0x5c8] ss:$16 sps:$4 sm:$0xff]   ;;  %v3953_v15 = vunpack.c.l.b16 %v5801_v58  ;;  %v6888_v1 = vld [vmem:[#allocation11 + $0x70] sm:$0xff]  }
 0x901   :  { %v6891_v58 = vld [vmem:[#allocation11 + $0x38] sm:$0xff]  }
 0x903   :  { %5117 = vmatpush1.bf16.msra.mxu0 %v6812_v33  ;;  %5240 = vmatpush1.bf16.msra.mxu1 %v6815_v44  ;;  %v4030_v33 = vsel %vm3972_vm5, %v4029_v24, %v4028_v19  ;;  %v6857_v44 = vld [vmem:[#allocation9 + $0x5e8] ss:$16 sps:$4 sm:$0xff]  }
 0x904   :  { %5118 = vmatprep.subr.bf16.mxu0 %v6820_v34  ;;  %5241 = vmatprep.subr.bf16.mxu1 %v6823_v31  ;;  %v4031_v34 = vsel %vm3974_vm6, %v3953_v15, %v4030_v33 }
 0x905   :  { %v4050_v31 = vpack.c.b16 %v4031_v34, %v4031_v34 }
 0x907   :  { %5119 = vmatpush1.bf16.msra.mxu0 %v6818_v22  ;;  %5242 = vmatpush1.bf16.msra.mxu1 %v6821_v7  ;;  %v8535_v7 = vcombine.high %v8525_v14, %v8526_v21 }
 0x908   :  { %5120 = vmatprep.subr.bf16.mxu0 %v6826_v47  ;;  %5243 = vmatprep.subr.bf16.mxu1 %v6829_v27 }
 0x90b   :  { %5121 = vmatpush1.bf16.msra.mxu0 %v6824_v42  ;;  %5244 = vmatpush1.bf16.msra.mxu1 %v6827_v53 }
 0x90c   :  { %5122 = vmatprep.subr.bf16.mxu0 %v6832_v13  ;;  %5245 = vmatprep.subr.bf16.mxu1 %v6835_v46 }
 0x90f   :  { %5123 = vmatpush1.bf16.msra.mxu0 %v6830_v5  ;;  %5246 = vmatpush1.bf16.msra.mxu1 %v6833_v30 }
 0x910   :  { %5124 = vmatprep.subr.bf16.mxu0 %v6838_v16  ;;  %5247 = vmatprep.subr.bf16.mxu1 %v6841_v29 }
 0x913   :  { %5125 = vmatpush1.bf16.msra.mxu0 %v6836_v18  ;;  %5248 = vmatpush1.bf16.msra.mxu1 %v6839_v36  ;;  %v6880_v18 = vld [vmem:[#allocation11 + $0x50] sm:$0xff]  }
 0x914   :  { %5126 = vmatprep.subr.bf16.mxu0 %v6844_v41  ;;  %5249 = vmatprep.subr.bf16.mxu1 %v6847_v23  ;;  %v6881_v36 = vld [vmem:[#allocation11 + $0x10] sm:$0xff]   ;;  %v6884_v41 = vld [vmem:[#allocation11 + $0x60] sm:$0xff]  }
 0x915   :  { %v6885_v23 = vld [vmem:[#allocation11 + $0x20] sm:$0xff]  }
 0x917   :  { %5127 = vmatpush1.bf16.msra.mxu0 %v6842_v3  ;;  %5250 = vmatpush1.bf16.msra.mxu1 %v6845_v45  ;;  %v6889_v3 = vld [vmem:[#allocation11 + $0x30] sm:$0xff]   ;;  %v6890_v45 = vld [vmem:[#allocation11 + $0x78] sm:$0xff]  }
 0x918   :  { %5128 = vmatprep.subr.bf16.mxu0 %v6850_v0  ;;  %5251 = vmatprep.subr.bf16.mxu1 %v6853_v62  ;;  %v3765_v0 = vld [vmem:[%s8434_s5] sm:$0xf]  ;;  %v8538_v62 = vld [vmem:[#allocation23_spill] sm:$0xff] }
 0x919   :  { %v8539_v24 = vsub.s32 0, %v8538_v62 }
 0x91b   :  { %5129 = vmatpush1.bf16.msra.mxu0 %v6848_v11  ;;  %5252 = vmatpush1.bf16.msra.mxu1 %v6851_v43  ;;  %v3770_v19 = vrot.slane %v3765_v0, %v8539_v24  ;;  %v8540_v11 = vsub.s32 1, %v8538_v62 }
 0x91c   :  { %5130 = vmatprep.subr.bf16.mxu0 %v6856_v40  ;;  %5253 = vmatprep.subr.bf16.mxu1 %v6859_v4 }
 0x91d   :  { %v3774_v43 = vrot.slane %v3765_v0, %v8540_v11 }
 0x91f   :  { %5131 = vmatpush1.bf16.msra.mxu0 %v6854_v49  ;;  %5254 = vmatpush1.bf16.msra.mxu1 %v6857_v44 }
 0x920   :  { %6015 = vmatprep.subr.bf16.mxu0 %v6876_v6 }
 0x922   :  { %5133 = vmatmul.mubr.bf16.vlgmr.msra.gmra.mrb[48].mxu0 %v4050_v31  ;;  %5256 = vmatmul.mubr.bf16.vlgmr.msra.gmra.mrb[48].mxu1 %v4050_v31 }
 0x923   :  { %6016 = vmatpush3.bf16.msra.mxu0 %v6877_v28 }
 0x924   :  { %6017 = vmatprep.subr.bf16.mxu0 %v6878_v59 }
 0x927   :  { %6018 = vmatpush3.bf16.msra.mxu0 %v6879_v10 }
 0x928   :  { %6019 = vmatprep.subr.bf16.mxu0 %v6880_v18 }
 0x92b   :  { %6020 = vmatpush3.bf16.msra.mxu0 %v6881_v36 }
 0x92c   :  { %6021 = vmatprep.subr.bf16.mxu0 %v6882_v37 }
 0x935   :  { %v3473_v51 = vpop.f32.mrb[44].mxu0  ;;  %v3514_v17 = vpop.f32.mrb[44].mxu1 }
 0x936   :  { %v3521_v22 = vadd.f32 %v3473_v51, %v8534_v38  ;;  %v3523_v54 = vadd.f32 %v3514_v17, %v8535_v7  ;;  %v3475_v47 = vpop.f32.mrb[45].mxu0  ;;  %v3516_v27 = vpop.f32.mrb[45].mxu1  ;;  %v8541_v7 = vsub.s32 3, %v8538_v62 }
 0x937   :  { %v3522_v20 = vadd.f32 %v3475_v47, %v8536_v8  ;;  %v3524_v63 = vadd.f32 %v3516_v27, %v8537_v60  ;;  %v3477_v42 = vpop.f32.mrb[46].mxu0  ;;  %v3518_v53 = vpop.f32.mrb[46].mxu1  ;;  %v8542_v27 = vsub.s32 2, %v8538_v62 }
 0x938   :  { %v5752_v32 = vmul.f32 -1.442695, %v3521_v22  ;;  %v3478_v13 = vpop.f32.mrb[47].mxu0  ;;  %v3519_v61 = vpop.f32.mrb[47].mxu1 }
 0x939   :  { %v5753_v26 = vmul.f32 -1.442695, %v3522_v20  ;;  %v5754_v14 = vmul.f32 -1.442695, %v3524_v63  ;;  %v3778_v8 = vrot.slane %v3765_v0, %v8542_v27 }
 0x93a   :  { %7004 = vpow2.f32 %v5752_v32 }
 0x93b   :  { %7006 = vpow2.f32 %v5753_v26 }
 0x93c   :  { %7008 = vpow2.f32 %v5754_v14 }
 0x93d   :  { %7010 = vtanh.f32 %v3523_v54  ;;  %v3782_v54 = vrot.slane %v3765_v0, %v8541_v7 }
 0x944   :  { %v7005_v21 = vpop.eup %7004 }
 0x945   :  { %v7007_v46 = vpop.eup %7006  ;;  %v3528_v55 = vadd.f32 1.0, %v7005_v21 }
 0x946   :  { %v3534_v50 = vadd.f32 1.0, %v7007_v46  ;;  %v7009_v35 = vpop.eup %7008 }
 0x947   :  { %7012 = vrcp.f32 %v3528_v55  ;;  %v7011_v39 = vpop.eup %7010  ;;  %v3541_v48 = vadd.f32 1.0, %v7009_v35 }
 0x948   :  { %7014 = vrcp.f32 %v3534_v50 }
 0x949   :  { %7016 = vrcp.f32 %v3541_v48 }
 0x951   :  { %v7013_v56 = vpop.eup %7012 }
 0x952   :  { %v7015_v52 = vpop.eup %7014  ;;  %v3545_v2 = vmul.f32 %v7013_v56, %v7011_v39 }
 0x953   :  { %v3544_v5 = vmul.f32 %v7015_v52, %v8227_v57  ;;  %v7017_v9 = vpop.eup %7016  ;;  %v6883_v57 = vld [vmem:[#allocation11 + $0x18] sm:$0xff]  }
 0x954   :  { %6022 = vmatpush3.bf16.msra.mxu0 %v6883_v57 }
 0x955   :  { %v3546_v30 = vadd.f32 %v3545_v2, %v3544_v5  ;;  %6023 = vmatprep.subr.bf16.mxu0 %v6884_v41  ;;  %v5998_v5 = vld [vmem:[%s8436_s7] ss:$0 sm:$0xff] }
 0x957   :  { %7018 = vtanh.f32 %v3546_v30 }
 0x958   :  { %6024 = vmatpush3.bf16.msra.mxu0 %v6885_v23 }
 0x959   :  { %6025 = vmatprep.subr.bf16.mxu0 %v6886_v25 }
 0x95c   :  { %6026 = vmatpush3.bf16.msra.mxu0 %v6887_v12 }
 0x95d   :  { %6027 = vmatprep.subr.bf16.mxu0 %v6888_v1 }
 0x960   :  { %6028 = vmatpush3.bf16.msra.mxu0 %v6889_v3 }
 0x961   :  { %v7019_v16 = vpop.eup %7018  ;;  %6029 = vmatprep.subr.bf16.mxu0 %v6890_v45 }
 0x962   :  { %v8399_v29 = vmul.f32 %v7019_v16, %v7017_v9 }
 0x964   :  { %6030 = vmatpush3.bf16.msra.mxu0 %v6891_v58  ;;  %v5288_v2 = vpack.c.bf16 %v8399_v29, %v8399_v29 }
 0x9f5   :  { %v5134_v15 = vpop.f32.mrb[48].mxu0  ;;  %v5257_v40 = vpop.f32.mrb[48].mxu1 }
 0x9f6   :  { %v6069_v4 = vadd.f32 %v5134_v15, %v3770_v19  ;;  %v5136_v33 = vpop.f32.mrb[49].mxu0  ;;  %v5259_v49 = vpop.f32.mrb[49].mxu1  ;;  %v6071_v60 = vadd.f32 %v5257_v40, %v3778_v8 }
 0x9f7   :  { %v6070_v44 = vadd.f32 %v5136_v33, %v3774_v43  ;;  %v5138_v34 = vpop.f32.mrb[50].mxu0  ;;  %v5261_v31 = vpop.f32.mrb[50].mxu1  ;;  %v6072_v47 = vadd.f32 %v5259_v49, %v3782_v54 }
 0x9f8   :  { %v5995_v51 = vmul.f32 -1.442695, %v6069_v4  ;;  %v5139_v17 = vpop.f32.mrb[51].mxu0  ;;  %v5262_v38 = vpop.f32.mrb[51].mxu1 }
 0x9f9   :  { %v5996_v22 = vmul.f32 -1.442695, %v6070_v44  ;;  %v5997_v20 = vmul.f32 -1.442695, %v6072_v47 }
 0x9fa   :  { %7020 = vpow2.f32 %v5995_v51 }
 0x9fb   :  { %7022 = vpow2.f32 %v5996_v22 }
 0x9fc   :  { %7024 = vpow2.f32 %v5997_v20 }
 0x9fd   :  { %7026 = vtanh.f32 %v6071_v60 }
 0xa04   :  { %v7021_v63 = vpop.eup %7020 }
 0xa05   :  { %v7023_v42 = vpop.eup %7022  ;;  %v5267_v53 = vadd.f32 1.0, %v7021_v63 }
 0xa06   :  { %v5273_v32 = vadd.f32 1.0, %v7023_v42  ;;  %v7025_v13 = vpop.eup %7024 }
 0xa07   :  { %7028 = vrcp.f32 %v5267_v53  ;;  %v7027_v61 = vpop.eup %7026  ;;  %v5280_v46 = vadd.f32 1.0, %v7025_v13 }
 0xa08   :  { %7030 = vrcp.f32 %v5273_v32 }
 0xa09   :  { %7032 = vrcp.f32 %v5280_v46 }
 0xa11   :  { %v7029_v26 = vpop.eup %7028 }
 0xa12   :  { %v7031_v14 = vpop.eup %7030  ;;  %v5284_v21 = vmul.f32 %v7029_v26, %v7027_v61 }
 0xa13   :  { %v5283_v55 = vmul.f32 0.0, %v7031_v14  ;;  %v7033_v35 = vpop.eup %7032 }
 0xa15   :  { %v5285_v50 = vadd.f32 %v5284_v21, %v5283_v55 }
 0xa17   :  { %7034 = vtanh.f32 %v5285_v50 }
 0xa21   :  { %v7035_v39 = vpop.eup %7034 }
 0xa22   :  { %v5287_v56 = vmul.f32 %v7035_v39, %v7033_v35 }
 0xa24   :  { %v5289_v52 = vpack.c.bf16 %v5287_v56, %v5287_v56 }
 0xa26   :  { %5457 = vmatprep.mubr.bf16.mxu0 %v5289_v52 }
 0xa27   :  { %5458 = vmatmul.mubr.bf16.vlgmr.msra.gmra.mrb[52].mxu0 %v5288_v2 }
 0xafa   :  { %v6031_v48 = vpop.f32.mrb[52].mxu0 }
 0xafb   :  { %v6032_v30 = vpop.f32.mrb[53].mxu0 }
 0xafc   :  { %v6033_v9 = vadd.f32 %v6032_v30, %v6031_v48  ;;  %v6034_v16 = vpop.f32.mrb[54].mxu0 }
 0xafd   :  { %v6035_v6 = vpop.f32.mrb[55].mxu0 }
 0xafe   :  { %v5460_v28 = vadd.f32 %v6033_v9, %v5998_v5 }
 0xb00   :  { %5465 = vst [vmem:[#allocation12] sm:$0xff] %v5460_v28 }
 0xb01   :  { %7189 = shalt.err (!%p7186_p2)
}
 0xb02   :  { %s7190_s7 = scalar_lea.hbm %s8437_s8, 128 }
 0xb03   :  { %p7191_p3 = scmp.ne.s32.totalorder %s8437_s8, %s7190_s7  ;;  %p7194_p4 = scmp.lt.u32.totalorder %s7190_s7, %s8437_s8 }
 0xb05   :  { %p7196_p5 = pnand %p7194_p4, %p7191_p3 }
 0xb07   :  { %7199 = shalt.err (!%p7196_p5)
}
 0xb08   :  { %5475 = dma.vmem_to_hbm [thread:$0]  %s5473_s29, 128, %s8437_s8, [#allocation5]  }
 0xb09   :  { %7206 = dma.done.wait [#allocation5], 128  }
 0xb0a   :  { %7207 = vsyncadd [#allocation5], 4294967168 }
 0xb0b   :  { %5479 = vsyncpa [#allocation4], 1 }
 0xb0c   :  { %5480 = vsyncpa [#allocation7], 1 }
 0xb0d   :  { %5481 = vsyncpa [#allocation10], 1 }
 0xb0e   :  { %5482 = vsyncpa [#allocation5], 1 }

// kernel: tpu_custom_call.1
= control target key start
LH: loop header
LB: loop body
LE: loop exit
PB: predicated region body
PF: predicated region fallthrough
CT: control target
= control target key end

     0   :  { %13 = vsyncpa [#allocation4], 0  ;;  %s8429_s0 = inlined_call_operand.hbm [shape: bf16[8,8,768], index: 0, kind: input, shape index: {}]   ;;  %s8430_s1 = inlined_call_operand.hbm [shape: bf16[768,512], index: 1, kind: input, shape index: {}]   ;;  %s8431_s2 = inlined_call_operand.hbm [shape: bf16[128,512], index: 2, kind: input, shape index: {}]   ;;  %s8432_s3 = inlined_call_operand.vmem [shape: f32[1,512], index: 3, kind: input, shape index: {}]   ;;  %s8433_s4 = inlined_call_operand.hbm [shape: bf16[768,512], index: 4, kind: input, shape index: {}]   ;;  %s8434_s5 = inlined_call_operand.vmem [shape: f32[1,512], index: 5, kind: input, shape index: {}]   ;;  %s8435_s6 = inlined_call_operand.hbm [shape: bf16[256,128], index: 6, kind: input, shape index: {}]   ;;  %s8436_s7 = inlined_call_operand.vmem [shape: f32[1,128], index: 7, kind: input, shape index: {}]   ;;  %s8437_s8 = inlined_call_operand.hbm [shape: f32[8,128], index: 8, kind: output, shape index: {}]  }
   0x1   :  { %14 = vsyncpa [#allocation7], 0 }
   0x2   :  { %15 = vsyncpa [#allocation10], 0 }
   0x3   :  { %16 = vsyncpa [#allocation5], 0  ;;  %s7208_s27 = smov [#allocation6]   ;;  %s7068_s9 = scalar_lea.hbm %s8430_s1, 24576 }
   0x4   :  { %s34_s28 = sshll.u32 %s7208_s27, 4  ;;  %p7069_p0 = scmp.ne.s32.totalorder %s8430_s1, %s7068_s9  ;;  %s35_s28 = int_to_ptr.vmem [resolvable:$true] %s34_s28 }
   0x5   :  { %p7072_p1 = scmp.lt.u32.totalorder %s7068_s9, %s8430_s1 }
   0x7   :  { %p7074_p2 = pnand %p7072_p1, %p7069_p0 }
   0x9   :  { %7077 = shalt.err (!%p7074_p2)
}
   0xa   :  { %s7078_s14 = scalar_lea.vmem %s35_s28, 24576  ;;  %p7083_p4 = scmp.lt.s32.totalorder %s35_s28, %s35_s28 }
   0xb   :  { %p7079_p3 = scmp.ne.s32.totalorder %s35_s28, %s7078_s14  ;;  %p7084_p5 = scmp.lt.s32.totalorder %s7078_s14, %s7078_s14 }
   0xd   :  { %p7085_p6 = por %p7084_p5, %p7083_p4 }
   0xf   :  { %p7086_p7 = pnand %p7085_p6, %p7079_p3 }
  0x11   :  { %7089 = shalt.err (!%p7086_p7)
}
  0x12   :  { %s7209_s15 = smov 256   ;;  %s7210_s16 = smov 16  }
  0x13   :  { %40 = dma.hbm_to_vmem [thread:$0]  %s8430_s1, 24576, %s35_s28, [#allocation7], %s7209_s15, %s7209_s15, %s7210_s16  }
  0x14   :  { %s7211_s19 = smov [#allocation9]   ;;  %s7212_s21 = smov [#allocation3]  }
  0x15   :  { %s60_s20 = sshll.u32 %s7211_s19, 4  ;;  %s22_s22 = sshll.u32 %s7212_s21, 4  ;;  %s61_s20 = int_to_ptr.vmem [resolvable:$true] %s60_s20  ;;  %s23_s22 = int_to_ptr.vmem [resolvable:$true] %s22_s22 }
  0x16   :  { %s7090_s25 = scalar_lea.hbm %s8433_s4, 24576 }
  0x17   :  { %p7091_p8 = scmp.ne.s32.totalorder %s8433_s4, %s7090_s25  ;;  %p7094_p9 = scmp.lt.u32.totalorder %s7090_s25, %s8433_s4 }
  0x19   :  { %p7096_p10 = pnand %p7094_p9, %p7091_p8 }
  0x1b   :  { %7099 = shalt.err (!%p7096_p10)
}
  0x1c   :  { %s7100_s1 = scalar_lea.vmem %s61_s20, 24576  ;;  %p7105_p12 = scmp.lt.s32.totalorder %s61_s20, %s61_s20 }
  0x1d   :  { %p7101_p11 = scmp.ne.s32.totalorder %s61_s20, %s7100_s1  ;;  %p7106_p13 = scmp.lt.s32.totalorder %s7100_s1, %s7100_s1 }
  0x1f   :  { %p7107_p0 = por %p7106_p13, %p7105_p12 }
  0x21   :  { %p7108_p1 = pnand %p7107_p0, %p7101_p11 }
  0x23   :  { %7111 = shalt.err (!%p7108_p1)
}
  0x24   :  { %66 = dma.hbm_to_vmem [thread:$0]  %s8433_s4, 24576, %s61_s20, [#allocation10], %s7209_s15, %s7209_s15, %s7210_s16  }
  0x25   :  { %s7112_s12 = scalar_lea.hbm %s8429_s0, 3072 }
  0x26   :  { %p7113_p2 = scmp.ne.s32.totalorder %s8429_s0, %s7112_s12  ;;  %p7116_p3 = scmp.lt.u32.totalorder %s7112_s12, %s8429_s0 }
  0x28   :  { %p7118_p4 = pnand %p7116_p3, %p7113_p2 }
  0x2a   :  { %7121 = shalt.err (!%p7118_p4)
}
  0x2b   :  { %s7122_s19 = scalar_lea.vmem %s23_s22, 3072  ;;  %p7127_p6 = scmp.lt.s32.totalorder %s23_s22, %s23_s22 }
  0x2c   :  { %p7123_p5 = scmp.ne.s32.totalorder %s23_s22, %s7122_s19  ;;  %p7128_p7 = scmp.lt.s32.totalorder %s7122_s19, %s7122_s19 }
  0x2e   :  { %p7129_p8 = por %p7128_p7, %p7127_p6 }
  0x30   :  { %p7130_p9 = pnand %p7129_p8, %p7123_p5 }
  0x32   :  { %7133 = shalt.err (!%p7130_p9)
}
  0x33   :  { %s7213_s4 = smov 384   ;;  %s7214_s20 = smov 24  }
  0x34   :  { %28 = dma.hbm_to_vmem [thread:$0]  %s8429_s0, 3072, %s23_s22, [#allocation4], %s7213_s4, %s7213_s4, %s7214_s20  }
  0x35   :  { %s7215_s24 = smov [#allocation8]   ;;  %s7216_s26 = smov [#allocation11]  }
  0x36   :  { %s46_s25 = sshll.u32 %s7215_s24, 4  ;;  %s74_s27 = sshll.u32 %s7216_s26, 4  ;;  %s47_s25 = int_to_ptr.vmem [resolvable:$true] %s46_s25  ;;  %s75_s27 = int_to_ptr.vmem [resolvable:$true] %s74_s27 }
  0x37   :  { %s7134_s1 = scalar_lea.hbm %s8431_s2, 4096 }
  0x38   :  { %p7135_p10 = scmp.ne.s32.totalorder %s8431_s2, %s7134_s1  ;;  %p7138_p11 = scmp.lt.u32.totalorder %s7134_s1, %s8431_s2 }
  0x3a   :  { %p7140_p12 = pnand %p7138_p11, %p7135_p10 }
  0x3c   :  { %7143 = shalt.err (!%p7140_p12)
}
  0x3d   :  { %s7144_s0 = scalar_lea.vmem %s47_s25, 4096  ;;  %p7149_p0 = scmp.lt.s32.totalorder %s47_s25, %s47_s25 }
  0x3e   :  { %p7145_p13 = scmp.ne.s32.totalorder %s47_s25, %s7144_s0  ;;  %p7150_p1 = scmp.lt.s32.totalorder %s7144_s0, %s7144_s0 }
  0x40   :  { %p7151_p2 = por %p7150_p1, %p7149_p0 }
  0x42   :  { %p7152_p3 = pnand %p7151_p2, %p7145_p13 }
  0x44   :  { %7155 = shalt.err (!%p7152_p3)
}
  0x45   :  { %52 = dma.hbm_to_vmem [thread:$0]  %s8431_s2, 4096, %s47_s25, [#allocation7], %s7209_s15, %s7209_s15, %s7210_s16  }
  0x46   :  { %s7156_s17 = scalar_lea.hbm %s8435_s6, 2048 }
  0x47   :  { %p7157_p4 = scmp.ne.s32.totalorder %s8435_s6, %s7156_s17  ;;  %p7160_p5 = scmp.lt.u32.totalorder %s7156_s17, %s8435_s6 }
  0x49   :  { %p7162_p6 = pnand %p7160_p5, %p7157_p4 }
  0x4b   :  { %7165 = shalt.err (!%p7162_p6)
}
  0x4c   :  { %s7166_s21 = scalar_lea.vmem %s75_s27, 2048  ;;  %p7171_p8 = scmp.lt.s32.totalorder %s75_s27, %s75_s27 }
  0x4d   :  { %p7167_p7 = scmp.ne.s32.totalorder %s75_s27, %s7166_s21  ;;  %p7172_p9 = scmp.lt.s32.totalorder %s7166_s21, %s7166_s21 }
  0x4f   :  { %p7173_p10 = por %p7172_p9, %p7171_p8 }
  0x51   :  { %p7174_p11 = pnand %p7173_p10, %p7167_p7 }
  0x53   :  { %7177 = shalt.err (!%p7174_p11)
}
  0x54   :  { %s7217_s2 = smov 64   ;;  %s7218_s15 = smov 4  }
  0x55   :  { %80 = dma.hbm_to_vmem [thread:$0]  %s8435_s6, 2048, %s75_s27, [#allocation10], %s7217_s2, %s7217_s2, %s7218_s15  }
  0x56   :  { %7200 = dma.done.wait [#allocation4], 3072  }
  0x57   :  { %7201 = vsyncadd [#allocation4], 4294964224 }
  0x58   :  { %7202 = dma.done.wait [#allocation7], 28672  }
  0x59   :  { %7203 = vsyncadd [#allocation7], 4294938624 }
  0x5a   :  { %7204 = dma.done.wait [#allocation10], 26624  }
  0x5b   :  { %7205 = vsyncadd [#allocation10], 4294940672  ;;  %v6168_v0 = vld [vmem:[#allocation6 + $0x4] ss:$16 sps:$4 sm:$0xff]   ;;  %v6170_v1 = vld [vmem:[#allocation6 + $0xc] ss:$16 sps:$4 sm:$0xff]  }
  0x5c   :  { %1417 = vmatprep.subr.bf16.mxu0 %v6168_v0  ;;  %v6172_v2 = vld [vmem:[#allocation6] ss:$16 sps:$4 sm:$0xff]   ;;  %v6173_v3 = vld [vmem:[#allocation6 + $0x8] ss:$16 sps:$4 sm:$0xff]   ;;  %1636 = vmatprep.subr.bf16.mxu1 %v6170_v1  ;;  %v6174_v4 = vld [vmem:[#allocation6 + $0x24] ss:$16 sps:$4 sm:$0xff]  }
  0x5d   :  { %1418 = vmatpush1.bf16.msra.mxu0 %v6172_v2  ;;  %1637 = vmatpush1.bf16.msra.mxu1 %v6173_v3  ;;  %v6176_v5 = vld [vmem:[#allocation6 + $0x2c] ss:$16 sps:$4 sm:$0xff]   ;;  %v6178_v6 = vld [vmem:[#allocation6 + $0x20] ss:$16 sps:$4 sm:$0xff]   ;;  %v6179_v7 = vld [vmem:[#allocation6 + $0x28] ss:$16 sps:$4 sm:$0xff]  }
  0x5e   :  { %1419 = vmatprep.subr.bf16.mxu0 %v6174_v4  ;;  %1638 = vmatprep.subr.bf16.mxu1 %v6176_v5  ;;  %v6180_v8 = vld [vmem:[#allocation6 + $0x44] ss:$16 sps:$4 sm:$0xff]   ;;  %v6182_v9 = vld [vmem:[#allocation6 + $0x4c] ss:$16 sps:$4 sm:$0xff]   ;;  %v6184_v10 = vld [vmem:[#allocation6 + $0x40] ss:$16 sps:$4 sm:$0xff]  }
  0x5f   :  { %v6185_v11 = vld [vmem:[#allocation6 + $0x48] ss:$16 sps:$4 sm:$0xff]   ;;  %v6186_v12 = vld [vmem:[#allocation6 + $0x64] ss:$16 sps:$4 sm:$0xff]   ;;  %v6188_v13 = vld [vmem:[#allocation6 + $0x6c] ss:$16 sps:$4 sm:$0xff]  }
  0x60   :  { %v6190_v14 = vld [vmem:[#allocation6 + $0x60] ss:$16 sps:$4 sm:$0xff]   ;;  %v6191_v15 = vld [vmem:[#allocation6 + $0x68] ss:$16 sps:$4 sm:$0xff]   ;;  %v6192_v16 = vld [vmem:[#allocation6 + $0x84] ss:$16 sps:$4 sm:$0xff]  }
  0x61   :  { %1420 = vmatpush1.bf16.msra.mxu0 %v6178_v6  ;;  %1639 = vmatpush1.bf16.msra.mxu1 %v6179_v7  ;;  %v6194_v17 = vld [vmem:[#allocation6 + $0x8c] ss:$16 sps:$4 sm:$0xff]   ;;  %v6196_v18 = vld [vmem:[#allocation6 + $0x80] ss:$16 sps:$4 sm:$0xff]   ;;  %v6197_v19 = vld [vmem:[#allocation6 + $0x88] ss:$16 sps:$4 sm:$0xff]  }
  0x62   :  { %1421 = vmatprep.subr.bf16.mxu0 %v6180_v8  ;;  %1640 = vmatprep.subr.bf16.mxu1 %v6182_v9  ;;  %v6198_v20 = vld [vmem:[#allocation6 + $0xa4] ss:$16 sps:$4 sm:$0xff]   ;;  %v6200_v21 = vld [vmem:[#allocation6 + $0xac] ss:$16 sps:$4 sm:$0xff]   ;;  %v6202_v22 = vld [vmem:[#allocation6 + $0xa0] ss:$16 sps:$4 sm:$0xff]  }
  0x63   :  { %v6203_v23 = vld [vmem:[#allocation6 + $0xa8] ss:$16 sps:$4 sm:$0xff]   ;;  %v6204_v24 = vld [vmem:[#allocation6 + $0xc4] ss:$16 sps:$4 sm:$0xff]   ;;  %v6206_v25 = vld [vmem:[#allocation6 + $0xcc] ss:$16 sps:$4 sm:$0xff]  }
  0x64   :  { %v6208_v26 = vld [vmem:[#allocation6 + $0xc0] ss:$16 sps:$4 sm:$0xff]   ;;  %v6209_v27 = vld [vmem:[#allocation6 + $0xc8] ss:$16 sps:$4 sm:$0xff]   ;;  %v6210_v28 = vld [vmem:[#allocation6 + $0xe4] ss:$16 sps:$4 sm:$0xff]  }
  0x65   :  { %1422 = vmatpush1.bf16.msra.mxu0 %v6184_v10  ;;  %1641 = vmatpush1.bf16.msra.mxu1 %v6185_v11  ;;  %v6212_v29 = vld [vmem:[#allocation6 + $0xec] ss:$16 sps:$4 sm:$0xff]   ;;  %v6214_v30 = vld [vmem:[#allocation6 + $0xe0] ss:$16 sps:$4 sm:$0xff]   ;;  %v6215_v31 = vld [vmem:[#allocation6 + $0xe8] ss:$16 sps:$4 sm:$0xff]  }
  0x66   :  { %1423 = vmatprep.subr.bf16.mxu0 %v6186_v12  ;;  %1642 = vmatprep.subr.bf16.mxu1 %v6188_v13  ;;  %v6216_v32 = vld [vmem:[#allocation6 + $0x104] ss:$16 sps:$4 sm:$0xff]   ;;  %v6218_v33 = vld [vmem:[#allocation6 + $0x10c] ss:$16 sps:$4 sm:$0xff]   ;;  %v6220_v34 = vld [vmem:[#allocation6 + $0x100] ss:$16 sps:$4 sm:$0xff]  }
  0x67   :  { %v6221_v35 = vld [vmem:[#allocation6 + $0x108] ss:$16 sps:$4 sm:$0xff]   ;;  %v6222_v36 = vld [vmem:[#allocation6 + $0x124] ss:$16 sps:$4 sm:$0xff]   ;;  %v6224_v37 = vld [vmem:[#allocation6 + $0x12c] ss:$16 sps:$4 sm:$0xff]  }
  0x68   :  { %v6226_v38 = vld [vmem:[#allocation6 + $0x120] ss:$16 sps:$4 sm:$0xff]   ;;  %v6227_v39 = vld [vmem:[#allocation6 + $0x128] ss:$16 sps:$4 sm:$0xff]   ;;  %v6228_v40 = vld [vmem:[#allocation6 + $0x144] ss:$16 sps:$4 sm:$0xff]  }
  0x69   :  { %1424 = vmatpush1.bf16.msra.mxu0 %v6190_v14  ;;  %1643 = vmatpush1.bf16.msra.mxu1 %v6191_v15  ;;  %v6230_v41 = vld [vmem:[#allocation6 + $0x14c] ss:$16 sps:$4 sm:$0xff]   ;;  %v6232_v42 = vld [vmem:[#allocation6 + $0x140] ss:$16 sps:$4 sm:$0xff]   ;;  %v6233_v43 = vld [vmem:[#allocation6 + $0x148] ss:$16 sps:$4 sm:$0xff]  }
  0x6a   :  { %1425 = vmatprep.subr.bf16.mxu0 %v6192_v16  ;;  %1644 = vmatprep.subr.bf16.mxu1 %v6194_v17  ;;  %v6234_v44 = vld [vmem:[#allocation6 + $0x164] ss:$16 sps:$4 sm:$0xff]   ;;  %v6236_v45 = vld [vmem:[#allocation6 + $0x16c] ss:$16 sps:$4 sm:$0xff]   ;;  %v6238_v46 = vld [vmem:[#allocation6 + $0x160] ss:$16 sps:$4 sm:$0xff]  }
  0x6b   :  { %v6239_v47 = vld [vmem:[#allocation6 + $0x168] ss:$16 sps:$4 sm:$0xff]   ;;  %v6266_v48 = vld [vmem:[#allocation3 + $0x4] ss:$24 sps:$4 sm:$0xff]   ;;  %v6244_v51 = vld [vmem:[#allocation6 + $0x180] ss:$16 sps:$4 sm:$0xff]  }
  0x6c   :  { %v6240_v49 = vld [vmem:[#allocation6 + $0x184] ss:$16 sps:$4 sm:$0xff]   ;;  %v6242_v50 = vld [vmem:[#allocation6 + $0x18c] ss:$16 sps:$4 sm:$0xff]   ;;  %1449 = vmatprep.mubr.bf16.mxu0 %v6266_v48  ;;  %1668 = vmatprep.mubr.bf16.mxu1 %v6266_v48  ;;  %v6245_v52 = vld [vmem:[#allocation6 + $0x188] ss:$16 sps:$4 sm:$0xff]  }
  0x6d   :  { %1426 = vmatpush1.bf16.msra.mxu0 %v6196_v18  ;;  %1645 = vmatpush1.bf16.msra.mxu1 %v6197_v19  ;;  %v6246_v53 = vld [vmem:[#allocation6 + $0x1a4] ss:$16 sps:$4 sm:$0xff]   ;;  %v6248_v54 = vld [vmem:[#allocation6 + $0x1ac] ss:$16 sps:$4 sm:$0xff]   ;;  %v6250_v55 = vld [vmem:[#allocation6 + $0x1a0] ss:$16 sps:$4 sm:$0xff]  }
  0x6e   :  { %1427 = vmatprep.subr.bf16.mxu0 %v6198_v20  ;;  %1646 = vmatprep.subr.bf16.mxu1 %v6200_v21  ;;  %v6251_v56 = vld [vmem:[#allocation6 + $0x1a8] ss:$16 sps:$4 sm:$0xff]   ;;  %v6252_v57 = vld [vmem:[#allocation6 + $0x1c4] ss:$16 sps:$4 sm:$0xff]   ;;  %v6254_v58 = vld [vmem:[#allocation6 + $0x1cc] ss:$16 sps:$4 sm:$0xff]  }
  0x6f   :  { %v6256_v59 = vld [vmem:[#allocation6 + $0x1c0] ss:$16 sps:$4 sm:$0xff]   ;;  %v6257_v60 = vld [vmem:[#allocation6 + $0x1c8] ss:$16 sps:$4 sm:$0xff]   ;;  %v6258_v61 = vld [vmem:[#allocation6 + $0x1e4] ss:$16 sps:$4 sm:$0xff]  }
  0x70   :  { %v6260_v62 = vld [vmem:[#allocation6 + $0x1ec] ss:$16 sps:$4 sm:$0xff]   ;;  %v6262_v63 = vld [vmem:[#allocation6 + $0x1e0] ss:$16 sps:$4 sm:$0xff]   ;;  %v6263_v0 = vld [vmem:[#allocation6 + $0x1e8] ss:$16 sps:$4 sm:$0xff]  }
  0x71   :  { %1428 = vmatpush1.bf16.msra.mxu0 %v6202_v22  ;;  %1647 = vmatpush1.bf16.msra.mxu1 %v6203_v23  ;;  %v6269_v1 = vld [vmem:[#allocation6 + $0x204] ss:$16 sps:$4 sm:$0xff]   ;;  %v6272_v2 = vld [vmem:[#allocation6 + $0x20c] ss:$16 sps:$4 sm:$0xff]   ;;  %v6264_v3 = vld [vmem:[#allocation3] ss:$24 sps:$4 sm:$0xff]  }
  0x72   :  { %1429 = vmatprep.subr.bf16.mxu0 %v6204_v24  ;;  %1648 = vmatprep.subr.bf16.mxu1 %v6206_v25  ;;  %v6267_v4 = vld [vmem:[#allocation6 + $0x200] ss:$16 sps:$4 sm:$0xff]   ;;  %v6270_v5 = vld [vmem:[#allocation6 + $0x208] ss:$16 sps:$4 sm:$0xff]   ;;  %v6275_v6 = vld [vmem:[#allocation6 + $0x224] ss:$16 sps:$4 sm:$0xff]  }
  0x73   :  { %v6278_v7 = vld [vmem:[#allocation6 + $0x22c] ss:$16 sps:$4 sm:$0xff]   ;;  %v6273_v8 = vld [vmem:[#allocation6 + $0x220] ss:$16 sps:$4 sm:$0xff]   ;;  %v6276_v9 = vld [vmem:[#allocation6 + $0x228] ss:$16 sps:$4 sm:$0xff]  }
  0x74   :  { %v6281_v10 = vld [vmem:[#allocation6 + $0x244] ss:$16 sps:$4 sm:$0xff]   ;;  %v6284_v11 = vld [vmem:[#allocation6 + $0x24c] ss:$16 sps:$4 sm:$0xff]   ;;  %v6279_v12 = vld [vmem:[#allocation6 + $0x240] ss:$16 sps:$4 sm:$0xff]  }
  0x75   :  { %1430 = vmatpush1.bf16.msra.mxu0 %v6208_v26  ;;  %1649 = vmatpush1.bf16.msra.mxu1 %v6209_v27  ;;  %v6327_v13 = vld [vmem:[#allocation3 + $0x34] ss:$24 sps:$4 sm:$0xff]   ;;  %v6282_v14 = vld [vmem:[#allocation6 + $0x248] ss:$16 sps:$4 sm:$0xff]   ;;  %v6285_v18 = vld [vmem:[#allocation6 + $0x260] ss:$16 sps:$4 sm:$0xff]  }
  0x76   :  { %1431 = vmatprep.subr.bf16.mxu0 %v6210_v28  ;;  %1650 = vmatprep.subr.bf16.mxu1 %v6212_v29  ;;  %v6287_v15 = vld [vmem:[#allocation6 + $0x264] ss:$16 sps:$4 sm:$0xff]   ;;  %v6290_v16 = vld [vmem:[#allocation6 + $0x26c] ss:$16 sps:$4 sm:$0xff]   ;;  %v6335_v17 = vld [vmem:[#allocation3 + $0x30] ss:$24 sps:$4 sm:$0xff]  }
  0x77   :  { %v6288_v19 = vld [vmem:[#allocation6 + $0x268] ss:$16 sps:$4 sm:$0xff]   ;;  %v6293_v20 = vld [vmem:[#allocation6 + $0x284] ss:$16 sps:$4 sm:$0xff]   ;;  %v6296_v21 = vld [vmem:[#allocation6 + $0x28c] ss:$16 sps:$4 sm:$0xff]  }
  0x78   :  { %v6342_v22 = vld [vmem:[#allocation3 + $0x64] ss:$24 sps:$4 sm:$0xff]   ;;  %v6291_v23 = vld [vmem:[#allocation6 + $0x280] ss:$16 sps:$4 sm:$0xff]   ;;  %v6294_v24 = vld [vmem:[#allocation6 + $0x288] ss:$16 sps:$4 sm:$0xff]  }
  0x79   :  { %1432 = vmatpush1.bf16.msra.mxu0 %v6214_v30  ;;  %1651 = vmatpush1.bf16.msra.mxu1 %v6215_v31  ;;  %v6299_v25 = vld [vmem:[#allocation6 + $0x2a4] ss:$16 sps:$4 sm:$0xff]   ;;  %v6302_v26 = vld [vmem:[#allocation6 + $0x2ac] ss:$16 sps:$4 sm:$0xff]   ;;  %v6297_v27 = vld [vmem:[#allocation6 + $0x2a0] ss:$16 sps:$4 sm:$0xff]  }
  0x7a   :  { %1433 = vmatprep.subr.bf16.mxu0 %v6216_v32  ;;  %1652 = vmatprep.subr.bf16.mxu1 %v6218_v33  ;;  %v6350_v28 = vld [vmem:[#allocation3 + $0x60] ss:$24 sps:$4 sm:$0xff]   ;;  %v6305_v30 = vld [vmem:[#allocation6 + $0x2c4] ss:$16 sps:$4 sm:$0xff]   ;;  %v6308_v32 = vld [vmem:[#allocation6 + $0x2cc] ss:$16 sps:$4 sm:$0xff]  }
  0x7b   :  { %v6300_v29 = vld [vmem:[#allocation6 + $0x2a8] ss:$16 sps:$4 sm:$0xff]   ;;  %v6357_v31 = vld [vmem:[#allocation3 + $0x94] ss:$24 sps:$4 sm:$0xff]   ;;  %v6303_v33 = vld [vmem:[#allocation6 + $0x2c0] ss:$16 sps:$4 sm:$0xff]  }
  0x7c   :  { %v6324_v48 = vld [vmem:[#allocation6 + $0x328] ss:$16 sps:$4 sm:$0xff]   ;;  %vm3957_vm0 = vcmask 1041409   ;;  %vm3960_vm1 = vcmask 1042434   ;;  %vm3963_vm2 = vcmask 1043459   ;;  %vm3966_vm3 = vcmask 1044484  }
  0x7d   :  { %1434 = vmatpush1.bf16.msra.mxu0 %v6220_v34  ;;  %1653 = vmatpush1.bf16.msra.mxu1 %v6221_v35  ;;  %v6306_v34 = vld [vmem:[#allocation6 + $0x2c8] ss:$16 sps:$4 sm:$0xff]   ;;  %v6311_v35 = vld [vmem:[#allocation6 + $0x2e4] ss:$16 sps:$4 sm:$0xff]   ;;  %vm3969_vm4 = vcmask 1045509   ;;  %vm3972_vm5 = vcmask 1046534  }
  0x7e   :  { %1435 = vmatprep.subr.bf16.mxu0 %v6222_v36  ;;  %1654 = vmatprep.subr.bf16.mxu1 %v6224_v37  ;;  %v6314_v36 = vld [vmem:[#allocation6 + $0x2ec] ss:$16 sps:$4 sm:$0xff]   ;;  %v6309_v37 = vld [vmem:[#allocation6 + $0x2e0] ss:$16 sps:$4 sm:$0xff]   ;;  %vm3974_vm6 = vcmask 1047559   ;;  %s7222_s27 = smov [#allocation12]  }
  0x7f   :  { %s5472_s29 = sshll.u32 %s7222_s27, 4  ;;  %s5473_s29 = int_to_ptr.vmem [resolvable:$true] %s5472_s29 }
  0x80   :  { %s7178_s30 = scalar_lea.vmem %s5473_s29, 128  ;;  %p7183_p13 = scmp.lt.s32.totalorder %s5473_s29, %s5473_s29 }
  0x81   :  { %1436 = vmatpush1.bf16.msra.mxu0 %v6226_v38  ;;  %1655 = vmatpush1.bf16.msra.mxu1 %v6227_v39  ;;  %v6365_v38 = vld [vmem:[#allocation3 + $0x90] ss:$24 sps:$4 sm:$0xff]   ;;  %p7179_p12 = scmp.ne.s32.totalorder %s5473_s29, %s7178_s30  ;;  %p7184_p0 = scmp.lt.s32.totalorder %s7178_s30, %s7178_s30 }
  0x82   :  { %1437 = vmatprep.subr.bf16.mxu0 %v6228_v40  ;;  %1656 = vmatprep.subr.bf16.mxu1 %v6230_v41  ;;  %v6312_v39 = vld [vmem:[#allocation6 + $0x2e8] ss:$16 sps:$4 sm:$0xff]   ;;  %v6374_v40 = vld [vmem:[#allocation3 + $0xc] ss:$24 sps:$4 sm:$0xff]  }
  0x83   :  { %v6317_v41 = vld [vmem:[#allocation6 + $0x304] ss:$16 sps:$4 sm:$0xff]   ;;  %p7185_p1 = por %p7184_p0, %p7183_p13 }
  0x85   :  { %1438 = vmatpush1.bf16.msra.mxu0 %v6232_v42  ;;  %1657 = vmatpush1.bf16.msra.mxu1 %v6233_v43  ;;  %v6320_v42 = vld [vmem:[#allocation6 + $0x30c] ss:$16 sps:$4 sm:$0xff]   ;;  %v6315_v43 = vld [vmem:[#allocation6 + $0x300] ss:$16 sps:$4 sm:$0xff]   ;;  %p7186_p2 = pnand %p7185_p1, %p7179_p12 }
  0x86   :  { %1439 = vmatprep.subr.bf16.mxu0 %v6234_v44  ;;  %1658 = vmatprep.subr.bf16.mxu1 %v6236_v45  ;;  %v6318_v44 = vld [vmem:[#allocation6 + $0x308] ss:$16 sps:$4 sm:$0xff]   ;;  %v6323_v45 = vld [vmem:[#allocation6 + $0x324] ss:$16 sps:$4 sm:$0xff]  }
  0x89   :  { %1440 = vmatpush1.bf16.msra.mxu0 %v6238_v46  ;;  %1659 = vmatpush1.bf16.msra.mxu1 %v6239_v47  ;;  %v6326_v46 = vld [vmem:[#allocation6 + $0x32c] ss:$16 sps:$4 sm:$0xff]   ;;  %v6321_v47 = vld [vmem:[#allocation6 + $0x320] ss:$16 sps:$4 sm:$0xff]  }
  0x8a   :  { %1441 = vmatprep.subr.bf16.mxu0 %v6240_v49  ;;  %1660 = vmatprep.subr.bf16.mxu1 %v6242_v50  ;;  %v6331_v49 = vld [vmem:[#allocation6 + $0x344] ss:$16 sps:$4 sm:$0xff]   ;;  %v6334_v50 = vld [vmem:[#allocation6 + $0x34c] ss:$16 sps:$4 sm:$0xff]  }
  0x8d   :  { %1442 = vmatpush1.bf16.msra.mxu0 %v6244_v51  ;;  %1661 = vmatpush1.bf16.msra.mxu1 %v6245_v52  ;;  %v6329_v51 = vld [vmem:[#allocation6 + $0x340] ss:$16 sps:$4 sm:$0xff]   ;;  %v6332_v52 = vld [vmem:[#allocation6 + $0x348] ss:$16 sps:$4 sm:$0xff]  }
  0x8e   :  { %1443 = vmatprep.subr.bf16.mxu0 %v6246_v53  ;;  %1662 = vmatprep.subr.bf16.mxu1 %v6248_v54  ;;  %v6338_v53 = vld [vmem:[#allocation6 + $0x364] ss:$16 sps:$4 sm:$0xff]   ;;  %v6341_v54 = vld [vmem:[#allocation6 + $0x36c] ss:$16 sps:$4 sm:$0xff]  }
  0x91   :  { %1444 = vmatpush1.bf16.msra.mxu0 %v6250_v55  ;;  %1663 = vmatpush1.bf16.msra.mxu1 %v6251_v56  ;;  %v6336_v55 = vld [vmem:[#allocation6 + $0x360] ss:$16 sps:$4 sm:$0xff]   ;;  %v6339_v56 = vld [vmem:[#allocation6 + $0x368] ss:$16 sps:$4 sm:$0xff]  }
  0x92   :  { %1445 = vmatprep.subr.bf16.mxu0 %v6252_v57  ;;  %1664 = vmatprep.subr.bf16.mxu1 %v6254_v58  ;;  %v6346_v57 = vld [vmem:[#allocation6 + $0x384] ss:$16 sps:$4 sm:$0xff]   ;;  %v6349_v58 = vld [vmem:[#allocation6 + $0x38c] ss:$16 sps:$4 sm:$0xff]  }
  0x95   :  { %1446 = vmatpush1.bf16.msra.mxu0 %v6256_v59  ;;  %1665 = vmatpush1.bf16.msra.mxu1 %v6257_v60  ;;  %v6344_v59 = vld [vmem:[#allocation6 + $0x380] ss:$16 sps:$4 sm:$0xff]   ;;  %v6347_v60 = vld [vmem:[#allocation6 + $0x388] ss:$16 sps:$4 sm:$0xff]  }
  0x96   :  { %1447 = vmatprep.subr.bf16.mxu0 %v6258_v61  ;;  %1666 = vmatprep.subr.bf16.mxu1 %v6260_v62  ;;  %v6353_v61 = vld [vmem:[#allocation6 + $0x3a4] ss:$16 sps:$4 sm:$0xff]   ;;  %v6356_v62 = vld [vmem:[#allocation6 + $0x3ac] ss:$16 sps:$4 sm:$0xff]  }
  0x99   :  { %1448 = vmatpush1.bf16.msra.mxu0 %v6262_v63  ;;  %1667 = vmatpush1.bf16.msra.mxu1 %v6263_v0  ;;  %v6351_v63 = vld [vmem:[#allocation6 + $0x3a0] ss:$16 sps:$4 sm:$0xff]   ;;  %v6354_v0 = vld [vmem:[#allocation6 + $0x3a8] ss:$16 sps:$4 sm:$0xff]  }
  0x9a   :  { %1490 = vmatprep.subr.bf16.mxu0 %v6269_v1  ;;  %1709 = vmatprep.subr.bf16.mxu1 %v6272_v2  ;;  %v6361_v1 = vld [vmem:[#allocation6 + $0x3c4] ss:$16 sps:$4 sm:$0xff]   ;;  %v6364_v2 = vld [vmem:[#allocation6 + $0x3cc] ss:$16 sps:$4 sm:$0xff]  }
  0x9c   :  { %1450 = vmatmul.mubr.bf16.vlgmr.msra.gmra.mrb[0].mxu0 %v6264_v3  ;;  %1669 = vmatmul.mubr.bf16.vlgmr.msra.gmra.mrb[0].mxu1 %v6264_v3  ;;  %v6359_v3 = vld [vmem:[#allocation6 + $0x3c0] ss:$16 sps:$4 sm:$0xff]  }
  0x9d   :  { %1491 = vmatpush1.bf16.msra.mxu0 %v6267_v4  ;;  %1710 = vmatpush1.bf16.msra.mxu1 %v6270_v5  ;;  %v6362_v4 = vld [vmem:[#allocation6 + $0x3c8] ss:$16 sps:$4 sm:$0xff]   ;;  %v6368_v5 = vld [vmem:[#allocation6 + $0x3e4] ss:$16 sps:$4 sm:$0xff]  }
  0x9e   :  { %1492 = vmatprep.subr.bf16.mxu0 %v6275_v6  ;;  %1711 = vmatprep.subr.bf16.mxu1 %v6278_v7  ;;  %v6371_v6 = vld [vmem:[#allocation6 + $0x3ec] ss:$16 sps:$4 sm:$0xff]   ;;  %v6366_v7 = vld [vmem:[#allocation6 + $0x3e0] ss:$16 sps:$4 sm:$0xff]  }
  0x9f   :  { %1459 = vmatprep.mubr.bf16.mxu0 %v6327_v13  ;;  %1678 = vmatprep.mubr.bf16.mxu1 %v6327_v13  ;;  %v6378_v13 = vld [vmem:[#allocation6 + $0x408] ss:$16 sps:$4 sm:$0xff]  }
  0xa1   :  { %1493 = vmatpush1.bf16.msra.mxu0 %v6273_v8  ;;  %1712 = vmatpush1.bf16.msra.mxu1 %v6276_v9  ;;  %v6369_v8 = vld [vmem:[#allocation6 + $0x3e8] ss:$16 sps:$4 sm:$0xff]   ;;  %v6377_v9 = vld [vmem:[#allocation6 + $0x404] ss:$16 sps:$4 sm:$0xff]  }
  0xa2   :  { %1494 = vmatprep.subr.bf16.mxu0 %v6281_v10  ;;  %1713 = vmatprep.subr.bf16.mxu1 %v6284_v11  ;;  %v6380_v10 = vld [vmem:[#allocation6 + $0x40c] ss:$16 sps:$4 sm:$0xff]   ;;  %v6372_v11 = vld [vmem:[#allocation3 + $0x8] ss:$24 sps:$4 sm:$0xff]  }
  0xa4   :  { %1460 = vmatmul.mubr.bf16.gmra.mrb[4].mxu0 %v6335_v17  ;;  %1679 = vmatmul.mubr.bf16.gmra.mrb[4].mxu1 %v6335_v17  ;;  %v6381_v17 = vld [vmem:[#allocation6 + $0x420] ss:$16 sps:$4 sm:$0xff]  }
  0xa5   :  { %1495 = vmatpush1.bf16.msra.mxu0 %v6279_v12  ;;  %1714 = vmatpush1.bf16.msra.mxu1 %v6282_v14  ;;  %v6375_v12 = vld [vmem:[#allocation6 + $0x400] ss:$16 sps:$4 sm:$0xff]   ;;  %v6383_v14 = vld [vmem:[#allocation6 + $0x424] ss:$16 sps:$4 sm:$0xff]  }
  0xa6   :  { %1496 = vmatprep.subr.bf16.mxu0 %v6287_v15  ;;  %1715 = vmatprep.subr.bf16.mxu1 %v6290_v16  ;;  %v6386_v15 = vld [vmem:[#allocation6 + $0x42c] ss:$16 sps:$4 sm:$0xff]  }
  0xa7   :  { %1469 = vmatprep.mubr.bf16.mxu0 %v6342_v22  ;;  %1688 = vmatprep.mubr.bf16.mxu1 %v6342_v22  ;;  %v6435_v16 = vld [vmem:[#allocation3 + $0x3c] ss:$24 sps:$4 sm:$0xff]   ;;  %v6390_v22 = vld [vmem:[#allocation6 + $0x448] ss:$16 sps:$4 sm:$0xff]  }
  0xa9   :  { %1497 = vmatpush1.bf16.msra.mxu0 %v6285_v18  ;;  %1716 = vmatpush1.bf16.msra.mxu1 %v6288_v19  ;;  %v6384_v18 = vld [vmem:[#allocation6 + $0x428] ss:$16 sps:$4 sm:$0xff]   ;;  %v6389_v19 = vld [vmem:[#allocation6 + $0x444] ss:$16 sps:$4 sm:$0xff]  }
  0xaa   :  { %1498 = vmatprep.subr.bf16.mxu0 %v6293_v20  ;;  %1717 = vmatprep.subr.bf16.mxu1 %v6296_v21  ;;  %v6392_v20 = vld [vmem:[#allocation6 + $0x44c] ss:$16 sps:$4 sm:$0xff]   ;;  %v6387_v21 = vld [vmem:[#allocation6 + $0x440] ss:$16 sps:$4 sm:$0xff]  }
  0xac   :  { %1470 = vmatmul.mubr.bf16.gmra.mrb[8].mxu0 %v6350_v28  ;;  %1689 = vmatmul.mubr.bf16.gmra.mrb[8].mxu1 %v6350_v28  ;;  %v6396_v28 = vld [vmem:[#allocation6 + $0x468] ss:$16 sps:$4 sm:$0xff]  }
  0xad   :  { %1499 = vmatpush1.bf16.msra.mxu0 %v6291_v23  ;;  %1718 = vmatpush1.bf16.msra.mxu1 %v6294_v24  ;;  %v6437_v23 = vld [vmem:[#allocation3 + $0x38] ss:$24 sps:$4 sm:$0xff]   ;;  %v6395_v24 = vld [vmem:[#allocation6 + $0x464] ss:$16 sps:$4 sm:$0xff]  }
  0xae   :  { %1500 = vmatprep.subr.bf16.mxu0 %v6299_v25  ;;  %1719 = vmatprep.subr.bf16.mxu1 %v6302_v26  ;;  %v6398_v25 = vld [vmem:[#allocation6 + $0x46c] ss:$16 sps:$4 sm:$0xff]  }
  0xaf   :  { %1479 = vmatprep.mubr.bf16.mxu0 %v6357_v31  ;;  %1698 = vmatprep.mubr.bf16.mxu1 %v6357_v31  ;;  %v6450_v26 = vld [vmem:[#allocation3 + $0x6c] ss:$24 sps:$4 sm:$0xff]   ;;  %v6452_v31 = vld [vmem:[#allocation3 + $0x68] ss:$24 sps:$4 sm:$0xff]  }
  0xb1   :  { %1501 = vmatpush1.bf16.msra.mxu0 %v6297_v27  ;;  %1720 = vmatpush1.bf16.msra.mxu1 %v6300_v29  ;;  %v6393_v27 = vld [vmem:[#allocation6 + $0x460] ss:$16 sps:$4 sm:$0xff]   ;;  %v6401_v29 = vld [vmem:[#allocation6 + $0x484] ss:$16 sps:$4 sm:$0xff]  }
  0xb2   :  { %1502 = vmatprep.subr.bf16.mxu0 %v6305_v30  ;;  %1721 = vmatprep.subr.bf16.mxu1 %v6308_v32  ;;  %v6404_v30 = vld [vmem:[#allocation6 + $0x48c] ss:$16 sps:$4 sm:$0xff]   ;;  %v6399_v32 = vld [vmem:[#allocation6 + $0x480] ss:$16 sps:$4 sm:$0xff]  }
  0xb4   :  { %1480 = vmatmul.mubr.bf16.gmra.mrb[12].mxu0 %v6365_v38  ;;  %1699 = vmatmul.mubr.bf16.gmra.mrb[12].mxu1 %v6365_v38  ;;  %v6408_v38 = vld [vmem:[#allocation6 + $0x4a8] ss:$16 sps:$4 sm:$0xff]  }
  0xb5   :  { %1503 = vmatpush1.bf16.msra.mxu0 %v6303_v33  ;;  %1722 = vmatpush1.bf16.msra.mxu1 %v6306_v34  ;;  %v6402_v33 = vld [vmem:[#allocation6 + $0x488] ss:$16 sps:$4 sm:$0xff]   ;;  %v6407_v34 = vld [vmem:[#allocation6 + $0x4a4] ss:$16 sps:$4 sm:$0xff]  }
  0xb6   :  { %1504 = vmatprep.subr.bf16.mxu0 %v6311_v35  ;;  %1723 = vmatprep.subr.bf16.mxu1 %v6314_v36  ;;  %v6410_v35 = vld [vmem:[#allocation6 + $0x4ac] ss:$16 sps:$4 sm:$0xff]  }
  0xb7   :  { %1522 = vmatprep.mubr.bf16.mxu0 %v6374_v40  ;;  %1741 = vmatprep.mubr.bf16.mxu1 %v6374_v40  ;;  %v6465_v36 = vld [vmem:[#allocation3 + $0x9c] ss:$24 sps:$4 sm:$0xff]  }
  0xb8   :  { %v6416_v40 = vld [vmem:[#allocation6 + $0x4cc] ss:$16 sps:$4 sm:$0xff]  }
  0xb9   :  { %1505 = vmatpush1.bf16.msra.mxu0 %v6309_v37  ;;  %1724 = vmatpush1.bf16.msra.mxu1 %v6312_v39  ;;  %v6405_v37 = vld [vmem:[#allocation6 + $0x4a0] ss:$16 sps:$4 sm:$0xff]   ;;  %v6413_v39 = vld [vmem:[#allocation6 + $0x4c4] ss:$16 sps:$4 sm:$0xff]  }
  0xba   :  { %1506 = vmatprep.subr.bf16.mxu0 %v6317_v41  ;;  %1725 = vmatprep.subr.bf16.mxu1 %v6320_v42  ;;  %v6411_v41 = vld [vmem:[#allocation6 + $0x4c0] ss:$16 sps:$4 sm:$0xff]   ;;  %v6414_v42 = vld [vmem:[#allocation6 + $0x4c8] ss:$16 sps:$4 sm:$0xff]  }
  0xbd   :  { %1507 = vmatpush1.bf16.msra.mxu0 %v6315_v43  ;;  %1726 = vmatpush1.bf16.msra.mxu1 %v6318_v44  ;;  %v6467_v43 = vld [vmem:[#allocation3 + $0x98] ss:$24 sps:$4 sm:$0xff]   ;;  %v6419_v44 = vld [vmem:[#allocation6 + $0x4e4] ss:$16 sps:$4 sm:$0xff]  }
  0xbe   :  { %1508 = vmatprep.subr.bf16.mxu0 %v6323_v45  ;;  %1727 = vmatprep.subr.bf16.mxu1 %v6326_v46  ;;  %v6422_v45 = vld [vmem:[#allocation6 + $0x4ec] ss:$16 sps:$4 sm:$0xff]  }
  0xbf   :  { %v6482_v46 = vld [vmem:[#allocation3 + $0x14] ss:$24 sps:$4 sm:$0xff]  }
  0xc1   :  { %1509 = vmatpush1.bf16.msra.mxu0 %v6321_v47  ;;  %1728 = vmatpush1.bf16.msra.mxu1 %v6324_v48  ;;  %v6417_v47 = vld [vmem:[#allocation6 + $0x4e0] ss:$16 sps:$4 sm:$0xff]   ;;  %v6420_v48 = vld [vmem:[#allocation6 + $0x4e8] ss:$16 sps:$4 sm:$0xff]  }
  0xc2   :  { %1510 = vmatprep.subr.bf16.mxu0 %v6331_v49  ;;  %1729 = vmatprep.subr.bf16.mxu1 %v6334_v50  ;;  %v6425_v49 = vld [vmem:[#allocation6 + $0x504] ss:$16 sps:$4 sm:$0xff]   ;;  %v6428_v50 = vld [vmem:[#allocation6 + $0x50c] ss:$16 sps:$4 sm:$0xff]  }
  0xc5   :  { %1511 = vmatpush1.bf16.msra.mxu0 %v6329_v51  ;;  %1730 = vmatpush1.bf16.msra.mxu1 %v6332_v52  ;;  %v6423_v51 = vld [vmem:[#allocation6 + $0x500] ss:$16 sps:$4 sm:$0xff]   ;;  %v6426_v52 = vld [vmem:[#allocation6 + $0x508] ss:$16 sps:$4 sm:$0xff]  }
  0xc6   :  { %1512 = vmatprep.subr.bf16.mxu0 %v6338_v53  ;;  %1731 = vmatprep.subr.bf16.mxu1 %v6341_v54  ;;  %v6431_v53 = vld [vmem:[#allocation6 + $0x524] ss:$16 sps:$4 sm:$0xff]   ;;  %v6434_v54 = vld [vmem:[#allocation6 + $0x52c] ss:$16 sps:$4 sm:$0xff]  }
  0xc9   :  { %1513 = vmatpush1.bf16.msra.mxu0 %v6336_v55  ;;  %1732 = vmatpush1.bf16.msra.mxu1 %v6339_v56  ;;  %v6429_v55 = vld [vmem:[#allocation6 + $0x520] ss:$16 sps:$4 sm:$0xff]   ;;  %v6432_v56 = vld [vmem:[#allocation6 + $0x528] ss:$16 sps:$4 sm:$0xff]  }
  0xca   :  { %1514 = vmatprep.subr.bf16.mxu0 %v6346_v57  ;;  %1733 = vmatprep.subr.bf16.mxu1 %v6349_v58  ;;  %v6440_v57 = vld [vmem:[#allocation6 + $0x544] ss:$16 sps:$4 sm:$0xff]   ;;  %v6443_v58 = vld [vmem:[#allocation6 + $0x54c] ss:$16 sps:$4 sm:$0xff]  }
  0xcd   :  { %1515 = vmatpush1.bf16.msra.mxu0 %v6344_v59  ;;  %1734 = vmatpush1.bf16.msra.mxu1 %v6347_v60  ;;  %v6438_v59 = vld [vmem:[#allocation6 + $0x540] ss:$16 sps:$4 sm:$0xff]   ;;  %v6441_v60 = vld [vmem:[#allocation6 + $0x548] ss:$16 sps:$4 sm:$0xff]  }
  0xce   :  { %1516 = vmatprep.subr.bf16.mxu0 %v6353_v61  ;;  %1735 = vmatprep.subr.bf16.mxu1 %v6356_v62  ;;  %v6446_v61 = vld [vmem:[#allocation6 + $0x564] ss:$16 sps:$4 sm:$0xff]   ;;  %v6449_v62 = vld [vmem:[#allocation6 + $0x56c] ss:$16 sps:$4 sm:$0xff]  }
  0xd1   :  { %1517 = vmatpush1.bf16.msra.mxu0 %v6351_v63  ;;  %1736 = vmatpush1.bf16.msra.mxu1 %v6354_v0  ;;  %v6444_v63 = vld [vmem:[#allocation6 + $0x560] ss:$16 sps:$4 sm:$0xff]   ;;  %v6447_v0 = vld [vmem:[#allocation6 + $0x568] ss:$16 sps:$4 sm:$0xff]  }
  0xd2   :  { %1518 = vmatprep.subr.bf16.mxu0 %v6361_v1  ;;  %1737 = vmatprep.subr.bf16.mxu1 %v6364_v2  ;;  %v6455_v1 = vld [vmem:[#allocation6 + $0x584] ss:$16 sps:$4 sm:$0xff]   ;;  %v6458_v2 = vld [vmem:[#allocation6 + $0x58c] ss:$16 sps:$4 sm:$0xff]  }
  0xd5   :  { %1519 = vmatpush1.bf16.msra.mxu0 %v6359_v3  ;;  %1738 = vmatpush1.bf16.msra.mxu1 %v6362_v4  ;;  %v6453_v3 = vld [vmem:[#allocation6 + $0x580] ss:$16 sps:$4 sm:$0xff]   ;;  %v6456_v4 = vld [vmem:[#allocation6 + $0x588] ss:$16 sps:$4 sm:$0xff]  }
  0xd6   :  { %1520 = vmatprep.subr.bf16.mxu0 %v6368_v5  ;;  %1739 = vmatprep.subr.bf16.mxu1 %v6371_v6  ;;  %v6461_v5 = vld [vmem:[#allocation6 + $0x5a4] ss:$16 sps:$4 sm:$0xff]   ;;  %v6464_v6 = vld [vmem:[#allocation6 + $0x5ac] ss:$16 sps:$4 sm:$0xff]  }
  0xd9   :  { %1521 = vmatpush1.bf16.msra.mxu0 %v6366_v7  ;;  %1740 = vmatpush1.bf16.msra.mxu1 %v6369_v8  ;;  %v6459_v7 = vld [vmem:[#allocation6 + $0x5a0] ss:$16 sps:$4 sm:$0xff]   ;;  %v6462_v8 = vld [vmem:[#allocation6 + $0x5a8] ss:$16 sps:$4 sm:$0xff]  }
  0xda   :  { %1563 = vmatprep.subr.bf16.mxu0 %v6377_v9  ;;  %1782 = vmatprep.subr.bf16.mxu1 %v6380_v10  ;;  %v6470_v9 = vld [vmem:[#allocation6 + $0x5c4] ss:$16 sps:$4 sm:$0xff]   ;;  %v6473_v10 = vld [vmem:[#allocation6 + $0x5cc] ss:$16 sps:$4 sm:$0xff]  }
  0xdc   :  { %1523 = vmatmul.mubr.bf16.vlgmr.msra.gmra.mrb[0].mxu0 %v6372_v11  ;;  %1742 = vmatmul.mubr.bf16.vlgmr.msra.gmra.mrb[0].mxu1 %v6372_v11  ;;  %v6468_v11 = vld [vmem:[#allocation6 + $0x5c0] ss:$16 sps:$4 sm:$0xff]  }
  0xdd   :  { %1564 = vmatpush1.bf16.msra.mxu0 %v6375_v12  ;;  %1783 = vmatpush1.bf16.msra.mxu1 %v6378_v13  ;;  %v6471_v12 = vld [vmem:[#allocation6 + $0x5c8] ss:$16 sps:$4 sm:$0xff]   ;;  %v6476_v13 = vld [vmem:[#allocation6 + $0x5e4] ss:$16 sps:$4 sm:$0xff]  }
  0xde   :  { %1565 = vmatprep.subr.bf16.mxu0 %v6383_v14  ;;  %1784 = vmatprep.subr.bf16.mxu1 %v6386_v15  ;;  %v6479_v14 = vld [vmem:[#allocation6 + $0x5ec] ss:$16 sps:$4 sm:$0xff]   ;;  %v6474_v15 = vld [vmem:[#allocation6 + $0x5e0] ss:$16 sps:$4 sm:$0xff]  }
  0xdf   :  { %1532 = vmatprep.mubr.bf16.mxu0 %v6435_v16  ;;  %1751 = vmatprep.mubr.bf16.mxu1 %v6435_v16  ;;  %v6477_v16 = vld [vmem:[#allocation6 + $0x5e8] ss:$16 sps:$4 sm:$0xff]  }
  0xe1   :  { %1566 = vmatpush1.bf16.msra.mxu0 %v6381_v17  ;;  %1785 = vmatpush1.bf16.msra.mxu1 %v6384_v18  ;;  %v7337_v17 = vld [vmem:[#allocation8 + $0x4] ss:$16 sps:$4 sm:$0xff]   ;;  %v7339_v18 = vld [vmem:[#allocation8 + $0xc] ss:$16 sps:$4 sm:$0xff]  }
  0xe2   :  { %1567 = vmatprep.subr.bf16.mxu0 %v6389_v19  ;;  %1786 = vmatprep.subr.bf16.mxu1 %v6392_v20  ;;  %v6480_v19 = vld [vmem:[#allocation3 + $0x10] ss:$24 sps:$4 sm:$0xff]  }
  0xe3   :  { %v7341_v20 = vld [vmem:[#allocation8] ss:$16 sps:$4 sm:$0xff]  }
  0xe4   :  { %1533 = vmatmul.mubr.bf16.gmra.mrb[4].mxu0 %v6437_v23  ;;  %1752 = vmatmul.mubr.bf16.gmra.mrb[4].mxu1 %v6437_v23  ;;  %v7345_v23 = vld [vmem:[#allocation8 + $0x8] ss:$16 sps:$4 sm:$0xff]  }
  0xe5   :  { %1568 = vmatpush1.bf16.msra.mxu0 %v6387_v21  ;;  %1787 = vmatpush1.bf16.msra.mxu1 %v6390_v22  ;;  %v6488_v21 = vld [vmem:[#allocation3 + $0x44] ss:$24 sps:$4 sm:$0xff]  }
  0xe6   :  { %1569 = vmatprep.subr.bf16.mxu0 %v6395_v24  ;;  %1788 = vmatprep.subr.bf16.mxu1 %v6398_v25  ;;  %v7343_v22 = vld [vmem:[#allocation8 + $0x24] ss:$16 sps:$4 sm:$0xff]   ;;  %v7349_v24 = vld [vmem:[#allocation8 + $0x2c] ss:$16 sps:$4 sm:$0xff]   ;;  %v7351_v25 = vld [vmem:[#allocation8 + $0x20] ss:$16 sps:$4 sm:$0xff]  }
  0xe7   :  { %1542 = vmatprep.mubr.bf16.mxu0 %v6450_v26  ;;  %1761 = vmatprep.mubr.bf16.mxu1 %v6450_v26  ;;  %v7353_v26 = vld [vmem:[#allocation8 + $0x44] ss:$16 sps:$4 sm:$0xff]  }
  0xe9   :  { %1570 = vmatpush1.bf16.msra.mxu0 %v6393_v27  ;;  %1789 = vmatpush1.bf16.msra.mxu1 %v6396_v28  ;;  %v7356_v27 = vld [vmem:[#allocation8 + $0x28] ss:$16 sps:$4 sm:$0xff]  }
  0xea   :  { %1571 = vmatprep.subr.bf16.mxu0 %v6401_v29  ;;  %1790 = vmatprep.subr.bf16.mxu1 %v6404_v30  ;;  %v6493_v28 = vld [vmem:[#allocation3 + $0x40] ss:$24 sps:$4 sm:$0xff]   ;;  %v7362_v30 = vld [vmem:[#allocation8 + $0x4c] ss:$16 sps:$4 sm:$0xff]  }
  0xeb   :  { %v7360_v29 = vld [vmem:[#allocation8 + $0x40] ss:$16 sps:$4 sm:$0xff]  }
  0xec   :  { %1543 = vmatmul.mubr.bf16.gmra.mrb[8].mxu0 %v6452_v31  ;;  %1762 = vmatmul.mubr.bf16.gmra.mrb[8].mxu1 %v6452_v31  ;;  %v6503_v31 = vld [vmem:[#allocation3 + $0x74] ss:$24 sps:$4 sm:$0xff]  }
  0xed   :  { %1572 = vmatpush1.bf16.msra.mxu0 %v6399_v32  ;;  %1791 = vmatpush1.bf16.msra.mxu1 %v6402_v33  ;;  %v7366_v32 = vld [vmem:[#allocation8 + $0x64] ss:$16 sps:$4 sm:$0xff]   ;;  %v7368_v33 = vld [vmem:[#allocation8 + $0x48] ss:$16 sps:$4 sm:$0xff]  }
  0xee   :  { %1573 = vmatprep.subr.bf16.mxu0 %v6407_v34  ;;  %1792 = vmatprep.subr.bf16.mxu1 %v6410_v35  ;;  %v7371_v34 = vld [vmem:[#allocation8 + $0x6c] ss:$16 sps:$4 sm:$0xff]   ;;  %v7374_v35 = vld [vmem:[#allocation8 + $0x60] ss:$16 sps:$4 sm:$0xff]  }
  0xef   :  { %1552 = vmatprep.mubr.bf16.mxu0 %v6465_v36  ;;  %1771 = vmatprep.mubr.bf16.mxu1 %v6465_v36  ;;  %v7376_v36 = vld [vmem:[#allocation8 + $0x84] ss:$16 sps:$4 sm:$0xff]  }
  0xf1   :  { %1574 = vmatpush1.bf16.msra.mxu0 %v6405_v37  ;;  %1793 = vmatpush1.bf16.msra.mxu1 %v6408_v38  ;;  %v7380_v37 = vld [vmem:[#allocation8 + $0x68] ss:$16 sps:$4 sm:$0xff]  }
  0xf2   :  { %1575 = vmatprep.subr.bf16.mxu0 %v6413_v39  ;;  %1794 = vmatprep.subr.bf16.mxu1 %v6416_v40  ;;  %v6508_v38 = vld [vmem:[#allocation3 + $0x70] ss:$24 sps:$4 sm:$0xff]   ;;  %v7386_v40 = vld [vmem:[#allocation8 + $0x8c] ss:$16 sps:$4 sm:$0xff]  }
  0xf3   :  { %v7384_v39 = vld [vmem:[#allocation8 + $0x80] ss:$16 sps:$4 sm:$0xff]  }
  0xf4   :  { %1553 = vmatmul.mubr.bf16.gmra.mrb[12].mxu0 %v6467_v43  ;;  %1772 = vmatmul.mubr.bf16.gmra.mrb[12].mxu1 %v6467_v43  ;;  %v7392_v43 = vld [vmem:[#allocation8 + $0x88] ss:$16 sps:$4 sm:$0xff]  }
  0xf5   :  { %1576 = vmatpush1.bf16.msra.mxu0 %v6411_v41  ;;  %1795 = vmatpush1.bf16.msra.mxu1 %v6414_v42  ;;  %v6518_v41 = vld [vmem:[#allocation3 + $0xa4] ss:$24 sps:$4 sm:$0xff]  }
  0xf6   :  { %1577 = vmatprep.subr.bf16.mxu0 %v6419_v44  ;;  %1796 = vmatprep.subr.bf16.mxu1 %v6422_v45  ;;  %v7390_v42 = vld [vmem:[#allocation8 + $0xa4] ss:$16 sps:$4 sm:$0xff]   ;;  %v7395_v44 = vld [vmem:[#allocation8 + $0xac] ss:$16 sps:$4 sm:$0xff]   ;;  %v7398_v45 = vld [vmem:[#allocation8 + $0xa0] ss:$16 sps:$4 sm:$0xff]  }
  0xf7   :  { %1595 = vmatprep.mubr.bf16.mxu0 %v6482_v46  ;;  %1814 = vmatprep.mubr.bf16.mxu1 %v6482_v46  ;;  %v7400_v46 = vld [vmem:[#allocation8 + $0xc4] ss:$16 sps:$4 sm:$0xff]  }
  0xf9   :  { %1578 = vmatpush1.bf16.msra.mxu0 %v6417_v47  ;;  %1797 = vmatpush1.bf16.msra.mxu1 %v6420_v48  ;;  %v7404_v47 = vld [vmem:[#allocation8 + $0xa8] ss:$16 sps:$4 sm:$0xff]  }
  0xfa   :  { %1579 = vmatprep.subr.bf16.mxu0 %v6425_v49  ;;  %1798 = vmatprep.subr.bf16.mxu1 %v6428_v50  ;;  %v6523_v48 = vld [vmem:[#allocation3 + $0xa0] ss:$24 sps:$4 sm:$0xff]   ;;  %v7410_v50 = vld [vmem:[#allocation8 + $0xcc] ss:$16 sps:$4 sm:$0xff]  }
  0xfb   :  { %v7408_v49 = vld [vmem:[#allocation8 + $0xc0] ss:$16 sps:$4 sm:$0xff]  }
  0xfc   :  { %8476 = vst [vmem:[#allocation17_spill] sm:$0xff] %v7408_v49 }
  0xfd   :  { %1580 = vmatpush1.bf16.msra.mxu0 %v6423_v51  ;;  %1799 = vmatpush1.bf16.msra.mxu1 %v6426_v52  ;;  %v7413_v51 = vld [vmem:[#allocation8 + $0xe4] ss:$16 sps:$4 sm:$0xff]   ;;  %v7416_v52 = vld [vmem:[#allocation8 + $0xc8] ss:$16 sps:$4 sm:$0xff]  }
  0xfe   :  { %1581 = vmatprep.subr.bf16.mxu0 %v6431_v53  ;;  %1800 = vmatprep.subr.bf16.mxu1 %v6434_v54  ;;  %8477 = vst [vmem:[#allocation18_spill] sm:$0xff] %v7413_v51  ;;  %8478 = vst [vmem:[#allocation19_spill] sm:$0xff] %v7416_v52  ;;  %v7419_v53 = vld [vmem:[#allocation8 + $0xec] ss:$16 sps:$4 sm:$0xff]   ;;  %v7422_v54 = vld [vmem:[#allocation8 + $0xe0] ss:$16 sps:$4 sm:$0xff]  }
  0xff   :  { %8479 = vst [vmem:[#allocation20_spill] sm:$0xff] %v7419_v53  ;;  %8480 = vst [vmem:[#allocation21_spill] sm:$0xff] %v7422_v54 }
 0x101   :  { %1582 = vmatpush1.bf16.msra.mxu0 %v6429_v55  ;;  %1801 = vmatpush1.bf16.msra.mxu1 %v6432_v56  ;;  %v7426_v55 = vld [vmem:[#allocation8 + $0xe8] ss:$16 sps:$4 sm:$0xff]   ;;  %v8442_v56 = vmov 0  }
 0x102   :  { %1583 = vmatprep.subr.bf16.mxu0 %v6440_v57  ;;  %1802 = vmatprep.subr.bf16.mxu1 %v6443_v58  ;;  %8481 = vst [vmem:[#allocation22_spill] sm:$0xff] %v7426_v55  ;;  %v317_v57 = vlaneseq }
 0x104   :  { %v7473_v58 = vshrl.u32 %v317_v57, 7 }
 0x105   :  { %1584 = vmatpush1.bf16.msra.mxu0 %v6438_v59  ;;  %1803 = vmatpush1.bf16.msra.mxu1 %v6441_v60 }
 0x106   :  { %1585 = vmatprep.subr.bf16.mxu0 %v6446_v61  ;;  %1804 = vmatprep.subr.bf16.mxu1 %v6449_v62  ;;  %8482 = vst [vmem:[#allocation23_spill] sm:$0xff] %v7473_v58  ;;  %v7220_v61 = vmov 1983009808  }
 0x107   :  { %v1858_v62 = vunpack.c.l.s4 %v7220_v61 }
 0x109   :  { %1586 = vmatpush1.bf16.msra.mxu0 %v6444_v63  ;;  %1805 = vmatpush1.bf16.msra.mxu1 %v6447_v0  ;;  %v7221_v63 = vmov 1934713408  }
 0x10a   :  { %1587 = vmatprep.subr.bf16.mxu0 %v6455_v1  ;;  %1806 = vmatprep.subr.bf16.mxu1 %v6458_v2  ;;  %v1922_v0 = vunpack.c.l.s4 %v7221_v63  ;;  %v8441_v1 = vsub.s32 0, %v7473_v58  ;;  %v8438_v2 = vsub.s32 2, %v7473_v58 }
 0x10d   :  { %1588 = vmatpush1.bf16.msra.mxu0 %v6453_v3  ;;  %1807 = vmatpush1.bf16.msra.mxu1 %v6456_v4 }
 0x10e   :  { %1589 = vmatprep.subr.bf16.mxu0 %v6461_v5  ;;  %1808 = vmatprep.subr.bf16.mxu1 %v6464_v6  ;;  %v315_v5 = vld [vmem:[%s8432_s3] sm:$0xf]  ;;  %v8440_v6 = vsub.s32 1, %v7473_v58 }
 0x111   :  { %1590 = vmatpush1.bf16.msra.mxu0 %v6459_v7  ;;  %1809 = vmatpush1.bf16.msra.mxu1 %v6462_v8  ;;  %v8439_v7 = vsub.s32 3, %v7473_v58 }
 0x112   :  { %1591 = vmatprep.subr.bf16.mxu0 %v6470_v9  ;;  %1810 = vmatprep.subr.bf16.mxu1 %v6473_v10 }
 0x115   :  { %1592 = vmatpush1.bf16.msra.mxu0 %v6468_v11  ;;  %1811 = vmatpush1.bf16.msra.mxu1 %v6471_v12  ;;  %v1859_v12 = vunpack.c.0.s8 %v1858_v62 }
 0x116   :  { %1593 = vmatprep.subr.bf16.mxu0 %v6476_v13  ;;  %1812 = vmatprep.subr.bf16.mxu1 %v6479_v14  ;;  %v1923_v13 = vunpack.c.0.s8 %v1922_v0  ;;  %v7484_v14 = vrot.slane %v315_v5, %v8441_v1 }
 0x119   :  { %1594 = vmatpush1.bf16.msra.mxu0 %v6474_v15  ;;  %1813 = vmatpush1.bf16.msra.mxu1 %v6477_v16  ;;  %v7488_v15 = vrot.slane %v315_v5, %v8438_v2  ;;  %v7492_v16 = vrot.slane %v315_v5, %v8440_v6 }
 0x11a   :  { %2627 = vmatprep.subr.bf16.mxu0 %v7337_v17  ;;  %2668 = vmatprep.subr.bf16.mxu1 %v7339_v18 }
 0x11c   :  { %1596 = vmatmul.mubr.bf16.vlgmr.msra.gmra.mrb[0].mxu0 %v6480_v19  ;;  %1815 = vmatmul.mubr.bf16.vlgmr.msra.gmra.mrb[0].mxu1 %v6480_v19  ;;  %v7499_v19 = vsub.s32 %v1859_v12, %v7473_v58 }
 0x11d   :  { %2628 = vmatpush1.bf16.msra.mxu0 %v7341_v20  ;;  %1605 = vmatprep.mubr.bf16.mxu0 %v6488_v21 }
 0x11e   :  { %1824 = vmatprep.mubr.bf16.mxu1 %v6488_v21  ;;  %2629 = vmatprep.subr.bf16.mxu0 %v7343_v22  ;;  %v7502_v21 = vsub.s32 %v1923_v13, %v7473_v58 }
 0x11f   :  { %2669 = vmatpush1.bf16.msra.mxu1 %v7345_v23 }
 0x120   :  { %2670 = vmatprep.subr.bf16.mxu1 %v7349_v24 }
 0x121   :  { %2630 = vmatpush1.bf16.msra.mxu0 %v7351_v25 }
 0x122   :  { %2631 = vmatprep.subr.bf16.mxu0 %v7353_v26 }
 0x123   :  { %2671 = vmatpush1.bf16.msra.mxu1 %v7356_v27 }
 0x124   :  { %1606 = vmatmul.mubr.bf16.gmra.mrb[4].mxu0 %v6493_v28  ;;  %1825 = vmatmul.mubr.bf16.gmra.mrb[4].mxu1 %v6493_v28 }
 0x125   :  { %2632 = vmatpush1.bf16.msra.mxu0 %v7360_v29  ;;  %2672 = vmatprep.subr.bf16.mxu1 %v7362_v30 }
 0x126   :  { %1615 = vmatprep.mubr.bf16.mxu0 %v6503_v31  ;;  %1834 = vmatprep.mubr.bf16.mxu1 %v6503_v31 }
 0x127   :  { %2633 = vmatprep.subr.bf16.mxu0 %v7366_v32  ;;  %2673 = vmatpush1.bf16.msra.mxu1 %v7368_v33 }
 0x128   :  { %2674 = vmatprep.subr.bf16.mxu1 %v7371_v34 }
 0x129   :  { %2634 = vmatpush1.bf16.msra.mxu0 %v7374_v35 }
 0x12a   :  { %2635 = vmatprep.subr.bf16.mxu0 %v7376_v36 }
 0x12b   :  { %2675 = vmatpush1.bf16.msra.mxu1 %v7380_v37 }
 0x12c   :  { %1616 = vmatmul.mubr.bf16.gmra.mrb[8].mxu0 %v6508_v38  ;;  %1835 = vmatmul.mubr.bf16.gmra.mrb[8].mxu1 %v6508_v38 }
 0x12d   :  { %2636 = vmatpush1.bf16.msra.mxu0 %v7384_v39  ;;  %2676 = vmatprep.subr.bf16.mxu1 %v7386_v40 }
 0x12e   :  { %1625 = vmatprep.mubr.bf16.mxu0 %v6518_v41  ;;  %1844 = vmatprep.mubr.bf16.mxu1 %v6518_v41 }
 0x12f   :  { %2637 = vmatprep.subr.bf16.mxu0 %v7390_v42  ;;  %2677 = vmatpush1.bf16.msra.mxu1 %v7392_v43 }
 0x130   :  { %2678 = vmatprep.subr.bf16.mxu1 %v7395_v44 }
 0x131   :  { %2638 = vmatpush1.bf16.msra.mxu0 %v7398_v45 }
 0x132   :  { %2639 = vmatprep.subr.bf16.mxu0 %v7400_v46 }
 0x133   :  { %2679 = vmatpush1.bf16.msra.mxu1 %v7404_v47 }
 0x134   :  { %1626 = vmatmul.mubr.bf16.gmra.mrb[12].mxu0 %v6523_v48  ;;  %1845 = vmatmul.mubr.bf16.gmra.mrb[12].mxu1 %v6523_v48 }
 0x135   :  { %2640 = vmatpush1.bf16.msra.mxu0 %v7408_v49  ;;  %2680 = vmatprep.subr.bf16.mxu1 %v7410_v50 }
 0x136   :  { %2641 = vmatprep.subr.bf16.mxu0 %v7413_v51  ;;  %2659 = vmatprep.mubr.bf16.mxu0 %v8442_v56 }
 0x137   :  { %2681 = vmatpush1.bf16.msra.mxu1 %v7416_v52  ;;  %2700 = vmatprep.mubr.bf16.mxu1 %v8442_v56 }
 0x138   :  { %2682 = vmatprep.subr.bf16.mxu1 %v7419_v53 }
 0x139   :  { %2642 = vmatpush1.bf16.msra.mxu0 %v7422_v54 }
 0x13a   :  { %2743 = vmatprep.subr.bf16.mxu0 %v7337_v17 }
 0x13b   :  { %2683 = vmatpush1.bf16.msra.mxu1 %v7426_v55 }
 0x13c   :  { %2660 = vmatmul.mubr.bf16.vlgmr.msra.gmra.mrb[16].mxu0 %v8442_v56  ;;  %2784 = vmatprep.subr.bf16.mxu1 %v7339_v18 }
 0x13d   :  { %2744 = vmatpush1.bf16.msra.mxu0 %v7341_v20  ;;  %2775 = vmatprep.mubr.bf16.mxu0 %v8442_v56 }
 0x13e   :  { %2701 = vmatmul.mubr.bf16.vlgmr.msra.gmra.mrb[16].mxu1 %v8442_v56  ;;  %2745 = vmatprep.subr.bf16.mxu0 %v7343_v22 }
 0x13f   :  { %2785 = vmatpush1.bf16.msra.mxu1 %v7345_v23  ;;  %2816 = vmatprep.mubr.bf16.mxu1 %v8442_v56 }
 0x140   :  { %2786 = vmatprep.subr.bf16.mxu1 %v7349_v24 }
 0x141   :  { %2746 = vmatpush1.bf16.msra.mxu0 %v7351_v25 }
 0x142   :  { %2747 = vmatprep.subr.bf16.mxu0 %v7353_v26 }
 0x143   :  { %2787 = vmatpush1.bf16.msra.mxu1 %v7356_v27 }
 0x144   :  { %2788 = vmatprep.subr.bf16.mxu1 %v7362_v30 }
 0x145   :  { %2748 = vmatpush1.bf16.msra.mxu0 %v7360_v29 }
 0x146   :  { %2749 = vmatprep.subr.bf16.mxu0 %v7366_v32 }
 0x147   :  { %2789 = vmatpush1.bf16.msra.mxu1 %v7368_v33 }
 0x148   :  { %2790 = vmatprep.subr.bf16.mxu1 %v7371_v34 }
 0x149   :  { %2750 = vmatpush1.bf16.msra.mxu0 %v7374_v35 }
 0x14a   :  { %2751 = vmatprep.subr.bf16.mxu0 %v7376_v36 }
 0x14b   :  { %2791 = vmatpush1.bf16.msra.mxu1 %v7380_v37 }
 0x14c   :  { %2792 = vmatprep.subr.bf16.mxu1 %v7386_v40 }
 0x14d   :  { %2752 = vmatpush1.bf16.msra.mxu0 %v7384_v39 }
 0x14e   :  { %2753 = vmatprep.subr.bf16.mxu0 %v7390_v42 }
 0x14f   :  { %2793 = vmatpush1.bf16.msra.mxu1 %v7392_v43 }
 0x150   :  { %2794 = vmatprep.subr.bf16.mxu1 %v7395_v44 }
 0x151   :  { %2754 = vmatpush1.bf16.msra.mxu0 %v7398_v45 }
 0x152   :  { %2755 = vmatprep.subr.bf16.mxu0 %v7400_v46 }
 0x153   :  { %2795 = vmatpush1.bf16.msra.mxu1 %v7404_v47 }
 0x154   :  { %2796 = vmatprep.subr.bf16.mxu1 %v7410_v50 }
 0x155   :  { %2756 = vmatpush1.bf16.msra.mxu0 %v7408_v49 }
 0x156   :  { %2757 = vmatprep.subr.bf16.mxu0 %v7413_v51 }
 0x157   :  { %2797 = vmatpush1.bf16.msra.mxu1 %v7416_v52 }
 0x158   :  { %2798 = vmatprep.subr.bf16.mxu1 %v7419_v53 }
 0x159   :  { %2758 = vmatpush1.bf16.msra.mxu0 %v7422_v54 }
 0x15a   :  { %2859 = vmatprep.subr.bf16.mxu0 %v7337_v17  ;;  %v7496_v17 = vrot.slane %v315_v5, %v8439_v7 }
 0x15b   :  { %2799 = vmatpush1.bf16.msra.mxu1 %v7426_v55 }
 0x15c   :  { %2900 = vmatprep.subr.bf16.mxu1 %v7339_v18 }
 0x1ef   :  { %v1597_v59 = vpop.f32.mrb[0].mxu0  ;;  %v1816_v60 = vpop.f32.mrb[0].mxu1 }
 0x1f0   :  { %v1599_v3 = vpop.f32.mrb[1].mxu0  ;;  %v1818_v4 = vpop.f32.mrb[1].mxu1  ;;  %v6037_v22 = vadd.f32 %v1597_v59, %v7484_v14  ;;  %v6053_v23 = vadd.f32 %v1816_v60, %v7488_v15 }
 0x1f1   :  { %v1601_v8 = vpop.f32.mrb[2].mxu0  ;;  %v1820_v9 = vpop.f32.mrb[2].mxu1  ;;  %v6038_v28 = vadd.f32 %v1599_v3, %v7492_v16  ;;  %v6054_v29 = vadd.f32 %v1818_v4, %v7496_v17 }
 0x1f2   :  { %v1603_v10 = vpop.f32.mrb[3].mxu0  ;;  %v1822_v11 = vpop.f32.mrb[3].mxu1  ;;  %v6039_v0 = vadd.f32 %v1601_v8, %v7484_v14  ;;  %v6055_v3 = vadd.f32 %v1820_v9, %v7488_v15 }
 0x1f3   :  { %v6040_v12 = vadd.f32 %v1603_v10, %v7492_v16  ;;  %v6056_v13 = vadd.f32 %v1822_v11, %v7496_v17 }
 0x1f7   :  { %v1607_v18 = vpop.f32.mrb[4].mxu0  ;;  %v1826_v20 = vpop.f32.mrb[4].mxu1 }
 0x1f8   :  { %v6041_v24 = vadd.f32 %v1607_v18, %v7484_v14  ;;  %v6057_v25 = vadd.f32 %v1826_v20, %v7488_v15  ;;  %v1609_v26 = vpop.f32.mrb[5].mxu0  ;;  %v1828_v27 = vpop.f32.mrb[5].mxu1 }
 0x1f9   :  { %v6042_v30 = vadd.f32 %v1609_v26, %v7492_v16  ;;  %v6058_v31 = vadd.f32 %v1828_v27, %v7496_v17  ;;  %v1611_v32 = vpop.f32.mrb[6].mxu0  ;;  %v1830_v33 = vpop.f32.mrb[6].mxu1 }
 0x1fa   :  { %v1855_v34 = vcombine.low %v6037_v22, %v6041_v24  ;;  %v1856_v38 = vcombine.high %v6037_v22, %v6041_v24  ;;  %v2127_v41 = vcombine.low %v6053_v23, %v6057_v25  ;;  %v2128_v48 = vcombine.high %v6053_v23, %v6057_v25  ;;  %v1613_v57 = vpop.f32.mrb[7].mxu0  ;;  %v1832_v59 = vpop.f32.mrb[7].mxu1 }
 0x1fb   :  { %v1991_v60 = vcombine.low %v6038_v28, %v6042_v30  ;;  %v1992_v61 = vcombine.high %v6038_v28, %v6042_v30  ;;  %v2263_v62 = vcombine.low %v6054_v29, %v6058_v31  ;;  %v2264_v63 = vcombine.high %v6054_v29, %v6058_v31 }
 0x1fc   :  { %v7515_v4 = vrot.slane %v1856_v38, %v7499_v19  ;;  %v7518_v5 = vrot.slane %v2128_v48, %v7499_v19  ;;  %v6043_v8 = vadd.f32 %v1611_v32, %v7484_v14  ;;  %v6059_v9 = vadd.f32 %v1830_v33, %v7488_v15 }
 0x1fd   :  { %v7523_v18 = vrot.slane %v1992_v61, %v7499_v19  ;;  %v7526_v20 = vrot.slane %v2264_v63, %v7499_v19  ;;  %v6044_v22 = vadd.f32 %v1613_v57, %v7492_v16  ;;  %v6060_v23 = vadd.f32 %v1832_v59, %v7496_v17 }
 0x1fe   :  { %v7533_v24 = vrot.slane %v1855_v34, %v7499_v19  ;;  %v7536_v10 = vrot.slane %v2127_v41, %v7499_v19  ;;  %v7539_v11 = vrot.slane %v1991_v60, %v7499_v19  ;;  %v7542_v25 = vrot.slane %v2263_v62, %v7499_v19 }
 0x1ff   :  { %v1617_v26 = vpop.f32.mrb[8].mxu0  ;;  %v1836_v27 = vpop.f32.mrb[8].mxu1  ;;  %v1871_v28 = vcombine.low %v6039_v0, %v6043_v8  ;;  %v1872_v29 = vcombine.high %v6039_v0, %v6043_v8  ;;  %v2143_v30 = vcombine.low %v6055_v3, %v6059_v9  ;;  %v2144_v31 = vcombine.high %v6055_v3, %v6059_v9 }
 0x200   :  { %v1619_v32 = vpop.f32.mrb[9].mxu0  ;;  %v1838_v33 = vpop.f32.mrb[9].mxu1  ;;  %v2007_v38 = vcombine.low %v6040_v12, %v6044_v22  ;;  %v2008_v34 = vcombine.high %v6040_v12, %v6044_v22  ;;  %v2279_v48 = vcombine.low %v6056_v13, %v6060_v23  ;;  %v2280_v57 = vcombine.high %v6056_v13, %v6060_v23 }
 0x201   :  { %v1621_v41 = vpop.f32.mrb[10].mxu0  ;;  %v1840_v59 = vpop.f32.mrb[10].mxu1  ;;  %v7545_v60 = vrot.slane %v1871_v28, %v7499_v19  ;;  %v7548_v61 = vrot.slane %v1872_v29, %v7499_v19  ;;  %v7551_v62 = vrot.slane %v2143_v30, %v7499_v19  ;;  %v7554_v63 = vrot.slane %v2144_v31, %v7499_v19 }
 0x202   :  { %v1623_v0 = vpop.f32.mrb[11].mxu0  ;;  %v1842_v3 = vpop.f32.mrb[11].mxu1  ;;  %v2015_v12 = vrot.slane %v2007_v38, %v7499_v19  ;;  %v7558_v13 = vrot.slane %v2008_v34, %v7499_v19  ;;  %v2287_v8 = vrot.slane %v2279_v48, %v7499_v19  ;;  %v7562_v9 = vrot.slane %v2280_v57, %v7499_v19 }
 0x203   :  { %v6045_v22 = vadd.f32 %v1617_v26, %v7484_v14  ;;  %v6061_v23 = vadd.f32 %v1836_v27, %v7488_v15  ;;  %v6046_v28 = vadd.f32 %v1619_v32, %v7492_v16  ;;  %v6062_v29 = vadd.f32 %v1838_v33, %v7496_v17 }
 0x204   :  { %v7569_v30 = vadd.f32 %v1621_v41, %v7484_v14  ;;  %v7572_v31 = vadd.f32 %v1840_v59, %v7488_v15  ;;  %v7575_v38 = vadd.f32 %v1623_v0, %v7492_v16  ;;  %v7578_v34 = vadd.f32 %v1842_v3, %v7496_v17 }
 0x205   :  { %v1919_v26 = vcombine.low %v7533_v24, %v7545_v60  ;;  %v2055_v27 = vcombine.low %v7539_v11, %v2015_v12  ;;  %v2191_v32 = vcombine.low %v7536_v10, %v7551_v62  ;;  %v2327_v33 = vcombine.low %v7542_v25, %v2287_v8 }
 0x206   :  { %v1920_v41 = vcombine.high %v7533_v24, %v7545_v60  ;;  %v2192_v59 = vcombine.high %v7536_v10, %v7551_v62  ;;  %v2056_v0 = vcombine.high %v7539_v11, %v2015_v12  ;;  %v2328_v3 = vcombine.high %v7542_v25, %v2287_v8 }
 0x207   :  { %v1627_v48 = vpop.f32.mrb[12].mxu0  ;;  %v1846_v57 = vpop.f32.mrb[12].mxu1  ;;  %v7595_v56 = vrot.slane %v1919_v26, %v7502_v21  ;;  %v7598_v58 = vrot.slane %v2055_v27, %v7502_v21  ;;  %v7603_v25 = vrot.slane %v2191_v32, %v7502_v21  ;;  %v7606_v62 = vrot.slane %v2327_v33, %v7502_v21 }
 0x208   :  { %v6049_v2 = vadd.f32 %v1627_v48, %v7484_v14  ;;  %v6065_v7 = vadd.f32 %v1846_v57, %v7488_v15  ;;  %v1629_v6 = vpop.f32.mrb[13].mxu0  ;;  %v1848_v1 = vpop.f32.mrb[13].mxu1 }
 0x209   :  { %v6050_v24 = vadd.f32 %v1629_v6, %v7492_v16  ;;  %v6066_v10 = vadd.f32 %v1848_v1, %v7496_v17  ;;  %v1631_v60 = vpop.f32.mrb[14].mxu0  ;;  %v1850_v11 = vpop.f32.mrb[14].mxu1 }
 0x20a   :  { %v1887_v12 = vcombine.low %v6045_v22, %v6049_v2  ;;  %v1888_v8 = vcombine.high %v6045_v22, %v6049_v2  ;;  %v2159_v48 = vcombine.low %v6061_v23, %v6065_v7  ;;  %v2160_v26 = vcombine.high %v6061_v23, %v6065_v7  ;;  %v1633_v57 = vpop.f32.mrb[15].mxu0  ;;  %v1852_v55 = vpop.f32.mrb[15].mxu1 }
 0x20b   :  { %v2023_v27 = vcombine.low %v6046_v28, %v6050_v24  ;;  %v2024_v54 = vcombine.high %v6046_v28, %v6050_v24  ;;  %v2295_v53 = vcombine.low %v6062_v29, %v6066_v10  ;;  %v2296_v6 = vcombine.high %v6062_v29, %v6066_v10 }
 0x20c   :  { %v1895_v1 = vrot.slane %v1887_v12, %v7499_v19  ;;  %v7610_v51 = vrot.slane %v1888_v8, %v7499_v19  ;;  %v2167_v32 = vrot.slane %v2159_v48, %v7499_v19  ;;  %v7614_v33 = vrot.slane %v2160_v26, %v7499_v19 }
 0x20d   :  { %v2031_v2 = vrot.slane %v2023_v27, %v7499_v19  ;;  %v7618_v7 = vrot.slane %v2024_v54, %v7499_v19  ;;  %v2303_v22 = vrot.slane %v2295_v53, %v7499_v19  ;;  %v7622_v23 = vrot.slane %v2296_v6, %v7499_v19 }
 0x20e   :  { %v6051_v28 = vadd.f32 %v1631_v60, %v7484_v14  ;;  %v6067_v29 = vadd.f32 %v1850_v11, %v7488_v15  ;;  %v6052_v24 = vadd.f32 %v1633_v57, %v7492_v16  ;;  %v6068_v10 = vadd.f32 %v1852_v55, %v7496_v17 }
 0x20f   :  { %v2661_v12 = vpop.f32.mrb[16].mxu0  ;;  %v7629_v8 = vrot.slane %v1920_v41, %v7502_v21  ;;  %v7632_v54 = vrot.slane %v2192_v59, %v7502_v21  ;;  %v7635_v53 = vrot.slane %v2056_v0, %v7502_v21  ;;  %v7638_v48 = vrot.slane %v2328_v3, %v7502_v21 }
 0x210   :  { %v1903_v14 = vcombine.low %v7569_v30, %v6051_v28  ;;  %v1904_v15 = vcombine.high %v7569_v30, %v6051_v28  ;;  %v2175_v16 = vcombine.low %v7572_v31, %v6067_v29  ;;  %v2176_v55 = vcombine.high %v7572_v31, %v6067_v29  ;;  %v2663_v17 = vpop.f32.mrb[17].mxu0 }
 0x211   :  { %v2039_v41 = vcombine.low %v7575_v38, %v6052_v24  ;;  %v2040_v59 = vcombine.high %v7575_v38, %v6052_v24  ;;  %v2311_v60 = vcombine.low %v7578_v34, %v6068_v10  ;;  %v2312_v0 = vcombine.high %v7578_v34, %v6068_v10  ;;  %v2665_v11 = vpop.f32.mrb[18].mxu0  ;;  %v2702_v3 = vpop.f32.mrb[16].mxu1 }
 0x212   :  { %v1911_v26 = vrot.slane %v1903_v14, %v7499_v19  ;;  %v7650_v57 = vrot.slane %v1904_v15, %v7499_v19  ;;  %v2183_v30 = vrot.slane %v2175_v16, %v7499_v19  ;;  %v7654_v31 = vrot.slane %v2176_v55, %v7499_v19  ;;  %v2666_v27 = vpop.f32.mrb[19].mxu0  ;;  %v2704_v6 = vpop.f32.mrb[17].mxu1 }
 0x213   :  { %v2047_v38 = vrot.slane %v2039_v41, %v7499_v19  ;;  %v7658_v28 = vrot.slane %v2040_v59, %v7499_v19  ;;  %v2319_v34 = vrot.slane %v2311_v60, %v7499_v19  ;;  %v7662_v29 = vrot.slane %v2312_v0, %v7499_v19  ;;  %v2706_v24 = vpop.f32.mrb[18].mxu1 }
 0x214   :  { %v1951_v10 = vcombine.low %v1895_v1, %v1911_v26  ;;  %v2223_v14 = vcombine.low %v2167_v32, %v2183_v30  ;;  %v2707_v15 = vpop.f32.mrb[19].mxu1  ;;  %v1952_v16 = vcombine.high %v1895_v1, %v1911_v26  ;;  %v2224_v11 = vcombine.high %v2167_v32, %v2183_v30 }
 0x215   :  { %v2087_v55 = vcombine.low %v2031_v2, %v2047_v38  ;;  %v2359_v52 = vcombine.low %v2303_v22, %v2319_v34  ;;  %v2088_v27 = vcombine.high %v2031_v2, %v2047_v38  ;;  %v2360_v49 = vcombine.high %v2303_v22, %v2319_v34 }
 0x216   :  { %v7665_v41 = vrot.slane %v1951_v10, %v7502_v21  ;;  %v7668_v59 = vrot.slane %v2223_v14, %v7502_v21  ;;  %v7671_v60 = vrot.slane %v1952_v16, %v7502_v21  ;;  %v7674_v19 = vrot.slane %v2224_v11, %v7502_v21 }
 0x217   :  { %v7677_v0 = vrot.slane %v2087_v55, %v7502_v21  ;;  %v7680_v1 = vrot.slane %v2359_v52, %v7502_v21  ;;  %v7683_v32 = vrot.slane %v2088_v27, %v7502_v21  ;;  %v7686_v2 = vrot.slane %v2360_v49, %v7502_v21 }
 0x218   :  { %v1983_v22 = vcombine.low %v7595_v56, %v7665_v41  ;;  %v2255_v26 = vcombine.low %v7603_v25, %v7668_v59  ;;  %v1984_v30 = vcombine.high %v7595_v56, %v7665_v41 }
 0x219   :  { %v2119_v52 = vcombine.low %v7598_v58, %v7677_v0  ;;  %v2391_v34 = vcombine.low %v7606_v62, %v7680_v1  ;;  %v2392_v24 = vcombine.high %v7606_v62, %v7680_v1 }
 0x21a   :  { %v2709_v10 = vadd.f32 %v2661_v12, %v1983_v22  ;;  %v7704_v14 = vadd.f32 %v2702_v3, %v2255_v26 }
 0x21b   :  { %v2710_v11 = vadd.f32 %v2663_v17, %v2119_v52  ;;  %v2712_v55 = vadd.f32 %v2704_v6, %v2391_v34  ;;  %v1935_v6 = vcombine.low %v7515_v4, %v7548_v61  ;;  %v1967_v52 = vcombine.low %v7610_v51, %v7650_v57 }
 0x21c   :  { %v5731_v38 = vmul.f32 -1.442695, %v2709_v10  ;;  %v2207_v34 = vcombine.low %v7518_v5, %v7554_v63  ;;  %v2239_v10 = vcombine.low %v7614_v33, %v7654_v31 }
 0x21d   :  { %v5732_v22 = vmul.f32 -1.442695, %v2710_v11  ;;  %v5733_v26 = vmul.f32 -1.442695, %v2712_v55  ;;  %v2071_v11 = vcombine.low %v7523_v18, %v7558_v13  ;;  %v2103_v55 = vcombine.low %v7618_v7, %v7658_v28 }
 0x21e   :  { %6892 = vpow2.f32 %v5731_v38  ;;  %v7735_v38 = vrot.slane %v1935_v6, %v7502_v21  ;;  %v7738_v17 = vrot.slane %v1967_v52, %v7502_v21  ;;  %v7741_v16 = vrot.slane %v2207_v34, %v7502_v21 }
 0x21f   :  { %6894 = vpow2.f32 %v5732_v22  ;;  %v7744_v22 = vrot.slane %v2239_v10, %v7502_v21  ;;  %v7747_v3 = vrot.slane %v2071_v11, %v7502_v21  ;;  %v7750_v12 = vrot.slane %v2103_v55, %v7502_v21 }
 0x220   :  { %6896 = vpow2.f32 %v5733_v26  ;;  %v2343_v26 = vcombine.low %v7526_v20, %v7562_v9  ;;  %v2375_v52 = vcombine.low %v7622_v23, %v7662_v29  ;;  %v1936_v10 = vcombine.high %v7515_v4, %v7548_v61 }
 0x221   :  { %8483 = vst [vmem:[#allocation24_spill] sm:$0xff] %v7750_v12  ;;  %v1968_v61 = vcombine.high %v7610_v51, %v7650_v57  ;;  %v2208_v55 = vcombine.high %v7518_v5, %v7554_v63  ;;  %v2072_v6 = vcombine.high %v7523_v18, %v7558_v13  ;;  %v2344_v5 = vcombine.high %v7526_v20, %v7562_v9  ;;  %v7841_v9 = vld [vmem:[#allocation8 + $0x8] ss:$16 sps:$4 sm:$0xff]  }
 0x222   :  { %v7767_v49 = vrot.slane %v2343_v26, %v7502_v21  ;;  %v7772_v27 = vrot.slane %v2375_v52, %v7502_v21  ;;  %v7777_v4 = vrot.slane %v1936_v10, %v7502_v21  ;;  %v2240_v26 = vcombine.high %v7614_v33, %v7654_v31 }
 0x223   :  { %v2104_v52 = vcombine.high %v7618_v7, %v7658_v28  ;;  %v7794_v51 = vrot.slane %v1968_v61, %v7502_v21  ;;  %v7799_v63 = vrot.slane %v2208_v55, %v7502_v21  ;;  %v7805_v13 = vrot.slane %v2072_v6, %v7502_v21 }
 0x224   :  { %8484 = vst [vmem:[#allocation25_spill] sm:$0xff] %v7767_v49  ;;  %8485 = vst [vmem:[#allocation26_spill] sm:$0xff] %v7772_v27  ;;  %v7802_v18 = vrot.slane %v2240_v26, %v7502_v21  ;;  %v7813_v31 = vrot.slane %v2344_v5, %v7502_v21  ;;  %v2376_v20 = vcombine.high %v7622_v23, %v7662_v29  ;;  %6898 = vtanh.f32 %v7704_v14  ;;  %v7838_v29 = vld [vmem:[#allocation8] ss:$16 sps:$4 sm:$0xff]  }
 0x225   :  { %8486 = vst [vmem:[#allocation27_spill] sm:$0xff] %v7777_v4  ;;  %8487 = vst [vmem:[#allocation28_spill] sm:$0xff] %v7794_v51  ;;  %v7808_v33 = vrot.slane %v2104_v52, %v7502_v21 }
 0x226   :  { %8488 = vst [vmem:[#allocation29_spill] sm:$0xff] %v7799_v63  ;;  %8489 = vst [vmem:[#allocation30_spill] sm:$0xff] %v7802_v18  ;;  %v7827_v23 = vrot.slane %v2376_v20, %v7502_v21 }
 0x227   :  { %8490 = vst [vmem:[#allocation31_spill] sm:$0xff] %v7805_v13  ;;  %8491 = vst [vmem:[#allocation32_spill] sm:$0xff] %v7808_v33  ;;  %v8506_v33 = vcombine.low %v7638_v48, %v7686_v2 }
 0x228   :  { %v6893_v7 = vpop.eup %6892  ;;  %8492 = vst [vmem:[#allocation33_spill] sm:$0xff] %v7813_v31  ;;  %8493 = vst [vmem:[#allocation34_spill] sm:$0xff] %v7827_v23 }
 0x229   :  { %v6895_v28 = vpop.eup %6894  ;;  %v2716_v55 = vadd.f32 1.0, %v6893_v7 }
 0x22a   :  { %v6897_v52 = vpop.eup %6896  ;;  %v2722_v5 = vadd.f32 1.0, %v6895_v28 }
 0x22b   :  { %6900 = vrcp.f32 %v2716_v55  ;;  %v2729_v57 = vadd.f32 1.0, %v6897_v52  ;;  %v7855_v52 = vld [vmem:[#allocation8 + $0x28] ss:$16 sps:$4 sm:$0xff]  }
 0x22c   :  { %6902 = vrcp.f32 %v2722_v5 }
 0x22d   :  { %6904 = vrcp.f32 %v2729_v57  ;;  %v7847_v57 = vld [vmem:[#allocation8 + $0x2c] ss:$16 sps:$4 sm:$0xff]  }
 0x22e   :  { %v6899_v61 = vpop.eup %6898 }
 0x235   :  { %v6901_v26 = vpop.eup %6900 }
 0x236   :  { %v6903_v6 = vpop.eup %6902  ;;  %v2733_v28 = vmul.f32 %v6901_v26, %v6899_v61  ;;  %v8494_v61 = vmov 0   ;;  %v7852_v26 = vld [vmem:[#allocation8 + $0x20] ss:$16 sps:$4 sm:$0xff]  }
 0x237   :  { %v2732_v14 = vmul.f32 0.0, %v6903_v6  ;;  %v6905_v21 = vpop.eup %6904  ;;  %v7844_v6 = vld [vmem:[#allocation8 + $0x24] ss:$16 sps:$4 sm:$0xff]  }
 0x239   :  { %v7835_v10 = vadd.f32 %v2733_v28, %v2732_v14  ;;  %v7858_v28 = vld [vmem:[#allocation8 + $0x44] ss:$16 sps:$4 sm:$0xff]   ;;  %v7861_v14 = vld [vmem:[#allocation8 + $0x4c] ss:$16 sps:$4 sm:$0xff]  }
 0x23b   :  { %6906 = vtanh.f32 %v7835_v10 }
 0x245   :  { %v6907_v20 = vpop.eup %6906 }
 0x246   :  { %v2736_v55 = vmul.f32 %v6907_v20, %v6905_v21  ;;  %v7864_v21 = vld [vmem:[#allocation8 + $0x40] ss:$16 sps:$4 sm:$0xff]   ;;  %v7867_v20 = vld [vmem:[#allocation8 + $0x48] ss:$16 sps:$4 sm:$0xff]  }
 0x248   :  { %v2742_v5 = vpack.c.bf16 %v2736_v55, %v2736_v55  ;;  %v7870_v55 = vld [vmem:[#allocation8 + $0x64] ss:$16 sps:$4 sm:$0xff]  }
 0x24a   :  { %2776 = vmatmul.mubr.bf16.vlgmr.msra.gmra.mrb[20].mxu0 %v2742_v5  ;;  %2817 = vmatmul.mubr.bf16.vlgmr.msra.gmra.mrb[20].mxu1 %v2742_v5  ;;  %v7873_v5 = vld [vmem:[#allocation8 + $0x6c] ss:$16 sps:$4 sm:$0xff]  }
 0x24b   :  { %2860 = vmatpush1.bf16.msra.mxu0 %v7838_v29  ;;  %2901 = vmatpush1.bf16.msra.mxu1 %v7841_v9 }
 0x24c   :  { %2861 = vmatprep.subr.bf16.mxu0 %v7844_v6  ;;  %2902 = vmatprep.subr.bf16.mxu1 %v7847_v57 }
 0x24d   :  { %2891 = vmatprep.mubr.bf16.mxu0 %v8494_v61  ;;  %2932 = vmatprep.mubr.bf16.mxu1 %v8494_v61 }
 0x24f   :  { %2862 = vmatpush1.bf16.msra.mxu0 %v7852_v26  ;;  %2903 = vmatpush1.bf16.msra.mxu1 %v7855_v52 }
 0x250   :  { %2863 = vmatprep.subr.bf16.mxu0 %v7858_v28  ;;  %2904 = vmatprep.subr.bf16.mxu1 %v7861_v14 }
 0x253   :  { %2864 = vmatpush1.bf16.msra.mxu0 %v7864_v21  ;;  %2905 = vmatpush1.bf16.msra.mxu1 %v7867_v20 }
 0x254   :  { %2865 = vmatprep.subr.bf16.mxu0 %v7870_v55  ;;  %2906 = vmatprep.subr.bf16.mxu1 %v7873_v5 }
 0x257   :  { %2866 = vmatpush1.bf16.msra.mxu0 %v7374_v35  ;;  %2907 = vmatpush1.bf16.msra.mxu1 %v7380_v37  ;;  %v8495_v35 = vld [vmem:[#allocation17_spill] sm:$0xff]  ;;  %v8497_v37 = vld [vmem:[#allocation18_spill] sm:$0xff] }
 0x258   :  { %2867 = vmatprep.subr.bf16.mxu0 %v7376_v36  ;;  %2908 = vmatprep.subr.bf16.mxu1 %v7386_v40  ;;  %v8496_v36 = vld [vmem:[#allocation19_spill] sm:$0xff]  ;;  %v8499_v40 = vld [vmem:[#allocation21_spill] sm:$0xff] }
 0x25b   :  { %2868 = vmatpush1.bf16.msra.mxu0 %v7384_v39  ;;  %2909 = vmatpush1.bf16.msra.mxu1 %v7392_v43  ;;  %v8498_v39 = vld [vmem:[#allocation20_spill] sm:$0xff] }
 0x25c   :  { %2869 = vmatprep.subr.bf16.mxu0 %v7390_v42  ;;  %2910 = vmatprep.subr.bf16.mxu1 %v7395_v44  ;;  %v8500_v42 = vld [vmem:[#allocation22_spill] sm:$0xff]  ;;  %v7897_v44 = vld [vmem:[#allocation8 + $0xc] ss:$16 sps:$4 sm:$0xff]  }
 0x25d   :  { %v7894_v43 = vld [vmem:[#allocation8 + $0x4] ss:$16 sps:$4 sm:$0xff]  }
 0x25f   :  { %2870 = vmatpush1.bf16.msra.mxu0 %v7398_v45  ;;  %2911 = vmatpush1.bf16.msra.mxu1 %v7404_v47 }
 0x260   :  { %2871 = vmatprep.subr.bf16.mxu0 %v7400_v46  ;;  %2912 = vmatprep.subr.bf16.mxu1 %v7410_v50  ;;  %v8501_v50 = vcombine.high %v7603_v25, %v7668_v59 }
 0x263   :  { %2872 = vmatpush1.bf16.msra.mxu0 %v8495_v35  ;;  %2913 = vmatpush1.bf16.msra.mxu1 %v8496_v36 }
 0x264   :  { %2873 = vmatprep.subr.bf16.mxu0 %v8497_v37  ;;  %2914 = vmatprep.subr.bf16.mxu1 %v8498_v39  ;;  %v8502_v39 = vcombine.high %v7598_v58, %v7677_v0 }
 0x267   :  { %2874 = vmatpush1.bf16.msra.mxu0 %v8499_v40  ;;  %2915 = vmatpush1.bf16.msra.mxu1 %v8500_v42 }
 0x268   :  { %2975 = vmatprep.subr.bf16.mxu0 %v7894_v43  ;;  %3016 = vmatprep.subr.bf16.mxu1 %v7897_v44 }
 0x31d   :  { %v2777_v45 = vpop.f32.mrb[20].mxu0  ;;  %v2818_v46 = vpop.f32.mrb[20].mxu1 }
 0x31e   :  { %v2825_v47 = vadd.f32 %v2777_v45, %v1984_v30  ;;  %v2827_v35 = vadd.f32 %v2818_v46, %v8501_v50  ;;  %v2779_v36 = vpop.f32.mrb[21].mxu0  ;;  %v2820_v37 = vpop.f32.mrb[21].mxu1  ;;  %v7933_v50 = vld [vmem:[#allocation8 + $0x68] ss:$16 sps:$4 sm:$0xff]  }
 0x31f   :  { %v2826_v7 = vadd.f32 %v2779_v36, %v8502_v39  ;;  %v2828_v34 = vadd.f32 %v2820_v37, %v2392_v24  ;;  %v2781_v11 = vpop.f32.mrb[22].mxu0  ;;  %v2822_v15 = vpop.f32.mrb[22].mxu1  ;;  %v7939_v36 = vld [vmem:[#allocation8 + $0x8c] ss:$16 sps:$4 sm:$0xff]   ;;  %v7942_v37 = vld [vmem:[#allocation8 + $0x80] ss:$16 sps:$4 sm:$0xff]  }
 0x320   :  { %v5734_v23 = vmul.f32 -1.442695, %v2825_v47  ;;  %v2782_v31 = vpop.f32.mrb[23].mxu0  ;;  %v2823_v56 = vpop.f32.mrb[23].mxu1  ;;  %v7945_v39 = vld [vmem:[#allocation8 + $0x88] ss:$16 sps:$4 sm:$0xff]  }
 0x321   :  { %v5735_v41 = vmul.f32 -1.442695, %v2826_v7  ;;  %v5736_v25 = vmul.f32 -1.442695, %v2828_v34  ;;  %v7948_v56 = vld [vmem:[#allocation8 + $0xa4] ss:$16 sps:$4 sm:$0xff]  }
 0x322   :  { %6908 = vpow2.f32 %v5734_v23 }
 0x323   :  { %6910 = vpow2.f32 %v5735_v41  ;;  %v7951_v41 = vld [vmem:[#allocation8 + $0xac] ss:$16 sps:$4 sm:$0xff]  }
 0x324   :  { %6912 = vpow2.f32 %v5736_v25  ;;  %v7954_v25 = vld [vmem:[#allocation8 + $0xa0] ss:$16 sps:$4 sm:$0xff]  }
 0x325   :  { %6914 = vtanh.f32 %v2827_v35  ;;  %v7936_v35 = vld [vmem:[#allocation8 + $0x84] ss:$16 sps:$4 sm:$0xff]  }
 0x32c   :  { %v6909_v59 = vpop.eup %6908 }
 0x32d   :  { %v6911_v30 = vpop.eup %6910  ;;  %v2832_v45 = vadd.f32 1.0, %v6909_v59  ;;  %v7957_v59 = vld [vmem:[#allocation8 + $0xa8] ss:$16 sps:$4 sm:$0xff]  }
 0x32e   :  { %v2838_v58 = vadd.f32 1.0, %v6911_v30  ;;  %v6913_v0 = vpop.eup %6912  ;;  %v7960_v30 = vld [vmem:[#allocation8 + $0xc4] ss:$16 sps:$4 sm:$0xff]  }
 0x32f   :  { %6916 = vrcp.f32 %v2832_v45  ;;  %v6915_v62 = vpop.eup %6914  ;;  %v2845_v11 = vadd.f32 1.0, %v6913_v0  ;;  %v7963_v45 = vld [vmem:[#allocation8 + $0xcc] ss:$16 sps:$4 sm:$0xff]   ;;  %v7969_v0 = vld [vmem:[#allocation8 + $0xc8] ss:$16 sps:$4 sm:$0xff]  }
 0x330   :  { %6918 = vrcp.f32 %v2838_v58  ;;  %v7966_v58 = vld [vmem:[#allocation8 + $0xc0] ss:$16 sps:$4 sm:$0xff]  }
 0x331   :  { %6920 = vrcp.f32 %v2845_v11  ;;  %v8503_v11 = vcombine.low %v7629_v8, %v7671_v60 }
 0x339   :  { %v6917_v1 = vpop.eup %6916 }
 0x33a   :  { %v6919_v24 = vpop.eup %6918  ;;  %v2849_v15 = vmul.f32 %v6917_v1, %v6915_v62  ;;  %v7972_v62 = vld [vmem:[#allocation8 + $0xe4] ss:$16 sps:$4 sm:$0xff]   ;;  %v7975_v1 = vld [vmem:[#allocation8 + $0xec] ss:$16 sps:$4 sm:$0xff]  }
 0x33b   :  { %v2848_v31 = vmul.f32 %v6919_v24, %v7835_v10  ;;  %v6921_v34 = vpop.eup %6920  ;;  %v7930_v10 = vld [vmem:[#allocation8 + $0x60] ss:$16 sps:$4 sm:$0xff]  }
 0x33d   :  { %v7913_v7 = vadd.f32 %v2849_v15, %v2848_v31 }
 0x33f   :  { %6922 = vtanh.f32 %v7913_v7 }
 0x349   :  { %v6923_v23 = vpop.eup %6922 }
 0x34a   :  { %v2852_v46 = vmul.f32 %v6923_v23, %v6921_v34  ;;  %v8504_v34 = vcombine.low %v7632_v54, %v7674_v19 }
 0x34c   :  { %v2858_v47 = vpack.c.bf16 %v2852_v46, %v2852_v46 }
 0x34e   :  { %2892 = vmatmul.mubr.bf16.vlgmr.msra.gmra.mrb[24].mxu0 %v2858_v47  ;;  %2933 = vmatmul.mubr.bf16.vlgmr.msra.gmra.mrb[24].mxu1 %v2858_v47 }
 0x34f   :  { %2976 = vmatpush1.bf16.msra.mxu0 %v7838_v29  ;;  %3017 = vmatpush1.bf16.msra.mxu1 %v7841_v9 }
 0x350   :  { %2977 = vmatprep.subr.bf16.mxu0 %v7844_v6  ;;  %3018 = vmatprep.subr.bf16.mxu1 %v7847_v57 }
 0x351   :  { %3007 = vmatprep.mubr.bf16.mxu0 %v8494_v61  ;;  %3048 = vmatprep.mubr.bf16.mxu1 %v8494_v61 }
 0x353   :  { %2978 = vmatpush1.bf16.msra.mxu0 %v7852_v26  ;;  %3019 = vmatpush1.bf16.msra.mxu1 %v7855_v52 }
 0x354   :  { %2979 = vmatprep.subr.bf16.mxu0 %v7858_v28  ;;  %3020 = vmatprep.subr.bf16.mxu1 %v7861_v14 }
 0x357   :  { %2980 = vmatpush1.bf16.msra.mxu0 %v7864_v21  ;;  %3021 = vmatpush1.bf16.msra.mxu1 %v7867_v20 }
 0x358   :  { %2981 = vmatprep.subr.bf16.mxu0 %v7870_v55  ;;  %3022 = vmatprep.subr.bf16.mxu1 %v7873_v5 }
 0x35b   :  { %2982 = vmatpush1.bf16.msra.mxu0 %v7930_v10  ;;  %3023 = vmatpush1.bf16.msra.mxu1 %v7933_v50 }
 0x35c   :  { %2983 = vmatprep.subr.bf16.mxu0 %v7936_v35  ;;  %3024 = vmatprep.subr.bf16.mxu1 %v7939_v36 }
 0x35f   :  { %2984 = vmatpush1.bf16.msra.mxu0 %v7942_v37  ;;  %3025 = vmatpush1.bf16.msra.mxu1 %v7945_v39 }
 0x360   :  { %2985 = vmatprep.subr.bf16.mxu0 %v7948_v56  ;;  %3026 = vmatprep.subr.bf16.mxu1 %v7951_v41 }
 0x363   :  { %2986 = vmatpush1.bf16.msra.mxu0 %v7954_v25  ;;  %3027 = vmatpush1.bf16.msra.mxu1 %v7957_v59 }
 0x364   :  { %2987 = vmatprep.subr.bf16.mxu0 %v7960_v30  ;;  %3028 = vmatprep.subr.bf16.mxu1 %v7963_v45 }
 0x367   :  { %2988 = vmatpush1.bf16.msra.mxu0 %v7966_v58  ;;  %3029 = vmatpush1.bf16.msra.mxu1 %v7969_v0 }
 0x368   :  { %2989 = vmatprep.subr.bf16.mxu0 %v7972_v62  ;;  %3030 = vmatprep.subr.bf16.mxu1 %v7975_v1 }
 0x36b   :  { %2990 = vmatpush1.bf16.msra.mxu0 %v8499_v40  ;;  %3031 = vmatpush1.bf16.msra.mxu1 %v8500_v42  ;;  %v8505_v40 = vcombine.low %v7635_v53, %v7683_v32 }
 0x36c   :  { %3091 = vmatprep.subr.bf16.mxu0 %v7894_v43  ;;  %3132 = vmatprep.subr.bf16.mxu1 %v7897_v44 }
 0x421   :  { %v2893_v24 = vpop.f32.mrb[24].mxu0  ;;  %v2934_v15 = vpop.f32.mrb[24].mxu1 }
 0x422   :  { %v2941_v31 = vadd.f32 %v2893_v24, %v8503_v11  ;;  %v2943_v23 = vadd.f32 %v2934_v15, %v8504_v34  ;;  %v2895_v46 = vpop.f32.mrb[25].mxu0  ;;  %v2936_v47 = vpop.f32.mrb[25].mxu1 }
 0x423   :  { %v2942_v42 = vadd.f32 %v2895_v46, %v8505_v40  ;;  %v2944_v13 = vadd.f32 %v2936_v47, %v8506_v33  ;;  %v2897_v18 = vpop.f32.mrb[26].mxu0  ;;  %v2938_v63 = vpop.f32.mrb[26].mxu1 }
 0x424   :  { %v5737_v51 = vmul.f32 -1.442695, %v2941_v31  ;;  %v2898_v4 = vpop.f32.mrb[27].mxu0  ;;  %v2939_v27 = vpop.f32.mrb[27].mxu1 }
 0x425   :  { %v5738_v24 = vmul.f32 -1.442695, %v2942_v42  ;;  %v5739_v11 = vmul.f32 -1.442695, %v2944_v13 }
 0x426   :  { %6924 = vpow2.f32 %v5737_v51 }
 0x427   :  { %6926 = vpow2.f32 %v5738_v24  ;;  %v8507_v24 = vcombine.high %v7629_v8, %v7671_v60 }
 0x428   :  { %6928 = vpow2.f32 %v5739_v11 }
 0x429   :  { %6930 = vtanh.f32 %v2943_v23 }
 0x430   :  { %v6925_v15 = vpop.eup %6924 }
 0x431   :  { %v6927_v34 = vpop.eup %6926  ;;  %v2948_v49 = vadd.f32 1.0, %v6925_v15  ;;  %v8508_v15 = vcombine.high %v7632_v54, %v7674_v19 }
 0x432   :  { %v2954_v12 = vadd.f32 1.0, %v6927_v34  ;;  %v6929_v46 = vpop.eup %6928 }
 0x433   :  { %6932 = vrcp.f32 %v2948_v49  ;;  %v6931_v40 = vpop.eup %6930  ;;  %v2961_v31 = vadd.f32 1.0, %v6929_v46  ;;  %v8028_v49 = vld [vmem:[#allocation8 + $0xe0] ss:$16 sps:$4 sm:$0xff]  }
 0x434   :  { %6934 = vrcp.f32 %v2954_v12  ;;  %v8031_v12 = vld [vmem:[#allocation8 + $0xe8] ss:$16 sps:$4 sm:$0xff]  }
 0x435   :  { %6936 = vrcp.f32 %v2961_v31 }
 0x43d   :  { %v6933_v33 = vpop.eup %6932 }
 0x43e   :  { %v6935_v18 = vpop.eup %6934  ;;  %v2965_v63 = vmul.f32 %v6933_v33, %v6931_v40  ;;  %v8509_v33 = vcombine.high %v7635_v53, %v7683_v32 }
 0x43f   :  { %v2964_v27 = vmul.f32 %v6935_v18, %v7913_v7  ;;  %v6937_v51 = vpop.eup %6936 }
 0x441   :  { %v7995_v4 = vadd.f32 %v2965_v63, %v2964_v27  ;;  %v8510_v63 = vcombine.high %v7638_v48, %v7686_v2 }
 0x443   :  { %6938 = vtanh.f32 %v7995_v4 }
 0x44d   :  { %v6939_v13 = vpop.eup %6938 }
 0x44e   :  { %v2968_v47 = vmul.f32 %v6939_v13, %v6937_v51 }
 0x450   :  { %v2974_v23 = vpack.c.bf16 %v2968_v47, %v2968_v47 }
 0x452   :  { %3008 = vmatmul.mubr.bf16.vlgmr.msra.gmra.mrb[28].mxu0 %v2974_v23  ;;  %3049 = vmatmul.mubr.bf16.vlgmr.msra.gmra.mrb[28].mxu1 %v2974_v23 }
 0x453   :  { %3092 = vmatpush1.bf16.msra.mxu0 %v7838_v29  ;;  %3133 = vmatpush1.bf16.msra.mxu1 %v7841_v9 }
 0x454   :  { %3093 = vmatprep.subr.bf16.mxu0 %v7844_v6  ;;  %3134 = vmatprep.subr.bf16.mxu1 %v7847_v57 }
 0x455   :  { %3123 = vmatprep.mubr.bf16.mxu0 %v8494_v61  ;;  %3164 = vmatprep.mubr.bf16.mxu1 %v8494_v61 }
 0x457   :  { %3094 = vmatpush1.bf16.msra.mxu0 %v7852_v26  ;;  %3135 = vmatpush1.bf16.msra.mxu1 %v7855_v52 }
 0x458   :  { %3095 = vmatprep.subr.bf16.mxu0 %v7858_v28  ;;  %3136 = vmatprep.subr.bf16.mxu1 %v7861_v14 }
 0x45b   :  { %3096 = vmatpush1.bf16.msra.mxu0 %v7864_v21  ;;  %3137 = vmatpush1.bf16.msra.mxu1 %v7867_v20 }
 0x45c   :  { %3097 = vmatprep.subr.bf16.mxu0 %v7870_v55  ;;  %3138 = vmatprep.subr.bf16.mxu1 %v7873_v5 }
 0x45f   :  { %3098 = vmatpush1.bf16.msra.mxu0 %v7930_v10  ;;  %3139 = vmatpush1.bf16.msra.mxu1 %v7933_v50 }
 0x460   :  { %3099 = vmatprep.subr.bf16.mxu0 %v7936_v35  ;;  %3140 = vmatprep.subr.bf16.mxu1 %v7939_v36 }
 0x463   :  { %3100 = vmatpush1.bf16.msra.mxu0 %v7942_v37  ;;  %3141 = vmatpush1.bf16.msra.mxu1 %v7945_v39 }
 0x464   :  { %3101 = vmatprep.subr.bf16.mxu0 %v7948_v56  ;;  %3142 = vmatprep.subr.bf16.mxu1 %v7951_v41 }
 0x467   :  { %3102 = vmatpush1.bf16.msra.mxu0 %v7954_v25  ;;  %3143 = vmatpush1.bf16.msra.mxu1 %v7957_v59 }
 0x468   :  { %3103 = vmatprep.subr.bf16.mxu0 %v7960_v30  ;;  %3144 = vmatprep.subr.bf16.mxu1 %v7963_v45 }
 0x46b   :  { %3104 = vmatpush1.bf16.msra.mxu0 %v7966_v58  ;;  %3145 = vmatpush1.bf16.msra.mxu1 %v7969_v0 }
 0x46c   :  { %3105 = vmatprep.subr.bf16.mxu0 %v7972_v62  ;;  %3146 = vmatprep.subr.bf16.mxu1 %v7975_v1 }
 0x46f   :  { %3106 = vmatpush1.bf16.msra.mxu0 %v8028_v49  ;;  %3147 = vmatpush1.bf16.msra.mxu1 %v8031_v12 }
 0x470   :  { %3207 = vmatprep.subr.bf16.mxu0 %v7894_v43  ;;  %3248 = vmatprep.subr.bf16.mxu1 %v7897_v44 }
 0x525   :  { %v3009_v7 = vpop.f32.mrb[28].mxu0  ;;  %v3050_v42 = vpop.f32.mrb[28].mxu1 }
 0x526   :  { %v3057_v11 = vadd.f32 %v3009_v7, %v8507_v24  ;;  %v3059_v34 = vadd.f32 %v3050_v42, %v8508_v15  ;;  %v3011_v46 = vpop.f32.mrb[29].mxu0  ;;  %v3052_v40 = vpop.f32.mrb[29].mxu1 }
 0x527   :  { %v3058_v18 = vadd.f32 %v3011_v46, %v8509_v33  ;;  %v3060_v31 = vadd.f32 %v3052_v40, %v8510_v63  ;;  %v3013_v27 = vpop.f32.mrb[30].mxu0  ;;  %v3054_v51 = vpop.f32.mrb[30].mxu1 }
 0x528   :  { %v5740_v13 = vmul.f32 -1.442695, %v3057_v11  ;;  %v3014_v47 = vpop.f32.mrb[31].mxu0  ;;  %v3055_v8 = vpop.f32.mrb[31].mxu1  ;;  %v8512_v51 = vcombine.low %v7741_v16, %v7744_v22 }
 0x529   :  { %v5741_v60 = vmul.f32 -1.442695, %v3058_v18  ;;  %v5742_v54 = vmul.f32 -1.442695, %v3060_v31  ;;  %v8511_v31 = vcombine.low %v7735_v38, %v7738_v17 }
 0x52a   :  { %6940 = vpow2.f32 %v5740_v13 }
 0x52b   :  { %6942 = vpow2.f32 %v5741_v60  ;;  %v8513_v60 = vld [vmem:[#allocation24_spill] sm:$0xff] }
 0x52c   :  { %6944 = vpow2.f32 %v5742_v54  ;;  %v8514_v54 = vcombine.low %v7747_v3, %v8513_v60 }
 0x52d   :  { %6946 = vtanh.f32 %v3059_v34 }
 0x534   :  { %v6941_v19 = vpop.eup %6940 }
 0x535   :  { %v6943_v23 = vpop.eup %6942  ;;  %v3064_v7 = vadd.f32 1.0, %v6941_v19 }
 0x536   :  { %v3070_v53 = vadd.f32 1.0, %v6943_v23  ;;  %v6945_v32 = vpop.eup %6944  ;;  %v8515_v23 = vld [vmem:[#allocation25_spill] sm:$0xff] }
 0x537   :  { %6948 = vrcp.f32 %v3064_v7  ;;  %v6947_v48 = vpop.eup %6946  ;;  %v3077_v11 = vadd.f32 1.0, %v6945_v32  ;;  %v8516_v7 = vld [vmem:[#allocation26_spill] sm:$0xff] }
 0x538   :  { %6950 = vrcp.f32 %v3070_v53  ;;  %v8517_v53 = vcombine.low %v8515_v23, %v8516_v7 }
 0x539   :  { %6952 = vrcp.f32 %v3077_v11 }
 0x541   :  { %v6949_v2 = vpop.eup %6948 }
 0x542   :  { %v6951_v42 = vpop.eup %6950  ;;  %v3081_v24 = vmul.f32 %v6949_v2, %v6947_v48 }
 0x543   :  { %v3080_v15 = vmul.f32 %v6951_v42, %v7995_v4  ;;  %v6953_v40 = vpop.eup %6952 }
 0x545   :  { %v8049_v46 = vadd.f32 %v3081_v24, %v3080_v15 }
 0x547   :  { %6954 = vtanh.f32 %v8049_v46 }
 0x551   :  { %v6955_v33 = vpop.eup %6954 }
 0x552   :  { %v3084_v18 = vmul.f32 %v6955_v33, %v6953_v40 }
 0x554   :  { %v3090_v34 = vpack.c.bf16 %v3084_v18, %v3084_v18 }
 0x556   :  { %3124 = vmatmul.mubr.bf16.vlgmr.msra.gmra.mrb[32].mxu0 %v3090_v34  ;;  %3165 = vmatmul.mubr.bf16.vlgmr.msra.gmra.mrb[32].mxu1 %v3090_v34 }
 0x557   :  { %3208 = vmatpush1.bf16.msra.mxu0 %v7838_v29  ;;  %3249 = vmatpush1.bf16.msra.mxu1 %v7841_v9 }
 0x558   :  { %3209 = vmatprep.subr.bf16.mxu0 %v7844_v6  ;;  %3250 = vmatprep.subr.bf16.mxu1 %v7847_v57 }
 0x559   :  { %3239 = vmatprep.mubr.bf16.mxu0 %v8494_v61  ;;  %3280 = vmatprep.mubr.bf16.mxu1 %v8494_v61 }
 0x55b   :  { %3210 = vmatpush1.bf16.msra.mxu0 %v7852_v26  ;;  %3251 = vmatpush1.bf16.msra.mxu1 %v7855_v52 }
 0x55c   :  { %3211 = vmatprep.subr.bf16.mxu0 %v7858_v28  ;;  %3252 = vmatprep.subr.bf16.mxu1 %v7861_v14 }
 0x55f   :  { %3212 = vmatpush1.bf16.msra.mxu0 %v7864_v21  ;;  %3253 = vmatpush1.bf16.msra.mxu1 %v7867_v20 }
 0x560   :  { %3213 = vmatprep.subr.bf16.mxu0 %v7870_v55  ;;  %3254 = vmatprep.subr.bf16.mxu1 %v7873_v5 }
 0x563   :  { %3214 = vmatpush1.bf16.msra.mxu0 %v7930_v10  ;;  %3255 = vmatpush1.bf16.msra.mxu1 %v7933_v50 }
 0x564   :  { %3215 = vmatprep.subr.bf16.mxu0 %v7936_v35  ;;  %3256 = vmatprep.subr.bf16.mxu1 %v7939_v36 }
 0x567   :  { %3216 = vmatpush1.bf16.msra.mxu0 %v7942_v37  ;;  %3257 = vmatpush1.bf16.msra.mxu1 %v7945_v39 }
 0x568   :  { %3217 = vmatprep.subr.bf16.mxu0 %v7948_v56  ;;  %3258 = vmatprep.subr.bf16.mxu1 %v7951_v41 }
 0x56b   :  { %3218 = vmatpush1.bf16.msra.mxu0 %v7954_v25  ;;  %3259 = vmatpush1.bf16.msra.mxu1 %v7957_v59 }
 0x56c   :  { %3219 = vmatprep.subr.bf16.mxu0 %v7960_v30  ;;  %3260 = vmatprep.subr.bf16.mxu1 %v7963_v45 }
 0x56f   :  { %3220 = vmatpush1.bf16.msra.mxu0 %v7966_v58  ;;  %3261 = vmatpush1.bf16.msra.mxu1 %v7969_v0 }
 0x570   :  { %3221 = vmatprep.subr.bf16.mxu0 %v7972_v62  ;;  %3262 = vmatprep.subr.bf16.mxu1 %v7975_v1 }
 0x573   :  { %3222 = vmatpush1.bf16.msra.mxu0 %v8028_v49  ;;  %3263 = vmatpush1.bf16.msra.mxu1 %v8031_v12 }
 0x574   :  { %3323 = vmatprep.subr.bf16.mxu0 %v7894_v43  ;;  %3364 = vmatprep.subr.bf16.mxu1 %v7897_v44 }
 0x629   :  { %v3125_v4 = vpop.f32.mrb[32].mxu0  ;;  %v3166_v63 = vpop.f32.mrb[32].mxu1 }
 0x62a   :  { %v3173_v27 = vadd.f32 %v3125_v4, %v8511_v31  ;;  %v3175_v13 = vadd.f32 %v3166_v63, %v8512_v51  ;;  %v3127_v47 = vpop.f32.mrb[33].mxu0  ;;  %v3168_v8 = vpop.f32.mrb[33].mxu1 }
 0x62b   :  { %v3174_v19 = vadd.f32 %v3127_v47, %v8514_v54  ;;  %v3176_v32 = vadd.f32 %v3168_v8, %v8517_v53  ;;  %v3129_v48 = vpop.f32.mrb[34].mxu0  ;;  %v3170_v2 = vpop.f32.mrb[34].mxu1 }
 0x62c   :  { %v5743_v42 = vmul.f32 -1.442695, %v3173_v27  ;;  %v3130_v24 = vpop.f32.mrb[35].mxu0  ;;  %v3171_v11 = vpop.f32.mrb[35].mxu1 }
 0x62d   :  { %v5744_v15 = vmul.f32 -1.442695, %v3174_v19  ;;  %v5745_v40 = vmul.f32 -1.442695, %v3176_v32  ;;  %v8519_v11 = vcombine.high %v7741_v16, %v7744_v22 }
 0x62e   :  { %6956 = vpow2.f32 %v5743_v42  ;;  %v8518_v42 = vcombine.high %v7735_v38, %v7738_v17 }
 0x62f   :  { %6958 = vpow2.f32 %v5744_v15 }
 0x630   :  { %6960 = vpow2.f32 %v5745_v40 }
 0x631   :  { %6962 = vtanh.f32 %v3175_v13 }
 0x638   :  { %v6957_v33 = vpop.eup %6956 }
 0x639   :  { %v6959_v18 = vpop.eup %6958  ;;  %v3180_v34 = vadd.f32 1.0, %v6957_v33 }
 0x63a   :  { %v3186_v4 = vadd.f32 1.0, %v6959_v18  ;;  %v6961_v63 = vpop.eup %6960  ;;  %v8520_v18 = vcombine.high %v7747_v3, %v8513_v60 }
 0x63b   :  { %6964 = vrcp.f32 %v3180_v34  ;;  %v6963_v31 = vpop.eup %6962  ;;  %v3193_v27 = vadd.f32 1.0, %v6961_v63 }
 0x63c   :  { %6966 = vrcp.f32 %v3186_v4 }
 0x63d   :  { %6968 = vrcp.f32 %v3193_v27 }
 0x645   :  { %v6965_v51 = vpop.eup %6964 }
 0x646   :  { %v6967_v47 = vpop.eup %6966  ;;  %v3197_v8 = vmul.f32 %v6965_v51, %v6963_v31 }
 0x647   :  { %v3196_v54 = vmul.f32 %v6967_v47, %v8049_v46  ;;  %v6969_v53 = vpop.eup %6968 }
 0x649   :  { %v8099_v19 = vadd.f32 %v3197_v8, %v3196_v54 }
 0x64b   :  { %6970 = vtanh.f32 %v8099_v19 }
 0x655   :  { %v6971_v32 = vpop.eup %6970 }
 0x656   :  { %v3200_v48 = vmul.f32 %v6971_v32, %v6969_v53 }
 0x658   :  { %v3206_v13 = vpack.c.bf16 %v3200_v48, %v3200_v48 }
 0x65a   :  { %3240 = vmatmul.mubr.bf16.vlgmr.msra.gmra.mrb[36].mxu0 %v3206_v13  ;;  %3281 = vmatmul.mubr.bf16.vlgmr.msra.gmra.mrb[36].mxu1 %v3206_v13 }
 0x65b   :  { %3324 = vmatpush1.bf16.msra.mxu0 %v7838_v29  ;;  %3365 = vmatpush1.bf16.msra.mxu1 %v7841_v9 }
 0x65c   :  { %3325 = vmatprep.subr.bf16.mxu0 %v7844_v6  ;;  %3366 = vmatprep.subr.bf16.mxu1 %v7847_v57 }
 0x65d   :  { %3355 = vmatprep.mubr.bf16.mxu0 %v8494_v61  ;;  %3396 = vmatprep.mubr.bf16.mxu1 %v8494_v61 }
 0x65f   :  { %3326 = vmatpush1.bf16.msra.mxu0 %v7852_v26  ;;  %3367 = vmatpush1.bf16.msra.mxu1 %v7855_v52 }
 0x660   :  { %3327 = vmatprep.subr.bf16.mxu0 %v7858_v28  ;;  %3368 = vmatprep.subr.bf16.mxu1 %v7861_v14 }
 0x663   :  { %3328 = vmatpush1.bf16.msra.mxu0 %v7864_v21  ;;  %3369 = vmatpush1.bf16.msra.mxu1 %v7867_v20 }
 0x664   :  { %3329 = vmatprep.subr.bf16.mxu0 %v7870_v55  ;;  %3370 = vmatprep.subr.bf16.mxu1 %v7873_v5 }
 0x667   :  { %3330 = vmatpush1.bf16.msra.mxu0 %v7930_v10  ;;  %3371 = vmatpush1.bf16.msra.mxu1 %v7933_v50 }
 0x668   :  { %3331 = vmatprep.subr.bf16.mxu0 %v7936_v35  ;;  %3372 = vmatprep.subr.bf16.mxu1 %v7939_v36 }
 0x66b   :  { %3332 = vmatpush1.bf16.msra.mxu0 %v7942_v37  ;;  %3373 = vmatpush1.bf16.msra.mxu1 %v7945_v39 }
 0x66c   :  { %3333 = vmatprep.subr.bf16.mxu0 %v7948_v56  ;;  %3374 = vmatprep.subr.bf16.mxu1 %v7951_v41 }
 0x66f   :  { %3334 = vmatpush1.bf16.msra.mxu0 %v7954_v25  ;;  %3375 = vmatpush1.bf16.msra.mxu1 %v7957_v59 }
 0x670   :  { %3335 = vmatprep.subr.bf16.mxu0 %v7960_v30  ;;  %3376 = vmatprep.subr.bf16.mxu1 %v7963_v45 }
 0x673   :  { %3336 = vmatpush1.bf16.msra.mxu0 %v7966_v58  ;;  %3377 = vmatpush1.bf16.msra.mxu1 %v7969_v0 }
 0x674   :  { %3337 = vmatprep.subr.bf16.mxu0 %v7972_v62  ;;  %3378 = vmatprep.subr.bf16.mxu1 %v7975_v1 }
 0x677   :  { %3338 = vmatpush1.bf16.msra.mxu0 %v8028_v49  ;;  %3379 = vmatpush1.bf16.msra.mxu1 %v8031_v12 }
 0x678   :  { %3439 = vmatprep.subr.bf16.mxu0 %v7894_v43  ;;  %3480 = vmatprep.subr.bf16.mxu1 %v7897_v44  ;;  %v8521_v43 = vcombine.high %v8515_v23, %v8516_v7 }
 0x72d   :  { %v3241_v46 = vpop.f32.mrb[36].mxu0  ;;  %v3282_v2 = vpop.f32.mrb[36].mxu1 }
 0x72e   :  { %v3289_v24 = vadd.f32 %v3241_v46, %v8518_v42  ;;  %v3291_v15 = vadd.f32 %v3282_v2, %v8519_v11  ;;  %v3243_v40 = vpop.f32.mrb[37].mxu0  ;;  %v3284_v33 = vpop.f32.mrb[37].mxu1 }
 0x72f   :  { %v3290_v34 = vadd.f32 %v3243_v40, %v8520_v18  ;;  %v3292_v44 = vadd.f32 %v3284_v33, %v8521_v43  ;;  %v3245_v4 = vpop.f32.mrb[38].mxu0  ;;  %v3286_v63 = vpop.f32.mrb[38].mxu1 }
 0x730   :  { %v5746_v31 = vmul.f32 -1.442695, %v3289_v24  ;;  %v3246_v51 = vpop.f32.mrb[39].mxu0  ;;  %v3287_v17 = vpop.f32.mrb[39].mxu1  ;;  %v8200_v24 = vld [vmem:[#allocation3 + $0x30] sm:$0x88] }
 0x731   :  { %v5747_v38 = vmul.f32 -1.442695, %v3290_v34  ;;  %v5748_v16 = vmul.f32 -1.442695, %v3292_v44  ;;  %v8206_v34 = vld [vmem:[#allocation3 + $0x48] sm:$0x88]  ;;  %v5768_v43 = vcombine.high %v8200_v24, %v8200_v24 }
 0x732   :  { %6972 = vpow2.f32 %v5746_v31  ;;  %v8210_v63 = vld [vmem:[#allocation3 + $0x60] sm:$0x88]  ;;  %v5774_v31 = vcombine.high %v8206_v34, %v8206_v34 }
 0x733   :  { %6974 = vpow2.f32 %v5747_v38  ;;  %v3920_v51 = vunpack.c.l.b16 %v5768_v43  ;;  %v6557_v43 = vld [vmem:[#allocation9 + $0x4c] ss:$16 sps:$4 sm:$0xff]  }
 0x734   :  { %6976 = vpow2.f32 %v5748_v16  ;;  %v8214_v16 = vld [vmem:[#allocation3 + $0x78] sm:$0x88] }
 0x735   :  { %6978 = vtanh.f32 %v3291_v15 }
 0x73c   :  { %v6973_v22 = vpop.eup %6972 }
 0x73d   :  { %v6975_v47 = vpop.eup %6974  ;;  %v3296_v8 = vadd.f32 1.0, %v6973_v22  ;;  %v5780_v22 = vcombine.high %v8210_v63, %v8210_v63 }
 0x73e   :  { %v3302_v3 = vadd.f32 1.0, %v6975_v47  ;;  %v6977_v60 = vpop.eup %6976  ;;  %v3926_v47 = vunpack.c.l.b16 %v5774_v31  ;;  %v6560_v31 = vld [vmem:[#allocation9 + $0x64] ss:$16 sps:$4 sm:$0xff]  }
 0x73f   :  { %6980 = vrcp.f32 %v3296_v8  ;;  %v6979_v23 = vpop.eup %6978  ;;  %v3309_v53 = vadd.f32 1.0, %v6977_v60 }
 0x740   :  { %6982 = vrcp.f32 %v3302_v3  ;;  %v3979_v3 = vrot.slane %v3920_v51, 5  ;;  %v6563_v51 = vld [vmem:[#allocation9 + $0x6c] ss:$16 sps:$4 sm:$0xff]  }
 0x741   :  { %6984 = vrcp.f32 %v3309_v53  ;;  %v3932_v53 = vunpack.c.l.b16 %v5780_v22  ;;  %v6566_v22 = vld [vmem:[#allocation9 + $0x84] ss:$16 sps:$4 sm:$0xff]  }
 0x749   :  { %v6981_v7 = vpop.eup %6980 }
 0x74a   :  { %v6983_v27 = vpop.eup %6982  ;;  %v3313_v54 = vmul.f32 %v6981_v7, %v6979_v23  ;;  %v8218_v23 = vld [vmem:[#allocation3 + $0x90] sm:$0x88]  ;;  %v5786_v7 = vcombine.high %v8214_v16, %v8214_v16 }
 0x74b   :  { %v3312_v32 = vmul.f32 %v6983_v27, %v8099_v19  ;;  %v6985_v13 = vpop.eup %6984 }
 0x74d   :  { %v8149_v48 = vadd.f32 %v3313_v54, %v3312_v32 }
 0x74f   :  { %6986 = vtanh.f32 %v8149_v48 }
 0x759   :  { %v6987_v46 = vpop.eup %6986 }
 0x75a   :  { %v3316_v2 = vmul.f32 %v6987_v46, %v6985_v13 }
 0x75c   :  { %v3322_v42 = vpack.c.bf16 %v3316_v2, %v3316_v2  ;;  %v3981_v2 = vrot.slane %v3926_v47, 4  ;;  %v6569_v47 = vld [vmem:[#allocation9 + $0x8c] ss:$16 sps:$4 sm:$0xff]  }
 0x75e   :  { %3356 = vmatmul.mubr.bf16.vlgmr.msra.gmra.mrb[40].mxu0 %v3322_v42  ;;  %3397 = vmatmul.mubr.bf16.vlgmr.msra.gmra.mrb[40].mxu1 %v3322_v42 }
 0x75f   :  { %3440 = vmatpush1.bf16.msra.mxu0 %v7838_v29  ;;  %3481 = vmatpush1.bf16.msra.mxu1 %v7841_v9  ;;  %v6542_v9 = vld [vmem:[#allocation9 + $0x4] ss:$16 sps:$4 sm:$0xff]   ;;  %v6545_v29 = vld [vmem:[#allocation9 + $0xc] ss:$16 sps:$4 sm:$0xff]  }
 0x760   :  { %3441 = vmatprep.subr.bf16.mxu0 %v7844_v6  ;;  %3482 = vmatprep.subr.bf16.mxu1 %v7847_v57 }
 0x761   :  { %3471 = vmatprep.mubr.bf16.mxu0 %v8494_v61  ;;  %3512 = vmatprep.mubr.bf16.mxu1 %v8494_v61  ;;  %v8522_v61 = vld [vmem:[#allocation27_spill] sm:$0xff] }
 0x763   :  { %3442 = vmatpush1.bf16.msra.mxu0 %v7852_v26  ;;  %3483 = vmatpush1.bf16.msra.mxu1 %v7855_v52  ;;  %v8523_v26 = vld [vmem:[#allocation28_spill] sm:$0xff] }
 0x764   :  { %3443 = vmatprep.subr.bf16.mxu0 %v7858_v28  ;;  %3484 = vmatprep.subr.bf16.mxu1 %v7861_v14  ;;  %v8524_v52 = vcombine.low %v8522_v61, %v8523_v26  ;;  %v8525_v14 = vld [vmem:[#allocation29_spill] sm:$0xff] }
 0x767   :  { %3444 = vmatpush1.bf16.msra.mxu0 %v7864_v21  ;;  %3485 = vmatpush1.bf16.msra.mxu1 %v7867_v20  ;;  %v8526_v21 = vld [vmem:[#allocation30_spill] sm:$0xff] }
 0x768   :  { %3445 = vmatprep.subr.bf16.mxu0 %v7870_v55  ;;  %3486 = vmatprep.subr.bf16.mxu1 %v7873_v5  ;;  %v8527_v20 = vcombine.low %v8525_v14, %v8526_v21 }
 0x76b   :  { %3446 = vmatpush1.bf16.msra.mxu0 %v7930_v10  ;;  %3487 = vmatpush1.bf16.msra.mxu1 %v7933_v50  ;;  %v8528_v50 = vld [vmem:[#allocation31_spill] sm:$0xff] }
 0x76c   :  { %3447 = vmatprep.subr.bf16.mxu0 %v7936_v35  ;;  %3488 = vmatprep.subr.bf16.mxu1 %v7939_v36  ;;  %v8529_v35 = vld [vmem:[#allocation32_spill] sm:$0xff] }
 0x76d   :  { %v8530_v36 = vcombine.low %v8528_v50, %v8529_v35 }
 0x76f   :  { %3448 = vmatpush1.bf16.msra.mxu0 %v7942_v37  ;;  %3489 = vmatpush1.bf16.msra.mxu1 %v7945_v39  ;;  %v8531_v39 = vld [vmem:[#allocation33_spill] sm:$0xff] }
 0x770   :  { %3449 = vmatprep.subr.bf16.mxu0 %v7948_v56  ;;  %3490 = vmatprep.subr.bf16.mxu1 %v7951_v41  ;;  %v8532_v56 = vld [vmem:[#allocation34_spill] sm:$0xff] }
 0x771   :  { %v8533_v41 = vcombine.low %v8531_v39, %v8532_v56 }
 0x773   :  { %3450 = vmatpush1.bf16.msra.mxu0 %v7954_v25  ;;  %3491 = vmatpush1.bf16.msra.mxu1 %v7957_v59 }
 0x774   :  { %3451 = vmatprep.subr.bf16.mxu0 %v7960_v30  ;;  %3492 = vmatprep.subr.bf16.mxu1 %v7963_v45 }
 0x777   :  { %3452 = vmatpush1.bf16.msra.mxu0 %v7966_v58  ;;  %3493 = vmatpush1.bf16.msra.mxu1 %v7969_v0 }
 0x778   :  { %3453 = vmatprep.subr.bf16.mxu0 %v7972_v62  ;;  %3494 = vmatprep.subr.bf16.mxu1 %v7975_v1 }
 0x77b   :  { %3454 = vmatpush1.bf16.msra.mxu0 %v8028_v49  ;;  %3495 = vmatpush1.bf16.msra.mxu1 %v8031_v12  ;;  %v8196_v49 = vld [vmem:[#allocation3] sm:$0x88]  ;;  %v8198_v12 = vld [vmem:[#allocation3 + $0x18] sm:$0x88] }
 0x77c   :  { %5018 = vmatprep.subr.bf16.mxu0 %v6542_v9  ;;  %5141 = vmatprep.subr.bf16.mxu1 %v6545_v29  ;;  %v5756_v11 = vcombine.high %v8196_v49, %v8196_v49  ;;  %v5762_v15 = vcombine.high %v8198_v12, %v8198_v12  ;;  %v5792_v9 = vcombine.high %v8218_v23, %v8218_v23 }
 0x77e   :  { %v3908_v44 = vunpack.c.l.b16 %v5756_v11  ;;  %v3914_v4 = vunpack.c.l.b16 %v5762_v15  ;;  %v6551_v11 = vld [vmem:[#allocation9 + $0x2c] ss:$16 sps:$4 sm:$0xff]  }
 0x780   :  { %v3976_v17 = vrot.slane %v3908_v44, 7  ;;  %v3977_v38 = vrot.slane %v3914_v4, 6  ;;  %v6552_v44 = vld [vmem:[#allocation9 + $0x40] ss:$16 sps:$4 sm:$0xff]   ;;  %v6555_v4 = vld [vmem:[#allocation9 + $0x48] ss:$16 sps:$4 sm:$0xff]  }
 0x782   :  { %v3978_v27 = vsel %vm3957_vm0, %v3977_v38, %v3976_v17  ;;  %v6558_v17 = vld [vmem:[#allocation9 + $0x60] ss:$16 sps:$4 sm:$0xff]   ;;  %v6561_v38 = vld [vmem:[#allocation9 + $0x68] ss:$16 sps:$4 sm:$0xff]  }
 0x783   :  { %v3980_v29 = vsel %vm3960_vm1, %v3979_v3, %v3978_v27  ;;  %v6567_v3 = vld [vmem:[#allocation9 + $0x88] ss:$16 sps:$4 sm:$0xff]   ;;  %v6570_v27 = vld [vmem:[#allocation9 + $0xa0] ss:$16 sps:$4 sm:$0xff]  }
 0x831   :  { %v3357_v6 = vpop.f32.mrb[40].mxu0  ;;  %v3398_v57 = vpop.f32.mrb[40].mxu1 }
 0x832   :  { %v3405_v28 = vadd.f32 %v3357_v6, %v8524_v52  ;;  %v3407_v55 = vadd.f32 %v3398_v57, %v8527_v20  ;;  %v3359_v5 = vpop.f32.mrb[41].mxu0  ;;  %v3400_v10 = vpop.f32.mrb[41].mxu1  ;;  %v3938_v6 = vunpack.c.l.b16 %v5786_v7  ;;  %v3983_v52 = vrot.slane %v3932_v53, 3  ;;  %v8231_v20 = vld [vmem:[#allocation3 + $0xa8] sm:$0x88] }
 0x833   :  { %v3406_v37 = vadd.f32 %v3359_v5, %v8530_v36  ;;  %v3408_v25 = vadd.f32 %v3400_v10, %v8533_v41  ;;  %v3361_v59 = vpop.f32.mrb[42].mxu0  ;;  %v3402_v30 = vpop.f32.mrb[42].mxu1  ;;  %v5798_v10 = vcombine.high %v8231_v20, %v8231_v20  ;;  %v6575_v7 = vld [vmem:[#allocation9 + $0xac] ss:$16 sps:$4 sm:$0xff]   ;;  %v6578_v53 = vld [vmem:[#allocation9 + $0xc4] ss:$16 sps:$4 sm:$0xff]  }
 0x834   :  { %v5749_v45 = vmul.f32 -1.442695, %v3405_v28  ;;  %v3362_v58 = vpop.f32.mrb[43].mxu0  ;;  %v3403_v0 = vpop.f32.mrb[43].mxu1  ;;  %v3982_v28 = vsel %vm3963_vm2, %v3981_v2, %v3980_v29  ;;  %v6584_v2 = vld [vmem:[#allocation9 + $0xe4] ss:$16 sps:$4 sm:$0xff]  }
 0x835   :  { %v5750_v62 = vmul.f32 -1.442695, %v3406_v37  ;;  %v5751_v1 = vmul.f32 -1.442695, %v3408_v25  ;;  %v3984_v5 = vsel %vm3966_vm3, %v3983_v52, %v3982_v28  ;;  %v3950_v41 = vunpack.c.l.b16 %v5798_v10  ;;  %v6540_v0 = vld [vmem:[#allocation9] ss:$16 sps:$4 sm:$0xff]  }
 0x836   :  { %6988 = vpow2.f32 %v5749_v45  ;;  %v6585_v29 = vld [vmem:[#allocation9 + $0xe8] ss:$16 sps:$4 sm:$0xff]   ;;  %v6593_v52 = vld [vmem:[#allocation9 + $0x10c] ss:$16 sps:$4 sm:$0xff]   ;;  %v5755_v28 = vcombine.low %v8196_v49, %v8196_v49  ;;  %v6588_v10 = vld [vmem:[#allocation9 + $0x100] ss:$16 sps:$4 sm:$0xff]  }
 0x837   :  { %6990 = vpow2.f32 %v5750_v62  ;;  %v6543_v62 = vld [vmem:[#allocation9 + $0x8] ss:$16 sps:$4 sm:$0xff]  }
 0x838   :  { %6992 = vpow2.f32 %v5751_v1 }
 0x839   :  { %6994 = vtanh.f32 %v3407_v55  ;;  %v3944_v55 = vunpack.c.l.b16 %v5792_v9  ;;  %v6582_v9 = vld [vmem:[#allocation9 + $0xe0] ss:$16 sps:$4 sm:$0xff]  }
 0x83b   :  { %v3987_v36 = vrot.slane %v3944_v55, 1  ;;  %v5761_v55 = vcombine.low %v8198_v12, %v8198_v12 }
 0x840   :  { %v6989_v19 = vpop.eup %6988 }
 0x841   :  { %v6991_v40 = vpop.eup %6990  ;;  %v3412_v33 = vadd.f32 1.0, %v6989_v19  ;;  %v6548_v19 = vld [vmem:[#allocation9 + $0x24] ss:$16 sps:$4 sm:$0xff]  }
 0x842   :  { %v3418_v18 = vadd.f32 1.0, %v6991_v40  ;;  %v6993_v8 = vpop.eup %6992  ;;  %v6546_v40 = vld [vmem:[#allocation9 + $0x20] ss:$16 sps:$4 sm:$0xff]  }
 0x843   :  { %6996 = vrcp.f32 %v3412_v33  ;;  %v6995_v60 = vpop.eup %6994  ;;  %v3425_v46 = vadd.f32 1.0, %v6993_v8  ;;  %v6549_v33 = vld [vmem:[#allocation9 + $0x28] ss:$16 sps:$4 sm:$0xff]   ;;  %v6564_v8 = vld [vmem:[#allocation9 + $0x80] ss:$16 sps:$4 sm:$0xff]  }
 0x844   :  { %6998 = vrcp.f32 %v3418_v18  ;;  %v6554_v18 = vld [vmem:[#allocation9 + $0x44] ss:$16 sps:$4 sm:$0xff]  }
 0x845   :  { %7000 = vrcp.f32 %v3425_v46  ;;  %v6579_v46 = vld [vmem:[#allocation9 + $0xc8] ss:$16 sps:$4 sm:$0xff]  }
 0x84d   :  { %v6997_v54 = vpop.eup %6996 }
 0x84e   :  { %v6999_v32 = vpop.eup %6998  ;;  %v3429_v13 = vmul.f32 %v6997_v54, %v6995_v60  ;;  %v6572_v60 = vld [vmem:[#allocation9 + $0xa4] ss:$16 sps:$4 sm:$0xff]   ;;  %v6573_v54 = vld [vmem:[#allocation9 + $0xa8] ss:$16 sps:$4 sm:$0xff]  }
 0x84f   :  { %v3428_v42 = vmul.f32 %v6999_v32, %v8149_v48  ;;  %v3985_v48 = vrot.slane %v3938_v6, 2  ;;  %v7001_v59 = vpop.eup %7000  ;;  %v6581_v32 = vld [vmem:[#allocation9 + $0xcc] ss:$16 sps:$4 sm:$0xff]   ;;  %v6590_v6 = vld [vmem:[#allocation9 + $0x104] ss:$16 sps:$4 sm:$0xff]  }
 0x851   :  { %v8227_v57 = vadd.f32 %v3429_v13, %v3428_v42  ;;  %v3986_v37 = vsel %vm3969_vm4, %v3985_v48, %v3984_v5  ;;  %v6576_v13 = vld [vmem:[#allocation9 + $0xc0] ss:$16 sps:$4 sm:$0xff]   ;;  %v6587_v42 = vld [vmem:[#allocation9 + $0xec] ss:$16 sps:$4 sm:$0xff]  }
 0x852   :  { %v3988_v25 = vsel %vm3972_vm5, %v3987_v36, %v3986_v37  ;;  %v8243_v48 = vld [vmem:[#allocation3 + $0x8] sm:$0x88]  ;;  %v8245_v5 = vld [vmem:[#allocation3 + $0x20] sm:$0x88] }
 0x853   :  { %7002 = vtanh.f32 %v8227_v57  ;;  %v3989_v58 = vsel %vm3974_vm6, %v3950_v41, %v3988_v25  ;;  %v6591_v36 = vld [vmem:[#allocation9 + $0x108] ss:$16 sps:$4 sm:$0xff]   ;;  %v6596_v37 = vld [vmem:[#allocation9 + $0x124] ss:$16 sps:$4 sm:$0xff]   ;;  %v6599_v41 = vld [vmem:[#allocation9 + $0x12c] ss:$16 sps:$4 sm:$0xff]   ;;  %v5767_v25 = vcombine.low %v8200_v24, %v8200_v24  ;;  %v5758_v49 = vcombine.high %v8243_v48, %v8243_v48 }
 0x854   :  { %v4047_v15 = vpack.c.b16 %v3989_v58, %v3989_v58  ;;  %v5764_v12 = vcombine.high %v8245_v5, %v8245_v5  ;;  %v6594_v58 = vld [vmem:[#allocation9 + $0x120] ss:$16 sps:$4 sm:$0xff]  }
 0x85d   :  { %v7003_v30 = vpop.eup %7002 }
 0x85e   :  { %v3432_v45 = vmul.f32 %v7003_v30, %v7001_v59  ;;  %v8249_v59 = vld [vmem:[#allocation3 + $0x38] sm:$0x88]  ;;  %v3907_v30 = vunpack.c.l.b16 %v5755_v28 }
 0x85f   :  { %v5770_v24 = vcombine.high %v8249_v59, %v8249_v59 }
 0x860   :  { %v3438_v1 = vpack.c.bf16 %v3432_v45, %v3432_v45  ;;  %v3913_v45 = vunpack.c.l.b16 %v5761_v55 }
 0x862   :  { %3472 = vmatmul.mubr.bf16.vlgmr.msra.gmra.mrb[44].mxu0 %v3438_v1  ;;  %3513 = vmatmul.mubr.bf16.vlgmr.msra.gmra.mrb[44].mxu1 %v3438_v1  ;;  %v8257_v1 = vld [vmem:[#allocation3 + $0x50] sm:$0x88] }
 0x863   :  { %5019 = vmatpush1.bf16.msra.mxu0 %v6540_v0  ;;  %5142 = vmatpush1.bf16.msra.mxu1 %v6543_v62  ;;  %v6597_v0 = vld [vmem:[#allocation9 + $0x128] ss:$16 sps:$4 sm:$0xff]   ;;  %v5773_v62 = vcombine.low %v8206_v34, %v8206_v34  ;;  %v5776_v34 = vcombine.high %v8257_v1, %v8257_v1 }
 0x864   :  { %5020 = vmatprep.subr.bf16.mxu0 %v6548_v19  ;;  %5143 = vmatprep.subr.bf16.mxu1 %v6551_v11  ;;  %v6602_v19 = vld [vmem:[#allocation9 + $0x144] ss:$16 sps:$4 sm:$0xff]   ;;  %v6605_v11 = vld [vmem:[#allocation9 + $0x14c] ss:$16 sps:$4 sm:$0xff]  }
 0x865   :  { %5050 = vmatprep.mubr.bf16.mxu0 %v4047_v15  ;;  %5173 = vmatprep.mubr.bf16.mxu1 %v4047_v15  ;;  %v3919_v15 = vunpack.c.l.b16 %v5767_v25  ;;  %v6615_v25 = vld [vmem:[#allocation9 + $0x188] ss:$16 sps:$4 sm:$0xff]  }
 0x867   :  { %5021 = vmatpush1.bf16.msra.mxu0 %v6546_v40  ;;  %5144 = vmatpush1.bf16.msra.mxu1 %v6549_v33  ;;  %v3910_v40 = vunpack.c.l.b16 %v5758_v49  ;;  %v3916_v33 = vunpack.c.l.b16 %v5764_v12 }
 0x868   :  { %5022 = vmatprep.subr.bf16.mxu0 %v6554_v18  ;;  %5145 = vmatprep.subr.bf16.mxu1 %v6557_v43  ;;  %v3955_v18 = vrot.slane %v3907_v30, 7  ;;  %v3956_v43 = vrot.slane %v3913_v45, 6  ;;  %v6620_v45 = vld [vmem:[#allocation9 + $0x1a4] ss:$16 sps:$4 sm:$0xff]  }
 0x86b   :  { %5023 = vmatpush1.bf16.msra.mxu0 %v6552_v44  ;;  %5146 = vmatpush1.bf16.msra.mxu1 %v6555_v4  ;;  %v5779_v44 = vcombine.low %v8210_v63, %v8210_v63  ;;  %v8263_v4 = vld [vmem:[#allocation3 + $0x68] sm:$0x88]  ;;  %v5785_v63 = vcombine.low %v8214_v16, %v8214_v16  ;;  %v6614_v16 = vld [vmem:[#allocation9 + $0x184] ss:$16 sps:$4 sm:$0xff]  }
 0x86c   :  { %5024 = vmatprep.subr.bf16.mxu0 %v6560_v31  ;;  %5147 = vmatprep.subr.bf16.mxu1 %v6563_v51  ;;  %v6600_v31 = vld [vmem:[#allocation9 + $0x140] ss:$16 sps:$4 sm:$0xff]   ;;  %v6603_v51 = vld [vmem:[#allocation9 + $0x148] ss:$16 sps:$4 sm:$0xff]  }
 0x86f   :  { %5025 = vmatpush1.bf16.msra.mxu0 %v6558_v17  ;;  %5148 = vmatpush1.bf16.msra.mxu1 %v6561_v38  ;;  %v6608_v17 = vld [vmem:[#allocation9 + $0x164] ss:$16 sps:$4 sm:$0xff]   ;;  %v3925_v38 = vunpack.c.l.b16 %v5773_v62 }
 0x870   :  { %5026 = vmatprep.subr.bf16.mxu0 %v6566_v22  ;;  %5149 = vmatprep.subr.bf16.mxu1 %v6569_v47  ;;  %v3922_v22 = vunpack.c.l.b16 %v5770_v24  ;;  %v6611_v47 = vld [vmem:[#allocation9 + $0x16c] ss:$16 sps:$4 sm:$0xff]  }
 0x873   :  { %5027 = vmatpush1.bf16.msra.mxu0 %v6564_v8  ;;  %5150 = vmatpush1.bf16.msra.mxu1 %v6567_v3  ;;  %v3959_v8 = vrot.slane %v3919_v15, 5  ;;  %v4004_v3 = vrot.slane %v3910_v40, 7  ;;  %v6618_v40 = vld [vmem:[#allocation9 + $0x1a0] ss:$16 sps:$4 sm:$0xff]  }
 0x874   :  { %5028 = vmatprep.subr.bf16.mxu0 %v6572_v60  ;;  %5151 = vmatprep.subr.bf16.mxu1 %v6575_v7  ;;  %v4005_v60 = vrot.slane %v3916_v33, 6  ;;  %v3958_v7 = vsel %vm3957_vm0, %v3956_v43, %v3955_v18  ;;  %v6621_v33 = vld [vmem:[#allocation9 + $0x1a8] ss:$16 sps:$4 sm:$0xff]   ;;  %v5797_v18 = vcombine.low %v8231_v20, %v8231_v20  ;;  %v8290_v43 = vld [vmem:[#allocation3 + $0xb0] sm:$0x88] }
 0x875   :  { %v6627_v20 = vld [vmem:[#allocation9 + $0x1c8] ss:$16 sps:$4 sm:$0xff]  }
 0x876   :  { %v4006_v55 = vsel %vm3957_vm0, %v4005_v60, %v4004_v3  ;;  %v3949_v3 = vunpack.c.l.b16 %v5797_v18  ;;  %v6682_v18 = vld [vmem:[#allocation9 + $0x2a0] ss:$16 sps:$4 sm:$0xff]  }
 0x877   :  { %5029 = vmatpush1.bf16.msra.mxu0 %v6570_v27  ;;  %5152 = vmatpush1.bf16.msra.mxu1 %v6573_v54  ;;  %v8270_v27 = vld [vmem:[#allocation3 + $0x80] sm:$0x88]  ;;  %v5782_v54 = vcombine.high %v8263_v4, %v8263_v4 }
 0x878   :  { %5030 = vmatprep.subr.bf16.mxu0 %v6578_v53  ;;  %5153 = vmatprep.subr.bf16.mxu1 %v6581_v32  ;;  %v3931_v53 = vunpack.c.l.b16 %v5779_v44  ;;  %v3928_v32 = vunpack.c.l.b16 %v5776_v34  ;;  %v5788_v28 = vcombine.high %v8270_v27, %v8270_v27  ;;  %v6626_v34 = vld [vmem:[#allocation9 + $0x1c4] ss:$16 sps:$4 sm:$0xff]  }
 0x87a   :  { %v3940_v62 = vunpack.c.l.b16 %v5788_v28  ;;  %v6652_v28 = vld [vmem:[#allocation9 + $0x200] ss:$16 sps:$4 sm:$0xff]  }
 0x87b   :  { %5031 = vmatpush1.bf16.msra.mxu0 %v6576_v13  ;;  %5154 = vmatpush1.bf16.msra.mxu1 %v6579_v46  ;;  %v6606_v13 = vld [vmem:[#allocation9 + $0x160] ss:$16 sps:$4 sm:$0xff]   ;;  %v6609_v46 = vld [vmem:[#allocation9 + $0x168] ss:$16 sps:$4 sm:$0xff]  }
 0x87c   :  { %5032 = vmatprep.subr.bf16.mxu0 %v6584_v2  ;;  %5155 = vmatprep.subr.bf16.mxu1 %v6587_v42  ;;  %v5791_v2 = vcombine.low %v8218_v23, %v8218_v23  ;;  %v3962_v42 = vrot.slane %v3925_v38, 4  ;;  %v6612_v23 = vld [vmem:[#allocation9 + $0x180] ss:$16 sps:$4 sm:$0xff]  }
 0x87f   :  { %5033 = vmatpush1.bf16.msra.mxu0 %v6582_v9  ;;  %5156 = vmatpush1.bf16.msra.mxu1 %v6585_v29  ;;  %v4007_v9 = vrot.slane %v3922_v22, 5  ;;  %v6617_v29 = vld [vmem:[#allocation9 + $0x18c] ss:$16 sps:$4 sm:$0xff]  }
 0x880   :  { %5034 = vmatprep.subr.bf16.mxu0 %v6590_v6  ;;  %5157 = vmatprep.subr.bf16.mxu1 %v6593_v52  ;;  %v3961_v6 = vsel %vm3960_vm1, %v3959_v8, %v3958_v7  ;;  %v8277_v52 = vld [vmem:[#allocation3 + $0x98] sm:$0x88]  ;;  %v6624_v8 = vld [vmem:[#allocation9 + $0x1c0] ss:$16 sps:$4 sm:$0xff]  }
 0x881   :  { %v3964_v49 = vsel %vm3963_vm2, %v3962_v42, %v3961_v6  ;;  %v5794_v12 = vcombine.high %v8277_v52, %v8277_v52  ;;  %v4008_v30 = vsel %vm3960_vm1, %v4007_v9, %v4006_v55  ;;  %v6635_v7 = vld [vmem:[#allocation9 + $0x1ec] ss:$16 sps:$4 sm:$0xff]   ;;  %v6654_v9 = vld [vmem:[#allocation9 + $0x204] ss:$16 sps:$4 sm:$0xff]   ;;  %v6655_v55 = vld [vmem:[#allocation9 + $0x208] ss:$16 sps:$4 sm:$0xff]  }
 0x883   :  { %5035 = vmatpush1.bf16.msra.mxu0 %v6588_v10  ;;  %5158 = vmatpush1.bf16.msra.mxu1 %v6591_v36  ;;  %v3937_v10 = vunpack.c.l.b16 %v5785_v63  ;;  %v3934_v36 = vunpack.c.l.b16 %v5782_v54  ;;  %v3946_v44 = vunpack.c.l.b16 %v5794_v12  ;;  %v6632_v63 = vld [vmem:[#allocation9 + $0x1e4] ss:$16 sps:$4 sm:$0xff]   ;;  %v6664_v12 = vld [vmem:[#allocation9 + $0x240] ss:$16 sps:$4 sm:$0xff]  }
 0x884   :  { %5036 = vmatprep.subr.bf16.mxu0 %v6596_v37  ;;  %5159 = vmatprep.subr.bf16.mxu1 %v6599_v41  ;;  %v3965_v37 = vrot.slane %v3931_v53, 3  ;;  %v4009_v41 = vrot.slane %v3928_v32, 4 }
 0x885   :  { %v3968_v24 = vrot.slane %v3937_v10, 2  ;;  %v4015_v60 = vrot.slane %v3946_v44, 1  ;;  %v6660_v10 = vld [vmem:[#allocation9 + $0x224] ss:$16 sps:$4 sm:$0xff]   ;;  %v6685_v44 = vld [vmem:[#allocation9 + $0x2a8] ss:$16 sps:$4 sm:$0xff]  }
 0x886   :  { %v4010_v15 = vsel %vm3963_vm2, %v4009_v41, %v4008_v30  ;;  %v6658_v41 = vld [vmem:[#allocation9 + $0x220] ss:$16 sps:$4 sm:$0xff]   ;;  %v6667_v30 = vld [vmem:[#allocation9 + $0x248] ss:$16 sps:$4 sm:$0xff]  }
 0x887   :  { %5037 = vmatpush1.bf16.msra.mxu0 %v6594_v58  ;;  %5160 = vmatpush1.bf16.msra.mxu1 %v6597_v0  ;;  %v6623_v58 = vld [vmem:[#allocation9 + $0x1ac] ss:$16 sps:$4 sm:$0xff]   ;;  %v3943_v0 = vunpack.c.l.b16 %v5791_v2 }
 0x888   :  { %5038 = vmatprep.subr.bf16.mxu0 %v6602_v19  ;;  %5161 = vmatprep.subr.bf16.mxu1 %v6605_v11  ;;  %v4011_v19 = vrot.slane %v3934_v36, 3  ;;  %v3967_v11 = vsel %vm3966_vm3, %v3965_v37, %v3964_v49  ;;  %v6663_v36 = vld [vmem:[#allocation9 + $0x22c] ss:$16 sps:$4 sm:$0xff]  }
 0x889   :  { %v3970_v38 = vsel %vm3969_vm4, %v3968_v24, %v3967_v11  ;;  %v6669_v49 = vld [vmem:[#allocation9 + $0x24c] ss:$16 sps:$4 sm:$0xff]   ;;  %v6678_v24 = vld [vmem:[#allocation9 + $0x284] ss:$16 sps:$4 sm:$0xff]   ;;  %v6676_v11 = vld [vmem:[#allocation9 + $0x280] ss:$16 sps:$4 sm:$0xff]  }
 0x88a   :  { %v4012_v22 = vsel %vm3966_vm3, %v4011_v19, %v4010_v15  ;;  %v6681_v19 = vld [vmem:[#allocation9 + $0x28c] ss:$16 sps:$4 sm:$0xff]   ;;  %v6679_v15 = vld [vmem:[#allocation9 + $0x288] ss:$16 sps:$4 sm:$0xff]  }
 0x88b   :  { %5039 = vmatpush1.bf16.msra.mxu0 %v6600_v31  ;;  %5162 = vmatpush1.bf16.msra.mxu1 %v6603_v51  ;;  %v6629_v31 = vld [vmem:[#allocation9 + $0x1cc] ss:$16 sps:$4 sm:$0xff]   ;;  %v3971_v51 = vrot.slane %v3943_v0, 1  ;;  %v6670_v0 = vld [vmem:[#allocation9 + $0x260] ss:$16 sps:$4 sm:$0xff]  }
 0x88c   :  { %5040 = vmatprep.subr.bf16.mxu0 %v6608_v17  ;;  %5163 = vmatprep.subr.bf16.mxu1 %v6611_v47  ;;  %v4013_v17 = vrot.slane %v3940_v62, 2  ;;  %v5800_v47 = vcombine.high %v8290_v43, %v8290_v43  ;;  %v6673_v62 = vld [vmem:[#allocation9 + $0x268] ss:$16 sps:$4 sm:$0xff]  }
 0x88d   :  { %v3973_v54 = vsel %vm3972_vm5, %v3971_v51, %v3970_v38  ;;  %v6688_v51 = vld [vmem:[#allocation9 + $0x2c0] ss:$16 sps:$4 sm:$0xff]   ;;  %v6696_v38 = vld [vmem:[#allocation9 + $0x2e4] ss:$16 sps:$4 sm:$0xff]  }
 0x88e   :  { %v4014_v53 = vsel %vm3969_vm4, %v4013_v17, %v4012_v22  ;;  %v3952_v32 = vunpack.c.l.b16 %v5800_v47  ;;  %v3975_v2 = vsel %vm3974_vm6, %v3949_v3, %v3973_v54  ;;  %v6691_v17 = vld [vmem:[#allocation9 + $0x2c8] ss:$16 sps:$4 sm:$0xff]   ;;  %v6699_v22 = vld [vmem:[#allocation9 + $0x2ec] ss:$16 sps:$4 sm:$0xff]   ;;  %v6694_v47 = vld [vmem:[#allocation9 + $0x2e0] ss:$16 sps:$4 sm:$0xff]  }
 0x88f   :  { %5041 = vmatpush1.bf16.msra.mxu0 %v6606_v13  ;;  %5164 = vmatpush1.bf16.msra.mxu1 %v6609_v46  ;;  %v6630_v13 = vld [vmem:[#allocation9 + $0x1e0] ss:$16 sps:$4 sm:$0xff]   ;;  %v6633_v46 = vld [vmem:[#allocation9 + $0x1e8] ss:$16 sps:$4 sm:$0xff]   ;;  %v4016_v42 = vsel %vm3972_vm5, %v4015_v60, %v4014_v53  ;;  %v6705_v3 = vld [vmem:[#allocation9 + $0x30c] ss:$16 sps:$4 sm:$0xff]   ;;  %v5757_v60 = vcombine.low %v8243_v48, %v8243_v48 }
 0x890   :  { %5042 = vmatprep.subr.bf16.mxu0 %v6614_v16  ;;  %5165 = vmatprep.subr.bf16.mxu1 %v6617_v29  ;;  %v6657_v16 = vld [vmem:[#allocation9 + $0x20c] ss:$16 sps:$4 sm:$0xff]   ;;  %v4046_v29 = vpack.c.b16 %v3975_v2, %v3975_v2  ;;  %v4017_v6 = vsel %vm3974_vm6, %v3952_v32, %v4016_v42  ;;  %v6700_v53 = vld [vmem:[#allocation9 + $0x300] ss:$16 sps:$4 sm:$0xff]   ;;  %v6703_v32 = vld [vmem:[#allocation9 + $0x308] ss:$16 sps:$4 sm:$0xff]   ;;  %v5769_v2 = vcombine.low %v8249_v59, %v8249_v59 }
 0x891   :  { %v4049_v37 = vpack.c.b16 %v4017_v6, %v4017_v6  ;;  %v8307_v54 = vld [vmem:[#allocation3 + $0x28] sm:$0x88]  ;;  %v8311_v42 = vld [vmem:[#allocation3 + $0x40] sm:$0x88] }
 0x892   :  { %v6709_v6 = vld [vmem:[#allocation9 + $0x328] ss:$16 sps:$4 sm:$0xff]   ;;  %v5772_v59 = vcombine.high %v8311_v42, %v8311_v42 }
 0x893   :  { %5043 = vmatpush1.bf16.msra.mxu0 %v6612_v23  ;;  %5166 = vmatpush1.bf16.msra.mxu1 %v6615_v25  ;;  %v6661_v23 = vld [vmem:[#allocation9 + $0x228] ss:$16 sps:$4 sm:$0xff]   ;;  %v6666_v25 = vld [vmem:[#allocation9 + $0x244] ss:$16 sps:$4 sm:$0xff]  }
 0x894   :  { %5044 = vmatprep.subr.bf16.mxu0 %v6620_v45  ;;  %5167 = vmatprep.subr.bf16.mxu1 %v6623_v58  ;;  %v6672_v45 = vld [vmem:[#allocation9 + $0x264] ss:$16 sps:$4 sm:$0xff]   ;;  %v6675_v58 = vld [vmem:[#allocation9 + $0x26c] ss:$16 sps:$4 sm:$0xff]  }
 0x897   :  { %5045 = vmatpush1.bf16.msra.mxu0 %v6618_v40  ;;  %5168 = vmatpush1.bf16.msra.mxu1 %v6621_v33  ;;  %v6684_v40 = vld [vmem:[#allocation9 + $0x2a4] ss:$16 sps:$4 sm:$0xff]   ;;  %v6687_v33 = vld [vmem:[#allocation9 + $0x2ac] ss:$16 sps:$4 sm:$0xff]  }
 0x898   :  { %5046 = vmatprep.subr.bf16.mxu0 %v6626_v34  ;;  %5169 = vmatprep.subr.bf16.mxu1 %v6629_v31  ;;  %v6690_v34 = vld [vmem:[#allocation9 + $0x2c4] ss:$16 sps:$4 sm:$0xff]   ;;  %v6693_v31 = vld [vmem:[#allocation9 + $0x2cc] ss:$16 sps:$4 sm:$0xff]  }
 0x89b   :  { %5047 = vmatpush1.bf16.msra.mxu0 %v6624_v8  ;;  %5170 = vmatpush1.bf16.msra.mxu1 %v6627_v20  ;;  %v6697_v8 = vld [vmem:[#allocation9 + $0x2e8] ss:$16 sps:$4 sm:$0xff]   ;;  %v6702_v20 = vld [vmem:[#allocation9 + $0x304] ss:$16 sps:$4 sm:$0xff]  }
 0x89c   :  { %5048 = vmatprep.subr.bf16.mxu0 %v6632_v63  ;;  %5171 = vmatprep.subr.bf16.mxu1 %v6635_v7  ;;  %v5763_v63 = vcombine.low %v8245_v5, %v8245_v5  ;;  %v8305_v7 = vld [vmem:[#allocation3 + $0x10] sm:$0x88]  ;;  %v5766_v5 = vcombine.high %v8307_v54, %v8307_v54 }
 0x89d   :  { %v5760_v48 = vcombine.high %v8305_v7, %v8305_v7 }
 0x89f   :  { %5049 = vmatpush1.bf16.msra.mxu0 %v6630_v13  ;;  %5172 = vmatpush1.bf16.msra.mxu1 %v6633_v46  ;;  %v6708_v13 = vld [vmem:[#allocation9 + $0x324] ss:$16 sps:$4 sm:$0xff]   ;;  %v6711_v46 = vld [vmem:[#allocation9 + $0x32c] ss:$16 sps:$4 sm:$0xff]  }
 0x8a0   :  { %5059 = vmatprep.subr.bf16.mxu0 %v6654_v9  ;;  %5182 = vmatprep.subr.bf16.mxu1 %v6657_v16  ;;  %v3909_v9 = vunpack.c.l.b16 %v5757_v60  ;;  %v3915_v16 = vunpack.c.l.b16 %v5763_v63 }
 0x8a2   :  { %5051 = vmatmul.mubr.bf16.vlgmr.msra.gmra.mrb[48].mxu0 %v4046_v29  ;;  %5174 = vmatmul.mubr.bf16.vlgmr.msra.gmra.mrb[48].mxu1 %v4046_v29  ;;  %v6706_v29 = vld [vmem:[#allocation9 + $0x320] ss:$16 sps:$4 sm:$0xff]  }
 0x8a3   :  { %5060 = vmatpush1.bf16.msra.mxu0 %v6652_v28  ;;  %5183 = vmatpush1.bf16.msra.mxu1 %v6655_v55  ;;  %v5775_v28 = vcombine.low %v8257_v1, %v8257_v1  ;;  %v8319_v55 = vld [vmem:[#allocation3 + $0x58] sm:$0x88] }
 0x8a4   :  { %5061 = vmatprep.subr.bf16.mxu0 %v6660_v10  ;;  %5184 = vmatprep.subr.bf16.mxu1 %v6663_v36  ;;  %v6714_v10 = vld [vmem:[#allocation9 + $0x344] ss:$16 sps:$4 sm:$0xff]   ;;  %v6717_v36 = vld [vmem:[#allocation9 + $0x34c] ss:$16 sps:$4 sm:$0xff]   ;;  %v5778_v1 = vcombine.high %v8319_v55, %v8319_v55 }
 0x8a5   :  { %5091 = vmatprep.mubr.bf16.mxu0 %v4049_v37  ;;  %5214 = vmatprep.mubr.bf16.mxu1 %v4049_v37  ;;  %v3921_v37 = vunpack.c.l.b16 %v5769_v2  ;;  %v6727_v2 = vld [vmem:[#allocation9 + $0x388] ss:$16 sps:$4 sm:$0xff]  }
 0x8a7   :  { %5062 = vmatpush1.bf16.msra.mxu0 %v6658_v41  ;;  %5185 = vmatpush1.bf16.msra.mxu1 %v6661_v23  ;;  %v3912_v41 = vunpack.c.l.b16 %v5760_v48  ;;  %v3918_v23 = vunpack.c.l.b16 %v5766_v5 }
 0x8a8   :  { %5063 = vmatprep.subr.bf16.mxu0 %v6666_v25  ;;  %5186 = vmatprep.subr.bf16.mxu1 %v6669_v49  ;;  %v3990_v25 = vrot.slane %v3909_v9, 7  ;;  %v3991_v49 = vrot.slane %v3915_v16, 6  ;;  %v6732_v16 = vld [vmem:[#allocation9 + $0x3a4] ss:$16 sps:$4 sm:$0xff]  }
 0x8ab   :  { %5064 = vmatpush1.bf16.msra.mxu0 %v6664_v12  ;;  %5187 = vmatpush1.bf16.msra.mxu1 %v6667_v30  ;;  %v5781_v12 = vcombine.low %v8263_v4, %v8263_v4  ;;  %v8325_v30 = vld [vmem:[#allocation3 + $0x70] sm:$0x88]  ;;  %v5787_v4 = vcombine.low %v8270_v27, %v8270_v27 }
 0x8ac   :  { %5065 = vmatprep.subr.bf16.mxu0 %v6672_v45  ;;  %5188 = vmatprep.subr.bf16.mxu1 %v6675_v58  ;;  %v6712_v45 = vld [vmem:[#allocation9 + $0x340] ss:$16 sps:$4 sm:$0xff]   ;;  %v6715_v58 = vld [vmem:[#allocation9 + $0x348] ss:$16 sps:$4 sm:$0xff]   ;;  %v6726_v27 = vld [vmem:[#allocation9 + $0x384] ss:$16 sps:$4 sm:$0xff]  }
 0x8af   :  { %5066 = vmatpush1.bf16.msra.mxu0 %v6670_v0  ;;  %5189 = vmatpush1.bf16.msra.mxu1 %v6673_v62  ;;  %v6720_v0 = vld [vmem:[#allocation9 + $0x364] ss:$16 sps:$4 sm:$0xff]   ;;  %v3927_v62 = vunpack.c.l.b16 %v5775_v28 }
 0x8b0   :  { %5067 = vmatprep.subr.bf16.mxu0 %v6678_v24  ;;  %5190 = vmatprep.subr.bf16.mxu1 %v6681_v19  ;;  %v3924_v24 = vunpack.c.l.b16 %v5772_v59  ;;  %v6723_v19 = vld [vmem:[#allocation9 + $0x36c] ss:$16 sps:$4 sm:$0xff]  }
 0x8b3   :  { %5068 = vmatpush1.bf16.msra.mxu0 %v6676_v11  ;;  %5191 = vmatpush1.bf16.msra.mxu1 %v6679_v15  ;;  %v3993_v11 = vrot.slane %v3921_v37, 5  ;;  %v4032_v15 = vrot.slane %v3912_v41, 7  ;;  %v6730_v41 = vld [vmem:[#allocation9 + $0x3a0] ss:$16 sps:$4 sm:$0xff]  }
 0x8b4   :  { %5069 = vmatprep.subr.bf16.mxu0 %v6684_v40  ;;  %5192 = vmatprep.subr.bf16.mxu1 %v6687_v33  ;;  %v4033_v40 = vrot.slane %v3918_v23, 6  ;;  %v3992_v33 = vsel %vm3957_vm0, %v3991_v49, %v3990_v25  ;;  %v6733_v23 = vld [vmem:[#allocation9 + $0x3a8] ss:$16 sps:$4 sm:$0xff]   ;;  %v5799_v25 = vcombine.low %v8290_v43, %v8290_v43 }
 0x8b5   :  { %v8352_v49 = vld [vmem:[#allocation3 + $0xb8] sm:$0x88] }
 0x8b6   :  { %v4034_v63 = vsel %vm3957_vm0, %v4033_v40, %v4032_v15  ;;  %v6739_v43 = vld [vmem:[#allocation9 + $0x3c8] ss:$16 sps:$4 sm:$0xff]   ;;  %v3951_v15 = vunpack.c.l.b16 %v5799_v25  ;;  %v6794_v25 = vld [vmem:[#allocation9 + $0x4a0] ss:$16 sps:$4 sm:$0xff]  }
 0x8b7   :  { %5070 = vmatpush1.bf16.msra.mxu0 %v6682_v18  ;;  %5193 = vmatpush1.bf16.msra.mxu1 %v6685_v44  ;;  %v8332_v18 = vld [vmem:[#allocation3 + $0x88] sm:$0x88]  ;;  %v5784_v44 = vcombine.high %v8325_v30, %v8325_v30 }
 0x8b8   :  { %5071 = vmatprep.subr.bf16.mxu0 %v6690_v34  ;;  %5194 = vmatprep.subr.bf16.mxu1 %v6693_v31  ;;  %v3933_v34 = vunpack.c.l.b16 %v5781_v12  ;;  %v3930_v31 = vunpack.c.l.b16 %v5778_v1  ;;  %v5790_v60 = vcombine.high %v8332_v18, %v8332_v18  ;;  %v6738_v1 = vld [vmem:[#allocation9 + $0x3c4] ss:$16 sps:$4 sm:$0xff]  }
 0x8ba   :  { %v3942_v28 = vunpack.c.l.b16 %v5790_v60  ;;  %v6764_v60 = vld [vmem:[#allocation9 + $0x400] ss:$16 sps:$4 sm:$0xff]  }
 0x8bb   :  { %5072 = vmatpush1.bf16.msra.mxu0 %v6688_v51  ;;  %5195 = vmatpush1.bf16.msra.mxu1 %v6691_v17  ;;  %v6718_v51 = vld [vmem:[#allocation9 + $0x360] ss:$16 sps:$4 sm:$0xff]   ;;  %v6721_v17 = vld [vmem:[#allocation9 + $0x368] ss:$16 sps:$4 sm:$0xff]  }
 0x8bc   :  { %5073 = vmatprep.subr.bf16.mxu0 %v6696_v38  ;;  %5196 = vmatprep.subr.bf16.mxu1 %v6699_v22  ;;  %v5793_v38 = vcombine.low %v8277_v52, %v8277_v52  ;;  %v3995_v22 = vrot.slane %v3927_v62, 4  ;;  %v6724_v52 = vld [vmem:[#allocation9 + $0x380] ss:$16 sps:$4 sm:$0xff]  }
 0x8bf   :  { %5074 = vmatpush1.bf16.msra.mxu0 %v6694_v47  ;;  %5197 = vmatpush1.bf16.msra.mxu1 %v6697_v8  ;;  %v4035_v47 = vrot.slane %v3924_v24, 5  ;;  %v6729_v8 = vld [vmem:[#allocation9 + $0x38c] ss:$16 sps:$4 sm:$0xff]  }
 0x8c0   :  { %5075 = vmatprep.subr.bf16.mxu0 %v6702_v20  ;;  %5198 = vmatprep.subr.bf16.mxu1 %v6705_v3  ;;  %v3994_v20 = vsel %vm3960_vm1, %v3993_v11, %v3992_v33  ;;  %v8339_v3 = vld [vmem:[#allocation3 + $0xa0] sm:$0x88]  ;;  %v6747_v33 = vld [vmem:[#allocation9 + $0x3ec] ss:$16 sps:$4 sm:$0xff]  }
 0x8c1   :  { %v3996_v48 = vsel %vm3963_vm2, %v3995_v22, %v3994_v20  ;;  %v5796_v5 = vcombine.high %v8339_v3, %v8339_v3  ;;  %v4036_v9 = vsel %vm3960_vm1, %v4035_v47, %v4034_v63  ;;  %v6736_v11 = vld [vmem:[#allocation9 + $0x3c0] ss:$16 sps:$4 sm:$0xff]   ;;  %v6766_v47 = vld [vmem:[#allocation9 + $0x404] ss:$16 sps:$4 sm:$0xff]   ;;  %v6767_v63 = vld [vmem:[#allocation9 + $0x408] ss:$16 sps:$4 sm:$0xff]  }
 0x8c3   :  { %5076 = vmatpush1.bf16.msra.mxu0 %v6700_v53  ;;  %5199 = vmatpush1.bf16.msra.mxu1 %v6703_v32  ;;  %v3939_v53 = vunpack.c.l.b16 %v5787_v4  ;;  %v3936_v32 = vunpack.c.l.b16 %v5784_v44  ;;  %v3948_v12 = vunpack.c.l.b16 %v5796_v5  ;;  %v6744_v4 = vld [vmem:[#allocation9 + $0x3e4] ss:$16 sps:$4 sm:$0xff]   ;;  %v6776_v5 = vld [vmem:[#allocation9 + $0x440] ss:$16 sps:$4 sm:$0xff]  }
 0x8c4   :  { %5077 = vmatprep.subr.bf16.mxu0 %v6708_v13  ;;  %5200 = vmatprep.subr.bf16.mxu1 %v6711_v46  ;;  %v3997_v13 = vrot.slane %v3933_v34, 3  ;;  %v4037_v46 = vrot.slane %v3930_v31, 4 }
 0x8c5   :  { %v3999_v59 = vrot.slane %v3939_v53, 2  ;;  %v4043_v40 = vrot.slane %v3948_v12, 1  ;;  %v6772_v53 = vld [vmem:[#allocation9 + $0x424] ss:$16 sps:$4 sm:$0xff]   ;;  %v6797_v12 = vld [vmem:[#allocation9 + $0x4a8] ss:$16 sps:$4 sm:$0xff]  }
 0x8c6   :  { %v4038_v37 = vsel %vm3963_vm2, %v4037_v46, %v4036_v9  ;;  %v6770_v46 = vld [vmem:[#allocation9 + $0x420] ss:$16 sps:$4 sm:$0xff]   ;;  %v6779_v9 = vld [vmem:[#allocation9 + $0x448] ss:$16 sps:$4 sm:$0xff]  }
 0x8c7   :  { %5078 = vmatpush1.bf16.msra.mxu0 %v6706_v29  ;;  %5201 = vmatpush1.bf16.msra.mxu1 %v6709_v6  ;;  %v6735_v29 = vld [vmem:[#allocation9 + $0x3ac] ss:$16 sps:$4 sm:$0xff]   ;;  %v3945_v6 = vunpack.c.l.b16 %v5793_v38 }
 0x8c8   :  { %5079 = vmatprep.subr.bf16.mxu0 %v6714_v10  ;;  %5202 = vmatprep.subr.bf16.mxu1 %v6717_v36  ;;  %v4039_v10 = vrot.slane %v3936_v32, 3  ;;  %v3998_v36 = vsel %vm3966_vm3, %v3997_v13, %v3996_v48  ;;  %v6775_v32 = vld [vmem:[#allocation9 + $0x42c] ss:$16 sps:$4 sm:$0xff]  }
 0x8c9   :  { %v4000_v62 = vsel %vm3969_vm4, %v3999_v59, %v3998_v36  ;;  %v6781_v48 = vld [vmem:[#allocation9 + $0x44c] ss:$16 sps:$4 sm:$0xff]   ;;  %v6790_v59 = vld [vmem:[#allocation9 + $0x484] ss:$16 sps:$4 sm:$0xff]   ;;  %v6788_v36 = vld [vmem:[#allocation9 + $0x480] ss:$16 sps:$4 sm:$0xff]  }
 0x8ca   :  { %v4040_v24 = vsel %vm3966_vm3, %v4039_v10, %v4038_v37  ;;  %v6793_v10 = vld [vmem:[#allocation9 + $0x48c] ss:$16 sps:$4 sm:$0xff]   ;;  %v6791_v37 = vld [vmem:[#allocation9 + $0x488] ss:$16 sps:$4 sm:$0xff]  }
 0x8cb   :  { %5080 = vmatpush1.bf16.msra.mxu0 %v6712_v45  ;;  %5203 = vmatpush1.bf16.msra.mxu1 %v6715_v58  ;;  %v6741_v45 = vld [vmem:[#allocation9 + $0x3cc] ss:$16 sps:$4 sm:$0xff]   ;;  %v4001_v58 = vrot.slane %v3945_v6, 1  ;;  %v6782_v6 = vld [vmem:[#allocation9 + $0x460] ss:$16 sps:$4 sm:$0xff]  }
 0x8cc   :  { %5081 = vmatprep.subr.bf16.mxu0 %v6720_v0  ;;  %5204 = vmatprep.subr.bf16.mxu1 %v6723_v19  ;;  %v4041_v0 = vrot.slane %v3942_v28, 2  ;;  %v5802_v19 = vcombine.high %v8352_v49, %v8352_v49  ;;  %v6785_v28 = vld [vmem:[#allocation9 + $0x468] ss:$16 sps:$4 sm:$0xff]  }
 0x8cd   :  { %v4002_v44 = vsel %vm3972_vm5, %v4001_v58, %v4000_v62  ;;  %v6800_v58 = vld [vmem:[#allocation9 + $0x4c0] ss:$16 sps:$4 sm:$0xff]   ;;  %v6808_v62 = vld [vmem:[#allocation9 + $0x4e4] ss:$16 sps:$4 sm:$0xff]  }
 0x8ce   :  { %v4042_v34 = vsel %vm3969_vm4, %v4041_v0, %v4040_v24  ;;  %v3954_v31 = vunpack.c.l.b16 %v5802_v19  ;;  %v4003_v38 = vsel %vm3974_vm6, %v3951_v15, %v4002_v44  ;;  %v6803_v0 = vld [vmem:[#allocation9 + $0x4c8] ss:$16 sps:$4 sm:$0xff]   ;;  %v6811_v24 = vld [vmem:[#allocation9 + $0x4ec] ss:$16 sps:$4 sm:$0xff]   ;;  %v6806_v19 = vld [vmem:[#allocation9 + $0x4e0] ss:$16 sps:$4 sm:$0xff]  }
 0x8cf   :  { %5082 = vmatpush1.bf16.msra.mxu0 %v6718_v51  ;;  %5205 = vmatpush1.bf16.msra.mxu1 %v6721_v17  ;;  %v6742_v51 = vld [vmem:[#allocation9 + $0x3e0] ss:$16 sps:$4 sm:$0xff]   ;;  %v6745_v17 = vld [vmem:[#allocation9 + $0x3e8] ss:$16 sps:$4 sm:$0xff]   ;;  %v4044_v22 = vsel %vm3972_vm5, %v4043_v40, %v4042_v34  ;;  %v6817_v15 = vld [vmem:[#allocation9 + $0x50c] ss:$16 sps:$4 sm:$0xff]   ;;  %v5759_v40 = vcombine.low %v8305_v7, %v8305_v7 }
 0x8d0   :  { %5083 = vmatprep.subr.bf16.mxu0 %v6726_v27  ;;  %5206 = vmatprep.subr.bf16.mxu1 %v6729_v8  ;;  %v6769_v27 = vld [vmem:[#allocation9 + $0x40c] ss:$16 sps:$4 sm:$0xff]   ;;  %v4048_v8 = vpack.c.b16 %v4003_v38, %v4003_v38  ;;  %v4045_v20 = vsel %vm3974_vm6, %v3954_v31, %v4044_v22  ;;  %v6815_v44 = vld [vmem:[#allocation9 + $0x508] ss:$16 sps:$4 sm:$0xff]   ;;  %v6820_v34 = vld [vmem:[#allocation9 + $0x524] ss:$16 sps:$4 sm:$0xff]  }
 0x8d1   :  { %v4051_v13 = vpack.c.b16 %v4045_v20, %v4045_v20  ;;  %v6823_v31 = vld [vmem:[#allocation9 + $0x52c] ss:$16 sps:$4 sm:$0xff]   ;;  %v6818_v22 = vld [vmem:[#allocation9 + $0x520] ss:$16 sps:$4 sm:$0xff]   ;;  %v6821_v7 = vld [vmem:[#allocation9 + $0x528] ss:$16 sps:$4 sm:$0xff]  }
 0x8d3   :  { %5084 = vmatpush1.bf16.msra.mxu0 %v6724_v52  ;;  %5207 = vmatpush1.bf16.msra.mxu1 %v6727_v2  ;;  %v6773_v52 = vld [vmem:[#allocation9 + $0x428] ss:$16 sps:$4 sm:$0xff]   ;;  %v6778_v2 = vld [vmem:[#allocation9 + $0x444] ss:$16 sps:$4 sm:$0xff]  }
 0x8d4   :  { %5085 = vmatprep.subr.bf16.mxu0 %v6732_v16  ;;  %5208 = vmatprep.subr.bf16.mxu1 %v6735_v29  ;;  %v6784_v16 = vld [vmem:[#allocation9 + $0x464] ss:$16 sps:$4 sm:$0xff]   ;;  %v6787_v29 = vld [vmem:[#allocation9 + $0x46c] ss:$16 sps:$4 sm:$0xff]  }
 0x8d7   :  { %5086 = vmatpush1.bf16.msra.mxu0 %v6730_v41  ;;  %5209 = vmatpush1.bf16.msra.mxu1 %v6733_v23  ;;  %v6796_v41 = vld [vmem:[#allocation9 + $0x4a4] ss:$16 sps:$4 sm:$0xff]   ;;  %v6799_v23 = vld [vmem:[#allocation9 + $0x4ac] ss:$16 sps:$4 sm:$0xff]  }
 0x8d8   :  { %5087 = vmatprep.subr.bf16.mxu0 %v6738_v1  ;;  %5210 = vmatprep.subr.bf16.mxu1 %v6741_v45  ;;  %v6802_v1 = vld [vmem:[#allocation9 + $0x4c4] ss:$16 sps:$4 sm:$0xff]   ;;  %v6805_v45 = vld [vmem:[#allocation9 + $0x4cc] ss:$16 sps:$4 sm:$0xff]  }
 0x8db   :  { %5088 = vmatpush1.bf16.msra.mxu0 %v6736_v11  ;;  %5211 = vmatpush1.bf16.msra.mxu1 %v6739_v43  ;;  %v6809_v11 = vld [vmem:[#allocation9 + $0x4e8] ss:$16 sps:$4 sm:$0xff]   ;;  %v6814_v43 = vld [vmem:[#allocation9 + $0x504] ss:$16 sps:$4 sm:$0xff]  }
 0x8dc   :  { %5089 = vmatprep.subr.bf16.mxu0 %v6744_v4  ;;  %5212 = vmatprep.subr.bf16.mxu1 %v6747_v33  ;;  %v5765_v4 = vcombine.low %v8307_v54, %v8307_v54  ;;  %v6812_v33 = vld [vmem:[#allocation9 + $0x500] ss:$16 sps:$4 sm:$0xff]   ;;  %v5777_v54 = vcombine.low %v8319_v55, %v8319_v55 }
 0x8de   :  { %v3917_v38 = vunpack.c.l.b16 %v5765_v4  ;;  %v6859_v4 = vld [vmem:[#allocation9 + $0x5ec] ss:$16 sps:$4 sm:$0xff]  }
 0x8df   :  { %5090 = vmatpush1.bf16.msra.mxu0 %v6742_v51  ;;  %5213 = vmatpush1.bf16.msra.mxu1 %v6745_v17  ;;  %v5771_v51 = vcombine.low %v8311_v42, %v8311_v42  ;;  %v3911_v17 = vunpack.c.l.b16 %v5759_v40  ;;  %v6824_v42 = vld [vmem:[#allocation9 + $0x540] ss:$16 sps:$4 sm:$0xff]   ;;  %v6856_v40 = vld [vmem:[#allocation9 + $0x5e4] ss:$16 sps:$4 sm:$0xff]  }
 0x8e0   :  { %5100 = vmatprep.subr.bf16.mxu0 %v6766_v47  ;;  %5223 = vmatprep.subr.bf16.mxu1 %v6769_v27  ;;  %v6826_v47 = vld [vmem:[#allocation9 + $0x544] ss:$16 sps:$4 sm:$0xff]   ;;  %v6829_v27 = vld [vmem:[#allocation9 + $0x54c] ss:$16 sps:$4 sm:$0xff]  }
 0x8e1   :  { %v4018_v20 = vrot.slane %v3911_v17, 7 }
 0x8e2   :  { %5092 = vmatmul.mubr.bf16.vlgmr.msra.gmra.mrb[48].mxu0 %v4048_v8  ;;  %5215 = vmatmul.mubr.bf16.vlgmr.msra.gmra.mrb[48].mxu1 %v4048_v8  ;;  %v3923_v8 = vunpack.c.l.b16 %v5771_v51 }
 0x8e3   :  { %5101 = vmatpush1.bf16.msra.mxu0 %v6764_v60  ;;  %5224 = vmatpush1.bf16.msra.mxu1 %v6767_v63  ;;  %v4019_v60 = vrot.slane %v3917_v38, 6  ;;  %v5783_v63 = vcombine.low %v8325_v30, %v8325_v30  ;;  %v6833_v30 = vld [vmem:[#allocation9 + $0x568] ss:$16 sps:$4 sm:$0xff]   ;;  %v8534_v38 = vcombine.high %v8522_v61, %v8523_v26 }
 0x8e4   :  { %5102 = vmatprep.subr.bf16.mxu0 %v6772_v53  ;;  %5225 = vmatprep.subr.bf16.mxu1 %v6775_v32  ;;  %v6827_v53 = vld [vmem:[#allocation9 + $0x548] ss:$16 sps:$4 sm:$0xff]   ;;  %v3929_v32 = vunpack.c.l.b16 %v5777_v54  ;;  %v4021_v55 = vrot.slane %v3923_v8, 5  ;;  %v8536_v8 = vcombine.high %v8528_v50, %v8529_v35 }
 0x8e5   :  { %5132 = vmatprep.mubr.bf16.mxu0 %v4051_v13  ;;  %5255 = vmatprep.mubr.bf16.mxu1 %v4051_v13  ;;  %v6832_v13 = vld [vmem:[#allocation9 + $0x564] ss:$16 sps:$4 sm:$0xff]  }
 0x8e7   :  { %5103 = vmatpush1.bf16.msra.mxu0 %v6770_v46  ;;  %5226 = vmatpush1.bf16.msra.mxu1 %v6773_v52  ;;  %v6835_v46 = vld [vmem:[#allocation9 + $0x56c] ss:$16 sps:$4 sm:$0xff]   ;;  %v5789_v52 = vcombine.low %v8332_v18, %v8332_v18  ;;  %v6836_v18 = vld [vmem:[#allocation9 + $0x580] ss:$16 sps:$4 sm:$0xff]  }
 0x8e8   :  { %5104 = vmatprep.subr.bf16.mxu0 %v6778_v2  ;;  %5227 = vmatprep.subr.bf16.mxu1 %v6781_v48  ;;  %v4020_v2 = vsel %vm3957_vm0, %v4019_v60, %v4018_v20  ;;  %v3935_v48 = vunpack.c.l.b16 %v5783_v63  ;;  %v8537_v60 = vcombine.high %v8531_v39, %v8532_v56 }
 0x8eb   :  { %5105 = vmatpush1.bf16.msra.mxu0 %v6776_v5  ;;  %5228 = vmatpush1.bf16.msra.mxu1 %v6779_v9  ;;  %v6830_v5 = vld [vmem:[#allocation9 + $0x560] ss:$16 sps:$4 sm:$0xff]   ;;  %v4023_v9 = vrot.slane %v3929_v32, 4 }
 0x8ec   :  { %5106 = vmatprep.subr.bf16.mxu0 %v6784_v16  ;;  %5229 = vmatprep.subr.bf16.mxu1 %v6787_v29  ;;  %v6838_v16 = vld [vmem:[#allocation9 + $0x584] ss:$16 sps:$4 sm:$0xff]   ;;  %v6841_v29 = vld [vmem:[#allocation9 + $0x58c] ss:$16 sps:$4 sm:$0xff]  }
 0x8ef   :  { %5107 = vmatpush1.bf16.msra.mxu0 %v6782_v6  ;;  %5230 = vmatpush1.bf16.msra.mxu1 %v6785_v28  ;;  %v5795_v6 = vcombine.low %v8339_v3, %v8339_v3  ;;  %v4022_v28 = vsel %vm3960_vm1, %v4021_v55, %v4020_v2  ;;  %v6842_v3 = vld [vmem:[#allocation9 + $0x5a0] ss:$16 sps:$4 sm:$0xff]  }
 0x8f0   :  { %5108 = vmatprep.subr.bf16.mxu0 %v6790_v59  ;;  %5231 = vmatprep.subr.bf16.mxu1 %v6793_v10  ;;  %v3941_v59 = vunpack.c.l.b16 %v5789_v52  ;;  %v4025_v10 = vrot.slane %v3935_v48, 3 }
 0x8f3   :  { %5109 = vmatpush1.bf16.msra.mxu0 %v6788_v36  ;;  %5232 = vmatpush1.bf16.msra.mxu1 %v6791_v37  ;;  %v6839_v36 = vld [vmem:[#allocation9 + $0x588] ss:$16 sps:$4 sm:$0xff]   ;;  %v4024_v37 = vsel %vm3963_vm2, %v4023_v9, %v4022_v28  ;;  %v6877_v28 = vld [vmem:[#allocation11] sm:$0xff]  }
 0x8f4   :  { %5110 = vmatprep.subr.bf16.mxu0 %v6796_v41  ;;  %5233 = vmatprep.subr.bf16.mxu1 %v6799_v23  ;;  %v6844_v41 = vld [vmem:[#allocation9 + $0x5a4] ss:$16 sps:$4 sm:$0xff]   ;;  %v6847_v23 = vld [vmem:[#allocation9 + $0x5ac] ss:$16 sps:$4 sm:$0xff]  }
 0x8f7   :  { %5111 = vmatpush1.bf16.msra.mxu0 %v6794_v25  ;;  %5234 = vmatpush1.bf16.msra.mxu1 %v6797_v12  ;;  %v3947_v25 = vunpack.c.l.b16 %v5795_v6  ;;  %v4027_v12 = vrot.slane %v3941_v59, 2  ;;  %v6876_v6 = vld [vmem:[#allocation11 + $0x40] sm:$0xff]   ;;  %v6878_v59 = vld [vmem:[#allocation11 + $0x48] sm:$0xff]  }
 0x8f8   :  { %5112 = vmatprep.subr.bf16.mxu0 %v6802_v1  ;;  %5235 = vmatprep.subr.bf16.mxu1 %v6805_v45  ;;  %v4026_v1 = vsel %vm3966_vm3, %v4025_v10, %v4024_v37  ;;  %v6845_v45 = vld [vmem:[#allocation9 + $0x5a8] ss:$16 sps:$4 sm:$0xff]  }
 0x8f9   :  { %v6879_v10 = vld [vmem:[#allocation11 + $0x8] sm:$0xff]   ;;  %v6882_v37 = vld [vmem:[#allocation11 + $0x58] sm:$0xff]  }
 0x8fb   :  { %5113 = vmatpush1.bf16.msra.mxu0 %v6800_v58  ;;  %5236 = vmatpush1.bf16.msra.mxu1 %v6803_v0  ;;  %v5801_v58 = vcombine.low %v8352_v49, %v8352_v49  ;;  %v6850_v0 = vld [vmem:[#allocation9 + $0x5c4] ss:$16 sps:$4 sm:$0xff]   ;;  %v6854_v49 = vld [vmem:[#allocation9 + $0x5e0] ss:$16 sps:$4 sm:$0xff]  }
 0x8fc   :  { %5114 = vmatprep.subr.bf16.mxu0 %v6808_v62  ;;  %5237 = vmatprep.subr.bf16.mxu1 %v6811_v24  ;;  %v6853_v62 = vld [vmem:[#allocation9 + $0x5cc] ss:$16 sps:$4 sm:$0xff]   ;;  %v4029_v24 = vrot.slane %v3947_v25, 1 }
 0x8fd   :  { %v6886_v25 = vld [vmem:[#allocation11 + $0x68] sm:$0xff]  }
 0x8ff   :  { %5115 = vmatpush1.bf16.msra.mxu0 %v6806_v19  ;;  %5238 = vmatpush1.bf16.msra.mxu1 %v6809_v11  ;;  %v4028_v19 = vsel %vm3969_vm4, %v4027_v12, %v4026_v1  ;;  %v6848_v11 = vld [vmem:[#allocation9 + $0x5c0] ss:$16 sps:$4 sm:$0xff]   ;;  %v6887_v12 = vld [vmem:[#allocation11 + $0x28] sm:$0xff]  }
 0x900   :  { %5116 = vmatprep.subr.bf16.mxu0 %v6814_v43  ;;  %5239 = vmatprep.subr.bf16.mxu1 %v6817_v15  ;;  %v6851_v43 = vld [vmem:[#allocation9 + $0x5c8] ss:$16 sps:$4 sm:$0xff]   ;;  %v3953_v15 = vunpack.c.l.b16 %v5801_v58  ;;  %v6888_v1 = vld [vmem:[#allocation11 + $0x70] sm:$0xff]  }
 0x901   :  { %v6891_v58 = vld [vmem:[#allocation11 + $0x38] sm:$0xff]  }
 0x903   :  { %5117 = vmatpush1.bf16.msra.mxu0 %v6812_v33  ;;  %5240 = vmatpush1.bf16.msra.mxu1 %v6815_v44  ;;  %v4030_v33 = vsel %vm3972_vm5, %v4029_v24, %v4028_v19  ;;  %v6857_v44 = vld [vmem:[#allocation9 + $0x5e8] ss:$16 sps:$4 sm:$0xff]  }
 0x904   :  { %5118 = vmatprep.subr.bf16.mxu0 %v6820_v34  ;;  %5241 = vmatprep.subr.bf16.mxu1 %v6823_v31  ;;  %v4031_v34 = vsel %vm3974_vm6, %v3953_v15, %v4030_v33 }
 0x905   :  { %v4050_v31 = vpack.c.b16 %v4031_v34, %v4031_v34 }
 0x907   :  { %5119 = vmatpush1.bf16.msra.mxu0 %v6818_v22  ;;  %5242 = vmatpush1.bf16.msra.mxu1 %v6821_v7  ;;  %v8535_v7 = vcombine.high %v8525_v14, %v8526_v21 }
 0x908   :  { %5120 = vmatprep.subr.bf16.mxu0 %v6826_v47  ;;  %5243 = vmatprep.subr.bf16.mxu1 %v6829_v27 }
 0x90b   :  { %5121 = vmatpush1.bf16.msra.mxu0 %v6824_v42  ;;  %5244 = vmatpush1.bf16.msra.mxu1 %v6827_v53 }
 0x90c   :  { %5122 = vmatprep.subr.bf16.mxu0 %v6832_v13  ;;  %5245 = vmatprep.subr.bf16.mxu1 %v6835_v46 }
 0x90f   :  { %5123 = vmatpush1.bf16.msra.mxu0 %v6830_v5  ;;  %5246 = vmatpush1.bf16.msra.mxu1 %v6833_v30 }
 0x910   :  { %5124 = vmatprep.subr.bf16.mxu0 %v6838_v16  ;;  %5247 = vmatprep.subr.bf16.mxu1 %v6841_v29 }
 0x913   :  { %5125 = vmatpush1.bf16.msra.mxu0 %v6836_v18  ;;  %5248 = vmatpush1.bf16.msra.mxu1 %v6839_v36  ;;  %v6880_v18 = vld [vmem:[#allocation11 + $0x50] sm:$0xff]  }
 0x914   :  { %5126 = vmatprep.subr.bf16.mxu0 %v6844_v41  ;;  %5249 = vmatprep.subr.bf16.mxu1 %v6847_v23  ;;  %v6881_v36 = vld [vmem:[#allocation11 + $0x10] sm:$0xff]   ;;  %v6884_v41 = vld [vmem:[#allocation11 + $0x60] sm:$0xff]  }
 0x915   :  { %v6885_v23 = vld [vmem:[#allocation11 + $0x20] sm:$0xff]  }
 0x917   :  { %5127 = vmatpush1.bf16.msra.mxu0 %v6842_v3  ;;  %5250 = vmatpush1.bf16.msra.mxu1 %v6845_v45  ;;  %v6889_v3 = vld [vmem:[#allocation11 + $0x30] sm:$0xff]   ;;  %v6890_v45 = vld [vmem:[#allocation11 + $0x78] sm:$0xff]  }
 0x918   :  { %5128 = vmatprep.subr.bf16.mxu0 %v6850_v0  ;;  %5251 = vmatprep.subr.bf16.mxu1 %v6853_v62  ;;  %v3765_v0 = vld [vmem:[%s8434_s5] sm:$0xf]  ;;  %v8538_v62 = vld [vmem:[#allocation23_spill] sm:$0xff] }
 0x919   :  { %v8539_v24 = vsub.s32 0, %v8538_v62 }
 0x91b   :  { %5129 = vmatpush1.bf16.msra.mxu0 %v6848_v11  ;;  %5252 = vmatpush1.bf16.msra.mxu1 %v6851_v43  ;;  %v3770_v19 = vrot.slane %v3765_v0, %v8539_v24  ;;  %v8540_v11 = vsub.s32 1, %v8538_v62 }
 0x91c   :  { %5130 = vmatprep.subr.bf16.mxu0 %v6856_v40  ;;  %5253 = vmatprep.subr.bf16.mxu1 %v6859_v4 }
 0x91d   :  { %v3774_v43 = vrot.slane %v3765_v0, %v8540_v11 }
 0x91f   :  { %5131 = vmatpush1.bf16.msra.mxu0 %v6854_v49  ;;  %5254 = vmatpush1.bf16.msra.mxu1 %v6857_v44 }
 0x920   :  { %6015 = vmatprep.subr.bf16.mxu0 %v6876_v6 }
 0x922   :  { %5133 = vmatmul.mubr.bf16.vlgmr.msra.gmra.mrb[48].mxu0 %v4050_v31  ;;  %5256 = vmatmul.mubr.bf16.vlgmr.msra.gmra.mrb[48].mxu1 %v4050_v31 }
 0x923   :  { %6016 = vmatpush3.bf16.msra.mxu0 %v6877_v28 }
 0x924   :  { %6017 = vmatprep.subr.bf16.mxu0 %v6878_v59 }
 0x927   :  { %6018 = vmatpush3.bf16.msra.mxu0 %v6879_v10 }
 0x928   :  { %6019 = vmatprep.subr.bf16.mxu0 %v6880_v18 }
 0x92b   :  { %6020 = vmatpush3.bf16.msra.mxu0 %v6881_v36 }
 0x92c   :  { %6021 = vmatprep.subr.bf16.mxu0 %v6882_v37 }
 0x935   :  { %v3473_v51 = vpop.f32.mrb[44].mxu0  ;;  %v3514_v17 = vpop.f32.mrb[44].mxu1 }
 0x936   :  { %v3521_v22 = vadd.f32 %v3473_v51, %v8534_v38  ;;  %v3523_v54 = vadd.f32 %v3514_v17, %v8535_v7  ;;  %v3475_v47 = vpop.f32.mrb[45].mxu0  ;;  %v3516_v27 = vpop.f32.mrb[45].mxu1  ;;  %v8541_v7 = vsub.s32 3, %v8538_v62 }
 0x937   :  { %v3522_v20 = vadd.f32 %v3475_v47, %v8536_v8  ;;  %v3524_v63 = vadd.f32 %v3516_v27, %v8537_v60  ;;  %v3477_v42 = vpop.f32.mrb[46].mxu0  ;;  %v3518_v53 = vpop.f32.mrb[46].mxu1  ;;  %v8542_v27 = vsub.s32 2, %v8538_v62 }
 0x938   :  { %v5752_v32 = vmul.f32 -1.442695, %v3521_v22  ;;  %v3478_v13 = vpop.f32.mrb[47].mxu0  ;;  %v3519_v61 = vpop.f32.mrb[47].mxu1 }
 0x939   :  { %v5753_v26 = vmul.f32 -1.442695, %v3522_v20  ;;  %v5754_v14 = vmul.f32 -1.442695, %v3524_v63  ;;  %v3778_v8 = vrot.slane %v3765_v0, %v8542_v27 }
 0x93a   :  { %7004 = vpow2.f32 %v5752_v32 }
 0x93b   :  { %7006 = vpow2.f32 %v5753_v26 }
 0x93c   :  { %7008 = vpow2.f32 %v5754_v14 }
 0x93d   :  { %7010 = vtanh.f32 %v3523_v54  ;;  %v3782_v54 = vrot.slane %v3765_v0, %v8541_v7 }
 0x944   :  { %v7005_v21 = vpop.eup %7004 }
 0x945   :  { %v7007_v46 = vpop.eup %7006  ;;  %v3528_v55 = vadd.f32 1.0, %v7005_v21 }
 0x946   :  { %v3534_v50 = vadd.f32 1.0, %v7007_v46  ;;  %v7009_v35 = vpop.eup %7008 }
 0x947   :  { %7012 = vrcp.f32 %v3528_v55  ;;  %v7011_v39 = vpop.eup %7010  ;;  %v3541_v48 = vadd.f32 1.0, %v7009_v35 }
 0x948   :  { %7014 = vrcp.f32 %v3534_v50 }
 0x949   :  { %7016 = vrcp.f32 %v3541_v48 }
 0x951   :  { %v7013_v56 = vpop.eup %7012 }
 0x952   :  { %v7015_v52 = vpop.eup %7014  ;;  %v3545_v2 = vmul.f32 %v7013_v56, %v7011_v39 }
 0x953   :  { %v3544_v5 = vmul.f32 %v7015_v52, %v8227_v57  ;;  %v7017_v9 = vpop.eup %7016  ;;  %v6883_v57 = vld [vmem:[#allocation11 + $0x18] sm:$0xff]  }
 0x954   :  { %6022 = vmatpush3.bf16.msra.mxu0 %v6883_v57 }
 0x955   :  { %v3546_v30 = vadd.f32 %v3545_v2, %v3544_v5  ;;  %6023 = vmatprep.subr.bf16.mxu0 %v6884_v41  ;;  %v5998_v5 = vld [vmem:[%s8436_s7] ss:$0 sm:$0xff] }
 0x957   :  { %7018 = vtanh.f32 %v3546_v30 }
 0x958   :  { %6024 = vmatpush3.bf16.msra.mxu0 %v6885_v23 }
 0x959   :  { %6025 = vmatprep.subr.bf16.mxu0 %v6886_v25 }
 0x95c   :  { %6026 = vmatpush3.bf16.msra.mxu0 %v6887_v12 }
 0x95d   :  { %6027 = vmatprep.subr.bf16.mxu0 %v6888_v1 }
 0x960   :  { %6028 = vmatpush3.bf16.msra.mxu0 %v6889_v3 }
 0x961   :  { %v7019_v16 = vpop.eup %7018  ;;  %6029 = vmatprep.subr.bf16.mxu0 %v6890_v45 }
 0x962   :  { %v8399_v29 = vmul.f32 %v7019_v16, %v7017_v9 }
 0x964   :  { %6030 = vmatpush3.bf16.msra.mxu0 %v6891_v58  ;;  %v5288_v2 = vpack.c.bf16 %v8399_v29, %v8399_v29 }
 0x9f5   :  { %v5134_v15 = vpop.f32.mrb[48].mxu0  ;;  %v5257_v40 = vpop.f32.mrb[48].mxu1 }
 0x9f6   :  { %v6069_v4 = vadd.f32 %v5134_v15, %v3770_v19  ;;  %v5136_v33 = vpop.f32.mrb[49].mxu0  ;;  %v5259_v49 = vpop.f32.mrb[49].mxu1  ;;  %v6071_v60 = vadd.f32 %v5257_v40, %v3778_v8 }
 0x9f7   :  { %v6070_v44 = vadd.f32 %v5136_v33, %v3774_v43  ;;  %v5138_v34 = vpop.f32.mrb[50].mxu0  ;;  %v5261_v31 = vpop.f32.mrb[50].mxu1  ;;  %v6072_v47 = vadd.f32 %v5259_v49, %v3782_v54 }
 0x9f8   :  { %v5995_v51 = vmul.f32 -1.442695, %v6069_v4  ;;  %v5139_v17 = vpop.f32.mrb[51].mxu0  ;;  %v5262_v38 = vpop.f32.mrb[51].mxu1 }
 0x9f9   :  { %v5996_v22 = vmul.f32 -1.442695, %v6070_v44  ;;  %v5997_v20 = vmul.f32 -1.442695, %v6072_v47 }
 0x9fa   :  { %7020 = vpow2.f32 %v5995_v51 }
 0x9fb   :  { %7022 = vpow2.f32 %v5996_v22 }
 0x9fc   :  { %7024 = vpow2.f32 %v5997_v20 }
 0x9fd   :  { %7026 = vtanh.f32 %v6071_v60 }
 0xa04   :  { %v7021_v63 = vpop.eup %7020 }
 0xa05   :  { %v7023_v42 = vpop.eup %7022  ;;  %v5267_v53 = vadd.f32 1.0, %v7021_v63 }
 0xa06   :  { %v5273_v32 = vadd.f32 1.0, %v7023_v42  ;;  %v7025_v13 = vpop.eup %7024 }
 0xa07   :  { %7028 = vrcp.f32 %v5267_v53  ;;  %v7027_v61 = vpop.eup %7026  ;;  %v5280_v46 = vadd.f32 1.0, %v7025_v13 }
 0xa08   :  { %7030 = vrcp.f32 %v5273_v32 }
 0xa09   :  { %7032 = vrcp.f32 %v5280_v46 }
 0xa11   :  { %v7029_v26 = vpop.eup %7028 }
 0xa12   :  { %v7031_v14 = vpop.eup %7030  ;;  %v5284_v21 = vmul.f32 %v7029_v26, %v7027_v61 }
 0xa13   :  { %v5283_v55 = vmul.f32 0.0, %v7031_v14  ;;  %v7033_v35 = vpop.eup %7032 }
 0xa15   :  { %v5285_v50 = vadd.f32 %v5284_v21, %v5283_v55 }
 0xa17   :  { %7034 = vtanh.f32 %v5285_v50 }
 0xa21   :  { %v7035_v39 = vpop.eup %7034 }
 0xa22   :  { %v5287_v56 = vmul.f32 %v7035_v39, %v7033_v35 }
 0xa24   :  { %v5289_v52 = vpack.c.bf16 %v5287_v56, %v5287_v56 }
 0xa26   :  { %5457 = vmatprep.mubr.bf16.mxu0 %v5289_v52 }
 0xa27   :  { %5458 = vmatmul.mubr.bf16.vlgmr.msra.gmra.mrb[52].mxu0 %v5288_v2 }
 0xafa   :  { %v6031_v48 = vpop.f32.mrb[52].mxu0 }
 0xafb   :  { %v6032_v30 = vpop.f32.mrb[53].mxu0 }
 0xafc   :  { %v6033_v9 = vadd.f32 %v6032_v30, %v6031_v48  ;;  %v6034_v16 = vpop.f32.mrb[54].mxu0 }
 0xafd   :  { %v6035_v6 = vpop.f32.mrb[55].mxu0 }
 0xafe   :  { %v5460_v28 = vadd.f32 %v6033_v9, %v5998_v5 }
 0xb00   :  { %5465 = vst [vmem:[#allocation12] sm:$0xff] %v5460_v28 }
 0xb01   :  { %7189 = shalt.err (!%p7186_p2)
}
 0xb02   :  { %s7190_s7 = scalar_lea.hbm %s8437_s8, 128 }
 0xb03   :  { %p7191_p3 = scmp.ne.s32.totalorder %s8437_s8, %s7190_s7  ;;  %p7194_p4 = scmp.lt.u32.totalorder %s7190_s7, %s8437_s8 }
 0xb05   :  { %p7196_p5 = pnand %p7194_p4, %p7191_p3 }
 0xb07   :  { %7199 = shalt.err (!%p7196_p5)
}
 0xb08   :  { %5475 = dma.vmem_to_hbm [thread:$0]  %s5473_s29, 128, %s8437_s8, [#allocation5]  }
 0xb09   :  { %7206 = dma.done.wait [#allocation5], 128  }
 0xb0a   :  { %7207 = vsyncadd [#allocation5], 4294967168 }
 0xb0b   :  { %5479 = vsyncpa [#allocation4], 1 }
 0xb0c   :  { %5480 = vsyncpa [#allocation7], 1 }
 0xb0d   :  { %5481 = vsyncpa [#allocation10], 1 }
 0xb0e   :  { %5482 = vsyncpa [#allocation5], 1 }

</bundles_post_ra>
